<compile_context>
chip_gen: v7x
topology: tpu7x:2x2x1
jax: 0.10.0
libtpu: 0.0.40
codegen_flags: <defaults>
</compile_context>

<pallas_src>
import functools

import jax
import jax.numpy as jnp
import numpy as np
from jax import lax
from jax.experimental import pallas as pl
from jax.experimental.pallas import tpu as pltpu


def _round_up(x, m):
    return (x + m - 1) // m * m


def _largest_divisor(n, cap):
    for d in range(min(n, cap), 0, -1):
        if n % d == 0:
            return d
    return 1


# -------------------- fused Conv3x3(pad=1) + ReLU + MaxPool2x2 --------------------
def _conv_relu_pool_kernel(xa_ref, xh_ref, wc_ref, b_ref, o_ref, x_scr,
                           *, th, wc2, wo, cin2, cout):
    # xa_ref: (1, M, cin2)          main 2*TH padded rows, flattened (row, col-pair)
    # xh_ref: (1, 2*wc2, cin2)      2-row halo (padded rows just below the block)
    # wc_ref: (6, cin2, 2*cout)     packed taps: index 2*dy + piece, N = [even | odd]
    # b_ref : (1, cout)             bias (f32)
    # o_ref : (1, th, wo, cout)     pooled output rows (bf16)
    # x_scr : (M + 2*wc2 + 8, cin2) VMEM scratch holding the block + halo + pad tail
    M = 2 * th * wc2

    # Assemble the block into one flat buffer so every tap piece is a single slice.
    x_scr[pl.ds(0, M), :] = xa_ref[0]
    x_scr[pl.ds(M, 2 * wc2), :] = xh_ref[0]
    x_scr[pl.ds(M + 2 * wc2, 8), :] = jnp.zeros((8, cin2), jnp.bfloat16)

    def dy_step(dy, acc):
        base = dy * wc2
        lo = x_scr[pl.ds(base, M), :]          # pair w2   of padded row r+dy
        hi = x_scr[pl.ds(base + 1, M), :]      # pair w2+1 of padded row r+dy
        acc = acc + jnp.dot(lo, wc_ref[2 * dy], preferred_element_type=jnp.float32)
        acc = acc + jnp.dot(hi, wc_ref[2 * dy + 1], preferred_element_type=jnp.float32)
        return acc

    acc = lax.fori_loop(0, 3, dy_step,
                        jnp.zeros((M, 2 * cout), jnp.float32), unroll=True)

    # 2x2 max pool: even/odd output columns live in the two lane halves of acc.
    h = jnp.maximum(acc[:, :cout], acc[:, cout:])       # 1x2 horizontal max: (M, cout)
    h3 = h.reshape(th, 2 * wc2, cout)                   # free: wc2 % 8 == 0
    v = jnp.maximum(h3[:, :wc2, :], h3[:, wc2:, :])     # 2x1 vertical max: (th, wc2, cout)
    # bias + ReLU after the max (both monotone); drop the padded garbage columns.
    out = jnp.maximum(v[:, :wo, :] + b_ref[...], 0.0)
    o_ref[0] = out.astype(o_ref.dtype)


def pack_conv_layer(w_oihw, b):
    """One-time host-side packing of torch Conv2d (Cout,Cin,3,3) weights."""
    cout, cin = int(w_oihw.shape[0]), int(w_oihw.shape[1])
    cin_p = _round_up(2 * cin, 8) // 2            # keep the packed lane width 8-aligned
    w_hwio = jnp.transpose(w_oihw, (2, 3, 1, 0))  # (3, 3, Cin, Cout)
    if cin_p != cin:
        w_hwio = jnp.pad(w_hwio, ((0, 0), (0, 0), (0, cin_p - cin), (0, 0)))
    zero = jnp.zeros((3, 1, cin_p, cout), w_hwio.dtype)
    # q indexes the 4 padded columns covered by one pooled column pair.
    w_even = jnp.concatenate([w_hwio, zero], axis=1)    # even cols use q = 0,1,2
    w_odd = jnp.concatenate([zero, w_hwio], axis=1)     # odd  cols use q = 1,2,3
    w_both = jnp.concatenate([w_even, w_odd], axis=-1)  # (3, 4, Cin_p, 2*Cout)
    wc = w_both.reshape(6, 2 * cin_p, 2 * cout).astype(jnp.bfloat16)
    b2 = b.reshape(1, cout).astype(jnp.float32)
    return {"wc": wc, "b": b2}


def conv_relu_pool(x_nhwc, layer, *, rows_per_step=16):
    """Fused Conv2d(3x3, stride 1, pad 1) + ReLU + MaxPool2d(2, 2). NHWC -> NHWC (bf16)."""
    N, H, W, Cin = x_nhwc.shape
    assert H % 2 == 0 and W % 2 == 0, "H and W must be even for 2x2 pooling"
    wc, bias = layer["wc"], layer["b"]
    cin2 = int(wc.shape[1])
    cin_p = cin2 // 2
    cout = int(wc.shape[2]) // 2
    assert Cin <= cin_p

    Hp, Wo = H // 2, W // 2
    wc2 = _round_up(Wo + 1, 8)                 # column pairs per padded row (8-aligned)

    # SAME padding (+ extra zero columns/channels for alignment), then a FREE reshape
    # that pairs adjacent image columns on the lane dim and flattens (row, pair).
    xp = jnp.pad(x_nhwc.astype(jnp.bfloat16),
                 ((0, 0), (1, 1), (1, 2 * wc2 - W - 1), (0, cin_p - Cin)))
    xflat = xp.reshape(N, (H + 2) * wc2, cin2)

    TH = _largest_divisor(Hp, rows_per_step)   # pooled rows per grid step
    nblk = Hp // TH
    M = 2 * TH * wc2

    kernel = functools.partial(_conv_relu_pool_kernel, th=TH, wc2=wc2, wo=Wo,
                               cin2=cin2, cout=cout)
    return pl.pallas_call(
        kernel,
        out_shape=jax.ShapeDtypeStruct((N, Hp, Wo, cout), jnp.bfloat16),
        grid_spec=pltpu.PrefetchScalarGridSpec(
            num_scalar_prefetch=0,
            grid=(N, nblk),
            in_specs=[
                # main 2*TH padded rows of this block (flattened with their pairs)
                pl.BlockSpec((1, M, cin2), lambda n, i: (n, i, 0)),
                # 2-row halo: the 2 padded rows just below this block (same array)
                pl.BlockSpec((1, 2 * wc2, cin2), lambda n, i: (n, TH * (i + 1), 0)),
                pl.BlockSpec((6, cin2, 2 * cout), lambda n, i: (0, 0, 0)),
                pl.BlockSpec((1, cout), lambda n, i: (0, 0)),
            ],
            out_specs=pl.BlockSpec((1, TH, Wo, cout), lambda n, i: (n, i, 0, 0)),
            scratch_shapes=[pltpu.VMEM((M + 2 * wc2 + 8, cin2), jnp.bfloat16)],
        ),
        compiler_params=pltpu.CompilerParams(
            dimension_semantics=("parallel", "parallel"),
            vmem_limit_bytes=32 * 1024 * 1024),
    )(xflat, xflat, wc, bias)


# ------------------------------ Linear: y = x W + b ------------------------------
def _fc_kernel(x_ref, w_ref, b_ref, o_ref, acc_ref):
    # x_ref: (N, tk) bf16; w_ref: (tk, tdo) bf16 (pre-transposed, Dout on lanes).
    k = pl.program_id(1)

    @pl.when(k == 0)
    def _():
        acc_ref[...] = jnp.zeros_like(acc_ref)

    acc_ref[...] += jnp.dot(x_ref[...], w_ref[...],
                            preferred_element_type=jnp.float32)

    @pl.when(k == pl.num_programs(1) - 1)
    def _():
        o_ref[...] = acc_ref[...] + b_ref[...]


def _pick_fc_tiles(F, Dout, tk_cap=4096, tdo_cap=512):
    # K tile: largest multiple of 128 dividing F (<= cap); else pad F.
    tk = 0
    for cand in range(128, min(F, tk_cap) + 1, 128):
        if F % cand == 0:
            tk = cand
    if tk == 0:
        tk = min(tk_cap, _round_up(F, 128))
    Fp = _round_up(F, tk)
    # Dout tile: largest multiple of 128 dividing Dout (<= cap); else full Dout.
    tdo = 0
    for cand in range(128, min(Dout, tdo_cap) + 1, 128):
        if Dout % cand == 0:
            tdo = cand
    if tdo == 0:
        tdo = Dout
    return tk, Fp, tdo


def linear(x, w_fd, b):
    # x: (N, F);  w_fd: (F, Dout) pre-permuted/pre-transposed;  b: (Dout,)
    N, F = x.shape
    Dout = w_fd.shape[1]
    tk, Fp, tdo = _pick_fc_tiles(F, Dout)
    xb = x.astype(jnp.bfloat16)
    wb = w_fd.astype(jnp.bfloat16)
    if Fp != F:
        xb = jnp.pad(xb, ((0, 0), (0, Fp - F)))
        wb = jnp.pad(wb, ((0, Fp - F), (0, 0)))
    b2 = b.reshape(1, Dout).astype(jnp.float32)
    return pl.pallas_call(
        _fc_kernel,
        out_shape=jax.ShapeDtypeStruct((N, Dout), jnp.float32),
        grid_spec=pltpu.PrefetchScalarGridSpec(
            num_scalar_prefetch=0,
            grid=(Dout // tdo, Fp // tk),
            in_specs=[
                pl.BlockSpec((N, tk), lambda j, k: (0, k)),
                pl.BlockSpec((tk, tdo), lambda j, k: (k, j)),
                pl.BlockSpec((1, tdo), lambda j, k: (0, j)),
            ],
            out_specs=pl.BlockSpec((N, tdo), lambda j, k: (0, j)),
            scratch_shapes=[pltpu.VMEM((N, tdo), jnp.float32)],
        ),
        compiler_params=pltpu.CompilerParams(
            dimension_semantics=("parallel", "arbitrary"),
            vmem_limit_bytes=32 * 1024 * 1024),
    )(xb, wb, b2)


# ---------------------------------- full forward ----------------------------------
def prepare_params(params, h, w):
    """One-time host-side weight repacking (conv tap packing + FC layout permute)."""
    convs = [pack_conv_layer(cw, cb) for cw, cb in params["convs"]]
    hp, wp = h // 8, w // 8
    dout, f = params["fc_w"].shape
    c_last = int(params["convs"][-1][0].shape[0])
    assert f == c_last * hp * wp
    # torch flattens (C, Hp, Wp); our conv output flattens (Hp, Wp, C) directly, so
    # permute the FC weight's input axis once and pre-transpose to (F, Dout).
    fc_w = params["fc_w"].reshape(dout, c_last, hp, wp)
    fc_w = jnp.transpose(fc_w, (2, 3, 1, 0)).reshape(f, dout).astype(jnp.bfloat16)
    return {"convs": convs, "fc_w": fc_w, "fc_b": params["fc_b"].astype(jnp.float32)}


def image_encoder_forward(x_nchw, prepared):
    x = jnp.transpose(x_nchw, (0, 2, 3, 1))      # NCHW -> NHWC (once, at the input)
    for layer in prepared["convs"]:
        x = conv_relu_pool(x, layer)
    x = x.reshape(x.shape[0], -1)                # direct NHWC flatten (no transpose)
    return linear(x, prepared["fc_w"], prepared["fc_b"])


# --------------------------- params / reference / main ---------------------------
def init_params(key, h, w):
    hp, wp = h // 8, w // 8
    fc_in = 256 * hp * wp   # canonical module: 256*26*37 for a 208x296 input
    keys = jax.random.split(key, 8)
    cins, couts = [3, 64, 128], [64, 128, 256]
    convs = []
    for i, (ci, co) in enumerate(zip(cins, couts)):
        fan = ci * 9
        wgt = jax.random.normal(keys[2 * i], (co, ci, 3, 3), jnp.float32) / (fan ** 0.5)
        bias = jax.random.normal(keys[2 * i + 1], (co,), jnp.float32) * 0.01
        convs.append((wgt, bias))
    fc_w = jax.random.normal(keys[6], (1024, fc_in), jnp.float32) / (fc_in ** 0.5)
    fc_b = jax.random.normal(keys[7], (1024,), jnp.float32) * 0.01
    return {"convs": convs, "fc_w": fc_w, "fc_b": fc_b}


def reference_forward(x_nchw, params):
    x = jnp.transpose(x_nchw, (0, 2, 3, 1)).astype(jnp.float32)
    for w, b in params["convs"]:
        w_hwio = jnp.transpose(w, (2, 3, 1, 0))
        x = jax.lax.conv_general_dilated(
            x, w_hwio, window_strides=(1, 1), padding="SAME",
            dimension_numbers=("NHWC", "HWIO", "NHWC"))
        x = jnp.maximum(x + b, 0.0)
        x = jax.lax.reduce_window(x, -jnp.inf, jax.lax.max,
                                  (1, 2, 2, 1), (1, 2, 2, 1), "VALID")
    N = x.shape[0]
    x = jnp.transpose(x, (0, 3, 1, 2)).reshape(N, -1)
    return x @ params["fc_w"].T + params["fc_b"]


if __name__ == "__main__":
    key = jax.random.PRNGKey(0)
    kx, kp = jax.random.split(key)
    N, H, W = 2, 16, 24                       # small demo shape (H, W divisible by 8)
    x = jax.random.normal(kx, (N, 3, H, W), jnp.float32)
    params = init_params(kp, H, W)
    prepared = prepare_params(params, H, W)

    fwd = jax.jit(image_encoder_forward)
    out = jax.block_until_ready(fwd(x, prepared))
    assert out.shape == (N, 1024)

    ref = reference_forward(x, params)
    np.testing.assert_allclose(np.asarray(out), np.asarray(ref), rtol=2e-2, atol=2e-2)
    print("KERNEL_OK")
</pallas_src>

<mosaic_0001>
module attributes {stable_mosaic.version = 11 : i64} {
  func.func @_conv_relu_pool_kernel(%arg0: i32, %arg1: i32, %arg2: memref<1x256x8xbf16, #tpu.memory_space<vmem>>, %arg3: memref<1x32x8xbf16, #tpu.memory_space<vmem>>, %arg4: memref<6x8x128xbf16, #tpu.memory_space<vmem>>, %arg5: memref<1x64xf32, #tpu.memory_space<vmem>>, %arg6: memref<1x8x12x64xbf16, #tpu.memory_space<vmem>>, %arg7: memref<296x8xbf16, #tpu.memory_space<vmem>>) attributes {dimension_semantics = [#tpu.dimension_semantics<parallel>, #tpu.dimension_semantics<parallel>], iteration_bounds = array<i64: 2, 1>, scalar_prefetch = 0 : i64, scratch_operands = 1 : i64, tpu.core_type = #tpu.core_type<tc>, window_params = [{transform_indices = @transform_0, window_bounds = array<i64: 1, 256, 8>}, {transform_indices = @transform_1, window_bounds = array<i64: 1, 32, 8>}, {pipeline_mode = #tpu.pipeline_mode<synchronous>, transform_indices = @transform_2, window_bounds = array<i64: 6, 8, 128>}, {pipeline_mode = #tpu.pipeline_mode<synchronous>, transform_indices = @transform_3, window_bounds = array<i64: 1, 64>}, {transform_indices = @transform_4, window_bounds = array<i64: 1, 8, 12, 64>}]} {
    %c0 = arith.constant 0 : index
    %c0_0 = arith.constant 0 : index
    %c0_1 = arith.constant 0 : index
    %0 = vector.load %arg2[%c0, %c0_0, %c0_1] : memref<1x256x8xbf16, #tpu.memory_space<vmem>>, vector<1x256x8xbf16>
    %1 = vector.shape_cast %0 : vector<1x256x8xbf16> to vector<256x8xbf16>
    %c0_2 = arith.constant 0 : index
    %c0_3 = arith.constant 0 : index
    %2 = vector.load %arg7[%c0_2, %c0_3] : memref<296x8xbf16, #tpu.memory_space<vmem>>, vector<256x8xbf16>
    tpu.vector_store %arg7[%c0_2, %c0_3], %1 {strides = array<i32>} : memref<296x8xbf16, #tpu.memory_space<vmem>>, vector<256x8xbf16>,
    %c0_4 = arith.constant 0 : index
    %c0_5 = arith.constant 0 : index
    %c0_6 = arith.constant 0 : index
    %3 = vector.load %arg3[%c0_4, %c0_5, %c0_6] : memref<1x32x8xbf16, #tpu.memory_space<vmem>>, vector<1x32x8xbf16>
    %4 = vector.shape_cast %3 : vector<1x32x8xbf16> to vector<32x8xbf16>
    %c256 = arith.constant 256 : index
    %c0_7 = arith.constant 0 : index
    %5 = vector.load %arg7[%c256, %c0_7] : memref<296x8xbf16, #tpu.memory_space<vmem>>, vector<32x8xbf16>
    tpu.vector_store %arg7[%c256, %c0_7], %4 {strides = array<i32>} : memref<296x8xbf16, #tpu.memory_space<vmem>>, vector<32x8xbf16>,
    %cst = arith.constant 0.000000e+00 : bf16
    %6 = vector.broadcast %cst : bf16 to vector<8x8xbf16>
    %c288 = arith.constant 288 : index
    %c0_8 = arith.constant 0 : index
    %7 = vector.load %arg7[%c288, %c0_8] : memref<296x8xbf16, #tpu.memory_space<vmem>>, vector<8x8xbf16>
    tpu.vector_store %arg7[%c288, %c0_8], %6 {strides = array<i32>} : memref<296x8xbf16, #tpu.memory_space<vmem>>, vector<8x8xbf16>,
    %cst_9 = arith.constant 0.000000e+00 : f32
    %8 = vector.broadcast %cst_9 : f32 to vector<256x128xf32>
    %c0_i32 = arith.constant 0 : i32
    %c16_i32 = arith.constant 16 : i32
    %9 = arith.muli %c0_i32, %c16_i32 : i32
    %10 = arith.index_cast %9 : i32 to index
    %c0_10 = arith.constant 0 : index
    %11 = vector.load %arg7[%10, %c0_10] : memref<296x8xbf16, #tpu.memory_space<vmem>>, vector<256x8xbf16>
    %c1_i32 = arith.constant 1 : i32
    %12 = arith.addi %9, %c1_i32 : i32
    %13 = arith.index_cast %12 : i32 to index
    %c0_11 = arith.constant 0 : index
    %14 = vector.load %arg7[%13, %c0_11] : memref<296x8xbf16, #tpu.memory_space<vmem>>, vector<256x8xbf16>
    %c2_i32 = arith.constant 2 : i32
    %15 = arith.muli %c2_i32, %c0_i32 : i32
    %16 = arith.index_cast %15 : i32 to index
    %c0_12 = arith.constant 0 : index
    %c0_13 = arith.constant 0 : index
    %17 = vector.load %arg4[%16, %c0_12, %c0_13] : memref<6x8x128xbf16, #tpu.memory_space<vmem>>, vector<1x8x128xbf16>
    %18 = vector.shape_cast %17 : vector<1x8x128xbf16> to vector<8x128xbf16>
    %cst_14 = arith.constant dense<0.000000e+00> : vector<256x128xf32>
    %19 = tpu.matmul %11, %18, %cst_14 {dimension_numbers = #tpu.dot_dimension_numbers<[1], [0], [0], [1], [0, 0, 1, 1], [], []>} : vector<256x8xbf16>, vector<8x128xbf16>, vector<256x128xf32> -> vector<256x128xf32>
    %20 = arith.addf %8, %19 : vector<256x128xf32>
    %c2_i32_15 = arith.constant 2 : i32
    %21 = arith.muli %c2_i32_15, %c0_i32 : i32
    %c1_i32_16 = arith.constant 1 : i32
    %22 = arith.addi %21, %c1_i32_16 : i32
    %23 = arith.index_cast %22 : i32 to index
    %c0_17 = arith.constant 0 : index
    %c0_18 = arith.constant 0 : index
    %24 = vector.load %arg4[%23, %c0_17, %c0_18] : memref<6x8x128xbf16, #tpu.memory_space<vmem>>, vector<1x8x128xbf16>
    %25 = vector.shape_cast %24 : vector<1x8x128xbf16> to vector<8x128xbf16>
    %cst_19 = arith.constant dense<0.000000e+00> : vector<256x128xf32>
    %26 = tpu.matmul %14, %25, %cst_19 {dimension_numbers = #tpu.dot_dimension_numbers<[1], [0], [0], [1], [0, 0, 1, 1], [], []>} : vector<256x8xbf16>, vector<8x128xbf16>, vector<256x128xf32> -> vector<256x128xf32>
    %27 = arith.addf %20, %26 : vector<256x128xf32>
    %c1_i32_20 = arith.constant 1 : i32
    %c16_i32_21 = arith.constant 16 : i32
    %28 = arith.muli %c1_i32_20, %c16_i32_21 : i32
    %29 = arith.index_cast %28 : i32 to index
    %c0_22 = arith.constant 0 : index
    %30 = vector.load %arg7[%29, %c0_22] : memref<296x8xbf16, #tpu.memory_space<vmem>>, vector<256x8xbf16>
    %c1_i32_23 = arith.constant 1 : i32
    %31 = arith.addi %28, %c1_i32_23 : i32
    %32 = arith.index_cast %31 : i32 to index
    %c0_24 = arith.constant 0 : index
    %33 = vector.load %arg7[%32, %c0_24] : memref<296x8xbf16, #tpu.memory_space<vmem>>, vector<256x8xbf16>
    %c2_i32_25 = arith.constant 2 : i32
    %34 = arith.muli %c2_i32_25, %c1_i32_20 : i32
    %35 = arith.index_cast %34 : i32 to index
    %c0_26 = arith.constant 0 : index
    %c0_27 = arith.constant 0 : index
    %36 = vector.load %arg4[%35, %c0_26, %c0_27] : memref<6x8x128xbf16, #tpu.memory_space<vmem>>, vector<1x8x128xbf16>
    %37 = vector.shape_cast %36 : vector<1x8x128xbf16> to vector<8x128xbf16>
    %cst_28 = arith.constant dense<0.000000e+00> : vector<256x128xf32>
    %38 = tpu.matmul %30, %37, %cst_28 {dimension_numbers = #tpu.dot_dimension_numbers<[1], [0], [0], [1], [0, 0, 1, 1], [], []>} : vector<256x8xbf16>, vector<8x128xbf16>, vector<256x128xf32> -> vector<256x128xf32>
    %39 = arith.addf %27, %38 : vector<256x128xf32>
    %c2_i32_29 = arith.constant 2 : i32
    %40 = arith.muli %c2_i32_29, %c1_i32_20 : i32
    %c1_i32_30 = arith.constant 1 : i32
    %41 = arith.addi %40, %c1_i32_30 : i32
    %42 = arith.index_cast %41 : i32 to index
    %c0_31 = arith.constant 0 : index
    %c0_32 = arith.constant 0 : index
    %43 = vector.load %arg4[%42, %c0_31, %c0_32] : memref<6x8x128xbf16, #tpu.memory_space<vmem>>, vector<1x8x128xbf16>
    %44 = vector.shape_cast %43 : vector<1x8x128xbf16> to vector<8x128xbf16>
    %cst_33 = arith.constant dense<0.000000e+00> : vector<256x128xf32>
    %45 = tpu.matmul %33, %44, %cst_33 {dimension_numbers = #tpu.dot_dimension_numbers<[1], [0], [0], [1], [0, 0, 1, 1], [], []>} : vector<256x8xbf16>, vector<8x128xbf16>, vector<256x128xf32> -> vector<256x128xf32>
    %46 = arith.addf %39, %45 : vector<256x128xf32>
    %c2_i32_34 = arith.constant 2 : i32
    %c16_i32_35 = arith.constant 16 : i32
    %47 = arith.muli %c2_i32_34, %c16_i32_35 : i32
    %48 = arith.index_cast %47 : i32 to index
    %c0_36 = arith.constant 0 : index
    %49 = vector.load %arg7[%48, %c0_36] : memref<296x8xbf16, #tpu.memory_space<vmem>>, vector<256x8xbf16>
    %c1_i32_37 = arith.constant 1 : i32
    %50 = arith.addi %47, %c1_i32_37 : i32
    %51 = arith.index_cast %50 : i32 to index
    %c0_38 = arith.constant 0 : index
    %52 = vector.load %arg7[%51, %c0_38] : memref<296x8xbf16, #tpu.memory_space<vmem>>, vector<256x8xbf16>
    %c2_i32_39 = arith.constant 2 : i32
    %53 = arith.muli %c2_i32_39, %c2_i32_34 : i32
    %54 = arith.index_cast %53 : i32 to index
    %c0_40 = arith.constant 0 : index
    %c0_41 = arith.constant 0 : index
    %55 = vector.load %arg4[%54, %c0_40, %c0_41] : memref<6x8x128xbf16, #tpu.memory_space<vmem>>, vector<1x8x128xbf16>
    %56 = vector.shape_cast %55 : vector<1x8x128xbf16> to vector<8x128xbf16>
    %cst_42 = arith.constant dense<0.000000e+00> : vector<256x128xf32>
    %57 = tpu.matmul %49, %56, %cst_42 {dimension_numbers = #tpu.dot_dimension_numbers<[1], [0], [0], [1], [0, 0, 1, 1], [], []>} : vector<256x8xbf16>, vector<8x128xbf16>, vector<256x128xf32> -> vector<256x128xf32>
    %58 = arith.addf %46, %57 : vector<256x128xf32>
    %c2_i32_43 = arith.constant 2 : i32
    %59 = arith.muli %c2_i32_43, %c2_i32_34 : i32
    %c1_i32_44 = arith.constant 1 : i32
    %60 = arith.addi %59, %c1_i32_44 : i32
    %61 = arith.index_cast %60 : i32 to index
    %c0_45 = arith.constant 0 : index
    %c0_46 = arith.constant 0 : index
    %62 = vector.load %arg4[%61, %c0_45, %c0_46] : memref<6x8x128xbf16, #tpu.memory_space<vmem>>, vector<1x8x128xbf16>
    %63 = vector.shape_cast %62 : vector<1x8x128xbf16> to vector<8x128xbf16>
    %cst_47 = arith.constant dense<0.000000e+00> : vector<256x128xf32>
    %64 = tpu.matmul %52, %63, %cst_47 {dimension_numbers = #tpu.dot_dimension_numbers<[1], [0], [0], [1], [0, 0, 1, 1], [], []>} : vector<256x8xbf16>, vector<8x128xbf16>, vector<256x128xf32> -> vector<256x128xf32>
    %65 = arith.addf %58, %64 : vector<256x128xf32>
    %c3_i32 = arith.constant 3 : i32
    %66 = vector.extract_strided_slice %65 {offsets = [0, 0], sizes = [256, 64], strides = [1, 1]} : vector<256x128xf32> to vector<256x64xf32>
    %67 = vector.extract_strided_slice %65 {offsets = [0, 64], sizes = [256, 64], strides = [1, 1]} : vector<256x128xf32> to vector<256x64xf32>
    %68 = arith.maximumf %66, %67 : vector<256x64xf32>
    %69 = vector.shape_cast %68 : vector<256x64xf32> to vector<8x32x64xf32>
    %70 = vector.extract_strided_slice %69 {offsets = [0, 0, 0], sizes = [8, 16, 64], strides = [1, 1, 1]} : vector<8x32x64xf32> to vector<8x16x64xf32>
    %71 = vector.extract_strided_slice %69 {offsets = [0, 16, 0], sizes = [8, 16, 64], strides = [1, 1, 1]} : vector<8x32x64xf32> to vector<8x16x64xf32>
    %72 = arith.maximumf %70, %71 : vector<8x16x64xf32>
    %73 = vector.extract_strided_slice %72 {offsets = [0, 0, 0], sizes = [8, 12, 64], strides = [1, 1, 1]} : vector<8x16x64xf32> to vector<8x12x64xf32>
    %c0_48 = arith.constant 0 : index
    %c0_49 = arith.constant 0 : index
    %74 = vector.load %arg5[%c0_48, %c0_49] : memref<1x64xf32, #tpu.memory_space<vmem>>, vector<1x64xf32>
    %75 = vector.shape_cast %74 : vector<1x64xf32> to vector<1x1x64xf32>
    %76 = vector.broadcast %75 : vector<1x1x64xf32> to vector<8x12x64xf32>
    %77 = arith.addf %73, %76 : vector<8x12x64xf32>
    %cst_50 = arith.constant 0.000000e+00 : f32
    %78 = vector.broadcast %cst_50 : f32 to vector<8x12x64xf32>
    %79 = arith.maximumf %77, %78 : vector<8x12x64xf32>
    %80 = arith.truncf %79 : vector<8x12x64xf32> to vector<8x12x64xbf16>
    %c0_51 = arith.constant 0 : index
    %c0_52 = arith.constant 0 : index
    %c0_53 = arith.constant 0 : index
    %c0_54 = arith.constant 0 : index
    %81 = vector.load %arg6[%c0_51, %c0_52, %c0_53, %c0_54] : memref<1x8x12x64xbf16, #tpu.memory_space<vmem>>, vector<1x8x12x64xbf16>
    %82 = vector.shape_cast %81 : vector<1x8x12x64xbf16> to vector<8x12x64xbf16>
    %83 = vector.shape_cast %80 : vector<8x12x64xbf16> to vector<1x8x12x64xbf16>
    tpu.vector_store %arg6[%c0_51, %c0_52, %c0_53, %c0_54], %83 {strides = array<i32>} : memref<1x8x12x64xbf16, #tpu.memory_space<vmem>>, vector<1x8x12x64xbf16>,
    return
  }
  func.func @transform_0(%arg0: i32, %arg1: i32) -> (i32, i32, i32) {
    %c0_i32 = arith.constant 0 : i32
    %c0_i32_0 = arith.constant 0 : i32
    return %arg0, %arg1, %c0_i32 : i32, i32, i32
  }
  func.func @transform_1(%arg0: i32, %arg1: i32) -> (i32, i32, i32) {
    %c1_i32 = arith.constant 1 : i32
    %0 = arith.addi %arg1, %c1_i32 : i32
    %c8_i32 = arith.constant 8 : i32
    %1 = arith.muli %c8_i32, %0 : i32
    %c0_i32 = arith.constant 0 : i32
    %c0_i32_0 = arith.constant 0 : i32
    return %arg0, %1, %c0_i32 : i32, i32, i32
  }
  func.func @transform_2(%arg0: i32, %arg1: i32) -> (i32, i32, i32) {
    %c0_i32 = arith.constant 0 : i32
    %c0_i32_0 = arith.constant 0 : i32
    %c0_i32_1 = arith.constant 0 : i32
    %c0_i32_2 = arith.constant 0 : i32
    return %c0_i32, %c0_i32_0, %c0_i32_1 : i32, i32, i32
  }
  func.func @transform_3(%arg0: i32, %arg1: i32) -> (i32, i32) {
    %c0_i32 = arith.constant 0 : i32
    %c0_i32_0 = arith.constant 0 : i32
    %c0_i32_1 = arith.constant 0 : i32
    return %c0_i32, %c0_i32_0 : i32, i32
  }
  func.func @transform_4(%arg0: i32, %arg1: i32) -> (i32, i32, i32, i32) {
    %c0_i32 = arith.constant 0 : i32
    %c0_i32_0 = arith.constant 0 : i32
    %c0_i32_1 = arith.constant 0 : i32
    return %arg0, %arg1, %c0_i32, %c0_i32_0 : i32, i32, i32, i32
  }
}

module attributes {stable_mosaic.version = 11 : i64} {
  func.func @_conv_relu_pool_kernel(%arg0: i32, %arg1: i32, %arg2: memref<1x64x128xbf16, #tpu.memory_space<vmem>>, %arg3: memref<1x16x128xbf16, #tpu.memory_space<vmem>>, %arg4: memref<6x128x256xbf16, #tpu.memory_space<vmem>>, %arg5: memref<1x128xf32, #tpu.memory_space<vmem>>, %arg6: memref<1x4x6x128xbf16, #tpu.memory_space<vmem>>, %arg7: memref<88x128xbf16, #tpu.memory_space<vmem>>) attributes {dimension_semantics = [#tpu.dimension_semantics<parallel>, #tpu.dimension_semantics<parallel>], iteration_bounds = array<i64: 2, 1>, scalar_prefetch = 0 : i64, scratch_operands = 1 : i64, tpu.core_type = #tpu.core_type<tc>, window_params = [{transform_indices = @transform_0, window_bounds = array<i64: 1, 64, 128>}, {transform_indices = @transform_1, window_bounds = array<i64: 1, 16, 128>}, {pipeline_mode = #tpu.pipeline_mode<synchronous>, transform_indices = @transform_2, window_bounds = array<i64: 6, 128, 256>}, {pipeline_mode = #tpu.pipeline_mode<synchronous>, transform_indices = @transform_3, window_bounds = array<i64: 1, 128>}, {transform_indices = @transform_4, window_bounds = array<i64: 1, 4, 6, 128>}]} {
    %c0 = arith.constant 0 : index
    %c0_0 = arith.constant 0 : index
    %c0_1 = arith.constant 0 : index
    %0 = vector.load %arg2[%c0, %c0_0, %c0_1] : memref<1x64x128xbf16, #tpu.memory_space<vmem>>, vector<1x64x128xbf16>
    %1 = vector.shape_cast %0 : vector<1x64x128xbf16> to vector<64x128xbf16>
    %c0_2 = arith.constant 0 : index
    %c0_3 = arith.constant 0 : index
    %2 = vector.load %arg7[%c0_2, %c0_3] : memref<88x128xbf16, #tpu.memory_space<vmem>>, vector<64x128xbf16>
    tpu.vector_store %arg7[%c0_2, %c0_3], %1 {strides = array<i32>} : memref<88x128xbf16, #tpu.memory_space<vmem>>, vector<64x128xbf16>,
    %c0_4 = arith.constant 0 : index
    %c0_5 = arith.constant 0 : index
    %c0_6 = arith.constant 0 : index
    %3 = vector.load %arg3[%c0_4, %c0_5, %c0_6] : memref<1x16x128xbf16, #tpu.memory_space<vmem>>, vector<1x16x128xbf16>
    %4 = vector.shape_cast %3 : vector<1x16x128xbf16> to vector<16x128xbf16>
    %c64 = arith.constant 64 : index
    %c0_7 = arith.constant 0 : index
    %5 = vector.load %arg7[%c64, %c0_7] : memref<88x128xbf16, #tpu.memory_space<vmem>>, vector<16x128xbf16>
    tpu.vector_store %arg7[%c64, %c0_7], %4 {strides = array<i32>} : memref<88x128xbf16, #tpu.memory_space<vmem>>, vector<16x128xbf16>,
    %cst = arith.constant 0.000000e+00 : bf16
    %6 = vector.broadcast %cst : bf16 to vector<8x128xbf16>
    %c80 = arith.constant 80 : index
    %c0_8 = arith.constant 0 : index
    %7 = vector.load %arg7[%c80, %c0_8] : memref<88x128xbf16, #tpu.memory_space<vmem>>, vector<8x128xbf16>
    tpu.vector_store %arg7[%c80, %c0_8], %6 {strides = array<i32>} : memref<88x128xbf16, #tpu.memory_space<vmem>>, vector<8x128xbf16>,
    %cst_9 = arith.constant 0.000000e+00 : f32
    %8 = vector.broadcast %cst_9 : f32 to vector<64x256xf32>
    %c0_i32 = arith.constant 0 : i32
    %c8_i32 = arith.constant 8 : i32
    %9 = arith.muli %c0_i32, %c8_i32 : i32
    %10 = arith.index_cast %9 : i32 to index
    %c0_10 = arith.constant 0 : index
    %11 = vector.load %arg7[%10, %c0_10] : memref<88x128xbf16, #tpu.memory_space<vmem>>, vector<64x128xbf16>
    %c1_i32 = arith.constant 1 : i32
    %12 = arith.addi %9, %c1_i32 : i32
    %13 = arith.index_cast %12 : i32 to index
    %c0_11 = arith.constant 0 : index
    %14 = vector.load %arg7[%13, %c0_11] : memref<88x128xbf16, #tpu.memory_space<vmem>>, vector<64x128xbf16>
    %c2_i32 = arith.constant 2 : i32
    %15 = arith.muli %c2_i32, %c0_i32 : i32
    %16 = arith.index_cast %15 : i32 to index
    %c0_12 = arith.constant 0 : index
    %c0_13 = arith.constant 0 : index
    %17 = vector.load %arg4[%16, %c0_12, %c0_13] : memref<6x128x256xbf16, #tpu.memory_space<vmem>>, vector<1x128x256xbf16>
    %18 = vector.shape_cast %17 : vector<1x128x256xbf16> to vector<128x256xbf16>
    %cst_14 = arith.constant dense<0.000000e+00> : vector<64x256xf32>
    %19 = tpu.matmul %11, %18, %cst_14 {dimension_numbers = #tpu.dot_dimension_numbers<[1], [0], [0], [1], [0, 0, 1, 1], [], []>} : vector<64x128xbf16>, vector<128x256xbf16>, vector<64x256xf32> -> vector<64x256xf32>
    %20 = arith.addf %8, %19 : vector<64x256xf32>
    %c2_i32_15 = arith.constant 2 : i32
    %21 = arith.muli %c2_i32_15, %c0_i32 : i32
    %c1_i32_16 = arith.constant 1 : i32
    %22 = arith.addi %21, %c1_i32_16 : i32
    %23 = arith.index_cast %22 : i32 to index
    %c0_17 = arith.constant 0 : index
    %c0_18 = arith.constant 0 : index
    %24 = vector.load %arg4[%23, %c0_17, %c0_18] : memref<6x128x256xbf16, #tpu.memory_space<vmem>>, vector<1x128x256xbf16>
    %25 = vector.shape_cast %24 : vector<1x128x256xbf16> to vector<128x256xbf16>
    %cst_19 = arith.constant dense<0.000000e+00> : vector<64x256xf32>
    %26 = tpu.matmul %14, %25, %cst_19 {dimension_numbers = #tpu.dot_dimension_numbers<[1], [0], [0], [1], [0, 0, 1, 1], [], []>} : vector<64x128xbf16>, vector<128x256xbf16>, vector<64x256xf32> -> vector<64x256xf32>
    %27 = arith.addf %20, %26 : vector<64x256xf32>
    %c1_i32_20 = arith.constant 1 : i32
    %c8_i32_21 = arith.constant 8 : i32
    %28 = arith.muli %c1_i32_20, %c8_i32_21 : i32
    %29 = arith.index_cast %28 : i32 to index
    %c0_22 = arith.constant 0 : index
    %30 = vector.load %arg7[%29, %c0_22] : memref<88x128xbf16, #tpu.memory_space<vmem>>, vector<64x128xbf16>
    %c1_i32_23 = arith.constant 1 : i32
    %31 = arith.addi %28, %c1_i32_23 : i32
    %32 = arith.index_cast %31 : i32 to index
    %c0_24 = arith.constant 0 : index
    %33 = vector.load %arg7[%32, %c0_24] : memref<88x128xbf16, #tpu.memory_space<vmem>>, vector<64x128xbf16>
    %c2_i32_25 = arith.constant 2 : i32
    %34 = arith.muli %c2_i32_25, %c1_i32_20 : i32
    %35 = arith.index_cast %34 : i32 to index
    %c0_26 = arith.constant 0 : index
    %c0_27 = arith.constant 0 : index
    %36 = vector.load %arg4[%35, %c0_26, %c0_27] : memref<6x128x256xbf16, #tpu.memory_space<vmem>>, vector<1x128x256xbf16>
    %37 = vector.shape_cast %36 : vector<1x128x256xbf16> to vector<128x256xbf16>
    %cst_28 = arith.constant dense<0.000000e+00> : vector<64x256xf32>
    %38 = tpu.matmul %30, %37, %cst_28 {dimension_numbers = #tpu.dot_dimension_numbers<[1], [0], [0], [1], [0, 0, 1, 1], [], []>} : vector<64x128xbf16>, vector<128x256xbf16>, vector<64x256xf32> -> vector<64x256xf32>
    %39 = arith.addf %27, %38 : vector<64x256xf32>
    %c2_i32_29 = arith.constant 2 : i32
    %40 = arith.muli %c2_i32_29, %c1_i32_20 : i32
    %c1_i32_30 = arith.constant 1 : i32
    %41 = arith.addi %40, %c1_i32_30 : i32
    %42 = arith.index_cast %41 : i32 to index
    %c0_31 = arith.constant 0 : index
    %c0_32 = arith.constant 0 : index
    %43 = vector.load %arg4[%42, %c0_31, %c0_32] : memref<6x128x256xbf16, #tpu.memory_space<vmem>>, vector<1x128x256xbf16>
    %44 = vector.shape_cast %43 : vector<1x128x256xbf16> to vector<128x256xbf16>
    %cst_33 = arith.constant dense<0.000000e+00> : vector<64x256xf32>
    %45 = tpu.matmul %33, %44, %cst_33 {dimension_numbers = #tpu.dot_dimension_numbers<[1], [0], [0], [1], [0, 0, 1, 1], [], []>} : vector<64x128xbf16>, vector<128x256xbf16>, vector<64x256xf32> -> vector<64x256xf32>
    %46 = arith.addf %39, %45 : vector<64x256xf32>
    %c2_i32_34 = arith.constant 2 : i32
    %c8_i32_35 = arith.constant 8 : i32
    %47 = arith.muli %c2_i32_34, %c8_i32_35 : i32
    %48 = arith.index_cast %47 : i32 to index
    %c0_36 = arith.constant 0 : index
    %49 = vector.load %arg7[%48, %c0_36] : memref<88x128xbf16, #tpu.memory_space<vmem>>, vector<64x128xbf16>
    %c1_i32_37 = arith.constant 1 : i32
    %50 = arith.addi %47, %c1_i32_37 : i32
    %51 = arith.index_cast %50 : i32 to index
    %c0_38 = arith.constant 0 : index
    %52 = vector.load %arg7[%51, %c0_38] : memref<88x128xbf16, #tpu.memory_space<vmem>>, vector<64x128xbf16>
    %c2_i32_39 = arith.constant 2 : i32
    %53 = arith.muli %c2_i32_39, %c2_i32_34 : i32
    %54 = arith.index_cast %53 : i32 to index
    %c0_40 = arith.constant 0 : index
    %c0_41 = arith.constant 0 : index
    %55 = vector.load %arg4[%54, %c0_40, %c0_41] : memref<6x128x256xbf16, #tpu.memory_space<vmem>>, vector<1x128x256xbf16>
    %56 = vector.shape_cast %55 : vector<1x128x256xbf16> to vector<128x256xbf16>
    %cst_42 = arith.constant dense<0.000000e+00> : vector<64x256xf32>
    %57 = tpu.matmul %49, %56, %cst_42 {dimension_numbers = #tpu.dot_dimension_numbers<[1], [0], [0], [1], [0, 0, 1, 1], [], []>} : vector<64x128xbf16>, vector<128x256xbf16>, vector<64x256xf32> -> vector<64x256xf32>
    %58 = arith.addf %46, %57 : vector<64x256xf32>
    %c2_i32_43 = arith.constant 2 : i32
    %59 = arith.muli %c2_i32_43, %c2_i32_34 : i32
    %c1_i32_44 = arith.constant 1 : i32
    %60 = arith.addi %59, %c1_i32_44 : i32
    %61 = arith.index_cast %60 : i32 to index
    %c0_45 = arith.constant 0 : index
    %c0_46 = arith.constant 0 : index
    %62 = vector.load %arg4[%61, %c0_45, %c0_46] : memref<6x128x256xbf16, #tpu.memory_space<vmem>>, vector<1x128x256xbf16>
    %63 = vector.shape_cast %62 : vector<1x128x256xbf16> to vector<128x256xbf16>
    %cst_47 = arith.constant dense<0.000000e+00> : vector<64x256xf32>
    %64 = tpu.matmul %52, %63, %cst_47 {dimension_numbers = #tpu.dot_dimension_numbers<[1], [0], [0], [1], [0, 0, 1, 1], [], []>} : vector<64x128xbf16>, vector<128x256xbf16>, vector<64x256xf32> -> vector<64x256xf32>
    %65 = arith.addf %58, %64 : vector<64x256xf32>
    %c3_i32 = arith.constant 3 : i32
    %66 = vector.extract_strided_slice %65 {offsets = [0, 0], sizes = [64, 128], strides = [1, 1]} : vector<64x256xf32> to vector<64x128xf32>
    %67 = vector.extract_strided_slice %65 {offsets = [0, 128], sizes = [64, 128], strides = [1, 1]} : vector<64x256xf32> to vector<64x128xf32>
    %68 = arith.maximumf %66, %67 : vector<64x128xf32>
    %69 = vector.shape_cast %68 : vector<64x128xf32> to vector<4x16x128xf32>
    %70 = vector.extract_strided_slice %69 {offsets = [0, 0, 0], sizes = [4, 8, 128], strides = [1, 1, 1]} : vector<4x16x128xf32> to vector<4x8x128xf32>
    %71 = vector.extract_strided_slice %69 {offsets = [0, 8, 0], sizes = [4, 8, 128], strides = [1, 1, 1]} : vector<4x16x128xf32> to vector<4x8x128xf32>
    %72 = arith.maximumf %70, %71 : vector<4x8x128xf32>
    %73 = vector.extract_strided_slice %72 {offsets = [0, 0, 0], sizes = [4, 6, 128], strides = [1, 1, 1]} : vector<4x8x128xf32> to vector<4x6x128xf32>
    %c0_48 = arith.constant 0 : index
    %c0_49 = arith.constant 0 : index
    %74 = vector.load %arg5[%c0_48, %c0_49] : memref<1x128xf32, #tpu.memory_space<vmem>>, vector<1x128xf32>
    %75 = vector.shape_cast %74 : vector<1x128xf32> to vector<1x1x128xf32>
    %76 = vector.broadcast %75 : vector<1x1x128xf32> to vector<4x6x128xf32>
    %77 = arith.addf %73, %76 : vector<4x6x128xf32>
    %cst_50 = arith.constant 0.000000e+00 : f32
    %78 = vector.broadcast %cst_50 : f32 to vector<4x6x128xf32>
    %79 = arith.maximumf %77, %78 : vector<4x6x128xf32>
    %80 = arith.truncf %79 : vector<4x6x128xf32> to vector<4x6x128xbf16>
    %c0_51 = arith.constant 0 : index
    %c0_52 = arith.constant 0 : index
    %c0_53 = arith.constant 0 : index
    %c0_54 = arith.constant 0 : index
    %81 = vector.load %arg6[%c0_51, %c0_52, %c0_53, %c0_54] : memref<1x4x6x128xbf16, #tpu.memory_space<vmem>>, vector<1x4x6x128xbf16>
    %82 = vector.shape_cast %81 : vector<1x4x6x128xbf16> to vector<4x6x128xbf16>
    %83 = vector.shape_cast %80 : vector<4x6x128xbf16> to vector<1x4x6x128xbf16>
    tpu.vector_store %arg6[%c0_51, %c0_52, %c0_53, %c0_54], %83 {strides = array<i32>} : memref<1x4x6x128xbf16, #tpu.memory_space<vmem>>, vector<1x4x6x128xbf16>,
    return
  }
  func.func @transform_0(%arg0: i32, %arg1: i32) -> (i32, i32, i32) {
    %c0_i32 = arith.constant 0 : i32
    %c0_i32_0 = arith.constant 0 : i32
    return %arg0, %arg1, %c0_i32 : i32, i32, i32
  }
  func.func @transform_1(%arg0: i32, %arg1: i32) -> (i32, i32, i32) {
    %c1_i32 = arith.constant 1 : i32
    %0 = arith.addi %arg1, %c1_i32 : i32
    %c4_i32 = arith.constant 4 : i32
    %1 = arith.muli %c4_i32, %0 : i32
    %c0_i32 = arith.constant 0 : i32
    %c0_i32_0 = arith.constant 0 : i32
    return %arg0, %1, %c0_i32 : i32, i32, i32
  }
  func.func @transform_2(%arg0: i32, %arg1: i32) -> (i32, i32, i32) {
    %c0_i32 = arith.constant 0 : i32
    %c0_i32_0 = arith.constant 0 : i32
    %c0_i32_1 = arith.constant 0 : i32
    %c0_i32_2 = arith.constant 0 : i32
    return %c0_i32, %c0_i32_0, %c0_i32_1 : i32, i32, i32
  }
  func.func @transform_3(%arg0: i32, %arg1: i32) -> (i32, i32) {
    %c0_i32 = arith.constant 0 : i32
    %c0_i32_0 = arith.constant 0 : i32
    %c0_i32_1 = arith.constant 0 : i32
    return %c0_i32, %c0_i32_0 : i32, i32
  }
  func.func @transform_4(%arg0: i32, %arg1: i32) -> (i32, i32, i32, i32) {
    %c0_i32 = arith.constant 0 : i32
    %c0_i32_0 = arith.constant 0 : i32
    %c0_i32_1 = arith.constant 0 : i32
    return %arg0, %arg1, %c0_i32, %c0_i32_0 : i32, i32, i32, i32
  }
}

module attributes {stable_mosaic.version = 11 : i64} {
  func.func @_conv_relu_pool_kernel(%arg0: i32, %arg1: i32, %arg2: memref<1x32x256xbf16, #tpu.memory_space<vmem>>, %arg3: memref<1x16x256xbf16, #tpu.memory_space<vmem>>, %arg4: memref<6x256x512xbf16, #tpu.memory_space<vmem>>, %arg5: memref<1x256xf32, #tpu.memory_space<vmem>>, %arg6: memref<1x2x3x256xbf16, #tpu.memory_space<vmem>>, %arg7: memref<56x256xbf16, #tpu.memory_space<vmem>>) attributes {dimension_semantics = [#tpu.dimension_semantics<parallel>, #tpu.dimension_semantics<parallel>], iteration_bounds = array<i64: 2, 1>, scalar_prefetch = 0 : i64, scratch_operands = 1 : i64, tpu.core_type = #tpu.core_type<tc>, window_params = [{transform_indices = @transform_0, window_bounds = array<i64: 1, 32, 256>}, {transform_indices = @transform_1, window_bounds = array<i64: 1, 16, 256>}, {pipeline_mode = #tpu.pipeline_mode<synchronous>, transform_indices = @transform_2, window_bounds = array<i64: 6, 256, 512>}, {pipeline_mode = #tpu.pipeline_mode<synchronous>, transform_indices = @transform_3, window_bounds = array<i64: 1, 256>}, {transform_indices = @transform_4, window_bounds = array<i64: 1, 2, 3, 256>}]} {
    %c0 = arith.constant 0 : index
    %c0_0 = arith.constant 0 : index
    %c0_1 = arith.constant 0 : index
    %0 = vector.load %arg2[%c0, %c0_0, %c0_1] : memref<1x32x256xbf16, #tpu.memory_space<vmem>>, vector<1x32x256xbf16>
    %1 = vector.shape_cast %0 : vector<1x32x256xbf16> to vector<32x256xbf16>
    %c0_2 = arith.constant 0 : index
    %c0_3 = arith.constant 0 : index
    %2 = vector.load %arg7[%c0_2, %c0_3] : memref<56x256xbf16, #tpu.memory_space<vmem>>, vector<32x256xbf16>
    tpu.vector_store %arg7[%c0_2, %c0_3], %1 {strides = array<i32>} : memref<56x256xbf16, #tpu.memory_space<vmem>>, vector<32x256xbf16>,
    %c0_4 = arith.constant 0 : index
    %c0_5 = arith.constant 0 : index
    %c0_6 = arith.constant 0 : index
    %3 = vector.load %arg3[%c0_4, %c0_5, %c0_6] : memref<1x16x256xbf16, #tpu.memory_space<vmem>>, vector<1x16x256xbf16>
    %4 = vector.shape_cast %3 : vector<1x16x256xbf16> to vector<16x256xbf16>
    %c32 = arith.constant 32 : index
    %c0_7 = arith.constant 0 : index
    %5 = vector.load %arg7[%c32, %c0_7] : memref<56x256xbf16, #tpu.memory_space<vmem>>, vector<16x256xbf16>
    tpu.vector_store %arg7[%c32, %c0_7], %4 {strides = array<i32>} : memref<56x256xbf16, #tpu.memory_space<vmem>>, vector<16x256xbf16>,
    %cst = arith.constant 0.000000e+00 : bf16
    %6 = vector.broadcast %cst : bf16 to vector<8x256xbf16>
    %c48 = arith.constant 48 : index
    %c0_8 = arith.constant 0 : index
    %7 = vector.load %arg7[%c48, %c0_8] : memref<56x256xbf16, #tpu.memory_space<vmem>>, vector<8x256xbf16>
    tpu.vector_store %arg7[%c48, %c0_8], %6 {strides = array<i32>} : memref<56x256xbf16, #tpu.memory_space<vmem>>, vector<8x256xbf16>,
    %cst_9 = arith.constant 0.000000e+00 : f32
    %8 = vector.broadcast %cst_9 : f32 to vector<32x512xf32>
    %c0_i32 = arith.constant 0 : i32
    %c8_i32 = arith.constant 8 : i32
    %9 = arith.muli %c0_i32, %c8_i32 : i32
    %10 = arith.index_cast %9 : i32 to index
    %c0_10 = arith.constant 0 : index
    %11 = vector.load %arg7[%10, %c0_10] : memref<56x256xbf16, #tpu.memory_space<vmem>>, vector<32x256xbf16>
    %c1_i32 = arith.constant 1 : i32
    %12 = arith.addi %9, %c1_i32 : i32
    %13 = arith.index_cast %12 : i32 to index
    %c0_11 = arith.constant 0 : index
    %14 = vector.load %arg7[%13, %c0_11] : memref<56x256xbf16, #tpu.memory_space<vmem>>, vector<32x256xbf16>
    %c2_i32 = arith.constant 2 : i32
    %15 = arith.muli %c2_i32, %c0_i32 : i32
    %16 = arith.index_cast %15 : i32 to index
    %c0_12 = arith.constant 0 : index
    %c0_13 = arith.constant 0 : index
    %17 = vector.load %arg4[%16, %c0_12, %c0_13] : memref<6x256x512xbf16, #tpu.memory_space<vmem>>, vector<1x256x512xbf16>
    %18 = vector.shape_cast %17 : vector<1x256x512xbf16> to vector<256x512xbf16>
    %cst_14 = arith.constant dense<0.000000e+00> : vector<32x512xf32>
    %19 = tpu.matmul %11, %18, %cst_14 {dimension_numbers = #tpu.dot_dimension_numbers<[1], [0], [0], [1], [0, 0, 1, 1], [], []>} : vector<32x256xbf16>, vector<256x512xbf16>, vector<32x512xf32> -> vector<32x512xf32>
    %20 = arith.addf %8, %19 : vector<32x512xf32>
    %c2_i32_15 = arith.constant 2 : i32
    %21 = arith.muli %c2_i32_15, %c0_i32 : i32
    %c1_i32_16 = arith.constant 1 : i32
    %22 = arith.addi %21, %c1_i32_16 : i32
    %23 = arith.index_cast %22 : i32 to index
    %c0_17 = arith.constant 0 : index
    %c0_18 = arith.constant 0 : index
    %24 = vector.load %arg4[%23, %c0_17, %c0_18] : memref<6x256x512xbf16, #tpu.memory_space<vmem>>, vector<1x256x512xbf16>
    %25 = vector.shape_cast %24 : vector<1x256x512xbf16> to vector<256x512xbf16>
    %cst_19 = arith.constant dense<0.000000e+00> : vector<32x512xf32>
    %26 = tpu.matmul %14, %25, %cst_19 {dimension_numbers = #tpu.dot_dimension_numbers<[1], [0], [0], [1], [0, 0, 1, 1], [], []>} : vector<32x256xbf16>, vector<256x512xbf16>, vector<32x512xf32> -> vector<32x512xf32>
    %27 = arith.addf %20, %26 : vector<32x512xf32>
    %c1_i32_20 = arith.constant 1 : i32
    %c8_i32_21 = arith.constant 8 : i32
    %28 = arith.muli %c1_i32_20, %c8_i32_21 : i32
    %29 = arith.index_cast %28 : i32 to index
    %c0_22 = arith.constant 0 : index
    %30 = vector.load %arg7[%29, %c0_22] : memref<56x256xbf16, #tpu.memory_space<vmem>>, vector<32x256xbf16>
    %c1_i32_23 = arith.constant 1 : i32
    %31 = arith.addi %28, %c1_i32_23 : i32
    %32 = arith.index_cast %31 : i32 to index
    %c0_24 = arith.constant 0 : index
    %33 = vector.load %arg7[%32, %c0_24] : memref<56x256xbf16, #tpu.memory_space<vmem>>, vector<32x256xbf16>
    %c2_i32_25 = arith.constant 2 : i32
    %34 = arith.muli %c2_i32_25, %c1_i32_20 : i32
    %35 = arith.index_cast %34 : i32 to index
    %c0_26 = arith.constant 0 : index
    %c0_27 = arith.constant 0 : index
    %36 = vector.load %arg4[%35, %c0_26, %c0_27] : memref<6x256x512xbf16, #tpu.memory_space<vmem>>, vector<1x256x512xbf16>
    %37 = vector.shape_cast %36 : vector<1x256x512xbf16> to vector<256x512xbf16>
    %cst_28 = arith.constant dense<0.000000e+00> : vector<32x512xf32>
    %38 = tpu.matmul %30, %37, %cst_28 {dimension_numbers = #tpu.dot_dimension_numbers<[1], [0], [0], [1], [0, 0, 1, 1], [], []>} : vector<32x256xbf16>, vector<256x512xbf16>, vector<32x512xf32> -> vector<32x512xf32>
    %39 = arith.addf %27, %38 : vector<32x512xf32>
    %c2_i32_29 = arith.constant 2 : i32
    %40 = arith.muli %c2_i32_29, %c1_i32_20 : i32
    %c1_i32_30 = arith.constant 1 : i32
    %41 = arith.addi %40, %c1_i32_30 : i32
    %42 = arith.index_cast %41 : i32 to index
    %c0_31 = arith.constant 0 : index
    %c0_32 = arith.constant 0 : index
    %43 = vector.load %arg4[%42, %c0_31, %c0_32] : memref<6x256x512xbf16, #tpu.memory_space<vmem>>, vector<1x256x512xbf16>
    %44 = vector.shape_cast %43 : vector<1x256x512xbf16> to vector<256x512xbf16>
    %cst_33 = arith.constant dense<0.000000e+00> : vector<32x512xf32>
    %45 = tpu.matmul %33, %44, %cst_33 {dimension_numbers = #tpu.dot_dimension_numbers<[1], [0], [0], [1], [0, 0, 1, 1], [], []>} : vector<32x256xbf16>, vector<256x512xbf16>, vector<32x512xf32> -> vector<32x512xf32>
    %46 = arith.addf %39, %45 : vector<32x512xf32>
    %c2_i32_34 = arith.constant 2 : i32
    %c8_i32_35 = arith.constant 8 : i32
    %47 = arith.muli %c2_i32_34, %c8_i32_35 : i32
    %48 = arith.index_cast %47 : i32 to index
    %c0_36 = arith.constant 0 : index
    %49 = vector.load %arg7[%48, %c0_36] : memref<56x256xbf16, #tpu.memory_space<vmem>>, vector<32x256xbf16>
    %c1_i32_37 = arith.constant 1 : i32
    %50 = arith.addi %47, %c1_i32_37 : i32
    %51 = arith.index_cast %50 : i32 to index
    %c0_38 = arith.constant 0 : index
    %52 = vector.load %arg7[%51, %c0_38] : memref<56x256xbf16, #tpu.memory_space<vmem>>, vector<32x256xbf16>
    %c2_i32_39 = arith.constant 2 : i32
    %53 = arith.muli %c2_i32_39, %c2_i32_34 : i32
    %54 = arith.index_cast %53 : i32 to index
    %c0_40 = arith.constant 0 : index
    %c0_41 = arith.constant 0 : index
    %55 = vector.load %arg4[%54, %c0_40, %c0_41] : memref<6x256x512xbf16, #tpu.memory_space<vmem>>, vector<1x256x512xbf16>
    %56 = vector.shape_cast %55 : vector<1x256x512xbf16> to vector<256x512xbf16>
    %cst_42 = arith.constant dense<0.000000e+00> : vector<32x512xf32>
    %57 = tpu.matmul %49, %56, %cst_42 {dimension_numbers = #tpu.dot_dimension_numbers<[1], [0], [0], [1], [0, 0, 1, 1], [], []>} : vector<32x256xbf16>, vector<256x512xbf16>, vector<32x512xf32> -> vector<32x512xf32>
    %58 = arith.addf %46, %57 : vector<32x512xf32>
    %c2_i32_43 = arith.constant 2 : i32
    %59 = arith.muli %c2_i32_43, %c2_i32_34 : i32
    %c1_i32_44 = arith.constant 1 : i32
    %60 = arith.addi %59, %c1_i32_44 : i32
    %61 = arith.index_cast %60 : i32 to index
    %c0_45 = arith.constant 0 : index
    %c0_46 = arith.constant 0 : index
    %62 = vector.load %arg4[%61, %c0_45, %c0_46] : memref<6x256x512xbf16, #tpu.memory_space<vmem>>, vector<1x256x512xbf16>
    %63 = vector.shape_cast %62 : vector<1x256x512xbf16> to vector<256x512xbf16>
    %cst_47 = arith.constant dense<0.000000e+00> : vector<32x512xf32>
    %64 = tpu.matmul %52, %63, %cst_47 {dimension_numbers = #tpu.dot_dimension_numbers<[1], [0], [0], [1], [0, 0, 1, 1], [], []>} : vector<32x256xbf16>, vector<256x512xbf16>, vector<32x512xf32> -> vector<32x512xf32>
    %65 = arith.addf %58, %64 : vector<32x512xf32>
    %c3_i32 = arith.constant 3 : i32
    %66 = vector.extract_strided_slice %65 {offsets = [0, 0], sizes = [32, 256], strides = [1, 1]} : vector<32x512xf32> to vector<32x256xf32>
    %67 = vector.extract_strided_slice %65 {offsets = [0, 256], sizes = [32, 256], strides = [1, 1]} : vector<32x512xf32> to vector<32x256xf32>
    %68 = arith.maximumf %66, %67 : vector<32x256xf32>
    %69 = vector.shape_cast %68 : vector<32x256xf32> to vector<2x16x256xf32>
    %70 = vector.extract_strided_slice %69 {offsets = [0, 0, 0], sizes = [2, 8, 256], strides = [1, 1, 1]} : vector<2x16x256xf32> to vector<2x8x256xf32>
    %71 = vector.extract_strided_slice %69 {offsets = [0, 8, 0], sizes = [2, 8, 256], strides = [1, 1, 1]} : vector<2x16x256xf32> to vector<2x8x256xf32>
    %72 = arith.maximumf %70, %71 : vector<2x8x256xf32>
    %73 = vector.extract_strided_slice %72 {offsets = [0, 0, 0], sizes = [2, 3, 256], strides = [1, 1, 1]} : vector<2x8x256xf32> to vector<2x3x256xf32>
    %c0_48 = arith.constant 0 : index
    %c0_49 = arith.constant 0 : index
    %74 = vector.load %arg5[%c0_48, %c0_49] : memref<1x256xf32, #tpu.memory_space<vmem>>, vector<1x256xf32>
    %75 = vector.shape_cast %74 : vector<1x256xf32> to vector<1x1x256xf32>
    %76 = vector.broadcast %75 : vector<1x1x256xf32> to vector<2x3x256xf32>
    %77 = arith.addf %73, %76 : vector<2x3x256xf32>
    %cst_50 = arith.constant 0.000000e+00 : f32
    %78 = vector.broadcast %cst_50 : f32 to vector<2x3x256xf32>
    %79 = arith.maximumf %77, %78 : vector<2x3x256xf32>
    %80 = arith.truncf %79 : vector<2x3x256xf32> to vector<2x3x256xbf16>
    %c0_51 = arith.constant 0 : index
    %c0_52 = arith.constant 0 : index
    %c0_53 = arith.constant 0 : index
    %c0_54 = arith.constant 0 : index
    %81 = vector.load %arg6[%c0_51, %c0_52, %c0_53, %c0_54] : memref<1x2x3x256xbf16, #tpu.memory_space<vmem>>, vector<1x2x3x256xbf16>
    %82 = vector.shape_cast %81 : vector<1x2x3x256xbf16> to vector<2x3x256xbf16>
    %83 = vector.shape_cast %80 : vector<2x3x256xbf16> to vector<1x2x3x256xbf16>
    tpu.vector_store %arg6[%c0_51, %c0_52, %c0_53, %c0_54], %83 {strides = array<i32>} : memref<1x2x3x256xbf16, #tpu.memory_space<vmem>>, vector<1x2x3x256xbf16>,
    return
  }
  func.func @transform_0(%arg0: i32, %arg1: i32) -> (i32, i32, i32) {
    %c0_i32 = arith.constant 0 : i32
    %c0_i32_0 = arith.constant 0 : i32
    return %arg0, %arg1, %c0_i32 : i32, i32, i32
  }
  func.func @transform_1(%arg0: i32, %arg1: i32) -> (i32, i32, i32) {
    %c1_i32 = arith.constant 1 : i32
    %0 = arith.addi %arg1, %c1_i32 : i32
    %c2_i32 = arith.constant 2 : i32
    %1 = arith.muli %c2_i32, %0 : i32
    %c0_i32 = arith.constant 0 : i32
    %c0_i32_0 = arith.constant 0 : i32
    return %arg0, %1, %c0_i32 : i32, i32, i32
  }
  func.func @transform_2(%arg0: i32, %arg1: i32) -> (i32, i32, i32) {
    %c0_i32 = arith.constant 0 : i32
    %c0_i32_0 = arith.constant 0 : i32
    %c0_i32_1 = arith.constant 0 : i32
    %c0_i32_2 = arith.constant 0 : i32
    return %c0_i32, %c0_i32_0, %c0_i32_1 : i32, i32, i32
  }
  func.func @transform_3(%arg0: i32, %arg1: i32) -> (i32, i32) {
    %c0_i32 = arith.constant 0 : i32
    %c0_i32_0 = arith.constant 0 : i32
    %c0_i32_1 = arith.constant 0 : i32
    return %c0_i32, %c0_i32_0 : i32, i32
  }
  func.func @transform_4(%arg0: i32, %arg1: i32) -> (i32, i32, i32, i32) {
    %c0_i32 = arith.constant 0 : i32
    %c0_i32_0 = arith.constant 0 : i32
    %c0_i32_1 = arith.constant 0 : i32
    return %arg0, %arg1, %c0_i32, %c0_i32_0 : i32, i32, i32, i32
  }
}

module attributes {stable_mosaic.version = 11 : i64} {
  func.func @_fc_kernel(%arg0: i32, %arg1: i32, %arg2: memref<2x1536xbf16, #tpu.memory_space<vmem>>, %arg3: memref<1536x512xbf16, #tpu.memory_space<vmem>>, %arg4: memref<1x512xf32, #tpu.memory_space<vmem>>, %arg5: memref<2x512xf32, #tpu.memory_space<vmem>>, %arg6: memref<2x512xf32, #tpu.memory_space<vmem>>) attributes {dimension_semantics = [#tpu.dimension_semantics<parallel>, #tpu.dimension_semantics<arbitrary>], iteration_bounds = array<i64: 2, 1>, scalar_prefetch = 0 : i64, scratch_operands = 1 : i64, tpu.core_type = #tpu.core_type<tc>, window_params = [{transform_indices = @transform_0, window_bounds = array<i64: 2, 1536>}, {transform_indices = @transform_1, window_bounds = array<i64: 1536, 512>}, {transform_indices = @transform_2, window_bounds = array<i64: 1, 512>}, {transform_indices = @transform_3, window_bounds = array<i64: 2, 512>}]} {
    %c0_i32 = arith.constant 0 : i32
    %0 = arith.cmpi eq, %arg1, %c0_i32 : i32
    %1 = arith.extui %0 : i1 to i32
    %c0_i32_0 = arith.constant 0 : i32
    %2 = arith.cmpi ne, %1, %c0_i32_0 : i32
    scf.if %2 {
      %cst_10 = arith.constant 0.000000e+00 : f32
      %12 = vector.broadcast %cst_10 : f32 to vector<2x512xf32>
      %c0_11 = arith.constant 0 : index
      %c0_12 = arith.constant 0 : index
      %13 = vector.load %arg6[%c0_11, %c0_12] : memref<2x512xf32, #tpu.memory_space<vmem>>, vector<2x512xf32>
      tpu.vector_store %arg6[%c0_11, %c0_12], %12 {strides = array<i32>} : memref<2x512xf32, #tpu.memory_space<vmem>>, vector<2x512xf32>,
    } else {
    }
    %c0 = arith.constant 0 : index
    %c0_1 = arith.constant 0 : index
    %3 = vector.load %arg6[%c0, %c0_1] : memref<2x512xf32, #tpu.memory_space<vmem>>, vector<2x512xf32>
    %c0_2 = arith.constant 0 : index
    %c0_3 = arith.constant 0 : index
    %4 = vector.load %arg2[%c0_2, %c0_3] : memref<2x1536xbf16, #tpu.memory_space<vmem>>, vector<2x1536xbf16>
    %c0_4 = arith.constant 0 : index
    %c0_5 = arith.constant 0 : index
    %5 = vector.load %arg3[%c0_4, %c0_5] : memref<1536x512xbf16, #tpu.memory_space<vmem>>, vector<1536x512xbf16>
    %cst = arith.constant dense<0.000000e+00> : vector<2x512xf32>
    %6 = tpu.matmul %4, %5, %cst {dimension_numbers = #tpu.dot_dimension_numbers<[1], [0], [0], [1], [0, 0, 1, 1], [], []>} : vector<2x1536xbf16>, vector<1536x512xbf16>, vector<2x512xf32> -> vector<2x512xf32>
    %7 = arith.addf %3, %6 : vector<2x512xf32>
    %c0_6 = arith.constant 0 : index
    %c0_7 = arith.constant 0 : index
    %8 = vector.load %arg6[%c0_6, %c0_7] : memref<2x512xf32, #tpu.memory_space<vmem>>, vector<2x512xf32>
    tpu.vector_store %arg6[%c0_6, %c0_7], %7 {strides = array<i32>} : memref<2x512xf32, #tpu.memory_space<vmem>>, vector<2x512xf32>,
    %c0_i32_8 = arith.constant 0 : i32
    %9 = arith.cmpi eq, %arg1, %c0_i32_8 : i32
    %10 = arith.extui %9 : i1 to i32
    %c0_i32_9 = arith.constant 0 : i32
    %11 = arith.cmpi ne, %10, %c0_i32_9 : i32
    scf.if %11 {
      %c0_10 = arith.constant 0 : index
      %c0_11 = arith.constant 0 : index
      %12 = vector.load %arg6[%c0_10, %c0_11] : memref<2x512xf32, #tpu.memory_space<vmem>>, vector<2x512xf32>
      %c0_12 = arith.constant 0 : index
      %c0_13 = arith.constant 0 : index
      %13 = vector.load %arg4[%c0_12, %c0_13] : memref<1x512xf32, #tpu.memory_space<vmem>>, vector<1x512xf32>
      %14 = vector.broadcast %13 : vector<1x512xf32> to vector<2x512xf32>
      %15 = arith.addf %12, %14 : vector<2x512xf32>
      %c0_14 = arith.constant 0 : index
      %c0_15 = arith.constant 0 : index
      %16 = vector.load %arg5[%c0_14, %c0_15] : memref<2x512xf32, #tpu.memory_space<vmem>>, vector<2x512xf32>
      tpu.vector_store %arg5[%c0_14, %c0_15], %15 {strides = array<i32>} : memref<2x512xf32, #tpu.memory_space<vmem>>, vector<2x512xf32>,
    } else {
    }
    return
  }
  func.func @transform_0(%arg0: i32, %arg1: i32) -> (i32, i32) {
    %c0_i32 = arith.constant 0 : i32
    %c0_i32_0 = arith.constant 0 : i32
    return %c0_i32, %arg1 : i32, i32
  }
  func.func @transform_1(%arg0: i32, %arg1: i32) -> (i32, i32) {
    %c0_i32 = arith.constant 0 : i32
    return %arg1, %arg0 : i32, i32
  }
  func.func @transform_2(%arg0: i32, %arg1: i32) -> (i32, i32) {
    %c0_i32 = arith.constant 0 : i32
    %c0_i32_0 = arith.constant 0 : i32
    return %c0_i32, %arg0 : i32, i32
  }
  func.func @transform_3(%arg0: i32, %arg1: i32) -> (i32, i32) {
    %c0_i32 = arith.constant 0 : i32
    %c0_i32_0 = arith.constant 0 : i32
    return %c0_i32, %arg0 : i32, i32
  }
}

</mosaic_0001>

<bundles_post_ra>
// kernel: image_encoder_forward.5
= control target key start
LH: loop header
LB: loop body
LE: loop exit
PB: predicated region body
PF: predicated region fallthrough
CT: control target
= control target key end

     0   :  { %9 = vsyncpa [#allocation4], 0  ;;  %s2653_s0 = inlined_call_operand.vmem [shape: bf16[2,80,128], index: 0, kind: input, shape index: {}, may-alias: {0,1}]   ;;  %s2654_s1 = inlined_call_operand.vmem [shape: bf16[2,80,128], index: 1, kind: input, shape index: {}, may-alias: {0,1}]   ;;  %s2655_s2 = inlined_call_operand.hbm [shape: bf16[6,128,256], index: 2, kind: input, shape index: {}]   ;;  %s2656_s3 = inlined_call_operand.hbm [shape: f32[1,128], index: 3, kind: input, shape index: {}]   ;;  %s2657_s4 = inlined_call_operand.vmem [shape: bf16[2,4,6,128], index: 4, kind: output, shape index: {}]  }
   0x1   :  { %10 = vsyncpa [#allocation6], 0  ;;  %s2390_s15 = smov 0   ;;  %s2392_s16 = smov 0  }
   0x2   :  { %s2394_s17 = smov 0  }
   0x3 LB: > { %s1842_s18 = sadd.s32 4294967295, %s2358_s17   ;;  %s28_s19 = sadd.s32 1, %s2354_s16  ;;  %s2358_s17 = sphi %s2394_s17, %s16_s17   ;;  %s2354_s16 = sphi %s2392_s16, %s2667_s16   ;;  %s2350_s15 = sphi %s2390_s15, %s2666_s15  }
   0x4   : > { %p30_p0 = scmp.ge.s32.totalorder %s28_s19, 2  ;;  %p1844_p1 = scmp.ge.s32.totalorder %s2358_s17, 1 }
   0x5   : > { %p163_p2 = scmp.lt.s32.totalorder %s2358_s17, 3  ;;  %p2415_p4 = scmp.eq.s32.totalorder %s1842_s18, 0 }
   0x6   : > { %s2669_s19 = smov (%p30_p0, %s28_s19), 0  ;;  %s2360_s22 = smov [#allocation3]  }
   0x7   : > { %p2411_p3 = pnand %p1844_p1, %p163_p2  ;;  %s175_s23 = sshll.u32 %s2360_s22, 4  ;;  %s176_s23 = int_to_ptr.vmem [resolvable:$true] %s175_s23 }
   0x8   : > { %s2662_s21 = scalar_select %p2415_p4, 1, 0 }
   0x9   : > { %s2661_s20 = scalar_select %p2411_p3, 1, 0 }
   0xa   : > { %p2070_p5 = pneg %p2411_p3  ;;  %s2361_s25 = smov [#allocation5]  }
   0xb   : > { %s189_s26 = sshll.u32 %s2361_s25, 4  ;;  %s2272_s29 = scalar_lea.hbm %s2655_s2, 12288  ;;  %s2427_s26 = int_to_ptr.vmem [resolvable:$true] %s189_s26 }
   0xc   : > { %p2423_p6 = pnand %p2415_p4, %p2070_p5  ;;  %p2273_p7 = scmp.ne.s32.totalorder %s2655_s2, %s2272_s29 }
   0xd   : > { %p2279_p11 = scmp.lt.u32.totalorder %s2272_s29, %s2655_s2 }
   0xe   : > { %p2274_p8 = pneg %p2423_p6 }
  0x10   : > { %p2275_p9 = pnand %p2274_p8, %p2273_p7 }
  0x12   : > { %p2276_p10 = pneg %p2275_p9 }
  0x14   : > { %p2281_p12 = pnand %p2279_p11, %p2276_p10 }
  0x16   : > { %2284 = shalt.err (!%p2281_p12)
}
  0x17   : > { %s2285_s8 = scalar_lea.vmem %s176_s23, 12288  ;;  %p2293_p2 = scmp.lt.s32.totalorder %s176_s23, %s176_s23 }
  0x18   : > { %p2286_p13 = scmp.ne.s32.totalorder %s176_s23, %s2285_s8  ;;  %p2294_p5 = scmp.lt.s32.totalorder %s2285_s8, %s2285_s8 }
  0x1a   : > { %p2288_p0 = pnand %p2286_p13, %p2274_p8  ;;  %p2295_p4 = por %p2294_p5, %p2293_p2 }
  0x1c   : > { %p2289_p1 = pneg %p2288_p0 }
  0x1e   : > { %p2296_p3 = pnand %p2295_p4, %p2289_p1 }
  0x20   : > { %2299 = shalt.err (!%p2296_p3)
}
  0x21   : > { %s2362_s9 = smov 128   ;;  %s2363_s10 = smov 8  }
  0x22   : > { %2073 = dma.hbm_to_vmem [thread:$0]  (!%p2423_p6), %s2655_s2, 12288, %s176_s23, [#allocation4], %s2362_s9, %s2362_s9, %s2363_s10  }
  0x23   : > { %s2300_s18 = scalar_lea.hbm %s2656_s3, 16 }
  0x24   : > { %p2301_p7 = scmp.ne.s32.totalorder %s2656_s3, %s2300_s18  ;;  %p2307_p9 = scmp.lt.u32.totalorder %s2300_s18, %s2656_s3 }
  0x26   : > { %p2303_p3 = pnand %p2301_p7, %p2274_p8 }
  0x28   : > { %p2304_p4 = pneg %p2303_p3 }
  0x2a   : > { %p2309_p10 = pnand %p2307_p9, %p2304_p4 }
  0x2c   : > { %2312 = shalt.err (!%p2309_p10)
}
  0x2d   : > { %s2313_s23 = scalar_lea.vmem %s2427_s26, 16  ;;  %s2320_s29 = scalar_lea.vmem %s2427_s26, 32 }
  0x2e   : > { %p2314_p11 = scmp.ne.s32.totalorder %s2427_s26, %s2313_s23  ;;  %p2321_p0 = scmp.lt.s32.totalorder %s2427_s26, %s2427_s26 }
  0x2f   : > { %p2322_p1 = scmp.lt.s32.totalorder %s2320_s29, %s2313_s23 }
  0x30   : > { %p2316_p12 = pnand %p2314_p11, %p2274_p8 }
  0x31   : > { %p2323_p2 = por %p2322_p1, %p2321_p0 }
  0x32   : > { %p2317_p13 = pneg %p2316_p12 }
  0x34   : > { %p2324_p5 = pnand %p2323_p2, %p2317_p13 }
  0x36   : > { %2327 = shalt.err (!%p2324_p5)
}
  0x37   : > { %2076 = dma.hbm_to_vmem [thread:$0]  (!%p2423_p6), %s2656_s3, 16, %s2427_s26, [#allocation6]  }
  0x38   : > { %p2664_p7 = scmp.ne.s32.totalorder %s2661_s20, 0 }
  0x39   : > { %p2665_p8 = scmp.ne.s32.totalorder (!%p2664_p7), %s2662_s21, 0 }
  0x3a   : > { %240 = sbr.rel (%p2664_p7) target bundleno = 418 (0x1a2), region = 36 }
  0x41   : > { %2341 = dma.done.wait (%p2665_p8), [#allocation4], 12288  }
  0x42   : > { %2343 = vsyncadd (%p2665_p8), [#allocation4], 4294955008 }
  0x43   : > { %2345 = dma.done.wait (%p2665_p8), [#allocation6], 16  }
  0x44   : > { %2347 = vsyncadd (%p2665_p8), [#allocation6], 4294967280  ;;  %p298_p3 = scmp.lt.s32.totalorder %s2350_s15, 1  ;;  %v2364_v0 = vmov 0   ;;  %v2111_v1 = vld [vmem:[#allocation3 + $0x84] ss:$8 sps:$4 sm:$0xff]  }
  0x45   : > { %575 = vmatprep.mubr.bf16.mxu1 %v2364_v0  ;;  %356 = vst [vmem:[#allocation2 + $0x28] sm:$0xf] %v2364_v0  ;;  %1168 = vmatprep.mubr.bf16.mxu0 %v2364_v0  ;;  %v2113_v2 = vld [vmem:[#allocation3 + $0x184] ss:$8 sps:$4 sm:$0xff]   ;;  %v2115_v3 = vld [vmem:[#allocation3 + $0x80] ss:$8 sps:$4 sm:$0xff]  }
  0x46   : > { %s2671_s15 = smov (!%p298_p3, %s2350_s15), 1  ;;  %543 = vmatprep.subr.bf16.mxu1 %v2111_v1  ;;  %v2116_v4 = vld [vmem:[#allocation3 + $0x180] ss:$8 sps:$4 sm:$0xff]   ;;  %1136 = vmatprep.subr.bf16.mxu0 %v2113_v2  ;;  %v2117_v5 = vld [vmem:[#allocation3 + $0x94] ss:$8 sps:$4 sm:$0xff]  }
  0x47   : > { %544 = vmatpush1.bf16.msra.mxu1 %v2115_v3  ;;  %1137 = vmatpush1.bf16.msra.mxu0 %v2116_v4  ;;  %v2119_v6 = vld [vmem:[#allocation3 + $0x194] ss:$8 sps:$4 sm:$0xff]   ;;  %v2121_v7 = vld [vmem:[#allocation3 + $0x90] ss:$8 sps:$4 sm:$0xff]   ;;  %v2123_v9 = vld [vmem:[#allocation3 + $0xa4] ss:$8 sps:$4 sm:$0xff]  }
  0x48   : > { %545 = vmatprep.subr.bf16.mxu1 %v2117_v5  ;;  %v2122_v8 = vld [vmem:[#allocation3 + $0x190] ss:$8 sps:$4 sm:$0xff]   ;;  %1138 = vmatprep.subr.bf16.mxu0 %v2119_v6  ;;  %v2125_v10 = vld [vmem:[#allocation3 + $0x1a4] ss:$8 sps:$4 sm:$0xff]   ;;  %v2127_v11 = vld [vmem:[#allocation3 + $0xa0] ss:$8 sps:$4 sm:$0xff]  }
  0x49   : > { %v2128_v12 = vld [vmem:[#allocation3 + $0x1a0] ss:$8 sps:$4 sm:$0xff]   ;;  %v2129_v13 = vld [vmem:[#allocation3 + $0xb4] ss:$8 sps:$4 sm:$0xff]   ;;  %v2133_v15 = vld [vmem:[#allocation3 + $0xb0] ss:$8 sps:$4 sm:$0xff]  }
  0x4a   : > { %v2131_v14 = vld [vmem:[#allocation3 + $0x1b4] ss:$8 sps:$4 sm:$0xff]   ;;  %v2134_v16 = vld [vmem:[#allocation3 + $0x1b0] ss:$8 sps:$4 sm:$0xff]   ;;  %v2135_v17 = vld [vmem:[#allocation3 + $0xc4] ss:$8 sps:$4 sm:$0xff]  }
  0x4b   : > { %546 = vmatpush1.bf16.msra.mxu1 %v2121_v7  ;;  %1139 = vmatpush1.bf16.msra.mxu0 %v2122_v8  ;;  %v2137_v18 = vld [vmem:[#allocation3 + $0x1c4] ss:$8 sps:$4 sm:$0xff]   ;;  %s2060_s20 = smul.u32 40, %s2671_s15  ;;  %v2139_v19 = vld [vmem:[#allocation3 + $0xc0] ss:$8 sps:$4 sm:$0xff]   ;;  %s1979_s10 = sshll.u32 %s2671_s15, 4 }
  0x4c   : > { %547 = vmatprep.subr.bf16.mxu1 %v2123_v9  ;;  %1140 = vmatprep.subr.bf16.mxu0 %v2125_v10  ;;  %v2140_v20 = vld [vmem:[#allocation3 + $0x1c0] ss:$8 sps:$4 sm:$0xff]   ;;  %v2141_v21 = vld [vmem:[#allocation3 + $0xd4] ss:$8 sps:$4 sm:$0xff]   ;;  %v2145_v23 = vld [vmem:[#allocation3 + $0xd0] ss:$8 sps:$4 sm:$0xff]   ;;  %s2638_s13 = scalar_lea.vmem %s2657_s4, %s1979_s10 }
  0x4d   : > { %v2143_v22 = vld [vmem:[#allocation3 + $0x1d4] ss:$8 sps:$4 sm:$0xff]   ;;  %s2500_s26 = scalar_lea.vmem %s2653_s0, %s2060_s20  ;;  %v2146_v24 = vld [vmem:[#allocation3 + $0x1d0] ss:$8 sps:$4 sm:$0xff]   ;;  %v2147_v25 = vld [vmem:[#allocation3 + $0xe4] ss:$8 sps:$4 sm:$0xff]  }
  0x4e   : > { %v2149_v26 = vld [vmem:[#allocation3 + $0x1e4] ss:$8 sps:$4 sm:$0xff]   ;;  %v336_v27 = vld [vmem:[%s2500_s26] sm:$0xff]   ;;  %v338_v28 = vld [vmem:[%s2500_s26 + $0x8] sm:$0xff]   ;;  %s1978_s6 = sadd.s32 32, %s2060_s20 }
  0x4f   : > { %548 = vmatpush1.bf16.msra.mxu1 %v2127_v11  ;;  %1141 = vmatpush1.bf16.msra.mxu0 %v2128_v12  ;;  %344 = vst [vmem:[#allocation2] sm:$0xff] %v336_v27   ;;  %346 = vst [vmem:[#allocation2 + $0x8] sm:$0xff] %v338_v28   ;;  %v2151_v29 = vld [vmem:[#allocation3 + $0xe0] ss:$8 sps:$4 sm:$0xff]   ;;  %v2153_v32 = vld [vmem:[#allocation3 + $0xf4] ss:$8 sps:$4 sm:$0xff]   ;;  %s321_s9 = scalar_lea.vmem %s2654_s1, %s1978_s6 }
  0x50   : > { %549 = vmatprep.subr.bf16.mxu1 %v2129_v13  ;;  %1142 = vmatprep.subr.bf16.mxu0 %v2131_v14  ;;  %v340_v30 = vld [vmem:[%s2500_s26 + $0x10] sm:$0xff]   ;;  %v2155_v33 = vld [vmem:[#allocation3 + $0x1f4] ss:$8 sps:$4 sm:$0xff]   ;;  %v2157_v34 = vld [vmem:[#allocation3 + $0xf0] ss:$8 sps:$4 sm:$0xff]  }
  0x51   : > { %v2152_v31 = vld [vmem:[#allocation3 + $0x1e0] ss:$8 sps:$4 sm:$0xff]   ;;  %348 = vst [vmem:[#allocation2 + $0x10] sm:$0xff] %v340_v30   ;;  %v2158_v35 = vld [vmem:[#allocation3 + $0x1f0] ss:$8 sps:$4 sm:$0xff]  }
  0x52   : > { %v2163_v36 = vld [vmem:[#allocation3 + $0x4] ss:$8 sps:$4 sm:$0xff]   ;;  %vm422_vm0 = vsmask.f32 7424  ;;  %v2161_v61 = vld [vmem:[#allocation3] ss:$8 sps:$4 sm:$0xff]  }
  0x53   : > { %550 = vmatpush1.bf16.msra.mxu1 %v2133_v15  ;;  %1143 = vmatpush1.bf16.msra.mxu0 %v2134_v16  ;;  %v2169_v37 = vld [vmem:[#allocation3 + $0x204] ss:$8 sps:$4 sm:$0xff]   ;;  %v2167_v2 = vld [vmem:[#allocation3 + $0x200] ss:$8 sps:$4 sm:$0xff]   ;;  %v2172_v6 = vld [vmem:[#allocation3 + $0x14] ss:$8 sps:$4 sm:$0xff]  }
  0x54   : > { %551 = vmatprep.subr.bf16.mxu1 %v2135_v17  ;;  %1144 = vmatprep.subr.bf16.mxu0 %v2137_v18  ;;  %v342_v55 = vld [vmem:[%s2500_s26 + $0x18] sm:$0xff]   ;;  %v2175_v10 = vld [vmem:[#allocation3 + $0x214] ss:$8 sps:$4 sm:$0xff]   ;;  %v2177_v28 = vld [vmem:[#allocation3 + $0x20] ss:$8 sps:$4 sm:$0xff]  }
  0x55   : > { %350 = vst [vmem:[#allocation2 + $0x18] sm:$0xff] %v342_v55   ;;  %v2170_v12 = vld [vmem:[#allocation3 + $0x10] ss:$8 sps:$4 sm:$0xff]   ;;  %v2183_v27 = vld [vmem:[#allocation3 + $0x224] ss:$8 sps:$4 sm:$0xff]  }
  0x56   : > { %v357_v38 = vld [vmem:[#allocation2] sm:$0xf]  ;;  %v2505_v39 = vld [vmem:[#allocation2 + $0x4] sm:$0xf]  ;;  %v2507_v40 = vld [vmem:[#allocation2 + $0x8] sm:$0xf] }
  0x57   : > { %552 = vmatpush1.bf16.msra.mxu1 %v2139_v19  ;;  %1145 = vmatpush1.bf16.msra.mxu0 %v2140_v20  ;;  %v2509_v41 = vld [vmem:[#allocation2 + $0xc] sm:$0xf]  ;;  %v2512_v42 = vcombine.low %v357_v38, %v2505_v39  ;;  %v774_v43 = vld [vmem:[#allocation2 + $0x4] sm:$0xf]  ;;  %v2514_v44 = vld [vmem:[#allocation2 + $0x8] sm:$0xf]  ;;  %v1892_v45 = vcombine.low %v2505_v39, %v2507_v40 }
  0x58   : > { %553 = vmatprep.subr.bf16.mxu1 %v2141_v21  ;;  %1146 = vmatprep.subr.bf16.mxu0 %v2143_v22  ;;  %v2520_v46 = vcombine.low %v2507_v40, %v2509_v41  ;;  %v2522_v47 = vld [vmem:[#allocation2 + $0xc] sm:$0xf]  ;;  %v2524_v48 = vld [vmem:[#allocation2 + $0x10] sm:$0xf]  ;;  %v1912_v49 = vcombine.low %v774_v43, %v2514_v44  ;;  %v2533_v54 = vld [vmem:[#allocation2 + $0x14] sm:$0xf] }
  0x59   : > { %v2527_v50 = vld [vmem:[#allocation2 + $0x10] sm:$0xf]  ;;  %v424_v51 = vshrl.u32 %v2512_v42, 16  ;;  %v426_v52 = vshll.u32 %v2512_v42, 16  ;;  %v1913_v53 = vcombine.low %v2522_v47, %v2524_v48  ;;  %v2551_v13 = vld [vmem:[#allocation2 + $0x14] sm:$0xf] }
  0x5a   : > { %v431_v56 = vshll.u32 %v2520_v46, 16  ;;  %v1017_v57 = vshrl.u32 %v1912_v49, 16  ;;  %v1019_v58 = vshll.u32 %v1912_v49, 16  ;;  %v2539_v59 = vcombine.low %v2527_v50, %v2533_v54  ;;  %v2173_v15 = vld [vmem:[#allocation3 + $0x210] ss:$8 sps:$4 sm:$0xff]  }
  0x5b   : > { %554 = vmatpush1.bf16.msra.mxu1 %v2145_v23  ;;  %1147 = vmatpush1.bf16.msra.mxu0 %v2146_v24  ;;  %v428_v60 = vrot.slane %v426_v52, 1  ;;  %v1024_v62 = vshll.u32 %v1913_v53, 16  ;;  %v435_v7 = vshrl.u32 %v2520_v46, 16  ;;  %v1893_v8 = vcombine.low %v2509_v41, %v2527_v50  ;;  %v352_v18 = vld [vmem:[%s321_s9] sm:$0xff]   ;;  %v2179_v23 = vld [vmem:[#allocation3 + $0x24] ss:$8 sps:$4 sm:$0xff]  }
  0x5c   : > { %555 = vmatprep.subr.bf16.mxu1 %v2147_v25  ;;  %1148 = vmatprep.subr.bf16.mxu0 %v2149_v26  ;;  %v433_v63 = vrot.slane %v431_v56, 1  ;;  %v1021_v1 = vrot.slane %v1019_v58, 1  ;;  %v439_v3 = vshll.u32 %v2539_v59, 16  ;;  %v1028_v17 = vshrl.u32 %v1913_v53, 16  ;;  %v2554_v20 = vld [vmem:[#allocation2 + $0x18] sm:$0xf] }
  0x5d   : > { %v429_v4 = vor.u32 %v428_v60, %v424_v51  ;;  %v1026_v5 = vrot.slane %v1024_v62, 1  ;;  %v2556_v21 = vld [vmem:[#allocation2 + $0x18] sm:$0xf]  ;;  %v2558_v22 = vld [vmem:[#allocation2 + $0x1c] sm:$0xf]  ;;  %354 = vst [vmem:[#allocation2 + $0x20] sm:$0xff] %v352_v18   ;;  %v1914_v24 = vcombine.low %v2551_v13, %v2554_v20 }
  0x5e   : > { %v1022_v9 = vor.u32 %v1021_v1, %v1017_v57  ;;  %v441_v16 = vrot.slane %v439_v3, 1  ;;  %v437_v19 = vor.u32 %v435_v7, %v433_v63  ;;  %v2564_v25 = vcombine.low %v2556_v21, %v2558_v22  ;;  %v2184_v38 = vld [vmem:[#allocation3 + $0x30] ss:$8 sps:$4 sm:$0xff]   ;;  %v2189_v43 = vld [vmem:[#allocation3 + $0x234] ss:$8 sps:$4 sm:$0xff]  }
  0x5f   : > { %556 = vmatpush1.bf16.msra.mxu1 %v2151_v29  ;;  %1149 = vmatpush1.bf16.msra.mxu0 %v2152_v31  ;;  %v434_v11 = vsel %vm422_vm0, %v429_v4, %v433_v63  ;;  %v1894_v26 = vcombine.low %v2533_v54, %v2556_v21  ;;  %v1030_v29 = vor.u32 %v1028_v17, %v1026_v5  ;;  %v1032_v30 = vshll.u32 %v1914_v24, 16  ;;  %v2187_v52 = vld [vmem:[#allocation3 + $0x230] ss:$8 sps:$4 sm:$0xff]   ;;  %v2191_v3 = vld [vmem:[#allocation3 + $0x40] ss:$8 sps:$4 sm:$0xff]  }
  0x60   : > { %557 = vmatprep.subr.bf16.mxu1 %v2153_v32  ;;  %1150 = vmatprep.subr.bf16.mxu0 %v2155_v33  ;;  %v1027_v14 = vsel %vm422_vm0, %v1022_v9, %v1026_v5  ;;  %v447_v31 = vshll.u32 %v2564_v25, 16  ;;  %v442_v32 = vsel %vm422_vm0, %v437_v19, %v441_v16  ;;  %v2181_v33 = vld [vmem:[#allocation3 + $0x220] ss:$8 sps:$4 sm:$0xff]   ;;  %v1036_v49 = vshrl.u32 %v1914_v24, 16  ;;  %v2201_v17 = vld [vmem:[#allocation3 + $0x250] ss:$8 sps:$4 sm:$0xff]  }
  0x61   : > { %v2195_v4 = vld [vmem:[#allocation3 + $0x240] ss:$8 sps:$4 sm:$0xff]   ;;  %v451_v7 = vshrl.u32 %v2564_v25, 16 }
  0x62   : > { %v449_v53 = vrot.slane %v447_v31, 1  ;;  %v2209_v31 = vld [vmem:[#allocation3 + $0x260] ss:$8 sps:$4 sm:$0xff]  }
  0x63   : > { %558 = vmatpush1.bf16.msra.mxu1 %v2157_v34  ;;  %1151 = vmatpush1.bf16.msra.mxu0 %v2158_v35  ;;  %v443_v34 = vshrl.u32 %v2539_v59, 16  ;;  %v1034_v35 = vrot.slane %v1032_v30, 1 }
  0x64   : > { %700 = vmatprep.subr.bf16.mxu1 %v2163_v36  ;;  %1342 = vmatprep.subr.bf16.mxu0 %v2169_v37  ;;  %v2186_v36 = vld [vmem:[#allocation3 + $0x34] ss:$8 sps:$4 sm:$0xff]   ;;  %v2573_v37 = vld [vmem:[#allocation2 + $0x1c] sm:$0xf]  ;;  %v453_v18 = vor.u32 %v451_v7, %v449_v53 }
  0x65   : > { %v1035_v51 = vsel %vm422_vm0, %v1030_v29, %v1034_v35  ;;  %v2576_v55 = vld [vmem:[#allocation2 + $0x20] sm:$0xf]  ;;  %v445_v56 = vor.u32 %v443_v34, %v441_v16  ;;  %v2208_v62 = vld [vmem:[#allocation2 + $0x24] ss:$0 sps:$4 sm:$0x11]   ;;  %v1038_v63 = vor.u32 %v1036_v49, %v1034_v35  ;;  %v2267_v7 = vld [vmem:[#allocation2 + $0x8] sm:$0xff]  }
  0x66   : > { %576 = vmatmul.mubr.bf16.vlgmr.msra.gmra.mrb[0].mxu1 %v434_v11  ;;  %1169 = vmatmul.mubr.bf16.vlgmr.msra.gmra.mrb[0].mxu0 %v1027_v14  ;;  %v1915_v57 = vcombine.low %v2573_v37, %v2576_v55  ;;  %v2204_v58 = vld [vmem:[#allocation2 + $0x20] ss:$0 sps:$4 sm:$0x11]   ;;  %v1895_v60 = vcombine.low %v2558_v22, %v2576_v55  ;;  %v2198_v16 = vld [vmem:[#allocation3 + $0x50] ss:$8 sps:$4 sm:$0xff]  }
  0x67   : > { %701 = vmatpush1.bf16.msra.mxu1 %v2161_v61  ;;  %1343 = vmatpush1.bf16.msra.mxu0 %v2167_v2  ;;  %v2193_v61 = vld [vmem:[#allocation3 + $0x44] ss:$8 sps:$4 sm:$0xff]   ;;  %v450_v5 = vsel %vm422_vm0, %v445_v56, %v449_v53  ;;  %v455_v9 = vshll.u32 %v2204_v58, 16  ;;  %v2205_v29 = vld [vmem:[#allocation3 + $0x60] ss:$8 sps:$4 sm:$0xff]  }
  0x68   : > { %702 = vmatprep.subr.bf16.mxu1 %v2172_v6  ;;  %1344 = vmatprep.subr.bf16.mxu0 %v2175_v10  ;;  %v1040_v1 = vshll.u32 %v1915_v57, 16  ;;  %v2197_v2 = vld [vmem:[#allocation3 + $0x244] ss:$8 sps:$4 sm:$0xff]   ;;  %v2200_v10 = vld [vmem:[#allocation3 + $0x54] ss:$8 sps:$4 sm:$0xff]   ;;  %v1044_v11 = vshrl.u32 %v1915_v57, 16 }
  0x69   : > { %585 = vmatprep.mubr.bf16.mxu1 %v2364_v0  ;;  %1178 = vmatprep.mubr.bf16.mxu0 %v2364_v0  ;;  %v457_v19 = vrot.slane %v455_v9, 1  ;;  %v2217_v34 = vld [vmem:[#allocation3 + $0x274] ss:$8 sps:$4 sm:$0xff]   ;;  %v2212_v35 = vld [vmem:[#allocation3 + $0x70] ss:$8 sps:$4 sm:$0xff]  }
  0x6a   : > { %v1042_v6 = vrot.slane %v1040_v1, 1  ;;  %v2218_v49 = vld [vmem:[#allocation3 + $0x100] ss:$8 sps:$4 sm:$0xff]   ;;  %v2226_v53 = vld [vmem:[#allocation3 + $0x114] ss:$8 sps:$4 sm:$0xff]  }
  0x6b   : > { %703 = vmatpush1.bf16.msra.mxu1 %v2170_v12  ;;  %1345 = vmatpush1.bf16.msra.mxu0 %v2173_v15  ;;  %v1048_v12 = vshll.u32 %v2208_v62, 16  ;;  %v2203_v15 = vld [vmem:[#allocation3 + $0x254] ss:$8 sps:$4 sm:$0xff]   ;;  %v458_v30 = vsel %vm422_vm0, %v453_v18, %v457_v19  ;;  %v2224_v57 = vld [vmem:[#allocation3 + $0x110] ss:$8 sps:$4 sm:$0xff]   ;;  %v1934_v62 = vcombine.low %v2524_v48, %v2551_v13  ;;  %v1935_v13 = vcombine.low %v2554_v20, %v2573_v37 }
  0x6c   : > { %704 = vmatprep.subr.bf16.mxu1 %v2179_v23  ;;  %1346 = vmatprep.subr.bf16.mxu0 %v2183_v27  ;;  %v1043_v14 = vsel %vm422_vm0, %v1038_v63, %v1042_v6  ;;  %v2207_v23 = vld [vmem:[#allocation3 + $0x64] ss:$8 sps:$4 sm:$0xff]   ;;  %v1046_v24 = vor.u32 %v1044_v11, %v1042_v6  ;;  %v2229_v56 = vld [vmem:[#allocation3 + $0x294] ss:$8 sps:$4 sm:$0xff]   ;;  %v2227_v58 = vld [vmem:[#allocation3 + $0x290] ss:$8 sps:$4 sm:$0xff]  }
  0x6d   : > { %v1050_v27 = vrot.slane %v1048_v12, 1  ;;  %v2233_v63 = vld [vmem:[#allocation3 + $0x2a0] ss:$8 sps:$4 sm:$0xff]   ;;  %v2241_v1 = vld [vmem:[#allocation3 + $0x2b4] ss:$8 sps:$4 sm:$0xff]   ;;  %v1472_v19 = vshrl.u32 %v2267_v7, 16 }
  0x6e   : > { %586 = vmatmul.mubr.bf16.gmra.mrb[4].mxu1 %v442_v32  ;;  %1179 = vmatmul.mubr.bf16.gmra.mrb[4].mxu0 %v1035_v51  ;;  %v1933_v51 = vcombine.low %v2514_v44, %v2522_v47  ;;  %v2235_v44 = vld [vmem:[#allocation3 + $0x2a4] ss:$8 sps:$4 sm:$0xff]   ;;  %v2230_v47 = vld [vmem:[#allocation3 + $0x120] ss:$8 sps:$4 sm:$0xff]   ;;  %v2250_v6 = vld [vmem:[#allocation3 + $0x154] ss:$8 sps:$4 sm:$0xff]  }
  0x6f   : > { %705 = vmatpush1.bf16.msra.mxu1 %v2177_v28  ;;  %1347 = vmatpush1.bf16.msra.mxu0 %v2181_v33  ;;  %v2211_v28 = vld [vmem:[#allocation3 + $0x264] ss:$8 sps:$4 sm:$0xff]   ;;  %v1051_v32 = vsel %vm422_vm0, %v1046_v24, %v1050_v27  ;;  %v2214_v33 = vld [vmem:[#allocation3 + $0x74] ss:$8 sps:$4 sm:$0xff]   ;;  %v2242_v48 = vld [vmem:[#allocation3 + $0x140] ss:$8 sps:$4 sm:$0xff]  }
  0x70   : > { %706 = vmatprep.subr.bf16.mxu1 %v2186_v36  ;;  %1348 = vmatprep.subr.bf16.mxu0 %v2189_v43  ;;  %v2215_v36 = vld [vmem:[#allocation3 + $0x270] ss:$8 sps:$4 sm:$0xff]   ;;  %v2223_v43 = vld [vmem:[#allocation3 + $0x284] ss:$8 sps:$4 sm:$0xff]   ;;  %v2253_v9 = vld [vmem:[#allocation3 + $0x2d4] ss:$8 sps:$4 sm:$0xff]  }
  0x71   : > { %595 = vmatprep.mubr.bf16.mxu1 %v2364_v0  ;;  %1188 = vmatprep.mubr.bf16.mxu0 %v2364_v0  ;;  %v2251_v11 = vld [vmem:[#allocation3 + $0x2d0] ss:$8 sps:$4 sm:$0xff]   ;;  %v2256_v12 = vld [vmem:[#allocation3 + $0x164] ss:$8 sps:$4 sm:$0xff]   ;;  %v2254_v37 = vld [vmem:[#allocation3 + $0x160] ss:$8 sps:$4 sm:$0xff]  }
  0x72   : > { %v2259_v20 = vld [vmem:[#allocation3 + $0x2e4] ss:$8 sps:$4 sm:$0xff]   ;;  %v2262_v18 = vld [vmem:[#allocation3 + $0x174] ss:$8 sps:$4 sm:$0xff]  }
  0x73   : > { %707 = vmatpush1.bf16.msra.mxu1 %v2184_v38  ;;  %1349 = vmatpush1.bf16.msra.mxu0 %v2187_v52  ;;  %v2220_v38 = vld [vmem:[#allocation3 + $0x104] ss:$8 sps:$4 sm:$0xff]   ;;  %v2221_v52 = vld [vmem:[#allocation3 + $0x280] ss:$8 sps:$4 sm:$0xff]   ;;  %v2265_v27 = vld [vmem:[#allocation3 + $0x2f4] ss:$8 sps:$4 sm:$0xff]  }
  0x74   : > { %708 = vmatprep.subr.bf16.mxu1 %v2193_v61  ;;  %1350 = vmatprep.subr.bf16.mxu0 %v2197_v2  ;;  %v2232_v61 = vld [vmem:[#allocation3 + $0x124] ss:$8 sps:$4 sm:$0xff]   ;;  %v2236_v2 = vld [vmem:[#allocation3 + $0x130] ss:$8 sps:$4 sm:$0xff]  }
  0x76   : > { %596 = vmatmul.mubr.bf16.gmra.mrb[8].mxu1 %v450_v5  ;;  %1189 = vmatmul.mubr.bf16.gmra.mrb[8].mxu0 %v1043_v14  ;;  %v2247_v5 = vld [vmem:[#allocation3 + $0x2c4] ss:$8 sps:$4 sm:$0xff]   ;;  %v1225_v14 = vld [vmem:[#allocation2 + $0x24] sm:$0xf] }
  0x77   : > { %709 = vmatpush1.bf16.msra.mxu1 %v2191_v3  ;;  %1351 = vmatpush1.bf16.msra.mxu0 %v2195_v4  ;;  %v2239_v3 = vld [vmem:[#allocation3 + $0x2b0] ss:$8 sps:$4 sm:$0xff]   ;;  %v2244_v4 = vld [vmem:[#allocation3 + $0x144] ss:$8 sps:$4 sm:$0xff]  }
  0x78   : > { %710 = vmatprep.subr.bf16.mxu1 %v2200_v10  ;;  %1352 = vmatprep.subr.bf16.mxu0 %v2203_v15  ;;  %v2248_v10 = vld [vmem:[#allocation3 + $0x150] ss:$8 sps:$4 sm:$0xff]   ;;  %v2268_v15 = vld [vmem:[#allocation2 + $0x10] sm:$0xff]  }
  0x79   : > { %605 = vmatprep.mubr.bf16.mxu1 %v2364_v0  ;;  %1198 = vmatprep.mubr.bf16.mxu0 %v2364_v0  ;;  %v1479_v24 = vshll.u32 %v2268_v15, 16 }
  0x7b   : > { %711 = vmatpush1.bf16.msra.mxu1 %v2198_v16  ;;  %1353 = vmatpush1.bf16.msra.mxu0 %v2201_v17  ;;  %v1474_v16 = vshll.u32 %v2267_v7, 16  ;;  %v2257_v17 = vld [vmem:[#allocation3 + $0x2e0] ss:$8 sps:$4 sm:$0xff]  }
  0x7c   : > { %712 = vmatprep.subr.bf16.mxu1 %v2207_v23  ;;  %1354 = vmatprep.subr.bf16.mxu0 %v2211_v28  ;;  %v2260_v28 = vld [vmem:[#allocation3 + $0x170] ss:$8 sps:$4 sm:$0xff]  }
  0x7d   : > { %v1476_v23 = vrot.slane %v1474_v16, 1 }
  0x7e   : > { %606 = vmatmul.mubr.bf16.gmra.mrb[12].mxu1 %v458_v30  ;;  %1199 = vmatmul.mubr.bf16.gmra.mrb[12].mxu0 %v1051_v32  ;;  %v2269_v32 = vld [vmem:[#allocation2 + $0x18] sm:$0xff]  }
  0x7f   : > { %713 = vmatpush1.bf16.msra.mxu1 %v2205_v29  ;;  %1355 = vmatpush1.bf16.msra.mxu0 %v2209_v31  ;;  %v2263_v29 = vld [vmem:[#allocation3 + $0x2f0] ss:$8 sps:$4 sm:$0xff]   ;;  %v1477_v30 = vor.u32 %v1476_v23, %v1472_v19  ;;  %v1481_v31 = vrot.slane %v1479_v24, 1 }
  0x80   : > { %714 = vmatprep.subr.bf16.mxu1 %v2214_v33  ;;  %1356 = vmatprep.subr.bf16.mxu0 %v2217_v34  ;;  %v1483_v34 = vshrl.u32 %v2268_v15, 16 }
  0x81   : > { %732 = vmatprep.mubr.bf16.mxu1 %v2364_v0  ;;  %1374 = vmatprep.mubr.bf16.mxu0 %v2364_v0  ;;  %v1482_v33 = vsel %vm422_vm0, %v1477_v30, %v1481_v31 }
  0x83   : > { %715 = vmatpush1.bf16.msra.mxu1 %v2212_v35  ;;  %1357 = vmatpush1.bf16.msra.mxu0 %v2215_v36  ;;  %v1485_v35 = vor.u32 %v1483_v34, %v1481_v31 }
  0x84   : > { %889 = vmatprep.subr.bf16.mxu1 %v2220_v38  ;;  %1591 = vmatprep.subr.bf16.mxu0 %v2223_v43  ;;  %v2270_v38 = vld [vmem:[#allocation2 + $0x20] sm:$0xff]  }
  0x86   : > { %733 = vmatmul.mubr.bf16.vlgmr.msra.gmra.mrb[0].mxu1 %v2512_v42  ;;  %1375 = vmatmul.mubr.bf16.vlgmr.msra.gmra.mrb[0].mxu0 %v1933_v51  ;;  %v2238_v42 = vld [vmem:[#allocation3 + $0x134] ss:$8 sps:$4 sm:$0xff]   ;;  %v1495_v51 = vshll.u32 %v2270_v38, 16 }
  0x87   : > { %890 = vmatpush1.bf16.msra.mxu1 %v2218_v49  ;;  %1592 = vmatpush1.bf16.msra.mxu0 %v2221_v52  ;;  %v1491_v49 = vshrl.u32 %v2269_v32, 16 }
  0x88   : > { %891 = vmatprep.subr.bf16.mxu1 %v2226_v53  ;;  %1593 = vmatprep.subr.bf16.mxu0 %v2229_v56  ;;  %v1497_v40 = vrot.slane %v1495_v51, 1  ;;  %v1499_v53 = vshrl.u32 %v2270_v38, 16 }
  0x89   : > { %742 = vmatprep.mubr.bf16.mxu1 %v2364_v0  ;;  %1384 = vmatprep.mubr.bf16.mxu0 %v2364_v0 }
  0x8a   : > { %v1501_v41 = vor.u32 %v1499_v53, %v1497_v40 }
  0x8b   : > { %892 = vmatpush1.bf16.msra.mxu1 %v2224_v57  ;;  %1594 = vmatpush1.bf16.msra.mxu0 %v2227_v58 }
  0x8c   : > { %893 = vmatprep.subr.bf16.mxu1 %v2232_v61  ;;  %1595 = vmatprep.subr.bf16.mxu0 %v2235_v44 }
  0x8e   : > { %743 = vmatmul.mubr.bf16.gmra.mrb[4].mxu1 %v2520_v46  ;;  %1385 = vmatmul.mubr.bf16.gmra.mrb[4].mxu0 %v1934_v62  ;;  %v2245_v46 = vld [vmem:[#allocation3 + $0x2c0] ss:$8 sps:$4 sm:$0xff]  }
  0x8f   : > { %894 = vmatpush1.bf16.msra.mxu1 %v2230_v47  ;;  %1596 = vmatpush1.bf16.msra.mxu0 %v2233_v63 }
  0x90   : > { %895 = vmatprep.subr.bf16.mxu1 %v2238_v42  ;;  %1597 = vmatprep.subr.bf16.mxu0 %v2241_v1 }
  0x91   : > { %752 = vmatprep.mubr.bf16.mxu1 %v2364_v0  ;;  %1394 = vmatprep.mubr.bf16.mxu0 %v2364_v0 }
  0x93   : > { %896 = vmatpush1.bf16.msra.mxu1 %v2236_v2  ;;  %1598 = vmatpush1.bf16.msra.mxu0 %v2239_v3  ;;  %v1974_v3 = vld [vmem:[#allocation5] ss:$0 sm:$0xff] }
  0x94   : > { %897 = vmatprep.subr.bf16.mxu1 %v2244_v4  ;;  %1599 = vmatprep.subr.bf16.mxu0 %v2247_v5 }
  0x96   : > { %753 = vmatmul.mubr.bf16.gmra.mrb[8].mxu1 %v2539_v59  ;;  %1395 = vmatmul.mubr.bf16.gmra.mrb[8].mxu0 %v1935_v13  ;;  %v1936_v59 = vcombine.low %v2576_v55, %v1225_v14 }
  0x97   : > { %898 = vmatpush1.bf16.msra.mxu1 %v2242_v48  ;;  %1600 = vmatpush1.bf16.msra.mxu0 %v2245_v46 }
  0x98   : > { %899 = vmatprep.subr.bf16.mxu1 %v2250_v6  ;;  %1601 = vmatprep.subr.bf16.mxu0 %v2253_v9 }
  0x99   : > { %762 = vmatprep.mubr.bf16.mxu1 %v2364_v0  ;;  %1404 = vmatprep.mubr.bf16.mxu0 %v2364_v0 }
  0x9b   : > { %900 = vmatpush1.bf16.msra.mxu1 %v2248_v10  ;;  %1602 = vmatpush1.bf16.msra.mxu0 %v2251_v11 }
  0x9c   : > { %901 = vmatprep.subr.bf16.mxu1 %v2256_v12  ;;  %1603 = vmatprep.subr.bf16.mxu0 %v2259_v20 }
  0x9e   : > { %763 = vmatmul.mubr.bf16.gmra.mrb[12].mxu1 %v2564_v25  ;;  %1405 = vmatmul.mubr.bf16.gmra.mrb[12].mxu0 %v1936_v59  ;;  %v1487_v25 = vshll.u32 %v2269_v32, 16 }
  0x9f   : > { %902 = vmatpush1.bf16.msra.mxu1 %v2254_v37  ;;  %1604 = vmatpush1.bf16.msra.mxu0 %v2257_v17 }
  0xa0   : > { %903 = vmatprep.subr.bf16.mxu1 %v2262_v18  ;;  %1605 = vmatprep.subr.bf16.mxu0 %v2265_v27  ;;  %v1489_v36 = vrot.slane %v1487_v25, 1 }
  0xa1   : > { %921 = vmatprep.mubr.bf16.mxu1 %v2364_v0  ;;  %1623 = vmatprep.mubr.bf16.mxu0 %v2364_v0 }
  0xa2   : > { %v1490_v43 = vsel %vm422_vm0, %v1485_v35, %v1489_v36  ;;  %v1493_v39 = vor.u32 %v1491_v49, %v1489_v36 }
  0xa3   : > { %904 = vmatpush1.bf16.msra.mxu1 %v2260_v28  ;;  %1606 = vmatpush1.bf16.msra.mxu0 %v2263_v29 }
  0xa4   : > { %v1498_v52 = vsel %vm422_vm0, %v1493_v39, %v1497_v40 }
  0xa6   : > { %922 = vmatmul.mubr.bf16.vlgmr.msra.gmra.mrb[0].mxu1 %v1892_v45  ;;  %1624 = vmatmul.mubr.bf16.vlgmr.msra.gmra.mrb[0].mxu0 %v1482_v33  ;;  %v2271_v45 = vld [vmem:[#allocation2 + $0x28] ss:$0 sps:$4 sm:$0x11]  }
  0xa7   : > { %931 = vmatprep.mubr.bf16.mxu1 %v2364_v0  ;;  %1633 = vmatprep.mubr.bf16.mxu0 %v2364_v0  ;;  %v1503_v56 = vshll.u32 %v2271_v45, 16 }
  0xa9   : > { %v1505_v50 = vrot.slane %v1503_v56, 1 }
  0xae   : > { %932 = vmatmul.mubr.bf16.gmra.mrb[4].mxu1 %v1893_v8  ;;  %1634 = vmatmul.mubr.bf16.gmra.mrb[4].mxu0 %v1490_v43  ;;  %v1506_v8 = vsel %vm422_vm0, %v1501_v41, %v1505_v50 }
  0xaf   : > { %941 = vmatprep.mubr.bf16.mxu1 %v2364_v0  ;;  %1643 = vmatprep.mubr.bf16.mxu0 %v2364_v0 }
  0xb6   : > { %942 = vmatmul.mubr.bf16.gmra.mrb[8].mxu1 %v1894_v26  ;;  %1644 = vmatmul.mubr.bf16.gmra.mrb[8].mxu0 %v1498_v52 }
  0xb7   : > { %951 = vmatprep.mubr.bf16.mxu1 %v2364_v0  ;;  %1653 = vmatprep.mubr.bf16.mxu0 %v2364_v0 }
  0xbe   : > { %952 = vmatmul.mubr.bf16.gmra.mrb[12].mxu1 %v1895_v60  ;;  %1654 = vmatmul.mubr.bf16.gmra.mrb[12].mxu0 %v1506_v8 }
 0x179   : > { %v923_v57 = vpop.f32.mrb[0].mxu1  ;;  %v1625_v58 = vpop.f32.mrb[0].mxu0 }
 0x17a   : > { %v925_v61 = vpop.f32.mrb[1].mxu1  ;;  %v1980_v44 = vadd.f32 %v1625_v58, %v923_v57  ;;  %v1627_v54 = vpop.f32.mrb[1].mxu0 }
 0x17b   : > { %v927_v21 = vpop.f32.mrb[2].mxu1  ;;  %v1981_v26 = vadd.f32 %v1627_v54, %v925_v61  ;;  %v1629_v47 = vpop.f32.mrb[2].mxu0 }
 0x17c   : > { %v929_v62 = vpop.f32.mrb[3].mxu1  ;;  %v1982_v0 = vadd.f32 %v1629_v47, %v927_v21  ;;  %v1631_v63 = vpop.f32.mrb[3].mxu0 }
 0x17d   : > { %v1680_v42 = vmax.f32 %v1980_v44, %v1981_v26  ;;  %v1983_v1 = vadd.f32 %v1631_v63, %v929_v62 }
 0x17f   : > { %v1681_v2 = vmax.f32 %v1982_v0, %v1983_v1 }
 0x181   : > { %v933_v4 = vpop.f32.mrb[4].mxu1  ;;  %v1688_v22 = vmax.f32 %v1680_v42, %v1681_v2  ;;  %v1635_v55 = vpop.f32.mrb[4].mxu0 }
 0x182   : > { %v935_v60 = vpop.f32.mrb[5].mxu1  ;;  %v1984_v5 = vadd.f32 %v1635_v55, %v933_v4  ;;  %v1637_v48 = vpop.f32.mrb[5].mxu0 }
 0x183   : > { %v937_v13 = vpop.f32.mrb[6].mxu1  ;;  %v1699_v46 = vadd.f32 %v1974_v3, %v1688_v22  ;;  %v1985_v6 = vadd.f32 %v1637_v48, %v935_v60  ;;  %v1639_v7 = vpop.f32.mrb[6].mxu0 }
 0x184   : > { %v939_v9 = vpop.f32.mrb[7].mxu1  ;;  %v1986_v10 = vadd.f32 %v1639_v7, %v937_v13  ;;  %v1641_v11 = vpop.f32.mrb[7].mxu0 }
 0x185   : > { %v1703_v12 = vmax.f32 %v1699_v46, 0.0  ;;  %v1682_v14 = vmax.f32 %v1984_v5, %v1985_v6  ;;  %v1987_v15 = vadd.f32 %v1641_v11, %v939_v9 }
 0x187   : > { %v1707_v16 = vpack.c.bf16 %v1703_v12, %v1703_v12  ;;  %v1683_v20 = vmax.f32 %v1986_v10, %v1987_v15 }
 0x189   : > { %v943_v37 = vpop.f32.mrb[8].mxu1  ;;  %1711 = vst [vmem:[%s2638_s13] sm:$0x7] %v1707_v16  ;;  %v1689_v59 = vmax.f32 %v1682_v14, %v1683_v20  ;;  %v1645_v17 = vpop.f32.mrb[8].mxu0 }
 0x18a   : > { %v945_v18 = vpop.f32.mrb[9].mxu1  ;;  %v1988_v19 = vadd.f32 %v1645_v17, %v943_v37  ;;  %v1647_v23 = vpop.f32.mrb[9].mxu0 }
 0x18b   : > { %v947_v24 = vpop.f32.mrb[10].mxu1  ;;  %v1700_v27 = vadd.f32 %v1974_v3, %v1689_v59  ;;  %v1989_v28 = vadd.f32 %v1647_v23, %v945_v18  ;;  %v1649_v29 = vpop.f32.mrb[10].mxu0 }
 0x18c   : > { %v949_v30 = vpop.f32.mrb[11].mxu1  ;;  %v1990_v31 = vadd.f32 %v1649_v29, %v947_v24  ;;  %v1651_v32 = vpop.f32.mrb[11].mxu0 }
 0x18d   : > { %v1704_v33 = vmax.f32 %v1700_v27, 0.0  ;;  %v1684_v34 = vmax.f32 %v1988_v19, %v1989_v28  ;;  %v1991_v25 = vadd.f32 %v1651_v32, %v949_v30 }
 0x18f   : > { %v1708_v35 = vpack.c.bf16 %v1704_v33, %v1704_v33  ;;  %v1685_v36 = vmax.f32 %v1990_v31, %v1991_v25 }
 0x191   : > { %v953_v38 = vpop.f32.mrb[12].mxu1  ;;  %1712 = vst [vmem:[%s2638_s13 + $0x4] sm:$0x7] %v1708_v35  ;;  %v1690_v43 = vmax.f32 %v1684_v34, %v1685_v36  ;;  %v1655_v49 = vpop.f32.mrb[12].mxu0 }
 0x192   : > { %v955_v51 = vpop.f32.mrb[13].mxu1  ;;  %v1992_v39 = vadd.f32 %v1655_v49, %v953_v38  ;;  %v1657_v40 = vpop.f32.mrb[13].mxu0 }
 0x193   : > { %v957_v45 = vpop.f32.mrb[14].mxu1  ;;  %v1701_v52 = vadd.f32 %v1974_v3, %v1690_v43  ;;  %v1993_v53 = vadd.f32 %v1657_v40, %v955_v51  ;;  %v1659_v56 = vpop.f32.mrb[14].mxu0 }
 0x194   : > { %v959_v41 = vpop.f32.mrb[15].mxu1  ;;  %v1994_v50 = vadd.f32 %v1659_v56, %v957_v45  ;;  %v1661_v8 = vpop.f32.mrb[15].mxu0 }
 0x195   : > { %v1705_v57 = vmax.f32 %v1701_v52, 0.0  ;;  %v1686_v58 = vmax.f32 %v1992_v39, %v1993_v53  ;;  %v1995_v61 = vadd.f32 %v1661_v8, %v959_v41 }
 0x197   : > { %v1709_v44 = vpack.c.bf16 %v1705_v57, %v1705_v57  ;;  %v1687_v54 = vmax.f32 %v1994_v50, %v1995_v61 }
 0x199   : > { %1713 = vst [vmem:[%s2638_s13 + $0x8] sm:$0x7] %v1709_v44  ;;  %v1691_v21 = vmax.f32 %v1686_v58, %v1687_v54 }
 0x19b   : > { %v1702_v26 = vadd.f32 %v1974_v3, %v1691_v21 }
 0x19d   : > { %v1706_v47 = vmax.f32 %v1702_v26, 0.0 }
 0x19f   : > { %v1710_v62 = vpack.c.bf16 %v1706_v47, %v1706_v47 }
 0x1a1   : > { %1714 = vst [vmem:[%s2638_s13 + $0xc] sm:$0x7] %v1710_v62 }
 0x1a2 PF: > { %s16_s17 = sadd.s32 1, %s2358_s17   ;;  %s2666_s15 = smov %s2354_s16 }
 0x1a3   : > { %p13_p6 = scmp.ge.s32.totalorder %s16_s17, 4   ;;  %s2667_s16 = smov %s2669_s19 }
 0x1a5   :  { %15 = sbr.rel (!%p13_p6) target bundleno = 3 (0x3), region = 83 }
 0x1ac   :  { %1745 = vsyncpa [#allocation4], 1 }
 0x1ad   :  { %1747 = vsyncpa [#allocation4 + $0x1], 1 }
 0x1ae   :  { %1748 = vsyncpa [#allocation6], 1 }

// kernel: image_encoder_forward.6
= control target key start
LH: loop header
LB: loop body
LE: loop exit
PB: predicated region body
PF: predicated region fallthrough
CT: control target
= control target key end

     0   :  { %9 = vsyncpa [#allocation4], 0  ;;  %s5377_s0 = inlined_call_operand.vmem [shape: bf16[2,48,256], index: 0, kind: input, shape index: {}, may-alias: {0,1}]   ;;  %s5378_s1 = inlined_call_operand.vmem [shape: bf16[2,48,256], index: 1, kind: input, shape index: {}, may-alias: {0,1}]   ;;  %s5379_s2 = inlined_call_operand.hbm [shape: bf16[6,256,512], index: 2, kind: input, shape index: {}]   ;;  %s5380_s3 = inlined_call_operand.hbm [shape: f32[1,256], index: 3, kind: input, shape index: {}]   ;;  %s5381_s4 = inlined_call_operand.vmem [shape: bf16[2,2,3,256], index: 4, kind: output, shape index: {}]  }
   0x1   :  { %10 = vsyncpa [#allocation6], 0  ;;  %s5093_s15 = smov 0   ;;  %s5095_s16 = smov 0  }
   0x2   :  { %s5097_s17 = smov 0  }
   0x3 LB: > { %s3816_s18 = sadd.s32 4294967295, %s5060_s17   ;;  %s28_s19 = sadd.s32 1, %s5056_s16  ;;  %s5060_s17 = sphi %s5097_s17, %s16_s17   ;;  %s5056_s16 = sphi %s5095_s16, %s5395_s16   ;;  %s5052_s15 = sphi %s5093_s15, %s5394_s15  }
   0x4   : > { %p30_p0 = scmp.ge.s32.totalorder %s28_s19, 2  ;;  %p3818_p1 = scmp.ge.s32.totalorder %s5060_s17, 1 }
   0x5   : > { %p163_p2 = scmp.lt.s32.totalorder %s5060_s17, 3  ;;  %p5118_p4 = scmp.eq.s32.totalorder %s3816_s18, 0 }
   0x6   : > { %s5397_s19 = smov (%p30_p0, %s28_s19), 0  ;;  %s5062_s22 = smov [#allocation3]  }
   0x7   : > { %p5114_p3 = pnand %p3818_p1, %p163_p2  ;;  %s175_s23 = sshll.u32 %s5062_s22, 4  ;;  %s176_s23 = int_to_ptr.vmem [resolvable:$true] %s175_s23 }
   0x8   : > { %s5386_s21 = scalar_select %p5118_p4, 1, 0 }
   0x9   : > { %s5385_s20 = scalar_select %p5114_p3, 1, 0 }
   0xa   : > { %p4336_p5 = pneg %p5114_p3  ;;  %s5063_s25 = smov [#allocation5]  }
   0xb   : > { %s189_s26 = sshll.u32 %s5063_s25, 4  ;;  %s4974_s29 = scalar_lea.hbm %s5379_s2, 49152  ;;  %s5130_s26 = int_to_ptr.vmem [resolvable:$true] %s189_s26 }
   0xc   : > { %p5126_p6 = pnand %p5118_p4, %p4336_p5  ;;  %p4975_p7 = scmp.ne.s32.totalorder %s5379_s2, %s4974_s29 }
   0xd   : > { %p4981_p11 = scmp.lt.u32.totalorder %s4974_s29, %s5379_s2 }
   0xe   : > { %p4976_p8 = pneg %p5126_p6 }
  0x10   : > { %p4977_p9 = pnand %p4976_p8, %p4975_p7 }
  0x12   : > { %p4978_p10 = pneg %p4977_p9 }
  0x14   : > { %p4983_p12 = pnand %p4981_p11, %p4978_p10 }
  0x16   : > { %4986 = shalt.err (!%p4983_p12)
}
  0x17   : > { %s4987_s8 = scalar_lea.vmem %s176_s23, 49152  ;;  %p4995_p2 = scmp.lt.s32.totalorder %s176_s23, %s176_s23 }
  0x18   : > { %p4988_p13 = scmp.ne.s32.totalorder %s176_s23, %s4987_s8  ;;  %p4996_p5 = scmp.lt.s32.totalorder %s4987_s8, %s4987_s8 }
  0x1a   : > { %p4990_p0 = pnand %p4988_p13, %p4976_p8  ;;  %p4997_p4 = por %p4996_p5, %p4995_p2 }
  0x1c   : > { %p4991_p1 = pneg %p4990_p0 }
  0x1e   : > { %p4998_p3 = pnand %p4997_p4, %p4991_p1 }
  0x20   : > { %5001 = shalt.err (!%p4998_p3)
}
  0x21   : > { %s5064_s9 = smov 256   ;;  %s5065_s10 = smov 16  }
  0x22   : > { %4339 = dma.hbm_to_vmem [thread:$0]  (!%p5126_p6), %s5379_s2, 49152, %s176_s23, [#allocation4], %s5064_s9, %s5064_s9, %s5065_s10  }
  0x23   : > { %s5002_s18 = scalar_lea.hbm %s5380_s3, 32 }
  0x24   : > { %p5003_p7 = scmp.ne.s32.totalorder %s5380_s3, %s5002_s18  ;;  %p5009_p9 = scmp.lt.u32.totalorder %s5002_s18, %s5380_s3 }
  0x26   : > { %p5005_p3 = pnand %p5003_p7, %p4976_p8 }
  0x28   : > { %p5006_p4 = pneg %p5005_p3 }
  0x2a   : > { %p5011_p10 = pnand %p5009_p9, %p5006_p4 }
  0x2c   : > { %5014 = shalt.err (!%p5011_p10)
}
  0x2d   : > { %s5015_s23 = scalar_lea.vmem %s5130_s26, 32  ;;  %p5023_p0 = scmp.lt.s32.totalorder %s5130_s26, %s5130_s26 }
  0x2e   : > { %p5016_p11 = scmp.ne.s32.totalorder %s5130_s26, %s5015_s23  ;;  %p5024_p1 = scmp.lt.s32.totalorder %s5015_s23, %s5015_s23 }
  0x30   : > { %p5018_p12 = pnand %p5016_p11, %p4976_p8  ;;  %p5025_p2 = por %p5024_p1, %p5023_p0 }
  0x32   : > { %p5019_p13 = pneg %p5018_p12 }
  0x34   : > { %p5026_p5 = pnand %p5025_p2, %p5019_p13 }
  0x36   : > { %5029 = shalt.err (!%p5026_p5)
}
  0x37   : > { %4342 = dma.hbm_to_vmem [thread:$0]  (!%p5126_p6), %s5380_s3, 32, %s5130_s26, [#allocation6]  }
  0x38   : > { %p5388_p7 = scmp.ne.s32.totalorder %s5385_s20, 0 }
  0x39   : > { %p5389_p3 = scmp.ne.s32.totalorder (!%p5388_p7), %s5386_s21, 0 }
  0x3a   : > { %244 = sbr.rel (%p5388_p7) target bundleno = 691 (0x2b3), region = 36 }
  0x41   : > { %5043 = dma.done.wait (%p5389_p3), [#allocation4], 49152  }
  0x42   : > { %5045 = vsyncadd (%p5389_p3), [#allocation4], 4294918144 }
  0x43   : > { %5047 = dma.done.wait (%p5389_p3), [#allocation6], 32  }
  0x44   : > { %5049 = vsyncadd (%p5389_p3), [#allocation6], 4294967264  ;;  %p307_p8 = scmp.lt.s32.totalorder %s5052_s15, 1  ;;  %v4378_v0 = vld [vmem:[#allocation3 + $0x204] ss:$16 sps:$4 sm:$0xff]   ;;  %vm3664_vm1 = vcmask 1041408  }
  0x45   : > { %v4380_v1 = vld [vmem:[#allocation3 + $0x20c] ss:$16 sps:$4 sm:$0xff]   ;;  %882 = vmatprep.subr.bf16.mxu0 %v4378_v0  ;;  %v4382_v2 = vld [vmem:[#allocation3 + $0x200] ss:$16 sps:$4 sm:$0xff]   ;;  %v4383_v3 = vld [vmem:[#allocation3 + $0x208] ss:$16 sps:$4 sm:$0xff]  }
  0x46   : > { %s5399_s15 = smov (!%p307_p8, %s5052_s15), 1  ;;  %935 = vmatprep.subr.bf16.mxu1 %v4380_v1  ;;  %v4384_v4 = vld [vmem:[#allocation3 + $0x224] ss:$16 sps:$4 sm:$0xff]   ;;  %883 = vmatpush1.bf16.msra.mxu0 %v4382_v2  ;;  %v4386_v5 = vld [vmem:[#allocation3 + $0x22c] ss:$16 sps:$4 sm:$0xff]   ;;  %vm3667_vm3 = vcmask 1043458  }
  0x47   : > { %936 = vmatpush1.bf16.msra.mxu1 %v4383_v3  ;;  %v4388_v6 = vld [vmem:[#allocation3 + $0x220] ss:$16 sps:$4 sm:$0xff]   ;;  %884 = vmatprep.subr.bf16.mxu0 %v4384_v4  ;;  %v4389_v7 = vld [vmem:[#allocation3 + $0x228] ss:$16 sps:$4 sm:$0xff]   ;;  %v4390_v8 = vld [vmem:[#allocation3 + $0x244] ss:$16 sps:$4 sm:$0xff]  }
  0x48   : > { %937 = vmatprep.subr.bf16.mxu1 %v4386_v5  ;;  %v4392_v9 = vld [vmem:[#allocation3 + $0x24c] ss:$16 sps:$4 sm:$0xff]   ;;  %v4394_v10 = vld [vmem:[#allocation3 + $0x240] ss:$16 sps:$4 sm:$0xff]   ;;  %v4395_v11 = vld [vmem:[#allocation3 + $0x248] ss:$16 sps:$4 sm:$0xff]  }
  0x49   : > { %v4396_v12 = vld [vmem:[#allocation3 + $0x264] ss:$16 sps:$4 sm:$0xff]   ;;  %v4398_v13 = vld [vmem:[#allocation3 + $0x26c] ss:$16 sps:$4 sm:$0xff]   ;;  %v4400_v14 = vld [vmem:[#allocation3 + $0x260] ss:$16 sps:$4 sm:$0xff]  }
  0x4a   : > { %885 = vmatpush1.bf16.msra.mxu0 %v4388_v6  ;;  %v4401_v15 = vld [vmem:[#allocation3 + $0x268] ss:$16 sps:$4 sm:$0xff]   ;;  %v4402_v16 = vld [vmem:[#allocation3 + $0x284] ss:$16 sps:$4 sm:$0xff]   ;;  %v4404_v17 = vld [vmem:[#allocation3 + $0x28c] ss:$16 sps:$4 sm:$0xff]  }
  0x4b   : > { %938 = vmatpush1.bf16.msra.mxu1 %v4389_v7  ;;  %886 = vmatprep.subr.bf16.mxu0 %v4390_v8  ;;  %v4406_v18 = vld [vmem:[#allocation3 + $0x280] ss:$16 sps:$4 sm:$0xff]   ;;  %v4407_v19 = vld [vmem:[#allocation3 + $0x288] ss:$16 sps:$4 sm:$0xff]   ;;  %v4408_v20 = vld [vmem:[#allocation3 + $0x2a4] ss:$16 sps:$4 sm:$0xff]  }
  0x4c   : > { %939 = vmatprep.subr.bf16.mxu1 %v4392_v9  ;;  %v4410_v21 = vld [vmem:[#allocation3 + $0x2ac] ss:$16 sps:$4 sm:$0xff]   ;;  %v4412_v22 = vld [vmem:[#allocation3 + $0x2a0] ss:$16 sps:$4 sm:$0xff]   ;;  %v4413_v23 = vld [vmem:[#allocation3 + $0x2a8] ss:$16 sps:$4 sm:$0xff]  }
  0x4d   : > { %v4414_v24 = vld [vmem:[#allocation3 + $0x2c4] ss:$16 sps:$4 sm:$0xff]   ;;  %v4416_v25 = vld [vmem:[#allocation3 + $0x2cc] ss:$16 sps:$4 sm:$0xff]   ;;  %v4418_v26 = vld [vmem:[#allocation3 + $0x2c0] ss:$16 sps:$4 sm:$0xff]  }
  0x4e   : > { %887 = vmatpush1.bf16.msra.mxu0 %v4394_v10  ;;  %v4419_v27 = vld [vmem:[#allocation3 + $0x2c8] ss:$16 sps:$4 sm:$0xff]   ;;  %v4420_v28 = vld [vmem:[#allocation3 + $0x2e4] ss:$16 sps:$4 sm:$0xff]   ;;  %v4422_v29 = vld [vmem:[#allocation3 + $0x2ec] ss:$16 sps:$4 sm:$0xff]  }
  0x4f   : > { %940 = vmatpush1.bf16.msra.mxu1 %v4395_v11  ;;  %888 = vmatprep.subr.bf16.mxu0 %v4396_v12  ;;  %v4424_v30 = vld [vmem:[#allocation3 + $0x2e0] ss:$16 sps:$4 sm:$0xff]   ;;  %v4425_v31 = vld [vmem:[#allocation3 + $0x2e8] ss:$16 sps:$4 sm:$0xff]   ;;  %v4426_v32 = vld [vmem:[#allocation3 + $0x304] ss:$16 sps:$4 sm:$0xff]  }
  0x50   : > { %941 = vmatprep.subr.bf16.mxu1 %v4398_v13  ;;  %v4428_v33 = vld [vmem:[#allocation3 + $0x30c] ss:$16 sps:$4 sm:$0xff]   ;;  %v4430_v34 = vld [vmem:[#allocation3 + $0x300] ss:$16 sps:$4 sm:$0xff]   ;;  %v4431_v35 = vld [vmem:[#allocation3 + $0x308] ss:$16 sps:$4 sm:$0xff]  }
  0x51   : > { %v4432_v36 = vld [vmem:[#allocation3 + $0x324] ss:$16 sps:$4 sm:$0xff]   ;;  %v4434_v37 = vld [vmem:[#allocation3 + $0x32c] ss:$16 sps:$4 sm:$0xff]   ;;  %v4436_v38 = vld [vmem:[#allocation3 + $0x320] ss:$16 sps:$4 sm:$0xff]  }
  0x52   : > { %889 = vmatpush1.bf16.msra.mxu0 %v4400_v14  ;;  %s4326_s20 = smul.u32 48, %s5399_s15  ;;  %v4437_v39 = vld [vmem:[#allocation3 + $0x328] ss:$16 sps:$4 sm:$0xff]   ;;  %v4438_v40 = vld [vmem:[#allocation3 + $0x344] ss:$16 sps:$4 sm:$0xff]   ;;  %s4245_s9 = sshll.u32 %s5399_s15, 3 }
  0x53   : > { %942 = vmatpush1.bf16.msra.mxu1 %v4401_v15  ;;  %890 = vmatprep.subr.bf16.mxu0 %v4402_v16  ;;  %v4440_v41 = vld [vmem:[#allocation3 + $0x34c] ss:$16 sps:$4 sm:$0xff]   ;;  %v4442_v42 = vld [vmem:[#allocation3 + $0x340] ss:$16 sps:$4 sm:$0xff]   ;;  %v4443_v43 = vld [vmem:[#allocation3 + $0x348] ss:$16 sps:$4 sm:$0xff]   ;;  %s346_s12 = scalar_lea.vmem %s5381_s4, %s4245_s9 }
  0x54   : > { %943 = vmatprep.subr.bf16.mxu1 %v4404_v17  ;;  %s315_s26 = scalar_lea.vmem %s5377_s0, %s4326_s20  ;;  %v4444_v44 = vld [vmem:[#allocation3 + $0x364] ss:$16 sps:$4 sm:$0xff]   ;;  %v4446_v45 = vld [vmem:[#allocation3 + $0x36c] ss:$16 sps:$4 sm:$0xff]   ;;  %v4448_v46 = vld [vmem:[#allocation3 + $0x360] ss:$16 sps:$4 sm:$0xff]  }
  0x55   : > { %v4449_v47 = vld [vmem:[#allocation3 + $0x368] ss:$16 sps:$4 sm:$0xff]   ;;  %v5199_v49 = vld [vmem:[%s315_s26 + $0x8] sm:$0xff]  ;;  %v352_v51 = vld [vmem:[%s315_s26 + $0x18] sm:$0xff]  ;;  %vm517_vm0 = vsmask.f32 7424 }
  0x56   : > { %891 = vmatpush1.bf16.msra.mxu0 %v4406_v18  ;;  %v349_v48 = vld [vmem:[%s315_s26] sm:$0xff]  ;;  %v5201_v50 = vld [vmem:[%s315_s26 + $0x10] sm:$0xff]  ;;  %v4450_v52 = vld [vmem:[#allocation3 + $0x384] ss:$16 sps:$4 sm:$0xff]   ;;  %354 = vst [vmem:[#allocation2 + $0x8] sm:$0xff] %v5199_v49  ;;  %s4244_s5 = sadd.s32 32, %s4326_s20 }
  0x57   : > { %944 = vmatpush1.bf16.msra.mxu1 %v4407_v19  ;;  %892 = vmatprep.subr.bf16.mxu0 %v4408_v20  ;;  %355 = vst [vmem:[#allocation2 + $0x10] sm:$0xff] %v5201_v50  ;;  %356 = vst [vmem:[#allocation2 + $0x18] sm:$0xff] %v352_v51  ;;  %v5206_v53 = vcombine.high %v349_v48, %v5199_v49  ;;  %v5209_v54 = vcombine.high %v5201_v50, %v352_v51  ;;  %v4452_v55 = vld [vmem:[#allocation3 + $0x38c] ss:$16 sps:$4 sm:$0xff]   ;;  %v4454_v59 = vld [vmem:[#allocation3 + $0x380] ss:$16 sps:$4 sm:$0xff]   ;;  %s5244_s8 = scalar_lea.vmem %s5378_s1, %s4244_s5 }
  0x58   : > { %945 = vmatprep.subr.bf16.mxu1 %v4410_v21  ;;  %v4455_v60 = vld [vmem:[#allocation3 + $0x388] ss:$16 sps:$4 sm:$0xff]   ;;  %v4456_v61 = vld [vmem:[#allocation3 + $0x3a4] ss:$16 sps:$4 sm:$0xff]   ;;  %v5217_v0 = vcombine.low %v349_v48, %v5199_v49  ;;  %v4458_v1 = vld [vmem:[#allocation3 + $0x3ac] ss:$16 sps:$4 sm:$0xff]   ;;  %v5222_v7 = vcombine.low %v5201_v50, %v352_v51 }
  0x59   : > { %v531_v56 = vshrl.u32 %v5206_v53, 16  ;;  %v533_v57 = vshll.u32 %v5206_v53, 16  ;;  %v538_v58 = vshll.u32 %v5209_v54, 16  ;;  %v4460_v3 = vld [vmem:[#allocation3 + $0x3a0] ss:$16 sps:$4 sm:$0xff]  }
  0x5a   : > { %893 = vmatpush1.bf16.msra.mxu0 %v4412_v22  ;;  %v4461_v4 = vld [vmem:[#allocation3 + $0x3a8] ss:$16 sps:$4 sm:$0xff]   ;;  %v4462_v5 = vld [vmem:[#allocation3 + $0x3c4] ss:$16 sps:$4 sm:$0xff]   ;;  %v521_v8 = vshll.u32 %v5217_v0, 16  ;;  %v519_v13 = vshrl.u32 %v5217_v0, 16 }
  0x5b   : > { %946 = vmatpush1.bf16.msra.mxu1 %v4413_v23  ;;  %894 = vmatprep.subr.bf16.mxu0 %v4414_v24  ;;  %v535_v62 = vrot.slane %v533_v57, 1  ;;  %v5214_v63 = vrot.slane %v538_v58, 1  ;;  %v4464_v9 = vld [vmem:[#allocation3 + $0x3cc] ss:$16 sps:$4 sm:$0xff]   ;;  %v4466_v10 = vld [vmem:[#allocation3 + $0x3c0] ss:$16 sps:$4 sm:$0xff]  }
  0x5c   : > { %947 = vmatprep.subr.bf16.mxu1 %v4416_v25  ;;  %v4467_v11 = vld [vmem:[#allocation3 + $0x3c8] ss:$16 sps:$4 sm:$0xff]   ;;  %v4468_v12 = vld [vmem:[#allocation3 + $0x3e4] ss:$16 sps:$4 sm:$0xff]   ;;  %v523_v14 = vrot.slane %v521_v8, 1  ;;  %v526_v15 = vshll.u32 %v5222_v7, 16 }
  0x5d   : > { %v536_v2 = vor.u32 %v535_v62, %v531_v56  ;;  %v4470_v16 = vld [vmem:[#allocation3 + $0x3ec] ss:$16 sps:$4 sm:$0xff]   ;;  %v4472_v17 = vld [vmem:[#allocation3 + $0x3e0] ss:$16 sps:$4 sm:$0xff]   ;;  %v4473_v18 = vld [vmem:[#allocation3 + $0x3e8] ss:$16 sps:$4 sm:$0xff]  }
  0x5e   : > { %895 = vmatpush1.bf16.msra.mxu0 %v4418_v26  ;;  %v4478_v19 = vld [vmem:[#allocation3 + $0x4] ss:$16 sps:$4 sm:$0xff]   ;;  %v524_v20 = vor.u32 %v523_v14, %v519_v13  ;;  %v5227_v21 = vrot.slane %v526_v15, 1  ;;  %v4481_v22 = vld [vmem:[#allocation3 + $0xc] ss:$16 sps:$4 sm:$0xff]   ;;  %v550_v57 = vshrl.u32 %v5209_v54, 16 }
  0x5f   : > { %948 = vmatpush1.bf16.msra.mxu1 %v4419_v27  ;;  %896 = vmatprep.subr.bf16.mxu0 %v4420_v28  ;;  %v541_v6 = vsel %vm517_vm0, %v536_v2, %v5214_v63  ;;  %v4476_v23 = vld [vmem:[#allocation3] ss:$16 sps:$4 sm:$0xff]   ;;  %v4479_v24 = vld [vmem:[#allocation3 + $0x8] ss:$16 sps:$4 sm:$0xff]   ;;  %v4486_v26 = vld [vmem:[#allocation3 + $0x24] ss:$16 sps:$4 sm:$0xff]   ;;  %v5233_v27 = vcombine.high %v5199_v49, %v5201_v50 }
  0x60   : > { %949 = vmatprep.subr.bf16.mxu1 %v4422_v29  ;;  %914 = vmatprep.mubr.bf16.mxu0 %v541_v6  ;;  %v529_v25 = vsel %vm517_vm0, %v524_v20, %v5227_v21  ;;  %v4489_v28 = vld [vmem:[#allocation3 + $0x2c] ss:$16 sps:$4 sm:$0xff]   ;;  %v5237_v29 = vcombine.low %v5199_v49, %v5201_v50  ;;  %v4511_v48 = vld [vmem:[#allocation3 + $0xa8] ss:$16 sps:$4 sm:$0xff]   ;;  %v4516_v49 = vld [vmem:[#allocation3 + $0xc4] ss:$16 sps:$4 sm:$0xff]  }
  0x61   : > { %967 = vmatprep.mubr.bf16.mxu1 %v541_v6  ;;  %v4519_v50 = vld [vmem:[#allocation3 + $0xcc] ss:$16 sps:$4 sm:$0xff]   ;;  %v4514_v51 = vld [vmem:[#allocation3 + $0xc0] ss:$16 sps:$4 sm:$0xff]   ;;  %v542_v58 = vshrl.u32 %v5222_v7, 16 }
  0x62   : > { %897 = vmatpush1.bf16.msra.mxu0 %v4424_v30  ;;  %v4484_v30 = vld [vmem:[#allocation3 + $0x20] ss:$16 sps:$4 sm:$0xff]   ;;  %v4525_v56 = vld [vmem:[#allocation3 + $0xec] ss:$16 sps:$4 sm:$0xff]   ;;  %v4528_v2 = vld [vmem:[#allocation3 + $0x104] ss:$16 sps:$4 sm:$0xff]  }
  0x63   : > { %950 = vmatpush1.bf16.msra.mxu1 %v4425_v31  ;;  %898 = vmatprep.subr.bf16.mxu0 %v4426_v32  ;;  %v4487_v31 = vld [vmem:[#allocation3 + $0x28] ss:$16 sps:$4 sm:$0xff]   ;;  %v4492_v32 = vld [vmem:[#allocation3 + $0x44] ss:$16 sps:$4 sm:$0xff]   ;;  %v544_v6 = vor.u32 %v542_v58, %v5227_v21  ;;  %v4537_v14 = vld [vmem:[#allocation3 + $0x12c] ss:$16 sps:$4 sm:$0xff]  }
  0x64   : > { %951 = vmatprep.subr.bf16.mxu1 %v4428_v33  ;;  %v4495_v33 = vld [vmem:[#allocation3 + $0x4c] ss:$16 sps:$4 sm:$0xff]   ;;  %v4534_v13 = vld [vmem:[#allocation3 + $0x124] ss:$16 sps:$4 sm:$0xff]   ;;  %v4538_v20 = vld [vmem:[#allocation3 + $0x140] ss:$16 sps:$4 sm:$0xff]  }
  0x65   : > { %v4541_v21 = vld [vmem:[#allocation3 + $0x148] ss:$16 sps:$4 sm:$0xff]   ;;  %v4596_v58 = vld [vmem:[#allocation3 + $0x464] ss:$16 sps:$4 sm:$0xff]   ;;  %vm3665_vm2 = vsmask.f32 1280 }
  0x66   : > { %899 = vmatpush1.bf16.msra.mxu0 %v4430_v34  ;;  %v4490_v34 = vld [vmem:[#allocation3 + $0x40] ss:$16 sps:$4 sm:$0xff]   ;;  %vm3668_vm4 = vsmask.f32 3328  ;;  %vm5353_vm5 = vmand %vm3664_vm1, %vm3665_vm2 }
  0x67   : > { %952 = vmatpush1.bf16.msra.mxu1 %v4431_v35  ;;  %900 = vmatprep.subr.bf16.mxu0 %v4432_v36  ;;  %v4493_v35 = vld [vmem:[#allocation3 + $0x48] ss:$16 sps:$4 sm:$0xff]   ;;  %v4498_v36 = vld [vmem:[#allocation3 + $0x64] ss:$16 sps:$4 sm:$0xff]   ;;  %vm5360_vm6 = vmand %vm3667_vm3, %vm3668_vm4 }
  0x68   : > { %953 = vmatprep.subr.bf16.mxu1 %v4434_v37  ;;  %v4501_v37 = vld [vmem:[#allocation3 + $0x6c] ss:$16 sps:$4 sm:$0xff]   ;;  %vm3670_vm7 = vmor %vm5360_vm6, %vm5353_vm5 }
  0x6a   : > { %901 = vmatpush1.bf16.msra.mxu0 %v4436_v38  ;;  %v4496_v38 = vld [vmem:[#allocation3 + $0x60] ss:$16 sps:$4 sm:$0xff]  }
  0x6b   : > { %954 = vmatpush1.bf16.msra.mxu1 %v4437_v39  ;;  %902 = vmatprep.subr.bf16.mxu0 %v4438_v40  ;;  %v4499_v39 = vld [vmem:[#allocation3 + $0x68] ss:$16 sps:$4 sm:$0xff]   ;;  %v4504_v40 = vld [vmem:[#allocation3 + $0x84] ss:$16 sps:$4 sm:$0xff]  }
  0x6c   : > { %955 = vmatprep.subr.bf16.mxu1 %v4440_v41  ;;  %v4507_v41 = vld [vmem:[#allocation3 + $0x8c] ss:$16 sps:$4 sm:$0xff]  }
  0x6e   : > { %903 = vmatpush1.bf16.msra.mxu0 %v4442_v42  ;;  %v4502_v42 = vld [vmem:[#allocation3 + $0x80] ss:$16 sps:$4 sm:$0xff]  }
  0x6f   : > { %956 = vmatpush1.bf16.msra.mxu1 %v4443_v43  ;;  %904 = vmatprep.subr.bf16.mxu0 %v4444_v44  ;;  %v4505_v43 = vld [vmem:[#allocation3 + $0x88] ss:$16 sps:$4 sm:$0xff]   ;;  %v4510_v44 = vld [vmem:[#allocation3 + $0xa4] ss:$16 sps:$4 sm:$0xff]  }
  0x70   : > { %957 = vmatprep.subr.bf16.mxu1 %v4446_v45  ;;  %v4513_v45 = vld [vmem:[#allocation3 + $0xac] ss:$16 sps:$4 sm:$0xff]  }
  0x72   : > { %905 = vmatpush1.bf16.msra.mxu0 %v4448_v46  ;;  %v5247_v46 = vld [vmem:[%s5244_s8] sm:$0xff] }
  0x73   : > { %958 = vmatpush1.bf16.msra.mxu1 %v4449_v47  ;;  %906 = vmatprep.subr.bf16.mxu0 %v4450_v52  ;;  %v4508_v47 = vld [vmem:[#allocation3 + $0xa0] ss:$16 sps:$4 sm:$0xff]   ;;  %359 = vst [vmem:[#allocation2 + $0x20] sm:$0xff] %v5247_v46  ;;  %v4517_v52 = vld [vmem:[#allocation3 + $0xc8] ss:$16 sps:$4 sm:$0xff]  }
  0x74   : > { %959 = vmatprep.subr.bf16.mxu1 %v4452_v55  ;;  %v4522_v55 = vld [vmem:[#allocation3 + $0xe4] ss:$16 sps:$4 sm:$0xff]  }
  0x76   : > { %907 = vmatpush1.bf16.msra.mxu0 %v4454_v59 }
  0x77   : > { %960 = vmatpush1.bf16.msra.mxu1 %v4455_v60  ;;  %908 = vmatprep.subr.bf16.mxu0 %v4456_v61  ;;  %v4520_v60 = vld [vmem:[#allocation3 + $0xe0] ss:$16 sps:$4 sm:$0xff]  }
  0x78   : > { %961 = vmatprep.subr.bf16.mxu1 %v4458_v1  ;;  %v4523_v1 = vld [vmem:[#allocation3 + $0xe8] ss:$16 sps:$4 sm:$0xff]  }
  0x7a   : > { %909 = vmatpush1.bf16.msra.mxu0 %v4460_v3  ;;  %v366_v59 = vld [vmem:[#allocation2 + $0x20] sm:$0x11] }
  0x7b   : > { %962 = vmatpush1.bf16.msra.mxu1 %v4461_v4  ;;  %910 = vmatprep.subr.bf16.mxu0 %v4462_v5  ;;  %v3834_v61 = vcombine.high %v366_v59, %v366_v59  ;;  %v3833_v62 = vcombine.low %v366_v59, %v366_v59  ;;  %v4531_v3 = vld [vmem:[#allocation3 + $0x10c] ss:$16 sps:$4 sm:$0xff]   ;;  %v552_v4 = vor.u32 %v550_v57, %v5214_v63  ;;  %v4532_v63 = vld [vmem:[#allocation3 + $0x120] ss:$16 sps:$4 sm:$0xff]   ;;  %v4591_v57 = vld [vmem:[#allocation3 + $0x448] ss:$16 sps:$4 sm:$0xff]  }
  0x7c   : > { %963 = vmatprep.subr.bf16.mxu1 %v4464_v9  ;;  %v4594_v59 = vld [vmem:[#allocation3 + $0x460] ss:$16 sps:$4 sm:$0xff]  }
  0x7d   : > { %v554_v5 = vshll.u32 %v3834_v61, 16  ;;  %v546_v8 = vshll.u32 %v3833_v62, 16  ;;  %v4602_v61 = vld [vmem:[#allocation3 + $0x484] ss:$16 sps:$4 sm:$0xff]   ;;  %v4600_v62 = vld [vmem:[#allocation3 + $0x480] ss:$16 sps:$4 sm:$0xff]  }
  0x7e   : > { %911 = vmatpush1.bf16.msra.mxu0 %v4466_v10 }
  0x7f   : > { %964 = vmatpush1.bf16.msra.mxu1 %v4467_v11  ;;  %912 = vmatprep.subr.bf16.mxu0 %v4468_v12  ;;  %v556_v9 = vrot.slane %v554_v5, 1  ;;  %v548_v10 = vrot.slane %v546_v8, 1  ;;  %v4526_v11 = vld [vmem:[#allocation3 + $0x100] ss:$16 sps:$4 sm:$0xff]   ;;  %v4529_v12 = vld [vmem:[#allocation3 + $0x108] ss:$16 sps:$4 sm:$0xff]  }
  0x80   : > { %965 = vmatprep.subr.bf16.mxu1 %v4470_v16  ;;  %v4614_v5 = vld [vmem:[#allocation3 + $0x4c4] ss:$16 sps:$4 sm:$0xff]   ;;  %v4612_v8 = vld [vmem:[#allocation3 + $0x4c0] ss:$16 sps:$4 sm:$0xff]  }
  0x81   : > { %v557_v15 = vsel %vm517_vm0, %v552_v4, %v556_v9  ;;  %v549_v16 = vsel %vm517_vm0, %v544_v6, %v548_v10  ;;  %v4609_v4 = vld [vmem:[#allocation3 + $0x4a8] ss:$16 sps:$4 sm:$0xff]   ;;  %v4617_v6 = vld [vmem:[#allocation3 + $0x4cc] ss:$16 sps:$4 sm:$0xff]   ;;  %v4620_v9 = vld [vmem:[#allocation3 + $0x4e4] ss:$16 sps:$4 sm:$0xff]  }
  0x82   : > { %913 = vmatpush1.bf16.msra.mxu0 %v4472_v17  ;;  %v4535_v17 = vld [vmem:[#allocation3 + $0x128] ss:$16 sps:$4 sm:$0xff]   ;;  %v4623_v10 = vld [vmem:[#allocation3 + $0x4ec] ss:$16 sps:$4 sm:$0xff]  }
  0x83   : > { %966 = vmatpush1.bf16.msra.mxu1 %v4473_v18  ;;  %1312 = vmatprep.subr.bf16.mxu0 %v4478_v19  ;;  %v4540_v18 = vld [vmem:[#allocation3 + $0x144] ss:$16 sps:$4 sm:$0xff]   ;;  %v4543_v19 = vld [vmem:[#allocation3 + $0x14c] ss:$16 sps:$4 sm:$0xff]  }
  0x84   : > { %1365 = vmatprep.subr.bf16.mxu1 %v4481_v22  ;;  %v4546_v22 = vld [vmem:[#allocation3 + $0x164] ss:$16 sps:$4 sm:$0xff]  }
  0x85   : > { %915 = vmatmul.mubr.bf16.vlgmr.msra.gmra.mrb[0].mxu0 %v529_v25 }
  0x86   : > { %968 = vmatmul.mubr.bf16.vlgmr.msra.gmra.mrb[0].mxu1 %v529_v25  ;;  %1313 = vmatpush1.bf16.msra.mxu0 %v4476_v23  ;;  %v4549_v23 = vld [vmem:[#allocation3 + $0x16c] ss:$16 sps:$4 sm:$0xff]   ;;  %v4547_v25 = vld [vmem:[#allocation3 + $0x168] ss:$16 sps:$4 sm:$0xff]  }
  0x87   : > { %1366 = vmatpush1.bf16.msra.mxu1 %v4479_v24  ;;  %1314 = vmatprep.subr.bf16.mxu0 %v4486_v26  ;;  %v4544_v24 = vld [vmem:[#allocation3 + $0x160] ss:$16 sps:$4 sm:$0xff]   ;;  %v4552_v26 = vld [vmem:[#allocation3 + $0x184] ss:$16 sps:$4 sm:$0xff]  }
  0x88   : > { %1367 = vmatprep.subr.bf16.mxu1 %v4489_v28  ;;  %924 = vmatprep.mubr.bf16.mxu0 %v557_v15  ;;  %v4555_v28 = vld [vmem:[#allocation3 + $0x18c] ss:$16 sps:$4 sm:$0xff]  }
  0x89   : > { %977 = vmatprep.mubr.bf16.mxu1 %v557_v15  ;;  %v4624_v15 = vld [vmem:[#allocation3 + $0x500] ss:$16 sps:$4 sm:$0xff]  }
  0x8a   : > { %1315 = vmatpush1.bf16.msra.mxu0 %v4484_v30  ;;  %v4550_v30 = vld [vmem:[#allocation3 + $0x180] ss:$16 sps:$4 sm:$0xff]  }
  0x8b   : > { %1368 = vmatpush1.bf16.msra.mxu1 %v4487_v31  ;;  %1316 = vmatprep.subr.bf16.mxu0 %v4492_v32  ;;  %v4558_v31 = vld [vmem:[#allocation3 + $0x1a4] ss:$16 sps:$4 sm:$0xff]   ;;  %v4561_v32 = vld [vmem:[#allocation3 + $0x1ac] ss:$16 sps:$4 sm:$0xff]  }
  0x8c   : > { %1369 = vmatprep.subr.bf16.mxu1 %v4495_v33  ;;  %v4556_v33 = vld [vmem:[#allocation3 + $0x1a0] ss:$16 sps:$4 sm:$0xff]  }
  0x8d   : > { %925 = vmatmul.mubr.bf16.gmra.mrb[4].mxu0 %v549_v16 }
  0x8e   : > { %1317 = vmatpush1.bf16.msra.mxu0 %v4490_v34  ;;  %978 = vmatmul.mubr.bf16.gmra.mrb[4].mxu1 %v549_v16  ;;  %v4559_v34 = vld [vmem:[#allocation3 + $0x1a8] ss:$16 sps:$4 sm:$0xff]  }
  0x8f   : > { %1370 = vmatpush1.bf16.msra.mxu1 %v4493_v35  ;;  %1318 = vmatprep.subr.bf16.mxu0 %v4498_v36  ;;  %v4565_v35 = vld [vmem:[#allocation3 + $0x1c4] ss:$16 sps:$4 sm:$0xff]   ;;  %v4568_v36 = vld [vmem:[#allocation3 + $0x1cc] ss:$16 sps:$4 sm:$0xff]   ;;  %v4627_v16 = vld [vmem:[#allocation3 + $0x508] ss:$16 sps:$4 sm:$0xff]  }
  0x90   : > { %1371 = vmatprep.subr.bf16.mxu1 %v4501_v37  ;;  %1344 = vmatprep.mubr.bf16.mxu0 %v5206_v53  ;;  %v4563_v37 = vld [vmem:[#allocation3 + $0x1c0] ss:$16 sps:$4 sm:$0xff]  }
  0x91   : > { %1397 = vmatprep.mubr.bf16.mxu1 %v5206_v53  ;;  %v4553_v53 = vld [vmem:[#allocation3 + $0x188] ss:$16 sps:$4 sm:$0xff]  }
  0x92   : > { %1319 = vmatpush1.bf16.msra.mxu0 %v4496_v38  ;;  %v4566_v38 = vld [vmem:[#allocation3 + $0x1c8] ss:$16 sps:$4 sm:$0xff]  }
  0x93   : > { %1372 = vmatpush1.bf16.msra.mxu1 %v4499_v39  ;;  %1320 = vmatprep.subr.bf16.mxu0 %v4504_v40  ;;  %v4572_v39 = vld [vmem:[#allocation3 + $0x1e4] ss:$16 sps:$4 sm:$0xff]   ;;  %v4575_v40 = vld [vmem:[#allocation3 + $0x1ec] ss:$16 sps:$4 sm:$0xff]  }
  0x94   : > { %1373 = vmatprep.subr.bf16.mxu1 %v4507_v41  ;;  %v4570_v41 = vld [vmem:[#allocation3 + $0x1e0] ss:$16 sps:$4 sm:$0xff]  }
  0x96   : > { %1321 = vmatpush1.bf16.msra.mxu0 %v4502_v42  ;;  %v4573_v42 = vld [vmem:[#allocation3 + $0x1e8] ss:$16 sps:$4 sm:$0xff]  }
  0x97   : > { %1374 = vmatpush1.bf16.msra.mxu1 %v4505_v43  ;;  %1322 = vmatprep.subr.bf16.mxu0 %v4510_v44  ;;  %v4578_v43 = vld [vmem:[#allocation3 + $0x404] ss:$16 sps:$4 sm:$0xff]   ;;  %v4581_v44 = vld [vmem:[#allocation3 + $0x40c] ss:$16 sps:$4 sm:$0xff]  }
  0x98   : > { %1375 = vmatprep.subr.bf16.mxu1 %v4513_v45  ;;  %v4576_v45 = vld [vmem:[#allocation3 + $0x400] ss:$16 sps:$4 sm:$0xff]  }
  0x9a   : > { %1323 = vmatpush1.bf16.msra.mxu0 %v4508_v47  ;;  %v4579_v47 = vld [vmem:[#allocation3 + $0x408] ss:$16 sps:$4 sm:$0xff]  }
  0x9b   : > { %1376 = vmatpush1.bf16.msra.mxu1 %v4511_v48  ;;  %1324 = vmatprep.subr.bf16.mxu0 %v4516_v49  ;;  %v4584_v48 = vld [vmem:[#allocation3 + $0x424] ss:$16 sps:$4 sm:$0xff]   ;;  %v4587_v49 = vld [vmem:[#allocation3 + $0x42c] ss:$16 sps:$4 sm:$0xff]  }
  0x9c   : > { %1377 = vmatprep.subr.bf16.mxu1 %v4519_v50  ;;  %v4582_v50 = vld [vmem:[#allocation3 + $0x420] ss:$16 sps:$4 sm:$0xff]  }
  0x9e   : > { %1325 = vmatpush1.bf16.msra.mxu0 %v4514_v51  ;;  %v4585_v51 = vld [vmem:[#allocation3 + $0x428] ss:$16 sps:$4 sm:$0xff]  }
  0x9f   : > { %1378 = vmatpush1.bf16.msra.mxu1 %v4517_v52  ;;  %1326 = vmatprep.subr.bf16.mxu0 %v4522_v55  ;;  %v4590_v52 = vld [vmem:[#allocation3 + $0x444] ss:$16 sps:$4 sm:$0xff]   ;;  %v4593_v55 = vld [vmem:[#allocation3 + $0x44c] ss:$16 sps:$4 sm:$0xff]  }
  0xa0   : > { %1379 = vmatprep.subr.bf16.mxu1 %v4525_v56  ;;  %v4588_v56 = vld [vmem:[#allocation3 + $0x440] ss:$16 sps:$4 sm:$0xff]  }
  0xa2   : > { %1327 = vmatpush1.bf16.msra.mxu0 %v4520_v60  ;;  %v4597_v60 = vld [vmem:[#allocation3 + $0x468] ss:$16 sps:$4 sm:$0xff]  }
  0xa3   : > { %1380 = vmatpush1.bf16.msra.mxu1 %v4523_v1  ;;  %1328 = vmatprep.subr.bf16.mxu0 %v4528_v2  ;;  %v4603_v1 = vld [vmem:[#allocation3 + $0x488] ss:$16 sps:$4 sm:$0xff]   ;;  %v4608_v2 = vld [vmem:[#allocation3 + $0x4a4] ss:$16 sps:$4 sm:$0xff]  }
  0xa4   : > { %1381 = vmatprep.subr.bf16.mxu1 %v4531_v3  ;;  %v4606_v3 = vld [vmem:[#allocation3 + $0x4a0] ss:$16 sps:$4 sm:$0xff]  }
  0xa6   : > { %1329 = vmatpush1.bf16.msra.mxu0 %v4526_v11  ;;  %v4618_v11 = vld [vmem:[#allocation3 + $0x4e0] ss:$16 sps:$4 sm:$0xff]  }
  0xa7   : > { %1382 = vmatpush1.bf16.msra.mxu1 %v4529_v12  ;;  %1330 = vmatprep.subr.bf16.mxu0 %v4534_v13  ;;  %v4621_v12 = vld [vmem:[#allocation3 + $0x4e8] ss:$16 sps:$4 sm:$0xff]   ;;  %v4626_v13 = vld [vmem:[#allocation3 + $0x504] ss:$16 sps:$4 sm:$0xff]  }
  0xa8   : > { %1383 = vmatprep.subr.bf16.mxu1 %v4537_v14  ;;  %v4629_v14 = vld [vmem:[#allocation3 + $0x50c] ss:$16 sps:$4 sm:$0xff]  }
  0xaa   : > { %1331 = vmatpush1.bf16.msra.mxu0 %v4532_v63  ;;  %v4632_v63 = vld [vmem:[#allocation3 + $0x524] ss:$16 sps:$4 sm:$0xff]  }
  0xab   : > { %1384 = vmatpush1.bf16.msra.mxu1 %v4535_v17  ;;  %1332 = vmatprep.subr.bf16.mxu0 %v4540_v18  ;;  %v4635_v17 = vld [vmem:[#allocation3 + $0x52c] ss:$16 sps:$4 sm:$0xff]   ;;  %v4630_v18 = vld [vmem:[#allocation3 + $0x520] ss:$16 sps:$4 sm:$0xff]  }
  0xac   : > { %1385 = vmatprep.subr.bf16.mxu1 %v4543_v19  ;;  %v4633_v19 = vld [vmem:[#allocation3 + $0x528] ss:$16 sps:$4 sm:$0xff]  }
  0xae   : > { %1333 = vmatpush1.bf16.msra.mxu0 %v4538_v20  ;;  %v4638_v20 = vld [vmem:[#allocation3 + $0x544] ss:$16 sps:$4 sm:$0xff]  }
  0xaf   : > { %1386 = vmatpush1.bf16.msra.mxu1 %v4541_v21  ;;  %1334 = vmatprep.subr.bf16.mxu0 %v4546_v22  ;;  %v4641_v21 = vld [vmem:[#allocation3 + $0x54c] ss:$16 sps:$4 sm:$0xff]   ;;  %v4636_v22 = vld [vmem:[#allocation3 + $0x540] ss:$16 sps:$4 sm:$0xff]  }
  0xb0   : > { %1387 = vmatprep.subr.bf16.mxu1 %v4549_v23  ;;  %v4639_v23 = vld [vmem:[#allocation3 + $0x548] ss:$16 sps:$4 sm:$0xff]  }
  0xb2   : > { %1335 = vmatpush1.bf16.msra.mxu0 %v4544_v24  ;;  %v4644_v24 = vld [vmem:[#allocation3 + $0x564] ss:$16 sps:$4 sm:$0xff]  }
  0xb3   : > { %1388 = vmatpush1.bf16.msra.mxu1 %v4547_v25  ;;  %1336 = vmatprep.subr.bf16.mxu0 %v4552_v26  ;;  %v4647_v25 = vld [vmem:[#allocation3 + $0x56c] ss:$16 sps:$4 sm:$0xff]   ;;  %v4642_v26 = vld [vmem:[#allocation3 + $0x560] ss:$16 sps:$4 sm:$0xff]  }
  0xb4   : > { %1389 = vmatprep.subr.bf16.mxu1 %v4555_v28  ;;  %v4645_v28 = vld [vmem:[#allocation3 + $0x568] ss:$16 sps:$4 sm:$0xff]  }
  0xb6   : > { %1337 = vmatpush1.bf16.msra.mxu0 %v4550_v30  ;;  %v4650_v30 = vld [vmem:[#allocation3 + $0x584] ss:$16 sps:$4 sm:$0xff]  }
  0xb7   : > { %1390 = vmatpush1.bf16.msra.mxu1 %v4553_v53  ;;  %1338 = vmatprep.subr.bf16.mxu0 %v4558_v31  ;;  %v4653_v53 = vld [vmem:[#allocation3 + $0x58c] ss:$16 sps:$4 sm:$0xff]   ;;  %v4648_v31 = vld [vmem:[#allocation3 + $0x580] ss:$16 sps:$4 sm:$0xff]  }
  0xb8   : > { %1391 = vmatprep.subr.bf16.mxu1 %v4561_v32  ;;  %v4651_v32 = vld [vmem:[#allocation3 + $0x588] ss:$16 sps:$4 sm:$0xff]  }
  0xba   : > { %1339 = vmatpush1.bf16.msra.mxu0 %v4556_v33  ;;  %v4656_v33 = vld [vmem:[#allocation3 + $0x5a4] ss:$16 sps:$4 sm:$0xff]  }
  0xbb   : > { %1392 = vmatpush1.bf16.msra.mxu1 %v4559_v34  ;;  %1340 = vmatprep.subr.bf16.mxu0 %v4565_v35  ;;  %v4659_v34 = vld [vmem:[#allocation3 + $0x5ac] ss:$16 sps:$4 sm:$0xff]   ;;  %v4654_v35 = vld [vmem:[#allocation3 + $0x5a0] ss:$16 sps:$4 sm:$0xff]  }
  0xbc   : > { %1393 = vmatprep.subr.bf16.mxu1 %v4568_v36  ;;  %v4657_v36 = vld [vmem:[#allocation3 + $0x5a8] ss:$16 sps:$4 sm:$0xff]  }
  0xbe   : > { %1341 = vmatpush1.bf16.msra.mxu0 %v4563_v37  ;;  %v4662_v37 = vld [vmem:[#allocation3 + $0x5c4] ss:$16 sps:$4 sm:$0xff]  }
  0xbf   : > { %1394 = vmatpush1.bf16.msra.mxu1 %v4566_v38  ;;  %1342 = vmatprep.subr.bf16.mxu0 %v4572_v39  ;;  %v4665_v38 = vld [vmem:[#allocation3 + $0x5cc] ss:$16 sps:$4 sm:$0xff]   ;;  %v4660_v39 = vld [vmem:[#allocation3 + $0x5c0] ss:$16 sps:$4 sm:$0xff]  }
  0xc0   : > { %1395 = vmatprep.subr.bf16.mxu1 %v4575_v40  ;;  %v4663_v40 = vld [vmem:[#allocation3 + $0x5c8] ss:$16 sps:$4 sm:$0xff]  }
  0xc2   : > { %1343 = vmatpush1.bf16.msra.mxu0 %v4570_v41  ;;  %v4668_v41 = vld [vmem:[#allocation3 + $0x5e4] ss:$16 sps:$4 sm:$0xff]  }
  0xc3   : > { %1396 = vmatpush1.bf16.msra.mxu1 %v4573_v42  ;;  %1819 = vmatprep.subr.bf16.mxu0 %v4578_v43  ;;  %v5266_v42 = vld [vmem:[#allocation2 + $0x8] sm:$0xff]  ;;  %v5268_v43 = vld [vmem:[#allocation2 + $0x10] sm:$0xff] }
  0xc4   : > { %1872 = vmatprep.subr.bf16.mxu1 %v4581_v44  ;;  %v4671_v44 = vld [vmem:[#allocation3 + $0x5ec] ss:$16 sps:$4 sm:$0xff]  }
  0xc5   : > { %1345 = vmatmul.mubr.bf16.vlgmr.msra.gmra.mrb[0].mxu0 %v5217_v0 }
  0xc6   : > { %1398 = vmatmul.mubr.bf16.vlgmr.msra.gmra.mrb[0].mxu1 %v5217_v0  ;;  %1820 = vmatpush1.bf16.msra.mxu0 %v4576_v45  ;;  %v4599_v0 = vld [vmem:[#allocation3 + $0x46c] ss:$16 sps:$4 sm:$0xff]   ;;  %v4666_v45 = vld [vmem:[#allocation3 + $0x5e0] ss:$16 sps:$4 sm:$0xff]  }
  0xc7   : > { %1873 = vmatpush1.bf16.msra.mxu1 %v4579_v47  ;;  %1821 = vmatprep.subr.bf16.mxu0 %v4584_v48  ;;  %v4669_v47 = vld [vmem:[#allocation3 + $0x5e8] ss:$16 sps:$4 sm:$0xff]   ;;  %v4675_v48 = vld [vmem:[#allocation3 + $0x604] ss:$16 sps:$4 sm:$0xff]  }
  0xc8   : > { %1874 = vmatprep.subr.bf16.mxu1 %v4587_v49  ;;  %1354 = vmatprep.mubr.bf16.mxu0 %v5209_v54  ;;  %v4032_v49 = vcombine.high %v5266_v42, %v5268_v43 }
  0xc9   : > { %1407 = vmatprep.mubr.bf16.mxu1 %v5209_v54  ;;  %v4605_v54 = vld [vmem:[#allocation3 + $0x48c] ss:$16 sps:$4 sm:$0xff]  }
  0xca   : > { %1822 = vmatpush1.bf16.msra.mxu0 %v4582_v50  ;;  %v5272_v50 = vld [vmem:[#allocation2 + $0x18] sm:$0xff] }
  0xcb   : > { %1875 = vmatpush1.bf16.msra.mxu1 %v4585_v51  ;;  %1823 = vmatprep.subr.bf16.mxu0 %v4590_v52  ;;  %v4678_v51 = vld [vmem:[#allocation3 + $0x60c] ss:$16 sps:$4 sm:$0xff]   ;;  %v4673_v52 = vld [vmem:[#allocation3 + $0x600] ss:$16 sps:$4 sm:$0xff]  }
  0xcc   : > { %1876 = vmatprep.subr.bf16.mxu1 %v4593_v55  ;;  %v4676_v55 = vld [vmem:[#allocation3 + $0x608] ss:$16 sps:$4 sm:$0xff]  }
  0xcd   : > { %1355 = vmatmul.mubr.bf16.gmra.mrb[4].mxu0 %v5222_v7 }
  0xce   : > { %1408 = vmatmul.mubr.bf16.gmra.mrb[4].mxu1 %v5222_v7  ;;  %1824 = vmatpush1.bf16.msra.mxu0 %v4588_v56  ;;  %v4611_v7 = vld [vmem:[#allocation3 + $0x4ac] ss:$16 sps:$4 sm:$0xff]   ;;  %v5276_v56 = vcombine.high %v5272_v50, %v5247_v46 }
  0xcf   : > { %1877 = vmatpush1.bf16.msra.mxu1 %v4591_v57  ;;  %1825 = vmatprep.subr.bf16.mxu0 %v4596_v58  ;;  %v2039_v57 = vshll.u32 %v4032_v49, 16  ;;  %v4682_v58 = vld [vmem:[#allocation3 + $0x624] ss:$16 sps:$4 sm:$0xff]  }
  0xd0   : > { %1878 = vmatprep.subr.bf16.mxu1 %v4599_v0  ;;  %1851 = vmatprep.mubr.bf16.mxu0 %v5233_v27  ;;  %v5280_v0 = vcombine.high %v5268_v43, %v5272_v50 }
  0xd1   : > { %1904 = vmatprep.mubr.bf16.mxu1 %v5233_v27  ;;  %v4615_v27 = vld [vmem:[#allocation3 + $0x4c8] ss:$16 sps:$4 sm:$0xff]  }
  0xd2   : > { %1826 = vmatpush1.bf16.msra.mxu0 %v4594_v59  ;;  %v4685_v59 = vld [vmem:[#allocation3 + $0x62c] ss:$16 sps:$4 sm:$0xff]  }
  0xd3   : > { %1879 = vmatpush1.bf16.msra.mxu1 %v4597_v60  ;;  %1827 = vmatprep.subr.bf16.mxu0 %v4602_v61  ;;  %v5284_v60 = vcombine.low %v5268_v43, %v5272_v50  ;;  %v4680_v61 = vld [vmem:[#allocation3 + $0x620] ss:$16 sps:$4 sm:$0xff]  }
  0xd4   : > { %1880 = vmatprep.subr.bf16.mxu1 %v4605_v54  ;;  %v4972_v54 = vld [vmem:[#allocation2 + $0x18] sm:$0xff] }
  0xd6   : > { %1828 = vmatpush1.bf16.msra.mxu0 %v4600_v62  ;;  %v3966_v62 = vcombine.high %v4972_v54, %v5247_v46 }
  0xd7   : > { %1881 = vmatpush1.bf16.msra.mxu1 %v4603_v1  ;;  %1829 = vmatprep.subr.bf16.mxu0 %v4608_v2  ;;  %v4683_v1 = vld [vmem:[#allocation3 + $0x628] ss:$16 sps:$4 sm:$0xff]   ;;  %v2037_v2 = vshrl.u32 %v4032_v49, 16 }
  0xd8   : > { %1882 = vmatprep.subr.bf16.mxu1 %v4611_v7  ;;  %v2041_v7 = vrot.slane %v2039_v57, 1  ;;  %v4743_v49 = vld [vmem:[#allocation3 + $0x768] ss:$16 sps:$4 sm:$0xff]  }
  0xd9   : > { %v4749_v57 = vld [vmem:[#allocation3 + $0x788] ss:$16 sps:$4 sm:$0xff]  }
  0xda   : > { %1830 = vmatpush1.bf16.msra.mxu0 %v4606_v3  ;;  %v2044_v3 = vshll.u32 %v5276_v56, 16 }
  0xdb   : > { %1883 = vmatpush1.bf16.msra.mxu1 %v4609_v4  ;;  %1831 = vmatprep.subr.bf16.mxu0 %v4614_v5  ;;  %v4688_v4 = vld [vmem:[#allocation3 + $0x644] ss:$16 sps:$4 sm:$0xff]   ;;  %v4691_v5 = vld [vmem:[#allocation3 + $0x64c] ss:$16 sps:$4 sm:$0xff]  }
  0xdc   : > { %1884 = vmatprep.subr.bf16.mxu1 %v4617_v6  ;;  %v4686_v6 = vld [vmem:[#allocation3 + $0x640] ss:$16 sps:$4 sm:$0xff]  }
  0xde   : > { %1832 = vmatpush1.bf16.msra.mxu0 %v4612_v8  ;;  %v4689_v8 = vld [vmem:[#allocation3 + $0x648] ss:$16 sps:$4 sm:$0xff]  }
  0xdf   : > { %1885 = vmatpush1.bf16.msra.mxu1 %v4615_v27  ;;  %1833 = vmatprep.subr.bf16.mxu0 %v4620_v9  ;;  %v3965_v27 = vcombine.low %v4972_v54, %v5247_v46  ;;  %v2042_v9 = vor.u32 %v2041_v7, %v2037_v2  ;;  %v4703_v46 = vld [vmem:[#allocation3 + $0x68c] ss:$16 sps:$4 sm:$0xff]   ;;  %v4752_v54 = vld [vmem:[#allocation3 + $0x7a0] ss:$16 sps:$4 sm:$0xff]  }
  0xe0   : > { %1886 = vmatprep.subr.bf16.mxu1 %v4623_v10  ;;  %v5291_v10 = vrot.slane %v2044_v3, 1  ;;  %v5301_v2 = vld [vmem:[#allocation2 + $0x20] sm:$0xff] }
  0xe1   : > { %v4033_v7 = vcombine.low %v5272_v50, %v5301_v2  ;;  %v2056_v50 = vshrl.u32 %v5276_v56, 16 }
  0xe2   : > { %1834 = vmatpush1.bf16.msra.mxu0 %v4618_v11  ;;  %v4697_v11 = vld [vmem:[#allocation3 + $0x66c] ss:$16 sps:$4 sm:$0xff]  }
  0xe3   : > { %1887 = vmatpush1.bf16.msra.mxu1 %v4621_v12  ;;  %1835 = vmatprep.subr.bf16.mxu0 %v4626_v13  ;;  %v4692_v12 = vld [vmem:[#allocation3 + $0x660] ss:$16 sps:$4 sm:$0xff]   ;;  %v4695_v13 = vld [vmem:[#allocation3 + $0x668] ss:$16 sps:$4 sm:$0xff]  }
  0xe4   : > { %1888 = vmatprep.subr.bf16.mxu1 %v4629_v14  ;;  %v2047_v14 = vsel %vm517_vm0, %v2042_v9, %v5291_v10 }
  0xe6   : > { %1836 = vmatpush1.bf16.msra.mxu0 %v4624_v15  ;;  %v4700_v15 = vld [vmem:[#allocation3 + $0x684] ss:$16 sps:$4 sm:$0xff]  }
  0xe7   : > { %1889 = vmatpush1.bf16.msra.mxu1 %v4627_v16  ;;  %1837 = vmatprep.subr.bf16.mxu0 %v4632_v63  ;;  %v4698_v16 = vld [vmem:[#allocation3 + $0x680] ss:$16 sps:$4 sm:$0xff]   ;;  %v4701_v63 = vld [vmem:[#allocation3 + $0x688] ss:$16 sps:$4 sm:$0xff]  }
  0xe8   : > { %1890 = vmatprep.subr.bf16.mxu1 %v4635_v17  ;;  %v4706_v17 = vld [vmem:[#allocation3 + $0x6a4] ss:$16 sps:$4 sm:$0xff]  }
  0xea   : > { %1838 = vmatpush1.bf16.msra.mxu0 %v4630_v18  ;;  %v4709_v18 = vld [vmem:[#allocation3 + $0x6ac] ss:$16 sps:$4 sm:$0xff]  }
  0xeb   : > { %1891 = vmatpush1.bf16.msra.mxu1 %v4633_v19  ;;  %1839 = vmatprep.subr.bf16.mxu0 %v4638_v20  ;;  %v4704_v19 = vld [vmem:[#allocation3 + $0x6a0] ss:$16 sps:$4 sm:$0xff]   ;;  %v4707_v20 = vld [vmem:[#allocation3 + $0x6a8] ss:$16 sps:$4 sm:$0xff]  }
  0xec   : > { %1892 = vmatprep.subr.bf16.mxu1 %v4641_v21  ;;  %v4712_v21 = vld [vmem:[#allocation3 + $0x6c4] ss:$16 sps:$4 sm:$0xff]  }
  0xee   : > { %1840 = vmatpush1.bf16.msra.mxu0 %v4636_v22  ;;  %v4715_v22 = vld [vmem:[#allocation3 + $0x6cc] ss:$16 sps:$4 sm:$0xff]  }
  0xef   : > { %1893 = vmatpush1.bf16.msra.mxu1 %v4639_v23  ;;  %1841 = vmatprep.subr.bf16.mxu0 %v4644_v24  ;;  %v5296_v23 = vld [vmem:[%s5244_s8 + $0x8] sm:$0xff] }
  0xf0   : > { %1894 = vmatprep.subr.bf16.mxu1 %v4647_v25  ;;  %360 = vst [vmem:[#allocation2 + $0x28] sm:$0xff] %v5296_v23  ;;  %v4710_v24 = vld [vmem:[#allocation3 + $0x6c0] ss:$16 sps:$4 sm:$0xff]   ;;  %v4713_v25 = vld [vmem:[#allocation3 + $0x6c8] ss:$16 sps:$4 sm:$0xff]  }
  0xf2   : > { %1842 = vmatpush1.bf16.msra.mxu0 %v4642_v26  ;;  %v4718_v26 = vld [vmem:[#allocation3 + $0x6e4] ss:$16 sps:$4 sm:$0xff]  }
  0xf3   : > { %1895 = vmatpush1.bf16.msra.mxu1 %v4645_v28  ;;  %1843 = vmatprep.subr.bf16.mxu0 %v4650_v30  ;;  %v4721_v28 = vld [vmem:[#allocation3 + $0x6ec] ss:$16 sps:$4 sm:$0xff]   ;;  %v4716_v30 = vld [vmem:[#allocation3 + $0x6e0] ss:$16 sps:$4 sm:$0xff]  }
  0xf4   : > { %1896 = vmatprep.subr.bf16.mxu1 %v4653_v53  ;;  %v4719_v53 = vld [vmem:[#allocation3 + $0x6e8] ss:$16 sps:$4 sm:$0xff]  }
  0xf6   : > { %1844 = vmatpush1.bf16.msra.mxu0 %v4648_v31  ;;  %v4724_v31 = vld [vmem:[#allocation3 + $0x704] ss:$16 sps:$4 sm:$0xff]  }
  0xf7   : > { %1897 = vmatpush1.bf16.msra.mxu1 %v4651_v32  ;;  %1845 = vmatprep.subr.bf16.mxu0 %v4656_v33  ;;  %v4727_v32 = vld [vmem:[#allocation3 + $0x70c] ss:$16 sps:$4 sm:$0xff]   ;;  %v4722_v33 = vld [vmem:[#allocation3 + $0x700] ss:$16 sps:$4 sm:$0xff]  }
  0xf8   : > { %1898 = vmatprep.subr.bf16.mxu1 %v4659_v34  ;;  %v4725_v34 = vld [vmem:[#allocation3 + $0x708] ss:$16 sps:$4 sm:$0xff]  }
  0xfa   : > { %1846 = vmatpush1.bf16.msra.mxu0 %v4654_v35  ;;  %v4730_v35 = vld [vmem:[#allocation3 + $0x724] ss:$16 sps:$4 sm:$0xff]  }
  0xfb   : > { %1899 = vmatpush1.bf16.msra.mxu1 %v4657_v36  ;;  %1847 = vmatprep.subr.bf16.mxu0 %v4662_v37  ;;  %v4733_v36 = vld [vmem:[#allocation3 + $0x72c] ss:$16 sps:$4 sm:$0xff]   ;;  %v4728_v37 = vld [vmem:[#allocation3 + $0x720] ss:$16 sps:$4 sm:$0xff]  }
  0xfc   : > { %1900 = vmatprep.subr.bf16.mxu1 %v4665_v38  ;;  %v4731_v38 = vld [vmem:[#allocation3 + $0x728] ss:$16 sps:$4 sm:$0xff]  }
  0xfe   : > { %1848 = vmatpush1.bf16.msra.mxu0 %v4660_v39  ;;  %v4736_v39 = vld [vmem:[#allocation3 + $0x744] ss:$16 sps:$4 sm:$0xff]  }
  0xff   : > { %1901 = vmatpush1.bf16.msra.mxu1 %v4663_v40  ;;  %1849 = vmatprep.subr.bf16.mxu0 %v4668_v41  ;;  %v4739_v40 = vld [vmem:[#allocation3 + $0x74c] ss:$16 sps:$4 sm:$0xff]   ;;  %v4734_v41 = vld [vmem:[#allocation3 + $0x740] ss:$16 sps:$4 sm:$0xff]  }
 0x100   : > { %1902 = vmatprep.subr.bf16.mxu1 %v4671_v44  ;;  %v4737_v44 = vld [vmem:[#allocation3 + $0x748] ss:$16 sps:$4 sm:$0xff]  }
 0x102   : > { %1850 = vmatpush1.bf16.msra.mxu0 %v4666_v45  ;;  %v4742_v45 = vld [vmem:[#allocation3 + $0x764] ss:$16 sps:$4 sm:$0xff]  }
 0x103   : > { %1903 = vmatpush1.bf16.msra.mxu1 %v4669_v47  ;;  %2388 = vmatprep.subr.bf16.mxu0 %v4675_v48  ;;  %v4745_v47 = vld [vmem:[#allocation3 + $0x76c] ss:$16 sps:$4 sm:$0xff]   ;;  %v4740_v48 = vld [vmem:[#allocation3 + $0x760] ss:$16 sps:$4 sm:$0xff]  }
 0x104   : > { %2441 = vmatprep.subr.bf16.mxu1 %v4678_v51  ;;  %v4748_v51 = vld [vmem:[#allocation3 + $0x784] ss:$16 sps:$4 sm:$0xff]  }
 0x105   : > { %1852 = vmatmul.mubr.bf16.vlgmr.msra.gmra.mrb[0].mxu0 %v5237_v29 }
 0x106   : > { %1905 = vmatmul.mubr.bf16.vlgmr.msra.gmra.mrb[0].mxu1 %v5237_v29  ;;  %2389 = vmatpush1.bf16.msra.mxu0 %v4673_v52  ;;  %v4694_v29 = vld [vmem:[#allocation3 + $0x664] ss:$16 sps:$4 sm:$0xff]   ;;  %v4751_v52 = vld [vmem:[#allocation3 + $0x78c] ss:$16 sps:$4 sm:$0xff]  }
 0x107   : > { %2442 = vmatpush1.bf16.msra.mxu1 %v4676_v55  ;;  %2390 = vmatprep.subr.bf16.mxu0 %v4682_v58  ;;  %v4746_v55 = vld [vmem:[#allocation3 + $0x780] ss:$16 sps:$4 sm:$0xff]   ;;  %v4754_v58 = vld [vmem:[#allocation3 + $0x7a4] ss:$16 sps:$4 sm:$0xff]  }
 0x108   : > { %2443 = vmatprep.subr.bf16.mxu1 %v4685_v59  ;;  %1861 = vmatprep.mubr.bf16.mxu0 %v3966_v62  ;;  %v4031_v59 = vcombine.low %v5266_v42, %v5268_v43  ;;  %v4761_v42 = vld [vmem:[#allocation3 + $0x7c8] ss:$16 sps:$4 sm:$0xff]  }
 0x109   : > { %1914 = vmatprep.mubr.bf16.mxu1 %v3966_v62  ;;  %v4755_v62 = vld [vmem:[#allocation3 + $0x7a8] ss:$16 sps:$4 sm:$0xff]  }
 0x10a   : > { %2391 = vmatpush1.bf16.msra.mxu0 %v4680_v61  ;;  %v4757_v61 = vld [vmem:[#allocation3 + $0x7ac] ss:$16 sps:$4 sm:$0xff]   ;;  %v2027_v3 = vshll.u32 %v4031_v59, 16 }
 0x10b   : > { %2444 = vmatpush1.bf16.msra.mxu1 %v4683_v1  ;;  %2392 = vmatprep.subr.bf16.mxu0 %v4688_v4  ;;  %v4760_v1 = vld [vmem:[#allocation3 + $0x7c4] ss:$16 sps:$4 sm:$0xff]  }
 0x10c   : > { %2445 = vmatprep.subr.bf16.mxu1 %v4691_v5  ;;  %v1422_v4 = vld [vmem:[#allocation2 + $0x28] sm:$0x11]  ;;  %v4763_v5 = vld [vmem:[#allocation3 + $0x7cc] ss:$16 sps:$4 sm:$0xff]   ;;  %v2029_v9 = vrot.slane %v2027_v3, 1 }
 0x10d   : > { %1862 = vmatmul.mubr.bf16.gmra.mrb[4].mxu0 %v3965_v27  ;;  %v4036_v43 = vcombine.high %v1422_v4, %v1422_v4  ;;  %v4801_v3 = vld [vmem:[#allocation3 + $0x88c] ss:$16 sps:$4 sm:$0xff]  }
 0x10e   : > { %1915 = vmatmul.mubr.bf16.gmra.mrb[4].mxu1 %v3965_v27  ;;  %2393 = vmatpush1.bf16.msra.mxu0 %v4686_v6  ;;  %v4758_v6 = vld [vmem:[#allocation3 + $0x7c0] ss:$16 sps:$4 sm:$0xff]   ;;  %v2025_v27 = vshrl.u32 %v4031_v59, 16 }
 0x10f   : > { %2446 = vmatpush1.bf16.msra.mxu1 %v4689_v8  ;;  %2394 = vmatprep.subr.bf16.mxu0 %v4694_v29  ;;  %v4766_v8 = vld [vmem:[#allocation3 + $0x7e4] ss:$16 sps:$4 sm:$0xff]   ;;  %v2032_v29 = vshll.u32 %v4033_v7, 16 }
 0x110   : > { %2447 = vmatprep.subr.bf16.mxu1 %v4697_v11  ;;  %2420 = vmatprep.mubr.bf16.mxu0 %v2047_v14  ;;  %v4769_v11 = vld [vmem:[#allocation3 + $0x7ec] ss:$16 sps:$4 sm:$0xff]  }
 0x111   : > { %2473 = vmatprep.mubr.bf16.mxu1 %v2047_v14  ;;  %v5066_v14 = vmov 0  }
 0x112   : > { %2395 = vmatpush1.bf16.msra.mxu0 %v4692_v12  ;;  %v4764_v12 = vld [vmem:[#allocation3 + $0x7e0] ss:$16 sps:$4 sm:$0xff]   ;;  %361 = vst [vmem:[#allocation2 + $0x30] sm:$0xff] %v5066_v14 }
 0x113   : > { %2448 = vmatpush1.bf16.msra.mxu1 %v4695_v13  ;;  %2396 = vmatprep.subr.bf16.mxu0 %v4700_v15  ;;  %v2060_v13 = vshll.u32 %v4036_v43, 16  ;;  %v4767_v15 = vld [vmem:[#allocation3 + $0x7e8] ss:$16 sps:$4 sm:$0xff]   ;;  %v4804_v43 = vld [vmem:[#allocation3 + $0x8a4] ss:$16 sps:$4 sm:$0xff]  }
 0x114   : > { %2449 = vmatprep.subr.bf16.mxu1 %v4703_v46  ;;  %v4774_v46 = vld [vmem:[#allocation3 + $0x804] ss:$16 sps:$4 sm:$0xff]   ;;  %v4814_v14 = vld [vmem:[#allocation3 + $0x8e0] ss:$16 sps:$4 sm:$0xff]  }
 0x116   : > { %2397 = vmatpush1.bf16.msra.mxu0 %v4698_v16  ;;  %v2030_v16 = vor.u32 %v2029_v9, %v2025_v27  ;;  %v4802_v27 = vld [vmem:[#allocation3 + $0x8a0] ss:$16 sps:$4 sm:$0xff]   ;;  %v4805_v9 = vld [vmem:[#allocation3 + $0x8a8] ss:$16 sps:$4 sm:$0xff]  }
 0x117   : > { %2450 = vmatpush1.bf16.msra.mxu1 %v4701_v63  ;;  %2398 = vmatprep.subr.bf16.mxu0 %v4706_v17  ;;  %v2034_v63 = vrot.slane %v2032_v29, 1  ;;  %v4035_v17 = vcombine.low %v1422_v4, %v1422_v4  ;;  %v4810_v29 = vld [vmem:[#allocation3 + $0x8c4] ss:$16 sps:$4 sm:$0xff]  }
 0x118   : > { %2451 = vmatprep.subr.bf16.mxu1 %v4709_v18  ;;  %v4777_v18 = vld [vmem:[#allocation3 + $0x80c] ss:$16 sps:$4 sm:$0xff]  }
 0x119   : > { %v2035_v56 = vsel %vm517_vm0, %v2030_v16, %v2034_v63  ;;  %v4825_v16 = vld [vmem:[#allocation3 + $0x90c] ss:$16 sps:$4 sm:$0xff]  }
 0x11a   : > { %2399 = vmatpush1.bf16.msra.mxu0 %v4704_v19  ;;  %v4772_v19 = vld [vmem:[#allocation3 + $0x800] ss:$16 sps:$4 sm:$0xff]  }
 0x11b   : > { %2452 = vmatpush1.bf16.msra.mxu1 %v4707_v20  ;;  %2400 = vmatprep.subr.bf16.mxu0 %v4712_v21  ;;  %v4775_v20 = vld [vmem:[#allocation3 + $0x808] ss:$16 sps:$4 sm:$0xff]   ;;  %v2058_v21 = vor.u32 %v2056_v50, %v5291_v10  ;;  %v4816_v50 = vld [vmem:[#allocation3 + $0x8e4] ss:$16 sps:$4 sm:$0xff]  }
 0x11c   : > { %2453 = vmatprep.subr.bf16.mxu1 %v4715_v22  ;;  %v2062_v22 = vrot.slane %v2060_v13, 1  ;;  %v4819_v13 = vld [vmem:[#allocation3 + $0x8ec] ss:$16 sps:$4 sm:$0xff]  }
 0x11e   : > { %2401 = vmatpush1.bf16.msra.mxu0 %v4710_v24  ;;  %v4780_v24 = vld [vmem:[#allocation3 + $0x824] ss:$16 sps:$4 sm:$0xff]   ;;  %v2063_v10 = vsel %vm517_vm0, %v2058_v21, %v2062_v22  ;;  %v4829_v21 = vld [vmem:[#allocation3 + $0x928] ss:$16 sps:$4 sm:$0xff]  }
 0x11f   : > { %2454 = vmatpush1.bf16.msra.mxu1 %v4713_v25  ;;  %2402 = vmatprep.subr.bf16.mxu0 %v4718_v26  ;;  %v2048_v25 = vshrl.u32 %v4033_v7, 16  ;;  %v2052_v26 = vshll.u32 %v4035_v17, 16  ;;  %v4798_v7 = vld [vmem:[#allocation3 + $0x884] ss:$16 sps:$4 sm:$0xff]   ;;  %v4823_v17 = vld [vmem:[#allocation3 + $0x908] ss:$16 sps:$4 sm:$0xff]  }
 0x120   : > { %2455 = vmatprep.subr.bf16.mxu1 %v4721_v28  ;;  %v4783_v28 = vld [vmem:[#allocation3 + $0x82c] ss:$16 sps:$4 sm:$0xff]   ;;  %v4834_v22 = vld [vmem:[#allocation3 + $0x944] ss:$16 sps:$4 sm:$0xff]  }
 0x122   : > { %2403 = vmatpush1.bf16.msra.mxu0 %v4716_v30  ;;  %v3135_v30 = vshll.u32 %v5280_v0, 16 }
 0x123   : > { %2456 = vmatpush1.bf16.msra.mxu1 %v4719_v53  ;;  %2404 = vmatprep.subr.bf16.mxu0 %v4724_v31  ;;  %v3123_v53 = vshll.u32 %v5284_v60, 16  ;;  %v4778_v31 = vld [vmem:[#allocation3 + $0x820] ss:$16 sps:$4 sm:$0xff]  }
 0x124   : > { %2457 = vmatprep.subr.bf16.mxu1 %v4727_v32  ;;  %v4781_v32 = vld [vmem:[#allocation3 + $0x828] ss:$16 sps:$4 sm:$0xff]  }
 0x126   : > { %2405 = vmatpush1.bf16.msra.mxu0 %v4722_v33  ;;  %v4786_v33 = vld [vmem:[#allocation3 + $0x844] ss:$16 sps:$4 sm:$0xff]  }
 0x127   : > { %2458 = vmatpush1.bf16.msra.mxu1 %v4725_v34  ;;  %2406 = vmatprep.subr.bf16.mxu0 %v4730_v35  ;;  %v4789_v34 = vld [vmem:[#allocation3 + $0x84c] ss:$16 sps:$4 sm:$0xff]   ;;  %v2050_v35 = vor.u32 %v2048_v25, %v2034_v63  ;;  %v4820_v63 = vld [vmem:[#allocation3 + $0x900] ss:$16 sps:$4 sm:$0xff]   ;;  %v4835_v25 = vld [vmem:[#allocation3 + $0x948] ss:$16 sps:$4 sm:$0xff]  }
 0x128   : > { %2459 = vmatprep.subr.bf16.mxu1 %v4733_v36  ;;  %v2054_v36 = vrot.slane %v2052_v26, 1  ;;  %v4840_v26 = vld [vmem:[#allocation3 + $0x964] ss:$16 sps:$4 sm:$0xff]  }
 0x12a   : > { %2407 = vmatpush1.bf16.msra.mxu0 %v4728_v37  ;;  %v3133_v37 = vshrl.u32 %v5280_v0, 16 }
 0x12b   : > { %2460 = vmatpush1.bf16.msra.mxu1 %v4731_v38  ;;  %2408 = vmatprep.subr.bf16.mxu0 %v4736_v39  ;;  %v3137_v38 = vrot.slane %v3135_v30, 1  ;;  %v3121_v39 = vshrl.u32 %v5284_v60, 16  ;;  %v4838_v30 = vld [vmem:[#allocation3 + $0x960] ss:$16 sps:$4 sm:$0xff]  }
 0x12c   : > { %2461 = vmatprep.subr.bf16.mxu1 %v4739_v40  ;;  %v3125_v40 = vrot.slane %v3123_v53, 1  ;;  %v4841_v53 = vld [vmem:[#allocation3 + $0x968] ss:$16 sps:$4 sm:$0xff]  }
 0x12e   : > { %2409 = vmatpush1.bf16.msra.mxu0 %v4734_v41  ;;  %v2513_v41 = vld [vmem:[#allocation2 + $0x20] sm:$0xff] }
 0x12f   : > { %2462 = vmatpush1.bf16.msra.mxu1 %v4737_v44  ;;  %2410 = vmatprep.subr.bf16.mxu0 %v4742_v45  ;;  %v5314_v44 = vcombine.low %v2513_v41, %v5296_v23  ;;  %v5317_v45 = vcombine.high %v2513_v41, %v5296_v23  ;;  %v4860_v41 = vld [vmem:[#allocation3 + $0x9c8] ss:$16 sps:$4 sm:$0xff]  }
 0x130   : > { %2463 = vmatprep.subr.bf16.mxu1 %v4745_v47  ;;  %v4784_v47 = vld [vmem:[#allocation3 + $0x840] ss:$16 sps:$4 sm:$0xff]  }
 0x131   : > { %v3128_v59 = vshll.u32 %v5314_v44, 16 }
 0x132   : > { %2411 = vmatpush1.bf16.msra.mxu0 %v4740_v48  ;;  %v4787_v48 = vld [vmem:[#allocation3 + $0x848] ss:$16 sps:$4 sm:$0xff]  }
 0x133   : > { %2464 = vmatpush1.bf16.msra.mxu1 %v4743_v49  ;;  %2412 = vmatprep.subr.bf16.mxu0 %v4748_v51  ;;  %v2055_v49 = vsel %vm517_vm0, %v2050_v35, %v2054_v36  ;;  %v4792_v51 = vld [vmem:[#allocation3 + $0x864] ss:$16 sps:$4 sm:$0xff]   ;;  %v4855_v35 = vld [vmem:[#allocation3 + $0x9ac] ss:$16 sps:$4 sm:$0xff]   ;;  %v4850_v36 = vld [vmem:[#allocation3 + $0x9a0] ss:$16 sps:$4 sm:$0xff]  }
 0x134   : > { %2465 = vmatprep.subr.bf16.mxu1 %v4751_v52  ;;  %v4795_v52 = vld [vmem:[#allocation3 + $0x86c] ss:$16 sps:$4 sm:$0xff]  }
 0x136   : > { %2413 = vmatpush1.bf16.msra.mxu0 %v4746_v55  ;;  %v3138_v55 = vor.u32 %v3137_v38, %v3133_v37  ;;  %v4853_v37 = vld [vmem:[#allocation3 + $0x9a8] ss:$16 sps:$4 sm:$0xff]   ;;  %v4859_v38 = vld [vmem:[#allocation3 + $0x9c4] ss:$16 sps:$4 sm:$0xff]  }
 0x137   : > { %2466 = vmatpush1.bf16.msra.mxu1 %v4749_v57  ;;  %2414 = vmatprep.subr.bf16.mxu0 %v4754_v58  ;;  %v3140_v57 = vshll.u32 %v5317_v45, 16  ;;  %v3126_v58 = vor.u32 %v3125_v40, %v3121_v39  ;;  %v4862_v39 = vld [vmem:[#allocation3 + $0x9cc] ss:$16 sps:$4 sm:$0xff]   ;;  %v4857_v40 = vld [vmem:[#allocation3 + $0x9c0] ss:$16 sps:$4 sm:$0xff]  }
 0x138   : > { %2467 = vmatprep.subr.bf16.mxu1 %v4757_v61 }
 0x139   : > { %v5322_v61 = vrot.slane %v3140_v57, 1  ;;  %v4871_v57 = vld [vmem:[#allocation3 + $0xa00] ss:$16 sps:$4 sm:$0xff]  }
 0x13a   : > { %2415 = vmatpush1.bf16.msra.mxu0 %v4752_v54  ;;  %v5324_v54 = vrot.slane %v3128_v59, 1  ;;  %v4880_v59 = vld [vmem:[#allocation3 + $0xa24] ss:$16 sps:$4 sm:$0xff]  }
 0x13b   : > { %2468 = vmatpush1.bf16.msra.mxu1 %v4755_v62  ;;  %2416 = vmatprep.subr.bf16.mxu0 %v4760_v1  ;;  %v4790_v62 = vld [vmem:[#allocation3 + $0x860] ss:$16 sps:$4 sm:$0xff]   ;;  %v4793_v1 = vld [vmem:[#allocation3 + $0x868] ss:$16 sps:$4 sm:$0xff]   ;;  %v5328_v4 = vsel %vm517_vm0, %v3138_v55, %v5322_v61  ;;  %v4876_v55 = vld [vmem:[#allocation3 + $0xa0c] ss:$16 sps:$4 sm:$0xff]  }
 0x13c   : > { %2469 = vmatprep.subr.bf16.mxu1 %v4763_v5  ;;  %v5332_v5 = vsel %vm517_vm0, %v3126_v58, %v5324_v54  ;;  %v4874_v58 = vld [vmem:[#allocation3 + $0xa08] ss:$16 sps:$4 sm:$0xff]  }
 0x13e   : > { %2417 = vmatpush1.bf16.msra.mxu0 %v4758_v6  ;;  %v4796_v6 = vld [vmem:[#allocation3 + $0x880] ss:$16 sps:$4 sm:$0xff]  }
 0x13f   : > { %2470 = vmatpush1.bf16.msra.mxu1 %v4761_v42  ;;  %2418 = vmatprep.subr.bf16.mxu0 %v4766_v8  ;;  %v4799_v42 = vld [vmem:[#allocation3 + $0x888] ss:$16 sps:$4 sm:$0xff]   ;;  %v4807_v8 = vld [vmem:[#allocation3 + $0x8ac] ss:$16 sps:$4 sm:$0xff]  }
 0x140   : > { %2471 = vmatprep.subr.bf16.mxu1 %v4769_v11  ;;  %v4813_v11 = vld [vmem:[#allocation3 + $0x8cc] ss:$16 sps:$4 sm:$0xff]  }
 0x142   : > { %2419 = vmatpush1.bf16.msra.mxu0 %v4764_v12  ;;  %v4808_v12 = vld [vmem:[#allocation3 + $0x8c0] ss:$16 sps:$4 sm:$0xff]  }
 0x143   : > { %2472 = vmatpush1.bf16.msra.mxu1 %v4767_v15  ;;  %2912 = vmatprep.subr.bf16.mxu0 %v4774_v46  ;;  %v4817_v15 = vld [vmem:[#allocation3 + $0x8e8] ss:$16 sps:$4 sm:$0xff]   ;;  %v4822_v46 = vld [vmem:[#allocation3 + $0x904] ss:$16 sps:$4 sm:$0xff]  }
 0x144   : > { %2965 = vmatprep.subr.bf16.mxu1 %v4777_v18  ;;  %v4828_v18 = vld [vmem:[#allocation3 + $0x924] ss:$16 sps:$4 sm:$0xff]  }
 0x145   : > { %2421 = vmatmul.mubr.bf16.vlgmr.msra.gmra.mrb[0].mxu0 %v2035_v56 }
 0x146   : > { %2474 = vmatmul.mubr.bf16.vlgmr.msra.gmra.mrb[0].mxu1 %v2035_v56  ;;  %2913 = vmatpush1.bf16.msra.mxu0 %v4772_v19  ;;  %v4831_v19 = vld [vmem:[#allocation3 + $0x92c] ss:$16 sps:$4 sm:$0xff]  }
 0x147   : > { %2966 = vmatpush1.bf16.msra.mxu1 %v4775_v20  ;;  %2914 = vmatprep.subr.bf16.mxu0 %v4780_v24  ;;  %v4826_v20 = vld [vmem:[#allocation3 + $0x920] ss:$16 sps:$4 sm:$0xff]   ;;  %v4837_v56 = vld [vmem:[#allocation3 + $0x94c] ss:$16 sps:$4 sm:$0xff]  }
 0x148   : > { %2967 = vmatprep.subr.bf16.mxu1 %v4783_v28  ;;  %2430 = vmatprep.mubr.bf16.mxu0 %v2063_v10  ;;  %v4832_v24 = vld [vmem:[#allocation3 + $0x940] ss:$16 sps:$4 sm:$0xff]   ;;  %v4843_v28 = vld [vmem:[#allocation3 + $0x96c] ss:$16 sps:$4 sm:$0xff]  }
 0x149   : > { %2483 = vmatprep.mubr.bf16.mxu1 %v2063_v10  ;;  %v4844_v10 = vld [vmem:[#allocation3 + $0x980] ss:$16 sps:$4 sm:$0xff]  }
 0x14a   : > { %2915 = vmatpush1.bf16.msra.mxu0 %v4778_v31  ;;  %v4846_v31 = vld [vmem:[#allocation3 + $0x984] ss:$16 sps:$4 sm:$0xff]  }
 0x14b   : > { %2968 = vmatpush1.bf16.msra.mxu1 %v4781_v32  ;;  %2916 = vmatprep.subr.bf16.mxu0 %v4786_v33  ;;  %v4849_v32 = vld [vmem:[#allocation3 + $0x98c] ss:$16 sps:$4 sm:$0xff]   ;;  %v4847_v33 = vld [vmem:[#allocation3 + $0x988] ss:$16 sps:$4 sm:$0xff]  }
 0x14c   : > { %2969 = vmatprep.subr.bf16.mxu1 %v4789_v34  ;;  %v4852_v34 = vld [vmem:[#allocation3 + $0x9a4] ss:$16 sps:$4 sm:$0xff]  }
 0x14d   : > { %2431 = vmatmul.mubr.bf16.gmra.mrb[4].mxu0 %v2055_v49 }
 0x14e   : > { %2484 = vmatmul.mubr.bf16.gmra.mrb[4].mxu1 %v2055_v49  ;;  %2917 = vmatpush1.bf16.msra.mxu0 %v4784_v47  ;;  %v4866_v47 = vld [vmem:[#allocation3 + $0x9e4] ss:$16 sps:$4 sm:$0xff]   ;;  %v4864_v49 = vld [vmem:[#allocation3 + $0x9e0] ss:$16 sps:$4 sm:$0xff]  }
 0x14f   : > { %2970 = vmatpush1.bf16.msra.mxu1 %v4787_v48  ;;  %2918 = vmatprep.subr.bf16.mxu0 %v4792_v51  ;;  %v4869_v48 = vld [vmem:[#allocation3 + $0x9ec] ss:$16 sps:$4 sm:$0xff]   ;;  %v4867_v51 = vld [vmem:[#allocation3 + $0x9e8] ss:$16 sps:$4 sm:$0xff]  }
 0x150   : > { %2971 = vmatprep.subr.bf16.mxu1 %v4795_v52  ;;  %2944 = vmatprep.mubr.bf16.mxu0 %v5280_v0  ;;  %v4873_v52 = vld [vmem:[#allocation3 + $0xa04] ss:$16 sps:$4 sm:$0xff]  }
 0x151   : > { %2997 = vmatprep.mubr.bf16.mxu1 %v5280_v0  ;;  %v4811_v0 = vld [vmem:[#allocation3 + $0x8c8] ss:$16 sps:$4 sm:$0xff]  }
 0x152   : > { %2919 = vmatpush1.bf16.msra.mxu0 %v4790_v62  ;;  %v4883_v62 = vld [vmem:[#allocation3 + $0xa2c] ss:$16 sps:$4 sm:$0xff]  }
 0x153   : > { %2972 = vmatpush1.bf16.msra.mxu1 %v4793_v1  ;;  %2920 = vmatprep.subr.bf16.mxu0 %v4798_v7  ;;  %v4104_v1 = vcombine.high %v5301_v2, %v5296_v23  ;;  %v4878_v7 = vld [vmem:[#allocation3 + $0xa20] ss:$16 sps:$4 sm:$0xff]  }
 0x154   : > { %2973 = vmatprep.subr.bf16.mxu1 %v4801_v3  ;;  %v4881_v3 = vld [vmem:[#allocation3 + $0xa28] ss:$16 sps:$4 sm:$0xff]  }
 0x156   : > { %2921 = vmatpush1.bf16.msra.mxu0 %v4796_v6  ;;  %v4886_v6 = vld [vmem:[#allocation3 + $0xa44] ss:$16 sps:$4 sm:$0xff]  }
 0x157   : > { %2974 = vmatpush1.bf16.msra.mxu1 %v4799_v42  ;;  %2922 = vmatprep.subr.bf16.mxu0 %v4804_v43  ;;  %v4889_v42 = vld [vmem:[#allocation3 + $0xa4c] ss:$16 sps:$4 sm:$0xff]   ;;  %v4103_v43 = vcombine.low %v5301_v2, %v5296_v23  ;;  %v4896_v23 = vld [vmem:[#allocation3 + $0xa80] ss:$16 sps:$4 sm:$0xff]   ;;  %v4899_v2 = vld [vmem:[#allocation3 + $0xa88] ss:$16 sps:$4 sm:$0xff]  }
 0x158   : > { %2975 = vmatprep.subr.bf16.mxu1 %v4807_v8  ;;  %v4884_v8 = vld [vmem:[#allocation3 + $0xa40] ss:$16 sps:$4 sm:$0xff]  }
 0x15a   : > { %2923 = vmatpush1.bf16.msra.mxu0 %v4802_v27  ;;  %v4887_v27 = vld [vmem:[#allocation3 + $0xa48] ss:$16 sps:$4 sm:$0xff]  }
 0x15b   : > { %2976 = vmatpush1.bf16.msra.mxu1 %v4805_v9  ;;  %2924 = vmatprep.subr.bf16.mxu0 %v4810_v29  ;;  %v4895_v9 = vld [vmem:[#allocation3 + $0xa6c] ss:$16 sps:$4 sm:$0xff]   ;;  %v4890_v29 = vld [vmem:[#allocation3 + $0xa60] ss:$16 sps:$4 sm:$0xff]  }
 0x15c   : > { %2977 = vmatprep.subr.bf16.mxu1 %v4813_v11  ;;  %v4893_v11 = vld [vmem:[#allocation3 + $0xa68] ss:$16 sps:$4 sm:$0xff]  }
 0x15e   : > { %2925 = vmatpush1.bf16.msra.mxu0 %v4808_v12  ;;  %v4898_v12 = vld [vmem:[#allocation3 + $0xa84] ss:$16 sps:$4 sm:$0xff]  }
 0x15f   : > { %2978 = vmatpush1.bf16.msra.mxu1 %v4811_v0  ;;  %2926 = vmatprep.subr.bf16.mxu0 %v4816_v50  ;;  %v4901_v0 = vld [vmem:[#allocation3 + $0xa8c] ss:$16 sps:$4 sm:$0xff]   ;;  %v4904_v50 = vld [vmem:[#allocation3 + $0xaa4] ss:$16 sps:$4 sm:$0xff]  }
 0x160   : > { %2979 = vmatprep.subr.bf16.mxu1 %v4819_v13  ;;  %v4907_v13 = vld [vmem:[#allocation3 + $0xaac] ss:$16 sps:$4 sm:$0xff]  }
 0x162   : > { %2927 = vmatpush1.bf16.msra.mxu0 %v4814_v14  ;;  %v4902_v14 = vld [vmem:[#allocation3 + $0xaa0] ss:$16 sps:$4 sm:$0xff]  }
 0x163   : > { %2980 = vmatpush1.bf16.msra.mxu1 %v4817_v15  ;;  %2928 = vmatprep.subr.bf16.mxu0 %v4822_v46  ;;  %v4905_v15 = vld [vmem:[#allocation3 + $0xaa8] ss:$16 sps:$4 sm:$0xff]   ;;  %v4910_v46 = vld [vmem:[#allocation3 + $0xac4] ss:$16 sps:$4 sm:$0xff]  }
 0x164   : > { %2981 = vmatprep.subr.bf16.mxu1 %v4825_v16  ;;  %v4913_v16 = vld [vmem:[#allocation3 + $0xacc] ss:$16 sps:$4 sm:$0xff]  }
 0x166   : > { %2929 = vmatpush1.bf16.msra.mxu0 %v4820_v63  ;;  %v4908_v63 = vld [vmem:[#allocation3 + $0xac0] ss:$16 sps:$4 sm:$0xff]  }
 0x167   : > { %2982 = vmatpush1.bf16.msra.mxu1 %v4823_v17  ;;  %2930 = vmatprep.subr.bf16.mxu0 %v4828_v18  ;;  %v4916_v17 = vld [vmem:[#allocation3 + $0xae4] ss:$16 sps:$4 sm:$0xff]   ;;  %v4919_v18 = vld [vmem:[#allocation3 + $0xaec] ss:$16 sps:$4 sm:$0xff]  }
 0x168   : > { %2983 = vmatprep.subr.bf16.mxu1 %v4831_v19  ;;  %v4914_v19 = vld [vmem:[#allocation3 + $0xae0] ss:$16 sps:$4 sm:$0xff]  }
 0x16a   : > { %2931 = vmatpush1.bf16.msra.mxu0 %v4826_v20  ;;  %v4917_v20 = vld [vmem:[#allocation3 + $0xae8] ss:$16 sps:$4 sm:$0xff]  }
 0x16b   : > { %2984 = vmatpush1.bf16.msra.mxu1 %v4829_v21  ;;  %2932 = vmatprep.subr.bf16.mxu0 %v4834_v22  ;;  %v4922_v21 = vld [vmem:[#allocation3 + $0xb04] ss:$16 sps:$4 sm:$0xff]   ;;  %v4925_v22 = vld [vmem:[#allocation3 + $0xb0c] ss:$16 sps:$4 sm:$0xff]  }
 0x16c   : > { %2985 = vmatprep.subr.bf16.mxu1 %v4837_v56  ;;  %v4920_v56 = vld [vmem:[#allocation3 + $0xb00] ss:$16 sps:$4 sm:$0xff]  }
 0x16e   : > { %2933 = vmatpush1.bf16.msra.mxu0 %v4832_v24  ;;  %v4923_v24 = vld [vmem:[#allocation3 + $0xb08] ss:$16 sps:$4 sm:$0xff]  }
 0x16f   : > { %2986 = vmatpush1.bf16.msra.mxu1 %v4835_v25  ;;  %2934 = vmatprep.subr.bf16.mxu0 %v4840_v26  ;;  %v4928_v25 = vld [vmem:[#allocation3 + $0xb24] ss:$16 sps:$4 sm:$0xff]   ;;  %v4931_v26 = vld [vmem:[#allocation3 + $0xb2c] ss:$16 sps:$4 sm:$0xff]  }
 0x170   : > { %2987 = vmatprep.subr.bf16.mxu1 %v4843_v28  ;;  %v4926_v28 = vld [vmem:[#allocation3 + $0xb20] ss:$16 sps:$4 sm:$0xff]  }
 0x172   : > { %2935 = vmatpush1.bf16.msra.mxu0 %v4838_v30  ;;  %v4929_v30 = vld [vmem:[#allocation3 + $0xb28] ss:$16 sps:$4 sm:$0xff]  }
 0x173   : > { %2988 = vmatpush1.bf16.msra.mxu1 %v4841_v53  ;;  %2936 = vmatprep.subr.bf16.mxu0 %v4846_v31  ;;  %v4934_v53 = vld [vmem:[#allocation3 + $0xb44] ss:$16 sps:$4 sm:$0xff]   ;;  %v4937_v31 = vld [vmem:[#allocation3 + $0xb4c] ss:$16 sps:$4 sm:$0xff]  }
 0x174   : > { %2989 = vmatprep.subr.bf16.mxu1 %v4849_v32  ;;  %v4932_v32 = vld [vmem:[#allocation3 + $0xb40] ss:$16 sps:$4 sm:$0xff]  }
 0x176   : > { %2937 = vmatpush1.bf16.msra.mxu0 %v4844_v10  ;;  %v4935_v10 = vld [vmem:[#allocation3 + $0xb48] ss:$16 sps:$4 sm:$0xff]  }
 0x177   : > { %2990 = vmatpush1.bf16.msra.mxu1 %v4847_v33  ;;  %2938 = vmatprep.subr.bf16.mxu0 %v4852_v34  ;;  %v4940_v33 = vld [vmem:[#allocation3 + $0xb64] ss:$16 sps:$4 sm:$0xff]   ;;  %v4943_v34 = vld [vmem:[#allocation3 + $0xb6c] ss:$16 sps:$4 sm:$0xff]  }
 0x178   : > { %2991 = vmatprep.subr.bf16.mxu1 %v4855_v35  ;;  %v4938_v35 = vld [vmem:[#allocation3 + $0xb60] ss:$16 sps:$4 sm:$0xff]  }
 0x17a   : > { %2939 = vmatpush1.bf16.msra.mxu0 %v4850_v36  ;;  %v4941_v36 = vld [vmem:[#allocation3 + $0xb68] ss:$16 sps:$4 sm:$0xff]  }
 0x17b   : > { %2992 = vmatpush1.bf16.msra.mxu1 %v4853_v37  ;;  %2940 = vmatprep.subr.bf16.mxu0 %v4859_v38  ;;  %v4946_v37 = vld [vmem:[#allocation3 + $0xb84] ss:$16 sps:$4 sm:$0xff]   ;;  %v4949_v38 = vld [vmem:[#allocation3 + $0xb8c] ss:$16 sps:$4 sm:$0xff]  }
 0x17c   : > { %2993 = vmatprep.subr.bf16.mxu1 %v4862_v39  ;;  %v4944_v39 = vld [vmem:[#allocation3 + $0xb80] ss:$16 sps:$4 sm:$0xff]  }
 0x17e   : > { %2941 = vmatpush1.bf16.msra.mxu0 %v4857_v40  ;;  %v4947_v40 = vld [vmem:[#allocation3 + $0xb88] ss:$16 sps:$4 sm:$0xff]  }
 0x17f   : > { %2994 = vmatpush1.bf16.msra.mxu1 %v4860_v41  ;;  %2942 = vmatprep.subr.bf16.mxu0 %v4866_v47  ;;  %v4952_v41 = vld [vmem:[#allocation3 + $0xba4] ss:$16 sps:$4 sm:$0xff]   ;;  %v4955_v47 = vld [vmem:[#allocation3 + $0xbac] ss:$16 sps:$4 sm:$0xff]  }
 0x180   : > { %2995 = vmatprep.subr.bf16.mxu1 %v4869_v48  ;;  %v2515_v48 = vld [vmem:[#allocation2 + $0x30] sm:$0x11] }
 0x182   : > { %2943 = vmatpush1.bf16.msra.mxu0 %v4864_v49  ;;  %v4950_v49 = vld [vmem:[#allocation3 + $0xba0] ss:$16 sps:$4 sm:$0xff]  }
 0x183   : > { %2996 = vmatpush1.bf16.msra.mxu1 %v4867_v51  ;;  %3484 = vmatprep.subr.bf16.mxu0 %v4873_v52  ;;  %v4953_v51 = vld [vmem:[#allocation3 + $0xba8] ss:$16 sps:$4 sm:$0xff]   ;;  %v4960_v52 = vld [vmem:[#allocation3 + $0xbc4] ss:$16 sps:$4 sm:$0xff]  }
 0x184   : > { %3537 = vmatprep.subr.bf16.mxu1 %v4876_v55  ;;  %v4963_v55 = vld [vmem:[#allocation3 + $0xbcc] ss:$16 sps:$4 sm:$0xff]  }
 0x185   : > { %2945 = vmatmul.mubr.bf16.vlgmr.msra.gmra.mrb[0].mxu0 %v5284_v60 }
 0x186   : > { %2998 = vmatmul.mubr.bf16.vlgmr.msra.gmra.mrb[0].mxu1 %v5284_v60  ;;  %3485 = vmatpush1.bf16.msra.mxu0 %v4871_v57  ;;  %v4892_v60 = vld [vmem:[#allocation3 + $0xa64] ss:$16 sps:$4 sm:$0xff]   ;;  %v4174_v57 = vcombine.high %v2515_v48, %v2515_v48 }
 0x187   : > { %3538 = vmatpush1.bf16.msra.mxu1 %v4874_v58  ;;  %3486 = vmatprep.subr.bf16.mxu0 %v4880_v59  ;;  %v4958_v58 = vld [vmem:[#allocation3 + $0xbc0] ss:$16 sps:$4 sm:$0xff]   ;;  %v4961_v59 = vld [vmem:[#allocation3 + $0xbc8] ss:$16 sps:$4 sm:$0xff]  }
 0x188   : > { %3539 = vmatprep.subr.bf16.mxu1 %v4883_v62  ;;  %2954 = vmatprep.mubr.bf16.mxu0 %v4104_v1  ;;  %v4966_v62 = vld [vmem:[#allocation3 + $0xbe4] ss:$16 sps:$4 sm:$0xff]  }
 0x189   : > { %3007 = vmatprep.mubr.bf16.mxu1 %v4104_v1  ;;  %v4969_v1 = vld [vmem:[#allocation3 + $0xbec] ss:$16 sps:$4 sm:$0xff]  }
 0x18a   : > { %3487 = vmatpush1.bf16.msra.mxu0 %v4878_v7  ;;  %v3152_v7 = vshrl.u32 %v5317_v45, 16 }
 0x18b   : > { %3540 = vmatpush1.bf16.msra.mxu1 %v4881_v3  ;;  %3488 = vmatprep.subr.bf16.mxu0 %v4886_v6  ;;  %v3156_v3 = vshll.u32 %v4174_v57, 16  ;;  %v4964_v6 = vld [vmem:[#allocation3 + $0xbe0] ss:$16 sps:$4 sm:$0xff]  }
 0x18c   : > { %3541 = vmatprep.subr.bf16.mxu1 %v4889_v42  ;;  %v4967_v42 = vld [vmem:[#allocation3 + $0xbe8] ss:$16 sps:$4 sm:$0xff]  }
 0x18d   : > { %2955 = vmatmul.mubr.bf16.gmra.mrb[4].mxu0 %v4103_v43 }
 0x18e   : > { %3008 = vmatmul.mubr.bf16.gmra.mrb[4].mxu1 %v4103_v43  ;;  %3489 = vmatpush1.bf16.msra.mxu0 %v4884_v8  ;;  %v4173_v43 = vcombine.low %v2515_v48, %v2515_v48  ;;  %v3154_v8 = vor.u32 %v3152_v7, %v5322_v61  ;;  %v3620_v61 = vlaneseq }
 0x18f   : > { %3542 = vmatpush1.bf16.msra.mxu1 %v4887_v27  ;;  %3490 = vmatprep.subr.bf16.mxu0 %v4892_v60  ;;  %v3158_v27 = vrot.slane %v3156_v3, 1  ;;  %v3144_v60 = vshrl.u32 %v5314_v44, 16 }
 0x190   : > { %3543 = vmatprep.subr.bf16.mxu1 %v4895_v9  ;;  %3516 = vmatprep.mubr.bf16.mxu0 %v5328_v4  ;;  %v3148_v9 = vshll.u32 %v4173_v43, 16 }
 0x191   : > { %3569 = vmatprep.mubr.bf16.mxu1 %v5328_v4  ;;  %v4911_v4 = vld [vmem:[#allocation3 + $0xac8] ss:$16 sps:$4 sm:$0xff]   ;;  %v3146_v45 = vor.u32 %v3144_v60, %v5324_v54  ;;  %v5067_v54 = vmov 1983009808  }
 0x192   : > { %3491 = vmatpush1.bf16.msra.mxu0 %v4890_v29  ;;  %v3159_v29 = vsel %vm517_vm0, %v3154_v8, %v3158_v27 }
 0x193   : > { %3544 = vmatpush1.bf16.msra.mxu1 %v4893_v11  ;;  %3492 = vmatprep.subr.bf16.mxu0 %v4898_v12  ;;  %v3150_v11 = vrot.slane %v3148_v9, 1 }
 0x194   : > { %3545 = vmatprep.subr.bf16.mxu1 %v4901_v0  ;;  %v3621_v0 = vshrl.u32 %v3620_v61, 7 }
 0x195   : > { %v3151_v12 = vsel %vm517_vm0, %v3146_v45, %v3150_v11 }
 0x196   : > { %3493 = vmatpush1.bf16.msra.mxu0 %v4896_v23  ;;  %v3622_v23 = vsub.s32 0, %v3621_v0 }
 0x197   : > { %3546 = vmatpush1.bf16.msra.mxu1 %v4899_v2  ;;  %3494 = vmatprep.subr.bf16.mxu0 %v4904_v50  ;;  %v3618_v50 = vld [vmem:[#allocation5] sm:$0x3] }
 0x198   : > { %3547 = vmatprep.subr.bf16.mxu1 %v4907_v13  ;;  %v3626_v13 = vsub.s32 1, %v3621_v0 }
 0x19a   : > { %3495 = vmatpush1.bf16.msra.mxu0 %v4902_v14 }
 0x19b   : > { %3548 = vmatpush1.bf16.msra.mxu1 %v4905_v15  ;;  %3496 = vmatprep.subr.bf16.mxu0 %v4910_v46 }
 0x19c   : > { %3549 = vmatprep.subr.bf16.mxu1 %v4913_v16 }
 0x19e   : > { %3497 = vmatpush1.bf16.msra.mxu0 %v4908_v63 }
 0x19f   : > { %3550 = vmatpush1.bf16.msra.mxu1 %v4911_v4  ;;  %3498 = vmatprep.subr.bf16.mxu0 %v4916_v17  ;;  %v3648_v4 = vunpack.c.l.s4 %v5067_v54 }
 0x1a0   : > { %3551 = vmatprep.subr.bf16.mxu1 %v4919_v18  ;;  %v3623_v18 = vrot.slane %v3618_v50, %v3622_v23 }
 0x1a2   : > { %3499 = vmatpush1.bf16.msra.mxu0 %v4914_v19 }
 0x1a3   : > { %3552 = vmatpush1.bf16.msra.mxu1 %v4917_v20  ;;  %3500 = vmatprep.subr.bf16.mxu0 %v4922_v21 }
 0x1a4   : > { %3553 = vmatprep.subr.bf16.mxu1 %v4925_v22  ;;  %v3627_v22 = vrot.slane %v3618_v50, %v3626_v13 }
 0x1a6   : > { %3501 = vmatpush1.bf16.msra.mxu0 %v4920_v56 }
 0x1a7   : > { %3554 = vmatpush1.bf16.msra.mxu1 %v4923_v24  ;;  %3502 = vmatprep.subr.bf16.mxu0 %v4928_v25  ;;  %v3649_v25 = vunpack.c.0.s8 %v3648_v4 }
 0x1a8   : > { %3555 = vmatprep.subr.bf16.mxu1 %v4931_v26 }
 0x1aa   : > { %3503 = vmatpush1.bf16.msra.mxu0 %v4926_v28 }
 0x1ab   : > { %3556 = vmatpush1.bf16.msra.mxu1 %v4929_v30  ;;  %3504 = vmatprep.subr.bf16.mxu0 %v4934_v53 }
 0x1ac   : > { %3557 = vmatprep.subr.bf16.mxu1 %v4937_v31 }
 0x1ae   : > { %3505 = vmatpush1.bf16.msra.mxu0 %v4932_v32 }
 0x1af   : > { %3558 = vmatpush1.bf16.msra.mxu1 %v4935_v10  ;;  %3506 = vmatprep.subr.bf16.mxu0 %v4940_v33 }
 0x1b0   : > { %3559 = vmatprep.subr.bf16.mxu1 %v4943_v34 }
 0x1b2   : > { %3507 = vmatpush1.bf16.msra.mxu0 %v4938_v35 }
 0x1b3   : > { %3560 = vmatpush1.bf16.msra.mxu1 %v4941_v36  ;;  %3508 = vmatprep.subr.bf16.mxu0 %v4946_v37  ;;  %v3652_v36 = vsub.s32 %v3649_v25, %v3621_v0 }
 0x1b4   : > { %3561 = vmatprep.subr.bf16.mxu1 %v4949_v38 }
 0x1b6   : > { %3509 = vmatpush1.bf16.msra.mxu0 %v4944_v39 }
 0x1b7   : > { %3562 = vmatpush1.bf16.msra.mxu1 %v4947_v40  ;;  %3510 = vmatprep.subr.bf16.mxu0 %v4952_v41 }
 0x1b8   : > { %3563 = vmatprep.subr.bf16.mxu1 %v4955_v47 }
 0x1ba   : > { %3511 = vmatpush1.bf16.msra.mxu0 %v4950_v49 }
 0x1bb   : > { %3564 = vmatpush1.bf16.msra.mxu1 %v4953_v51  ;;  %3512 = vmatprep.subr.bf16.mxu0 %v4960_v52  ;;  %v3671_v52 = vld [vmem:[%s346_s12] sm:$0xf] }
 0x1bc   : > { %3565 = vmatprep.subr.bf16.mxu1 %v4963_v55 }
 0x1be   : > { %3513 = vmatpush1.bf16.msra.mxu0 %v4958_v58 }
 0x1bf   : > { %3566 = vmatpush1.bf16.msra.mxu1 %v4961_v59  ;;  %3514 = vmatprep.subr.bf16.mxu0 %v4966_v62 }
 0x1c0   : > { %3567 = vmatprep.subr.bf16.mxu1 %v4969_v1 }
 0x1c2   : > { %3515 = vmatpush1.bf16.msra.mxu0 %v4964_v6 }
 0x1c3   : > { %3568 = vmatpush1.bf16.msra.mxu1 %v4967_v42  ;;  %v3674_v42 = vld [vmem:[%s346_s12 + $0x4] sm:$0xf] }
 0x1c5   : > { %3517 = vmatmul.mubr.bf16.vlgmr.msra.gmra.mrb[0].mxu0 %v5332_v5 }
 0x1c6   : > { %3570 = vmatmul.mubr.bf16.vlgmr.msra.gmra.mrb[0].mxu1 %v5332_v5  ;;  %3526 = vmatprep.mubr.bf16.mxu0 %v3159_v29 }
 0x1c7   : > { %3579 = vmatprep.mubr.bf16.mxu1 %v3159_v29 }
 0x1cd   : > { %3527 = vmatmul.mubr.bf16.gmra.mrb[4].mxu0 %v3151_v12 }
 0x1ce   : > { %3580 = vmatmul.mubr.bf16.gmra.mrb[4].mxu1 %v3151_v12 }
 0x298   : > { %v3518_v44 = vpop.f32.mrb[0].mxu0 }
 0x299   : > { %v3571_v2 = vpop.f32.mrb[0].mxu1  ;;  %v3520_v15 = vpop.f32.mrb[1].mxu0 }
 0x29a   : > { %v3606_v14 = vmax.f32 %v3518_v44, %v3571_v2  ;;  %v3573_v46 = vpop.f32.mrb[1].mxu1  ;;  %v3522_v16 = vpop.f32.mrb[2].mxu0 }
 0x29b   : > { %v3607_v5 = vmax.f32 %v3520_v15, %v3573_v46  ;;  %v3575_v63 = vpop.f32.mrb[2].mxu1  ;;  %v3524_v19 = vpop.f32.mrb[3].mxu0 }
 0x29c   : > { %v3608_v17 = vmax.f32 %v3522_v16, %v3575_v63  ;;  %v3577_v20 = vpop.f32.mrb[3].mxu1 }
 0x29d   : > { %v3609_v21 = vmax.f32 %v3524_v19, %v3577_v20 }
 0x29e   : > { %v3614_v56 = vmax.f32 %v3606_v14, %v3608_v17 }
 0x29f   : > { %v3615_v24 = vmax.f32 %v3607_v5, %v3609_v21 }
 0x2a0   : > { %v3630_v26 = vadd.f32 %v3623_v18, %v3614_v56  ;;  %v3528_v30 = vpop.f32.mrb[4].mxu0 }
 0x2a1   : > { %v3631_v28 = vadd.f32 %v3627_v22, %v3615_v24  ;;  %v3581_v53 = vpop.f32.mrb[4].mxu1  ;;  %v3530_v33 = vpop.f32.mrb[5].mxu0 }
 0x2a2   : > { %v3634_v31 = vmax.f32 %v3630_v26, 0.0  ;;  %v3610_v10 = vmax.f32 %v3528_v30, %v3581_v53  ;;  %v3583_v34 = vpop.f32.mrb[5].mxu1  ;;  %v3532_v39 = vpop.f32.mrb[6].mxu0 }
 0x2a3   : > { %v3635_v35 = vmax.f32 %v3631_v28, 0.0  ;;  %v3611_v38 = vmax.f32 %v3530_v33, %v3583_v34  ;;  %v3585_v40 = vpop.f32.mrb[6].mxu1  ;;  %v3534_v47 = vpop.f32.mrb[7].mxu0 }
 0x2a4   : > { %v3612_v41 = vmax.f32 %v3532_v39, %v3585_v40  ;;  %v3587_v48 = vpop.f32.mrb[7].mxu1 }
 0x2a5   : > { %v4239_v49 = vpack.c.bf16 %v3635_v35, %v3634_v31  ;;  %v3613_v51 = vmax.f32 %v3534_v47, %v3587_v48 }
 0x2a6   : > { %v3616_v55 = vmax.f32 %v3610_v10, %v3612_v41 }
 0x2a7   : > { %v3653_v57 = vrot.slane %v4239_v49, %v3652_v36  ;;  %v3617_v58 = vmax.f32 %v3611_v38, %v3613_v51 }
 0x2a8   : > { %v3632_v59 = vadd.f32 %v3623_v18, %v3616_v55 }
 0x2a9   : > { %v3672_v62 = vsel %vm3670_vm7, %v3653_v57, %v3671_v52  ;;  %v3633_v1 = vadd.f32 %v3627_v22, %v3617_v58 }
 0x2aa   : > { %3673 = vst [vmem:[%s346_s12] sm:$0xf] %v3672_v62  ;;  %v3636_v7 = vmax.f32 %v3632_v59, 0.0 }
 0x2ab   : > { %v3637_v3 = vmax.f32 %v3633_v1, 0.0 }
 0x2ad   : > { %v4240_v6 = vpack.c.bf16 %v3637_v3, %v3636_v7 }
 0x2af   : > { %v3661_v43 = vrot.slane %v4240_v6, %v3652_v36 }
 0x2b1   : > { %v3675_v8 = vsel %vm3670_vm7, %v3661_v43, %v3674_v42 }
 0x2b2   : > { %3676 = vst [vmem:[%s346_s12 + $0x4] sm:$0xf] %v3675_v8 }
 0x2b3 PF: > { %s16_s17 = sadd.s32 1, %s5060_s17   ;;  %s5394_s15 = smov %s5056_s16 }
 0x2b4   : > { %p13_p6 = scmp.ge.s32.totalorder %s16_s17, 4   ;;  %s5395_s16 = smov %s5397_s19 }
 0x2b6   :  { %15 = sbr.rel (!%p13_p6) target bundleno = 3 (0x3), region = 83 }
 0x2bd   :  { %3709 = vsyncpa [#allocation4], 1 }
 0x2be   :  { %3711 = vsyncpa [#allocation4 + $0x1], 1 }
 0x2bf   :  { %3712 = vsyncpa [#allocation6], 1 }

// kernel: image_encoder_forward.4
= control target key start
LH: loop header
LB: loop body
LE: loop exit
PB: predicated region body
PF: predicated region fallthrough
CT: control target
= control target key end

     0   :  { %9 = vsyncpa [#allocation4], 0  ;;  %s4653_s0 = inlined_call_operand.vmem [shape: bf16[2,288,8], index: 0, kind: input, shape index: {}, may-alias: {0,1}]   ;;  %s4654_s1 = inlined_call_operand.vmem [shape: bf16[2,288,8], index: 1, kind: input, shape index: {}, may-alias: {0,1}]   ;;  %s4655_s2 = inlined_call_operand.hbm [shape: bf16[6,8,128], index: 2, kind: input, shape index: {}]   ;;  %s4656_s3 = inlined_call_operand.hbm [shape: f32[1,64], index: 3, kind: input, shape index: {}]   ;;  %s4657_s4 = inlined_call_operand.vmem [shape: bf16[2,8,12,64], index: 4, kind: output, shape index: {}]  }
   0x1   :  { %10 = vsyncpa [#allocation6], 0  ;;  %s3844_s15 = smov 0   ;;  %s3846_s16 = smov 0  }
   0x2   :  { %s3848_s17 = smov 0  }
   0x3 LB: > { %s2952_s18 = sadd.s32 4294967295, %s3811_s17   ;;  %s28_s19 = sadd.s32 1, %s3807_s16  ;;  %s3811_s17 = sphi %s3848_s17, %s16_s17   ;;  %s3807_s16 = sphi %s3846_s16, %s4667_s16   ;;  %s3803_s15 = sphi %s3844_s15, %s4666_s15  }
   0x4   : > { %p30_p0 = scmp.ge.s32.totalorder %s28_s19, 2  ;;  %p2954_p1 = scmp.ge.s32.totalorder %s3811_s17, 1 }
   0x5   : > { %p163_p2 = scmp.lt.s32.totalorder %s3811_s17, 3  ;;  %p3869_p4 = scmp.eq.s32.totalorder %s2952_s18, 0 }
   0x6   : > { %s4669_s19 = smov (%p30_p0, %s28_s19), 0  ;;  %s3813_s22 = smov [#allocation3]  }
   0x7   : > { %p3865_p3 = pnand %p2954_p1, %p163_p2  ;;  %s175_s23 = sshll.u32 %s3813_s22, 4  ;;  %s176_s23 = int_to_ptr.vmem [resolvable:$true] %s175_s23 }
   0x8   : > { %s4662_s21 = scalar_select %p3869_p4, 1, 0 }
   0x9   : > { %s4661_s20 = scalar_select %p3865_p3, 1, 0 }
   0xa   : > { %p3632_p5 = pneg %p3865_p3  ;;  %s3814_s25 = smov [#allocation5]  }
   0xb   : > { %s189_s26 = sshll.u32 %s3814_s25, 4  ;;  %s3725_s29 = scalar_lea.hbm %s4655_s2, 384  ;;  %s3881_s26 = int_to_ptr.vmem [resolvable:$true] %s189_s26 }
   0xc   : > { %p3877_p6 = pnand %p3869_p4, %p3632_p5  ;;  %p3726_p7 = scmp.ne.s32.totalorder %s4655_s2, %s3725_s29 }
   0xd   : > { %p3732_p11 = scmp.lt.u32.totalorder %s3725_s29, %s4655_s2 }
   0xe   : > { %p3727_p8 = pneg %p3877_p6 }
  0x10   : > { %p3728_p9 = pnand %p3727_p8, %p3726_p7 }
  0x12   : > { %p3729_p10 = pneg %p3728_p9 }
  0x14   : > { %p3734_p12 = pnand %p3732_p11, %p3729_p10 }
  0x16   : > { %3737 = shalt.err (!%p3734_p12)
}
  0x17   : > { %s3738_s8 = scalar_lea.vmem %s176_s23, 384  ;;  %p3746_p2 = scmp.lt.s32.totalorder %s176_s23, %s176_s23 }
  0x18   : > { %p3739_p13 = scmp.ne.s32.totalorder %s176_s23, %s3738_s8  ;;  %p3747_p5 = scmp.lt.s32.totalorder %s3738_s8, %s3738_s8 }
  0x1a   : > { %p3741_p0 = pnand %p3739_p13, %p3727_p8  ;;  %p3748_p4 = por %p3747_p5, %p3746_p2 }
  0x1c   : > { %p3742_p1 = pneg %p3741_p0 }
  0x1e   : > { %p3749_p3 = pnand %p3748_p4, %p3742_p1 }
  0x20   : > { %3752 = shalt.err (!%p3749_p3)
}
  0x21   : > { %s3815_s9 = smov 64   ;;  %s3816_s10 = smov 4  }
  0x22   : > { %3635 = dma.hbm_to_vmem [thread:$0]  (!%p3877_p6), %s4655_s2, 384, %s176_s23, [#allocation4], %s3815_s9, %s3815_s9, %s3816_s10  }
  0x23   : > { %s3753_s18 = scalar_lea.hbm %s4656_s3, 16 }
  0x24   : > { %p3754_p7 = scmp.ne.s32.totalorder %s4656_s3, %s3753_s18  ;;  %p3760_p9 = scmp.lt.u32.totalorder %s3753_s18, %s4656_s3 }
  0x26   : > { %p3756_p3 = pnand %p3754_p7, %p3727_p8 }
  0x28   : > { %p3757_p4 = pneg %p3756_p3 }
  0x2a   : > { %p3762_p10 = pnand %p3760_p9, %p3757_p4 }
  0x2c   : > { %3765 = shalt.err (!%p3762_p10)
}
  0x2d   : > { %s3766_s23 = scalar_lea.vmem %s3881_s26, 16  ;;  %s3773_s29 = scalar_lea.vmem %s3881_s26, 32 }
  0x2e   : > { %p3767_p11 = scmp.ne.s32.totalorder %s3881_s26, %s3766_s23  ;;  %p3774_p0 = scmp.lt.s32.totalorder %s3881_s26, %s3881_s26 }
  0x2f   : > { %p3775_p1 = scmp.lt.s32.totalorder %s3773_s29, %s3766_s23 }
  0x30   : > { %p3769_p12 = pnand %p3767_p11, %p3727_p8 }
  0x31   : > { %p3776_p2 = por %p3775_p1, %p3774_p0 }
  0x32   : > { %p3770_p13 = pneg %p3769_p12 }
  0x34   : > { %p3777_p5 = pnand %p3776_p2, %p3770_p13 }
  0x36   : > { %3780 = shalt.err (!%p3777_p5)
}
  0x37   : > { %3638 = dma.hbm_to_vmem [thread:$0]  (!%p3877_p6), %s4656_s3, 16, %s3881_s26, [#allocation6]  }
  0x38   : > { %p4664_p7 = scmp.ne.s32.totalorder %s4661_s20, 0 }
  0x39   : > { %p4665_p8 = scmp.ne.s32.totalorder (!%p4664_p7), %s4662_s21, 0 }
  0x3a   : > { %240 = sbr.rel (%p4664_p7) target bundleno = 628 (0x274), region = 36 }
  0x41   : > { %3794 = dma.done.wait (%p4665_p8), [#allocation4], 384  }
  0x42   : > { %3796 = vsyncadd (%p4665_p8), [#allocation4], 4294966912 }
  0x43   : > { %3798 = dma.done.wait (%p4665_p8), [#allocation6], 16  }
  0x44   : > { %3800 = vsyncadd (%p4665_p8), [#allocation6], 4294967280  ;;  %p299_p3 = scmp.lt.s32.totalorder %s3803_s15, 1  ;;  %vm713_vm0 = vcmask 1043456   ;;  %vm370_vm1 = vcmask 60416   ;;  %vm664_vm3 = vcmask 64512  }
  0x45   : > { %v447_v0 = vld [vmem:[#allocation3 + $0x4] sm:$0xf]  ;;  %v1434_v1 = vld [vmem:[#allocation3 + $0xc] sm:$0xf]  ;;  %v445_v8 = vld [vmem:[#allocation3] sm:$0xf] }
  0x46   : > { %s4671_s15 = smov (!%p299_p3, %s3803_s15), 1  ;;  %3616 = vmatprep.subr.msk.bf16.mxu1 %vm713_vm0, %v447_v0  ;;  %3619 = vmatprep.subr.msk.bf16.mxu0 %vm713_vm0, %v1434_v1  ;;  %v715_v3 = vsel %vm713_vm0, %v447_v0, 0  ;;  %v1603_v4 = vsel %vm713_vm0, %v1434_v1, 0  ;;  %v1832_v11 = vld [vmem:[#allocation3 + $0x10] sm:$0xf]  ;;  %v911_v26 = vsel %vm713_vm0, %v445_v8, 0 }
  0x47   : > { %s3622_s20 = smul.u32 144, %s4671_s15  ;;  %3253 = vmatpush3.bf16.msra.mxu1 %v715_v3  ;;  %3355 = vmatpush3.bf16.msra.mxu0 %v1603_v4  ;;  %vm531_vm2 = vsmask.f32 7424  ;;  %v1962_v28 = vsel %vm713_vm0, %v1832_v11, 0  ;;  %s3818_s10 = smov 64   ;;  %vm2801_vm4 = vcmask 519168  }
  0x48   : > { %3617 = vmatprep.subr.msk.bf16.mxu1 %vm713_vm0, %v445_v8  ;;  %3620 = vmatprep.subr.msk.bf16.mxu0 %vm713_vm0, %v1832_v11  ;;  %s3133_s11 = sshll.u32 %s4671_s15, 6  ;;  %vm2803_vm5 = vcmask 517120  }
  0x49   : > { %s3951_s6 = scalar_lea.vmem %s4653_s0, %s3622_s20  ;;  %s3132_s21 = sadd.s32 128, %s3622_s20 }
  0x4a   : > { %v338_v2 = vld [vmem:[%s3951_s6] sm:$0xf]  ;;  %v339_v5 = vld [vmem:[%s3951_s6 + $0x4] sm:$0xf]  ;;  %v340_v6 = vld [vmem:[%s3951_s6 + $0x8] sm:$0xf]  ;;  %s4105_s9 = scalar_lea.vmem %s4654_s1, %s3132_s21  ;;  %s4567_s14 = scalar_lea.vmem %s4657_s4, %s3133_s11 }
  0x4b   : > { %371 = vst.msk [vmem:[#allocation2] sm:$0xf] %vm370_vm1, %v338_v2  ;;  %v341_v7 = vld [vmem:[%s3951_s6 + $0xc] sm:$0xf]  ;;  %372 = vst.msk [vmem:[#allocation2 + $0x4] sm:$0xf] %vm370_vm1, %v339_v5 }
  0x4c   : > { %373 = vst.msk [vmem:[#allocation2 + $0x8] sm:$0xf] %vm370_vm1, %v340_v6  ;;  %v342_v9 = vld [vmem:[%s3951_s6 + $0x10] sm:$0xf]  ;;  %374 = vst.msk [vmem:[#allocation2 + $0xc] sm:$0xf] %vm370_vm1, %v341_v7 }
  0x4d   : > { %v343_v10 = vld [vmem:[%s3951_s6 + $0x14] sm:$0xf]  ;;  %375 = vst.msk [vmem:[#allocation2 + $0x10] sm:$0xf] %vm370_vm1, %v342_v9  ;;  %v344_v12 = vld [vmem:[%s3951_s6 + $0x18] sm:$0xf] }
  0x4e   : > { %376 = vst.msk [vmem:[#allocation2 + $0x14] sm:$0xf] %vm370_vm1, %v343_v10  ;;  %v345_v13 = vld [vmem:[%s3951_s6 + $0x1c] sm:$0xf]  ;;  %377 = vst.msk [vmem:[#allocation2 + $0x18] sm:$0xf] %vm370_vm1, %v344_v12 }
  0x4f   : > { %378 = vst.msk [vmem:[#allocation2 + $0x1c] sm:$0xf] %vm370_vm1, %v345_v13  ;;  %v346_v14 = vld [vmem:[%s3951_s6 + $0x20] sm:$0xf]  ;;  %v347_v15 = vld [vmem:[%s3951_s6 + $0x24] sm:$0xf] }
  0x50   : > { %v348_v16 = vld [vmem:[%s3951_s6 + $0x28] sm:$0xf]  ;;  %379 = vst.msk [vmem:[#allocation2 + $0x20] sm:$0xf] %vm370_vm1, %v346_v14  ;;  %380 = vst.msk [vmem:[#allocation2 + $0x24] sm:$0xf] %vm370_vm1, %v347_v15 }
  0x51   : > { %v349_v17 = vld [vmem:[%s3951_s6 + $0x2c] sm:$0xf]  ;;  %381 = vst.msk [vmem:[#allocation2 + $0x28] sm:$0xf] %vm370_vm1, %v348_v16  ;;  %v350_v18 = vld [vmem:[%s3951_s6 + $0x30] sm:$0xf] }
  0x52   : > { %v351_v19 = vld [vmem:[%s3951_s6 + $0x34] sm:$0xf]  ;;  %382 = vst.msk [vmem:[#allocation2 + $0x2c] sm:$0xf] %vm370_vm1, %v349_v17  ;;  %383 = vst.msk [vmem:[#allocation2 + $0x30] sm:$0xf] %vm370_vm1, %v350_v18 }
  0x53   : > { %384 = vst.msk [vmem:[#allocation2 + $0x34] sm:$0xf] %vm370_vm1, %v351_v19  ;;  %v352_v20 = vld [vmem:[%s3951_s6 + $0x38] sm:$0xf]  ;;  %v353_v21 = vld [vmem:[%s3951_s6 + $0x3c] sm:$0xf] }
  0x54   : > { %v354_v22 = vld [vmem:[%s3951_s6 + $0x40] sm:$0xf]  ;;  %385 = vst.msk [vmem:[#allocation2 + $0x38] sm:$0xf] %vm370_vm1, %v352_v20  ;;  %386 = vst.msk [vmem:[#allocation2 + $0x3c] sm:$0xf] %vm370_vm1, %v353_v21 }
  0x55   : > { %v355_v23 = vld [vmem:[%s3951_s6 + $0x44] sm:$0xf]  ;;  %387 = vst.msk [vmem:[#allocation2 + $0x40] sm:$0xf] %vm370_vm1, %v354_v22  ;;  %v356_v24 = vld [vmem:[%s3951_s6 + $0x48] sm:$0xf] }
  0x56   : > { %v3995_v25 = vld [vmem:[#allocation2] sm:$0xff]   ;;  %388 = vst.msk [vmem:[#allocation2 + $0x44] sm:$0xf] %vm370_vm1, %v355_v23  ;;  %389 = vst.msk [vmem:[#allocation2 + $0x48] sm:$0xf] %vm370_vm1, %v356_v24  ;;  %v4000_v27 = vld [vmem:[#allocation2 + $0x8] sm:$0xff]  }
  0x57   : > { %v533_v29 = vshrl.u32 %v3995_v25, 16  ;;  %v535_v30 = vshll.u32 %v3995_v25, 16  ;;  %v540_v31 = vshll.u32 %v4000_v27, 16  ;;  %v544_v32 = vshrl.u32 %v4000_v27, 16  ;;  %v4007_v33 = vld [vmem:[#allocation2 + $0x8] sm:$0xff]   ;;  %v4009_v34 = vld [vmem:[#allocation2 + $0x10] sm:$0xff]  }
  0x58   : > { %v4011_v36 = vld [vmem:[#allocation2 + $0x10] sm:$0xff]   ;;  %v1438_v38 = vshrl.u32 %v4007_v33, 16  ;;  %v1440_v39 = vshll.u32 %v4007_v33, 16  ;;  %v1444_v40 = vshll.u32 %v4009_v34, 16  ;;  %v1448_v42 = vshrl.u32 %v4009_v34, 16  ;;  %v4018_v44 = vld [vmem:[#allocation2 + $0x18] sm:$0xff]  }
  0x59   : > { %v537_v35 = vrot.slane %v535_v30, 1  ;;  %v542_v37 = vrot.slane %v540_v31, 1  ;;  %v548_v43 = vshll.u32 %v4011_v36, 16  ;;  %v4020_v45 = vld [vmem:[#allocation2 + $0x18] sm:$0xff]   ;;  %v1451_v51 = vshll.u32 %v4018_v44, 16  ;;  %v4025_v53 = vld [vmem:[#allocation2 + $0x20] sm:$0xff]  }
  0x5a   : > { %v1442_v47 = vrot.slane %v1440_v39, 1  ;;  %v1446_v48 = vrot.slane %v1444_v40, 1  ;;  %v552_v52 = vshrl.u32 %v4011_v36, 16  ;;  %v556_v56 = vshll.u32 %v4020_v45, 16  ;;  %v4032_v62 = vld [vmem:[#allocation2 + $0x20] sm:$0xff]   ;;  %v4034_v63 = vld [vmem:[#allocation2 + $0x28] sm:$0xff]  }
  0x5b   : > { %v538_v41 = vor.u32 %v537_v35, %v533_v29  ;;  %v546_v46 = vor.u32 %v544_v32, %v542_v37  ;;  %v550_v50 = vrot.slane %v548_v43, 1  ;;  %v1455_v57 = vshrl.u32 %v4018_v44, 16  ;;  %v4046_v11 = vld [vmem:[#allocation2 + $0x28] sm:$0xff]   ;;  %v4048_v12 = vld [vmem:[#allocation2 + $0x30] sm:$0xff]   ;;  %v4059_v22 = vld [vmem:[#allocation2 + $0x38] sm:$0xff]  }
  0x5c   : > { %v1443_v54 = vor.u32 %v1442_v47, %v1438_v38  ;;  %v1450_v55 = vor.u32 %v1448_v42, %v1446_v48  ;;  %v1453_v59 = vrot.slane %v1451_v51, 1  ;;  %v1458_v61 = vshll.u32 %v4025_v53, 16  ;;  %v4054_v17 = vld [vmem:[#allocation2 + $0x30] sm:$0xff]   ;;  %v4067_v39 = vld [vmem:[#allocation2 + $0x38] sm:$0xff]  }
  0x5d   : > { %v543_v49 = vsel %vm531_vm2, %v538_v41, %v542_v37  ;;  %v551_v58 = vsel %vm531_vm2, %v546_v46, %v550_v50  ;;  %v554_v60 = vor.u32 %v552_v52, %v550_v50  ;;  %v558_v1 = vrot.slane %v556_v56, 1  ;;  %v4073_v43 = vld [vmem:[#allocation2 + $0x40] sm:$0xff]  }
  0x5e   : > { %3254 = vmatprep.mubr.msk.bf16.mxu1 %vm664_vm3, %v543_v49  ;;  %v1447_v0 = vsel %vm531_vm2, %v1443_v54, %v1446_v48  ;;  %v560_v2 = vshrl.u32 %v4020_v45, 16  ;;  %v1454_v3 = vsel %vm531_vm2, %v1450_v55, %v1453_v59  ;;  %v1457_v4 = vor.u32 %v1455_v57, %v1453_v59  ;;  %v4078_v49 = vld [vmem:[#allocation2 + $0x40] sm:$0xff]   ;;  %v357_v54 = vld [vmem:[%s3951_s6 + $0x4c] sm:$0xf] }
  0x5f   : > { %3255 = vmatmul.mubr.msk.bf16.vlgmr.msra.gmra.mrb[0].mxu1 %vm664_vm3, %v551_v58  ;;  %3356 = vmatprep.mubr.msk.bf16.mxu0 %vm664_vm3, %v1447_v0  ;;  %v1460_v5 = vrot.slane %v1458_v61, 1  ;;  %v564_v6 = vshll.u32 %v4032_v62, 16  ;;  %v559_v7 = vsel %vm531_vm2, %v554_v60, %v558_v1  ;;  %v1462_v9 = vshrl.u32 %v4025_v53, 16  ;;  %390 = vst.msk [vmem:[#allocation2 + $0x4c] sm:$0xf] %vm370_vm1, %v357_v54 }
  0x60   : > { %3287 = vmatpush3.bf16.msra.mxu1 %v911_v26  ;;  %3357 = vmatmul.mubr.msk.bf16.vlgmr.msra.gmra.mrb[0].mxu0 %vm664_vm3, %v1454_v3  ;;  %v562_v8 = vor.u32 %v560_v2, %v558_v1  ;;  %v1465_v10 = vshll.u32 %v4034_v63, 16  ;;  %v568_v15 = vshrl.u32 %v4032_v62, 16  ;;  %v1469_v16 = vshrl.u32 %v4034_v63, 16  ;;  %v358_v0 = vld [vmem:[%s3951_s6 + $0x50] sm:$0xf] }
  0x61   : > { %3389 = vmatpush3.bf16.msra.mxu0 %v1962_v28  ;;  %3258 = vmatprep.mubr.msk.bf16.mxu1 %vm664_vm3, %v559_v7  ;;  %v1461_v13 = vsel %vm531_vm2, %v1457_v4, %v1460_v5  ;;  %v566_v14 = vrot.slane %v564_v6, 1  ;;  %v1464_v18 = vor.u32 %v1462_v9, %v1460_v5  ;;  %v572_v20 = vshll.u32 %v4046_v11, 16  ;;  %v359_v4 = vld [vmem:[%s3951_s6 + $0x54] sm:$0xf]  ;;  %391 = vst.msk [vmem:[#allocation2 + $0x50] sm:$0xf] %vm370_vm1, %v358_v0 }
  0x62   : > { %3360 = vmatprep.mubr.msk.bf16.mxu0 %vm664_vm3, %v1461_v13  ;;  %v1467_v19 = vrot.slane %v1465_v10, 1  ;;  %v1472_v21 = vshll.u32 %v4048_v12, 16  ;;  %v576_v26 = vshrl.u32 %v4046_v11, 16  ;;  %v580_v28 = vshll.u32 %v4054_v17, 16  ;;  %v360_v5 = vld [vmem:[%s3951_s6 + $0x58] sm:$0xf] }
  0x63   : > { %v567_v23 = vsel %vm531_vm2, %v562_v8, %v566_v14  ;;  %v570_v24 = vor.u32 %v568_v15, %v566_v14  ;;  %v574_v29 = vrot.slane %v572_v20, 1  ;;  %v1476_v37 = vshrl.u32 %v4048_v12, 16  ;;  %392 = vst.msk [vmem:[#allocation2 + $0x54] sm:$0xf] %vm370_vm1, %v359_v4  ;;  %v361_v7 = vld [vmem:[%s3951_s6 + $0x5c] sm:$0xf] }
  0x64   : > { %v1471_v30 = vor.u32 %v1469_v16, %v1467_v19  ;;  %v1474_v31 = vrot.slane %v1472_v21, 1  ;;  %v1468_v32 = vsel %vm531_vm2, %v1464_v18, %v1467_v19  ;;  %v582_v35 = vrot.slane %v580_v28, 1  ;;  %393 = vst.msk [vmem:[#allocation2 + $0x58] sm:$0xf] %vm370_vm1, %v360_v5  ;;  %v362_v8 = vld [vmem:[%s3951_s6 + $0x60] sm:$0xf] }
  0x65   : > { %v1479_v38 = vshll.u32 %v4059_v22, 16  ;;  %v575_v40 = vsel %vm531_vm2, %v570_v24, %v574_v29  ;;  %v584_v42 = vshrl.u32 %v4054_v17, 16  ;;  %v578_v46 = vor.u32 %v576_v26, %v574_v29  ;;  %v363_v9 = vld [vmem:[%s3951_s6 + $0x64] sm:$0xf]  ;;  %394 = vst.msk [vmem:[#allocation2 + $0x5c] sm:$0xf] %vm370_vm1, %v361_v7 }
  0x66   : > { %v1475_v41 = vsel %vm531_vm2, %v1471_v30, %v1474_v31  ;;  %v588_v47 = vshll.u32 %v4067_v39, 16  ;;  %v1483_v48 = vshrl.u32 %v4059_v22, 16  ;;  %v1486_v52 = vshll.u32 %v4073_v43, 16  ;;  %395 = vst.msk [vmem:[#allocation2 + $0x60] sm:$0xf] %vm370_vm1, %v362_v8  ;;  %v4130_v28 = vld [vmem:[#allocation2 + $0x48] sm:$0xff]  }
  0x67   : > { %3259 = vmatmul.mubr.msk.bf16.gmra.mrb[4].mxu1 %vm664_vm3, %v567_v23  ;;  %v1481_v50 = vrot.slane %v1479_v38, 1  ;;  %v586_v51 = vor.u32 %v584_v42, %v582_v35  ;;  %v1478_v55 = vor.u32 %v1476_v37, %v1474_v31  ;;  %v596_v57 = vshll.u32 %v4078_v49, 16  ;;  %396 = vst.msk [vmem:[#allocation2 + $0x64] sm:$0xf] %vm370_vm1, %v363_v9  ;;  %v364_v13 = vld [vmem:[%s3951_s6 + $0x68] sm:$0xf] }
  0x68   : > { %3262 = vmatprep.mubr.msk.bf16.mxu1 %vm664_vm3, %v575_v40  ;;  %3361 = vmatmul.mubr.msk.bf16.gmra.mrb[4].mxu0 %vm664_vm3, %v1468_v32  ;;  %v590_v56 = vrot.slane %v588_v47, 1  ;;  %v1488_v59 = vrot.slane %v1486_v52, 1  ;;  %v592_v60 = vshrl.u32 %v4067_v39, 16  ;;  %v1490_v61 = vshrl.u32 %v4073_v43, 16  ;;  %v365_v14 = vld [vmem:[%s3951_s6 + $0x6c] sm:$0xf] }
  0x69   : > { %3364 = vmatprep.mubr.msk.bf16.mxu0 %vm664_vm3, %v1475_v41  ;;  %v1485_v58 = vor.u32 %v1483_v48, %v1481_v50  ;;  %v583_v1 = vsel %vm531_vm2, %v578_v46, %v582_v35  ;;  %v598_v2 = vrot.slane %v596_v57, 1  ;;  %v600_v3 = vshrl.u32 %v4078_v49, 16  ;;  %v366_v15 = vld [vmem:[%s3951_s6 + $0x70] sm:$0xf]  ;;  %397 = vst.msk [vmem:[#allocation2 + $0x68] sm:$0xf] %vm370_vm1, %v364_v13 }
  0x6a   : > { %v591_v6 = vsel %vm531_vm2, %v586_v51, %v590_v56  ;;  %v1482_v10 = vsel %vm531_vm2, %v1478_v55, %v1481_v50  ;;  %398 = vst.msk [vmem:[#allocation2 + $0x6c] sm:$0xf] %vm370_vm1, %v365_v14  ;;  %v367_v18 = vld [vmem:[%s3951_s6 + $0x74] sm:$0xf]  ;;  %399 = vst.msk [vmem:[#allocation2 + $0x70] sm:$0xf] %vm370_vm1, %v366_v15  ;;  %v594_v21 = vor.u32 %v592_v60, %v590_v56 }
  0x6b   : > { %v1489_v16 = vsel %vm531_vm2, %v1485_v58, %v1488_v59  ;;  %v368_v19 = vld [vmem:[%s3951_s6 + $0x78] sm:$0xf]  ;;  %v369_v20 = vld [vmem:[%s3951_s6 + $0x7c] sm:$0xf]  ;;  %400 = vst.msk [vmem:[#allocation2 + $0x74] sm:$0xf] %vm370_vm1, %v367_v18  ;;  %v1492_v31 = vor.u32 %v1490_v61, %v1488_v59  ;;  %v602_v38 = vor.u32 %v600_v3, %v598_v2 }
  0x6c   : > { %401 = vst.msk [vmem:[#allocation2 + $0x78] sm:$0xf] %vm370_vm1, %v368_v19  ;;  %402 = vst.msk [vmem:[#allocation2 + $0x7c] sm:$0xf] %vm370_vm1, %v369_v20  ;;  %v403_v23 = vld [vmem:[%s4105_s9] sm:$0xf]  ;;  %v599_v37 = vsel %vm531_vm2, %v594_v21, %v598_v2 }
  0x6d   : > { %v404_v24 = vld [vmem:[%s4105_s9 + $0x4] sm:$0xf]  ;;  %v405_v26 = vld [vmem:[%s4105_s9 + $0x8] sm:$0xf]  ;;  %407 = vst.msk [vmem:[#allocation2 + $0x80] sm:$0xf] %vm370_vm1, %v403_v23 }
  0x6e   : > { %408 = vst.msk [vmem:[#allocation2 + $0x84] sm:$0xf] %vm370_vm1, %v404_v24  ;;  %409 = vst.msk [vmem:[#allocation2 + $0x88] sm:$0xf] %vm370_vm1, %v405_v26  ;;  %v4136_v29 = vld [vmem:[#allocation2 + $0x48] sm:$0xff]   ;;  %v1493_v32 = vshll.u32 %v4130_v28, 16 }
  0x6f   : > { %3263 = vmatmul.mubr.msk.bf16.gmra.mrb[8].mxu1 %vm664_vm3, %v583_v1  ;;  %v4138_v30 = vld [vmem:[#allocation3 + $0x8] sm:$0xf]  ;;  %v1497_v35 = vshrl.u32 %v4130_v28, 16  ;;  %v604_v40 = vshll.u32 %v4136_v29, 16  ;;  %v4146_v41 = vld [vmem:[#allocation2 + $0x50] sm:$0xff]   ;;  %v608_v47 = vshrl.u32 %v4136_v29, 16 }
  0x70   : > { %3266 = vmatprep.mubr.msk.bf16.mxu1 %vm664_vm3, %v591_v6  ;;  %3365 = vmatmul.mubr.msk.bf16.gmra.mrb[8].mxu0 %vm664_vm3, %v1482_v10  ;;  %v1495_v42 = vrot.slane %v1493_v32, 1  ;;  %v4148_v46 = vld [vmem:[#allocation2 + $0x50] sm:$0xff]   ;;  %v4151_v48 = vld [vmem:[#allocation2 + $0x58] sm:$0xff]   ;;  %v1500_v51 = vshll.u32 %v4146_v41, 16  ;;  %v1504_v52 = vshrl.u32 %v4146_v41, 16  ;;  %v4166_v4 = vld [vmem:[#allocation2 + $0x60] sm:$0xff]  }
  0x71   : > { %3368 = vmatprep.mubr.msk.bf16.mxu0 %vm664_vm3, %v1489_v16  ;;  %3618 = vmatprep.subr.msk.bf16.mxu1 %vm713_vm0, %v4138_v30  ;;  %v606_v50 = vrot.slane %v604_v40, 1  ;;  %v4155_v54 = vld [vmem:[#allocation2 + $0x58] sm:$0xff]   ;;  %v612_v57 = vshll.u32 %v4148_v46, 16  ;;  %v1507_v58 = vshll.u32 %v4151_v48, 16  ;;  %v616_v0 = vshrl.u32 %v4148_v46, 16  ;;  %v4169_v6 = vld [vmem:[#allocation2 + $0x60] sm:$0xff]  }
  0x72   : > { %v1496_v55 = vsel %vm531_vm2, %v1492_v31, %v1495_v42  ;;  %v1499_v56 = vor.u32 %v1497_v35, %v1495_v42  ;;  %v1502_v60 = vrot.slane %v1500_v51, 1  ;;  %v620_v3 = vshll.u32 %v4155_v54, 16  ;;  %v4173_v10 = vld [vmem:[#allocation2 + $0x68] sm:$0xff]   ;;  %v4181_v21 = vld [vmem:[#allocation2 + $0x70] sm:$0xff]  }
  0x73   : > { %v607_v59 = vsel %vm531_vm2, %v602_v38, %v606_v50  ;;  %v610_v61 = vor.u32 %v608_v47, %v606_v50  ;;  %v614_v1 = vrot.slane %v612_v57, 1  ;;  %v1509_v2 = vrot.slane %v1507_v58, 1  ;;  %v4176_v15 = vld [vmem:[#allocation2 + $0x68] sm:$0xff]   ;;  %v4194_v51 = vld [vmem:[#allocation2 + $0x70] sm:$0xff]   ;;  %v4197_v57 = vld [vmem:[#allocation2 + $0x78] sm:$0xff]  }
  0x74   : > { %v1511_v5 = vshrl.u32 %v4151_v48, 16  ;;  %v1503_v7 = vsel %vm531_vm2, %v1499_v56, %v1502_v60  ;;  %v1506_v8 = vor.u32 %v1504_v52, %v1502_v60  ;;  %v624_v9 = vshrl.u32 %v4155_v54, 16  ;;  %v4200_v60 = vld [vmem:[#allocation2 + $0x78] sm:$0xff]  }
  0x75   : > { %v618_v13 = vor.u32 %v616_v0, %v614_v1  ;;  %v622_v14 = vrot.slane %v620_v3, 1  ;;  %v615_v16 = vsel %vm531_vm2, %v610_v61, %v614_v1  ;;  %v1514_v19 = vshll.u32 %v4166_v4, 16  ;;  %v4203_v1 = vld [vmem:[#allocation2 + $0x80] sm:$0xff]  }
  0x76   : > { %v1513_v18 = vor.u32 %v1511_v5, %v1509_v2  ;;  %v628_v20 = vshll.u32 %v4169_v6, 16  ;;  %v1510_v23 = vsel %vm531_vm2, %v1506_v8, %v1509_v2  ;;  %v1521_v26 = vshll.u32 %v4173_v10, 16 }
  0x77   : > { %3267 = vmatmul.mubr.msk.bf16.gmra.mrb[12].mxu1 %vm664_vm3, %v599_v37  ;;  %v623_v24 = vsel %vm531_vm2, %v618_v13, %v622_v14  ;;  %v632_v31 = vshrl.u32 %v4169_v6, 16  ;;  %v1516_v32 = vrot.slane %v1514_v19, 1  ;;  %v1518_v37 = vshrl.u32 %v4166_v4, 16 }
  0x78   : > { %3369 = vmatmul.mubr.msk.bf16.gmra.mrb[12].mxu0 %vm664_vm3, %v1496_v55  ;;  %3270 = vmatprep.mubr.msk.bf16.mxu1 %vm664_vm3, %v607_v59  ;;  %v630_v35 = vrot.slane %v628_v20, 1  ;;  %v636_v38 = vshll.u32 %v4176_v15, 16  ;;  %v1525_v40 = vshrl.u32 %v4173_v10, 16  ;;  %v1528_v42 = vshll.u32 %v4181_v21, 16 }
  0x79   : > { %3372 = vmatprep.mubr.msk.bf16.mxu0 %vm664_vm3, %v1503_v7  ;;  %v1517_v47 = vsel %vm531_vm2, %v1513_v18, %v1516_v32  ;;  %v626_v50 = vor.u32 %v624_v9, %v622_v14  ;;  %v1523_v52 = vrot.slane %v1521_v26, 1  ;;  %v1520_v58 = vor.u32 %v1518_v37, %v1516_v32  ;;  %v3706_v18 = vld [vmem:[#allocation2 + $0x80] ss:$0 sps:$4 sm:$0x11]  }
  0x7a   : > { %v634_v55 = vor.u32 %v632_v31, %v630_v35  ;;  %v638_v56 = vrot.slane %v636_v38, 1  ;;  %v1530_v59 = vrot.slane %v1528_v42, 1  ;;  %v644_v0 = vshll.u32 %v4194_v51, 16  ;;  %v3707_v37 = vld [vmem:[#allocation2 + $0x88] ss:$0 sps:$4 sm:$0x11]  }
  0x7b   : > { %v1527_v61 = vor.u32 %v1525_v40, %v1523_v52  ;;  %v631_v2 = vsel %vm531_vm2, %v626_v50, %v630_v35  ;;  %v640_v3 = vshrl.u32 %v4176_v15, 16  ;;  %v1535_v5 = vshll.u32 %v4197_v57, 16 }
  0x7c   : > { %v639_v7 = vsel %vm531_vm2, %v634_v55, %v638_v56  ;;  %v1532_v8 = vshrl.u32 %v4181_v21, 16  ;;  %v648_v9 = vshrl.u32 %v4194_v51, 16  ;;  %v652_v13 = vshll.u32 %v4200_v60, 16 }
  0x7d   : > { %v1524_v14 = vsel %vm531_vm2, %v1520_v58, %v1523_v52  ;;  %v1531_v19 = vsel %vm531_vm2, %v1527_v61, %v1530_v59  ;;  %v646_v20 = vrot.slane %v644_v0, 1  ;;  %v642_v26 = vor.u32 %v640_v3, %v638_v56 }
  0x7e   : > { %v1537_v31 = vrot.slane %v1535_v5, 1  ;;  %v654_v35 = vrot.slane %v652_v13, 1  ;;  %v1534_v38 = vor.u32 %v1532_v8, %v1530_v59  ;;  %v656_v50 = vshrl.u32 %v4200_v60, 16  ;;  %v406_v13 = vld [vmem:[%s4105_s9 + $0xc] sm:$0xf] }
  0x7f   : > { %3271 = vmatmul.mubr.msk.bf16.gmra.mrb[16].mxu1 %vm664_vm3, %v615_v16  ;;  %v1542_v16 = vshll.u32 %v4203_v1, 16  ;;  %v650_v32 = vor.u32 %v648_v9, %v646_v20  ;;  %v660_v52 = vshll.u32 %v3706_v18, 16  ;;  %v1546_v58 = vshrl.u32 %v4203_v1, 16  ;;  %v3708_v9 = vld [vmem:[#allocation2 + $0x10] sm:$0xff]   ;;  %410 = vst.msk [vmem:[#allocation2 + $0x8c] sm:$0xf] %vm370_vm1, %v406_v13 }
  0x80   : > { %3274 = vmatprep.mubr.msk.bf16.mxu1 %vm664_vm3, %v623_v24  ;;  %3373 = vmatmul.mubr.msk.bf16.gmra.mrb[16].mxu0 %vm664_vm3, %v1510_v23  ;;  %v1539_v23 = vshrl.u32 %v4197_v57, 16  ;;  %v2158_v24 = vld [vmem:[#allocation3 + $0x14] sm:$0xf]  ;;  %v1538_v56 = vsel %vm531_vm2, %v1534_v38, %v1537_v31  ;;  %v1550_v61 = vshll.u32 %v3707_v37, 16  ;;  %v658_v59 = vor.u32 %v656_v50, %v654_v35  ;;  %v4244_v18 = vld [vmem:[#allocation2 + $0x20] sm:$0xff]  }
  0x81   : > { %3376 = vmatprep.mubr.msk.bf16.mxu0 %vm664_vm3, %v1517_v47  ;;  %3621 = vmatprep.subr.msk.bf16.mxu0 %vm713_vm0, %v2158_v24  ;;  %v1544_v40 = vrot.slane %v1542_v16, 1  ;;  %v647_v47 = vsel %vm531_vm2, %v642_v26, %v646_v20  ;;  %v655_v55 = vsel %vm531_vm2, %v650_v32, %v654_v35  ;;  %v4242_v16 = vld [vmem:[#allocation2 + $0x18] sm:$0xff]   ;;  %v4258_v20 = vld [vmem:[#allocation2 + $0x30] sm:$0xff]   ;;  %v2175_v32 = vshll.u32 %v4244_v18, 16 }
  0x82   : > { %v1541_v42 = vor.u32 %v1539_v23, %v1537_v31  ;;  %v1552_v5 = vrot.slane %v1550_v61, 1  ;;  %v4318_v23 = vld [vmem:[#allocation2 + $0x80] sm:$0xff]  }
  0x83   : > { %v1548_v3 = vor.u32 %v1546_v58, %v1544_v40 }
  0x84   : > { %v1545_v0 = vsel %vm531_vm2, %v1541_v42, %v1544_v40  ;;  %v2177_v40 = vrot.slane %v2175_v32, 1 }
  0x85   : > { %v1553_v8 = vsel %vm531_vm2, %v1548_v3, %v1552_v5 }
  0x86   : > { %v4330_v35 = vld [vmem:[#allocation2 + $0x88] sm:$0xff]  }
  0x87   : > { %3275 = vmatmul.mubr.msk.bf16.gmra.mrb[20].mxu1 %vm664_vm3, %v631_v2  ;;  %v662_v2 = vrot.slane %v660_v52, 1 }
  0x88   : > { %3278 = vmatprep.mubr.msk.bf16.mxu1 %vm664_vm3, %v639_v7  ;;  %3377 = vmatmul.mubr.msk.bf16.gmra.mrb[20].mxu0 %vm664_vm3, %v1524_v14  ;;  %v1238_v14 = vsel %vm713_vm0, %v4138_v30, 0  ;;  %v4256_v30 = vld [vmem:[#allocation2 + $0x28] sm:$0xff]  }
  0x89   : > { %3380 = vmatprep.mubr.msk.bf16.mxu0 %vm664_vm3, %v1531_v19  ;;  %v663_v7 = vsel %vm531_vm2, %v658_v59, %v662_v2  ;;  %v2327_v19 = vsel %vm713_vm0, %v2158_v24, 0  ;;  %v2162_v24 = vshrl.u32 %v3708_v9, 16  ;;  %v2182_v38 = vshll.u32 %v4256_v30, 16 }
  0x8b   : > { %v2184_v50 = vrot.slane %v2182_v38, 1 }
  0x8f   : > { %3279 = vmatmul.mubr.msk.bf16.gmra.mrb[24].mxu1 %vm664_vm3, %v647_v47 }
  0x90   : > { %3282 = vmatprep.mubr.msk.bf16.mxu1 %vm664_vm3, %v655_v55  ;;  %3381 = vmatmul.mubr.msk.bf16.gmra.mrb[24].mxu0 %vm664_vm3, %v1538_v56  ;;  %v2186_v55 = vshrl.u32 %v4256_v30, 16  ;;  %v2193_v56 = vshrl.u32 %v4258_v20, 16 }
  0x91   : > { %3384 = vmatprep.mubr.msk.bf16.mxu0 %vm664_vm3, %v1545_v0 }
  0x92   : > { %v2188_v0 = vor.u32 %v2186_v55, %v2184_v50 }
  0x97   : > { %3283 = vmatmul.mubr.msk.bf16.gmra.mrb[28].mxu1 %vm664_vm3, %v663_v7 }
  0x98   : > { %3288 = vmatprep.mubr.msk.bf16.mxu1 %vm664_vm3, %v3995_v25  ;;  %3385 = vmatmul.mubr.msk.bf16.gmra.mrb[28].mxu0 %vm664_vm3, %v1553_v8  ;;  %v3817_v25 = vmov 0  }
  0x99   : > { %3390 = vmatprep.mubr.msk.bf16.mxu0 %vm664_vm3, %v3708_v9  ;;  %411 = vst.msk [vmem:[#allocation2 + $0x90] sm:$0xf] %vm370_vm1, %v3817_v25 }
  0x9f   : > { %3289 = vmatmul.mubr.msk.bf16.vlgmr.msra.gmra.mrb[0].mxu1 %vm664_vm3, %v4000_v27  ;;  %v4268_v27 = vld [vmem:[#allocation2 + $0x38] sm:$0xff]  }
  0xa0   : > { %3321 = vmatpush3.bf16.msra.mxu1 %v1238_v14  ;;  %3292 = vmatprep.mubr.msk.bf16.mxu1 %vm664_vm3, %v4011_v36  ;;  %v4270_v36 = vld [vmem:[#allocation2 + $0x40] sm:$0xff]   ;;  %v2196_v58 = vshll.u32 %v4268_v27, 16  ;;  %v2200_v5 = vshrl.u32 %v4268_v27, 16  ;;  %v3724_v55 = vld [vmem:[#allocation2 + $0x90] ss:$0 sps:$4 sm:$0x11]  }
  0xa1   : > { %3391 = vmatmul.mubr.msk.bf16.vlgmr.msra.gmra.mrb[0].mxu0 %vm664_vm3, %v4242_v16  ;;  %v2203_v3 = vshll.u32 %v4270_v36, 16 }
  0xa2   : > { %3423 = vmatpush3.bf16.msra.mxu0 %v2327_v19  ;;  %3394 = vmatprep.mubr.msk.bf16.mxu0 %vm664_vm3, %v4244_v18  ;;  %v2198_v2 = vrot.slane %v2196_v58, 1  ;;  %v2274_v58 = vshll.u32 %v3724_v55, 16 }
  0xa4   : > { %v2202_v13 = vor.u32 %v2200_v5, %v2198_v2 }
  0xa7   : > { %3293 = vmatmul.mubr.msk.bf16.gmra.mrb[4].mxu1 %vm664_vm3, %v4020_v45  ;;  %v4280_v45 = vld [vmem:[#allocation2 + $0x48] sm:$0xff]  }
  0xa8   : > { %3296 = vmatprep.mubr.msk.bf16.mxu1 %vm664_vm3, %v4032_v62  ;;  %v4282_v62 = vld [vmem:[#allocation2 + $0x50] sm:$0xff]   ;;  %v2210_v8 = vshll.u32 %v4280_v45, 16  ;;  %v2214_v19 = vshrl.u32 %v4280_v45, 16 }
  0xa9   : > { %3395 = vmatmul.mubr.msk.bf16.gmra.mrb[4].mxu0 %vm664_vm3, %v4256_v30 }
  0xaa   : > { %3398 = vmatprep.mubr.msk.bf16.mxu0 %vm664_vm3, %v4258_v20 }
  0xaf   : > { %3297 = vmatmul.mubr.msk.bf16.gmra.mrb[8].mxu1 %vm664_vm3, %v4046_v11  ;;  %v4292_v11 = vld [vmem:[#allocation2 + $0x58] sm:$0xff]  }
  0xb0   : > { %3300 = vmatprep.mubr.msk.bf16.mxu1 %vm664_vm3, %v4054_v17  ;;  %v4294_v17 = vld [vmem:[#allocation2 + $0x60] sm:$0xff]   ;;  %v2224_v30 = vshll.u32 %v4292_v11, 16 }
  0xb1   : > { %3399 = vmatmul.mubr.msk.bf16.gmra.mrb[8].mxu0 %vm664_vm3, %v4268_v27 }
  0xb2   : > { %3402 = vmatprep.mubr.msk.bf16.mxu0 %vm664_vm3, %v4270_v36 }
  0xb7   : > { %3301 = vmatmul.mubr.msk.bf16.gmra.mrb[12].mxu1 %vm664_vm3, %v4067_v39  ;;  %v4304_v39 = vld [vmem:[#allocation2 + $0x68] sm:$0xff]  }
  0xb8   : > { %3304 = vmatprep.mubr.msk.bf16.mxu1 %vm664_vm3, %v4078_v49  ;;  %v4306_v49 = vld [vmem:[#allocation2 + $0x70] sm:$0xff]  }
  0xb9   : > { %3403 = vmatmul.mubr.msk.bf16.gmra.mrb[12].mxu0 %vm664_vm3, %v4280_v45  ;;  %v2226_v45 = vrot.slane %v2224_v30, 1  ;;  %v2245_v32 = vshll.u32 %v4306_v49, 16 }
  0xba   : > { %3406 = vmatprep.mubr.msk.bf16.mxu0 %vm664_vm3, %v4282_v62 }
  0xbf   : > { %3305 = vmatmul.mubr.msk.bf16.gmra.mrb[16].mxu1 %vm664_vm3, %v4136_v29  ;;  %v2164_v29 = vshll.u32 %v3708_v9, 16  ;;  %v2205_v9 = vrot.slane %v2203_v3, 1 }
  0xc0   : > { %3308 = vmatprep.mubr.msk.bf16.mxu1 %vm664_vm3, %v4148_v46  ;;  %v4316_v46 = vld [vmem:[#allocation2 + $0x78] sm:$0xff]  }
  0xc1   : > { %3407 = vmatmul.mubr.msk.bf16.gmra.mrb[16].mxu0 %vm664_vm3, %v4292_v11  ;;  %v2166_v26 = vrot.slane %v2164_v29, 1  ;;  %v2231_v29 = vshll.u32 %v4294_v17, 16 }
  0xc2   : > { %3410 = vmatprep.mubr.msk.bf16.mxu0 %vm664_vm3, %v4294_v17 }
  0xc7   : > { %3309 = vmatmul.mubr.msk.bf16.gmra.mrb[20].mxu1 %vm664_vm3, %v4155_v54  ;;  %v2168_v54 = vshll.u32 %v4242_v16, 16 }
  0xc8   : > { %3312 = vmatprep.mubr.msk.bf16.mxu1 %vm664_vm3, %v4169_v6  ;;  %v2167_v6 = vor.u32 %v2166_v26, %v2162_v24  ;;  %v2228_v24 = vshrl.u32 %v4292_v11, 16  ;;  %v2238_v26 = vshll.u32 %v4304_v39, 16 }
  0xc9   : > { %3411 = vmatmul.mubr.msk.bf16.gmra.mrb[20].mxu0 %vm664_vm3, %v4304_v39  ;;  %v2170_v31 = vrot.slane %v2168_v54, 1  ;;  %v2233_v54 = vrot.slane %v2231_v29, 1 }
  0xca   : > { %3414 = vmatprep.mubr.msk.bf16.mxu0 %vm664_vm3, %v4306_v49  ;;  %v2240_v11 = vrot.slane %v2238_v26, 1 }
  0xcb   : > { %v2171_v37 = vsel %vm531_vm2, %v2167_v6, %v2170_v31  ;;  %v2230_v6 = vor.u32 %v2228_v24, %v2226_v45 }
  0xcf   : > { %3313 = vmatmul.mubr.msk.bf16.gmra.mrb[24].mxu1 %vm664_vm3, %v4176_v15  ;;  %v2172_v15 = vshrl.u32 %v4242_v16, 16  ;;  %v2212_v16 = vrot.slane %v2210_v8, 1 }
  0xd0   : > { %3316 = vmatprep.mubr.msk.bf16.mxu1 %vm664_vm3, %v4194_v51  ;;  %v2179_v51 = vshrl.u32 %v4244_v18, 16  ;;  %v2217_v18 = vshll.u32 %v4282_v62, 16 }
  0xd1   : > { %3415 = vmatmul.mubr.msk.bf16.gmra.mrb[24].mxu0 %vm664_vm3, %v4316_v46  ;;  %v2174_v42 = vor.u32 %v2172_v15, %v2170_v31  ;;  %v2216_v27 = vor.u32 %v2214_v19, %v2212_v16  ;;  %v2242_v15 = vshrl.u32 %v4304_v39, 16 }
  0xd2   : > { %3418 = vmatprep.mubr.msk.bf16.mxu0 %vm664_vm3, %v4318_v23  ;;  %v2181_v47 = vor.u32 %v2179_v51, %v2177_v40  ;;  %v2247_v51 = vrot.slane %v2245_v32, 1 }
  0xd3   : > { %v2178_v52 = vsel %vm531_vm2, %v2174_v42, %v2177_v40  ;;  %v2244_v38 = vor.u32 %v2242_v15, %v2240_v11  ;;  %v2259_v42 = vshll.u32 %v4318_v23, 16 }
  0xd7   : > { %3317 = vmatmul.mubr.msk.bf16.gmra.mrb[28].mxu1 %vm664_vm3, %v4200_v60  ;;  %v2189_v60 = vshll.u32 %v4258_v20, 16  ;;  %v2219_v20 = vrot.slane %v2217_v18, 1 }
  0xd8   : > { %3322 = vmatprep.mubr.msk.bf16.mxu1 %vm664_vm3, %v4007_v33  ;;  %v2185_v33 = vsel %vm531_vm2, %v2181_v47, %v2184_v50  ;;  %v2256_v47 = vshrl.u32 %v4316_v46, 16  ;;  %v2266_v50 = vshll.u32 %v4330_v35, 16 }
  0xd9   : > { %3419 = vmatmul.mubr.msk.bf16.gmra.mrb[28].mxu0 %vm664_vm3, %v4330_v35  ;;  %v2191_v61 = vrot.slane %v2189_v60, 1  ;;  %v2261_v60 = vrot.slane %v2259_v42, 1 }
  0xda   : > { %3424 = vmatprep.mubr.msk.bf16.mxu0 %vm664_vm3, %v2171_v37  ;;  %v2252_v37 = vshll.u32 %v4316_v46, 16 }
  0xdb   : > { %v2195_v59 = vor.u32 %v2193_v56, %v2191_v61  ;;  %v2270_v56 = vshrl.u32 %v4330_v35, 16 }
  0xdc   : > { %v2254_v39 = vrot.slane %v2252_v37, 1 }
  0xdd   : > { %v2199_v7 = vsel %vm531_vm2, %v2195_v59, %v2198_v2 }
  0xdf   : > { %3323 = vmatmul.mubr.msk.bf16.vlgmr.msra.gmra.mrb[0].mxu1 %vm664_vm3, %v4009_v34  ;;  %v2192_v34 = vsel %vm531_vm2, %v2188_v0, %v2191_v61  ;;  %v2276_v61 = vrot.slane %v2274_v58, 1 }
  0xe0   : > { %3326 = vmatprep.mubr.msk.bf16.mxu1 %vm664_vm3, %v4018_v44  ;;  %v2207_v44 = vshrl.u32 %v4270_v36, 16 }
  0xe1   : > { %3425 = vmatmul.mubr.msk.bf16.vlgmr.msra.gmra.mrb[0].mxu0 %vm664_vm3, %v2178_v52  ;;  %v2258_v52 = vor.u32 %v2256_v47, %v2254_v39 }
  0xe2   : > { %3428 = vmatprep.mubr.msk.bf16.mxu0 %vm664_vm3, %v2185_v33  ;;  %v2209_v14 = vor.u32 %v2207_v44, %v2205_v9  ;;  %v2268_v33 = vrot.slane %v2266_v50, 1 }
  0xe4   : > { %v2213_v25 = vsel %vm531_vm2, %v2209_v14, %v2212_v16 }
  0xe7   : > { %3327 = vmatmul.mubr.msk.bf16.gmra.mrb[4].mxu1 %vm664_vm3, %v4025_v53  ;;  %v2206_v53 = vsel %vm531_vm2, %v2202_v13, %v2205_v9 }
  0xe8   : > { %3330 = vmatprep.mubr.msk.bf16.mxu1 %vm664_vm3, %v4034_v63  ;;  %v2221_v63 = vshrl.u32 %v4282_v62, 16 }
  0xe9   : > { %3429 = vmatmul.mubr.msk.bf16.gmra.mrb[4].mxu0 %vm664_vm3, %v2192_v34 }
  0xea   : > { %3432 = vmatprep.mubr.msk.bf16.mxu0 %vm664_vm3, %v2199_v7  ;;  %v2223_v36 = vor.u32 %v2221_v63, %v2219_v20 }
  0xec   : > { %v2227_v62 = vsel %vm531_vm2, %v2223_v36, %v2226_v45 }
  0xef   : > { %3331 = vmatmul.mubr.msk.bf16.gmra.mrb[8].mxu1 %vm664_vm3, %v4048_v12  ;;  %v2220_v12 = vsel %vm531_vm2, %v2216_v27, %v2219_v20 }
  0xf0   : > { %3334 = vmatprep.mubr.msk.bf16.mxu1 %vm664_vm3, %v4059_v22  ;;  %v2235_v22 = vshrl.u32 %v4294_v17, 16 }
  0xf1   : > { %3433 = vmatmul.mubr.msk.bf16.gmra.mrb[8].mxu0 %vm664_vm3, %v2206_v53 }
  0xf2   : > { %3436 = vmatprep.mubr.msk.bf16.mxu0 %vm664_vm3, %v2213_v25  ;;  %v2237_v31 = vor.u32 %v2235_v22, %v2233_v54 }
  0xf4   : > { %v2241_v17 = vsel %vm531_vm2, %v2237_v31, %v2240_v11 }
  0xf7   : > { %3335 = vmatmul.mubr.msk.bf16.gmra.mrb[12].mxu1 %vm664_vm3, %v4073_v43  ;;  %v2234_v43 = vsel %vm531_vm2, %v2230_v6, %v2233_v54 }
  0xf8   : > { %3338 = vmatprep.mubr.msk.bf16.mxu1 %vm664_vm3, %v4130_v28  ;;  %v2249_v28 = vshrl.u32 %v4306_v49, 16 }
  0xf9   : > { %3437 = vmatmul.mubr.msk.bf16.gmra.mrb[12].mxu0 %vm664_vm3, %v2220_v12 }
  0xfa   : > { %3440 = vmatprep.mubr.msk.bf16.mxu0 %vm664_vm3, %v2227_v62  ;;  %v2251_v40 = vor.u32 %v2249_v28, %v2247_v51 }
  0xfc   : > { %v2255_v49 = vsel %vm531_vm2, %v2251_v40, %v2254_v39 }
  0xff   : > { %3339 = vmatmul.mubr.msk.bf16.gmra.mrb[16].mxu1 %vm664_vm3, %v4146_v41  ;;  %v2248_v41 = vsel %vm531_vm2, %v2244_v38, %v2247_v51 }
 0x100   : > { %3342 = vmatprep.mubr.msk.bf16.mxu1 %vm664_vm3, %v4151_v48  ;;  %v2263_v48 = vshrl.u32 %v4318_v23, 16 }
 0x101   : > { %3441 = vmatmul.mubr.msk.bf16.gmra.mrb[16].mxu0 %vm664_vm3, %v2234_v43 }
 0x102   : > { %3444 = vmatprep.mubr.msk.bf16.mxu0 %vm664_vm3, %v2241_v17  ;;  %v2265_v46 = vor.u32 %v2263_v48, %v2261_v60 }
 0x104   : > { %v2269_v23 = vsel %vm531_vm2, %v2265_v46, %v2268_v33 }
 0x107   : > { %3343 = vmatmul.mubr.msk.bf16.gmra.mrb[20].mxu1 %vm664_vm3, %v4166_v4  ;;  %v2262_v4 = vsel %vm531_vm2, %v2258_v52, %v2261_v60 }
 0x108   : > { %3346 = vmatprep.mubr.msk.bf16.mxu1 %vm664_vm3, %v4173_v10  ;;  %v2272_v10 = vor.u32 %v2270_v56, %v2268_v33 }
 0x109   : > { %3445 = vmatmul.mubr.msk.bf16.gmra.mrb[20].mxu0 %vm664_vm3, %v2248_v41 }
 0x10a   : > { %3448 = vmatprep.mubr.msk.bf16.mxu0 %vm664_vm3, %v2255_v49  ;;  %v2277_v0 = vsel %vm531_vm2, %v2272_v10, %v2276_v61 }
 0x10f   : > { %3347 = vmatmul.mubr.msk.bf16.gmra.mrb[24].mxu1 %vm664_vm3, %v4181_v21 }
 0x110   : > { %3350 = vmatprep.mubr.msk.bf16.mxu1 %vm664_vm3, %v4197_v57 }
 0x111   : > { %3449 = vmatmul.mubr.msk.bf16.gmra.mrb[24].mxu0 %vm664_vm3, %v2262_v4 }
 0x112   : > { %3452 = vmatprep.mubr.msk.bf16.mxu0 %vm664_vm3, %v2269_v23 }
 0x117   : > { %3351 = vmatmul.mubr.msk.bf16.gmra.mrb[28].mxu1 %vm664_vm3, %v4203_v1 }
 0x119   : > { %3453 = vmatmul.mubr.msk.bf16.gmra.mrb[28].mxu0 %vm664_vm3, %v2277_v0 }
 0x1b2   : > { %v3324_v35 = vpop.f32.mrb[0].mxu1 }
 0x1b3   : > { %v1274_v21 = vpop.f32.mrb[1].mxu1 }
 0x1b4   : > { %v3426_v59 = vpop.f32.mrb[0].mxu0  ;;  %v3325_v2 = vpop.f32.mrb[2].mxu1 }
 0x1b5   : > { %v4428_v3 = vadd.f32 %v3426_v59, %v3324_v35  ;;  %v2363_v57 = vpop.f32.mrb[1].mxu0  ;;  %v1277_v34 = vpop.f32.mrb[3].mxu1 }
 0x1b6   : > { %v4430_v5 = vadd.f32 %v2363_v57, %v1274_v21  ;;  %v3427_v7 = vpop.f32.mrb[2].mxu0 }
 0x1b7   : > { %v4432_v44 = vadd.f32 %v3427_v7, %v3325_v2  ;;  %v2366_v8 = vpop.f32.mrb[3].mxu0  ;;  %2558 = vrot.lane.b32.xlu1 %v4428_v3, %s3818_s10 }
 0x1b8   : > { %v4436_v1 = vadd.f32 %v2366_v8, %v1277_v34  ;;  %2554 = vrot.lane.b32.xlu0 %v4430_v5, %s3818_s10 }
 0x1ba   : > { %v3328_v9 = vpop.f32.mrb[4].mxu1 }
 0x1bb   : > { %2560 = vrot.lane.b32.xlu1 %v4432_v44, %s3818_s10  ;;  %v1290_v13 = vpop.f32.mrb[5].mxu1 }
 0x1bc   : > { %v3430_v14 = vpop.f32.mrb[4].mxu0  ;;  %2556 = vrot.lane.b32.xlu0 %v4436_v1, %s3818_s10  ;;  %v3329_v16 = vpop.f32.mrb[6].mxu1 }
 0x1bd   : > { %v4444_v18 = vadd.f32 %v3430_v14, %v3328_v9  ;;  %v2379_v53 = vpop.f32.mrb[5].mxu0  ;;  %v1293_v19 = vpop.f32.mrb[7].mxu1 }
 0x1be   : > { %v4446_v25 = vadd.f32 %v2379_v53, %v1290_v13  ;;  %v3431_v63 = vpop.f32.mrb[6].mxu0 }
 0x1bf   : > { %v4448_v30 = vadd.f32 %v3431_v63, %v3329_v16  ;;  %v2382_v20 = vpop.f32.mrb[7].mxu0 }
 0x1c0   : > { %v4450_v27 = vadd.f32 %v2382_v20, %v1293_v19  ;;  %2566 = vrot.lane.b32.xlu0 %v4444_v18, %s3818_s10 }
 0x1c1   : > { %2568 = vrot.lane.b32.xlu1 %v4448_v30, %s3818_s10 }
 0x1c2   : > { %v3332_v36 = vpop.f32.mrb[8].mxu1 }
 0x1c3   : > { %v1306_v45 = vpop.f32.mrb[9].mxu1 }
 0x1c4   : > { %v3434_v29 = vpop.f32.mrb[8].mxu0  ;;  %2562 = vrot.lane.b32.xlu0 %v4446_v25, %s3818_s10  ;;  %v3333_v12 = vpop.f32.mrb[10].mxu1 }
 0x1c5   : > { %v4458_v24 = vadd.f32 %v3434_v29, %v3332_v36  ;;  %v2395_v62 = vpop.f32.mrb[9].mxu0  ;;  %2564 = vrot.lane.b32.xlu1 %v4450_v27, %s3818_s10  ;;  %v1309_v22 = vpop.f32.mrb[11].mxu1 }
 0x1c6   : > { %v4462_v26 = vadd.f32 %v2395_v62, %v1306_v45  ;;  %v3435_v54 = vpop.f32.mrb[10].mxu0 }
 0x1c7   : > { %v4464_v6 = vadd.f32 %v3435_v54, %v3333_v12  ;;  %v2398_v31 = vpop.f32.mrb[11].mxu0 }
 0x1c8   : > { %v4466_v11 = vadd.f32 %v2398_v31, %v1309_v22  ;;  %2574 = vrot.lane.b32.xlu0 %v4458_v24, %s3818_s10 }
 0x1c9   : > { %2576 = vrot.lane.b32.xlu1 %v4464_v6, %s3818_s10 }
 0x1ca   : > { %v3336_v32 = vpop.f32.mrb[12].mxu1 }
 0x1cb   : > { %v1322_v43 = vpop.f32.mrb[13].mxu1 }
 0x1cc   : > { %v3438_v15 = vpop.f32.mrb[12].mxu0  ;;  %2570 = vrot.lane.b32.xlu0 %v4462_v26, %s3818_s10  ;;  %v3337_v17 = vpop.f32.mrb[14].mxu1 }
 0x1cd   : > { %v4474_v28 = vadd.f32 %v3438_v15, %v3336_v32  ;;  %v2411_v37 = vpop.f32.mrb[13].mxu0  ;;  %2572 = vrot.lane.b32.xlu1 %v4466_v11, %s3818_s10  ;;  %v1325_v51 = vpop.f32.mrb[15].mxu1 }
 0x1ce   : > { %v4478_v38 = vadd.f32 %v2411_v37, %v1322_v43  ;;  %v3439_v40 = vpop.f32.mrb[14].mxu0 }
 0x1cf   : > { %v4480_v39 = vadd.f32 %v3439_v40, %v3337_v17  ;;  %v2414_v42 = vpop.f32.mrb[15].mxu0 }
 0x1d0   : > { %v4482_v41 = vadd.f32 %v2414_v42, %v1325_v51  ;;  %2582 = vrot.lane.b32.xlu0 %v4474_v28, %s3818_s10 }
 0x1d1   : > { %2584 = vrot.lane.b32.xlu1 %v4480_v39, %s3818_s10 }
 0x1d2   : > { %v3340_v47 = vpop.f32.mrb[16].mxu1 }
 0x1d3   : > { %v1338_v49 = vpop.f32.mrb[17].mxu1 }
 0x1d4   : > { %v3442_v48 = vpop.f32.mrb[16].mxu0  ;;  %2578 = vrot.lane.b32.xlu0 %v4478_v38, %s3818_s10  ;;  %v3341_v50 = vpop.f32.mrb[18].mxu1 }
 0x1d5   : > { %v4490_v60 = vadd.f32 %v3442_v48, %v3340_v47  ;;  %v2427_v52 = vpop.f32.mrb[17].mxu0  ;;  %2580 = vrot.lane.b32.xlu1 %v4482_v41, %s3818_s10  ;;  %v1341_v55 = vpop.f32.mrb[19].mxu1 }
 0x1d6   : > { %v4494_v46 = vadd.f32 %v2427_v52, %v1338_v49  ;;  %v3443_v33 = vpop.f32.mrb[18].mxu0  ;;  %v4558_v52 = vld [vmem:[#allocation5] ss:$0 sm:$0xff] }
 0x1d7   : > { %v4496_v4 = vadd.f32 %v3443_v33, %v3341_v50  ;;  %v2430_v56 = vpop.f32.mrb[19].mxu0 }
 0x1d8   : > { %v4498_v58 = vadd.f32 %v2430_v56, %v1341_v55  ;;  %2590 = vrot.lane.b32.xlu0 %v4490_v60, %s3818_s10 }
 0x1d9   : > { %2592 = vrot.lane.b32.xlu1 %v4496_v4, %s3818_s10 }
 0x1da   : > { %v3344_v23 = vpop.f32.mrb[20].mxu1 }
 0x1db   : > { %v1354_v10 = vpop.f32.mrb[21].mxu1 }
 0x1dc   : > { %v3446_v61 = vpop.f32.mrb[20].mxu0  ;;  %2586 = vrot.lane.b32.xlu0 %v4494_v46, %s3818_s10  ;;  %v3345_v0 = vpop.f32.mrb[22].mxu1 }
 0x1dd   : > { %v4506_v35 = vadd.f32 %v3446_v61, %v3344_v23  ;;  %v2443_v21 = vpop.f32.mrb[21].mxu0  ;;  %2588 = vrot.lane.b32.xlu1 %v4498_v58, %s3818_s10  ;;  %v1357_v59 = vpop.f32.mrb[23].mxu1 }
 0x1de   : > { %v4510_v2 = vadd.f32 %v2443_v21, %v1354_v10  ;;  %v3447_v57 = vpop.f32.mrb[22].mxu0 }
 0x1df   : > { %v4512_v34 = vadd.f32 %v3447_v57, %v3345_v0  ;;  %v2446_v7 = vpop.f32.mrb[23].mxu0 }
 0x1e0   : > { %v4514_v8 = vadd.f32 %v2446_v7, %v1357_v59  ;;  %2598 = vrot.lane.b32.xlu0 %v4506_v35, %s3818_s10 }
 0x1e1   : > { %2600 = vrot.lane.b32.xlu1 %v4512_v34, %s3818_s10 }
 0x1e2   : > { %v3348_v9 = vpop.f32.mrb[24].mxu1 }
 0x1e3   : > { %v1370_v13 = vpop.f32.mrb[25].mxu1 }
 0x1e4   : > { %v3450_v14 = vpop.f32.mrb[24].mxu0  ;;  %2594 = vrot.lane.b32.xlu0 %v4510_v2, %s3818_s10  ;;  %v3349_v16 = vpop.f32.mrb[26].mxu1 }
 0x1e5   : > { %v4522_v53 = vadd.f32 %v3450_v14, %v3348_v9  ;;  %v2459_v19 = vpop.f32.mrb[25].mxu0  ;;  %2596 = vrot.lane.b32.xlu1 %v4514_v8, %s3818_s10  ;;  %v1373_v63 = vpop.f32.mrb[27].mxu1 }
 0x1e6   : > { %v4526_v20 = vadd.f32 %v2459_v19, %v1370_v13  ;;  %v3451_v36 = vpop.f32.mrb[26].mxu0 }
 0x1e7   : > { %v4528_v45 = vadd.f32 %v3451_v36, %v3349_v16  ;;  %v2462_v29 = vpop.f32.mrb[27].mxu0 }
 0x1e8   : > { %v4530_v12 = vadd.f32 %v2462_v29, %v1373_v63  ;;  %2606 = vrot.lane.b32.xlu0 %v4522_v53, %s3818_s10 }
 0x1e9   : > { %2608 = vrot.lane.b32.xlu1 %v4528_v45, %s3818_s10 }
 0x1ea   : > { %v3352_v62 = vpop.f32.mrb[28].mxu1 }
 0x1eb   : > { %v1386_v22 = vpop.f32.mrb[29].mxu1 }
 0x1ec   : > { %v3454_v54 = vpop.f32.mrb[28].mxu0  ;;  %2602 = vrot.lane.b32.xlu0 %v4526_v20, %s3818_s10  ;;  %v3353_v31 = vpop.f32.mrb[30].mxu1 }
 0x1ed   : > { %v4538_v32 = vadd.f32 %v3454_v54, %v3352_v62  ;;  %v2475_v43 = vpop.f32.mrb[29].mxu0  ;;  %2604 = vrot.lane.b32.xlu1 %v4530_v12, %s3818_s10  ;;  %v1389_v15 = vpop.f32.mrb[31].mxu1 }
 0x1ee   : > { %v4542_v17 = vadd.f32 %v2475_v43, %v1386_v22  ;;  %v3455_v37 = vpop.f32.mrb[30].mxu0 }
 0x1ef   : > { %v4544_v51 = vadd.f32 %v3455_v37, %v3353_v31  ;;  %v2478_v40 = vpop.f32.mrb[31].mxu0 }
 0x1f0   : > { %v4546_v42 = vadd.f32 %v2478_v40, %v1389_v15  ;;  %2610 = vrot.lane.b32.xlu0 %v4542_v17, %s3818_s10 }
 0x1f2   : > { %2612 = vrot.lane.b32.xlu1 %v4546_v42, %s3818_s10 }
 0x1f4   : > { %2614 = vrot.lane.b32.xlu0 %v4538_v32, %s3818_s10 }
 0x1f6   : > { %2616 = vrot.lane.b32.xlu1 %v4544_v51, %s3818_s10 }
 0x229   : > { %v2559_v47 = vpop.permute.xlu1 %2558 }
 0x22a   : > { %v2652_v49 = vmax.f32 %v4428_v3, %v2559_v47  ;;  %v2555_v48 = vpop.permute.xlu0 %2554 }
 0x22b   : > { %v2650_v50 = vmax.f32 %v4430_v5, %v2555_v48 }
 0x22d   : > { %v2682_v55 = vmax.f32 %v2650_v50, %v2652_v49  ;;  %v2561_v33 = vpop.permute.xlu1 %2560 }
 0x22e   : > { %v2653_v56 = vmax.f32 %v4432_v44, %v2561_v33  ;;  %v2557_v23 = vpop.permute.xlu0 %2556 }
 0x22f   : > { %v2705_v10 = vadd.f32 %v4558_v52, %v2682_v55  ;;  %v2651_v61 = vmax.f32 %v4436_v1, %v2557_v23 }
 0x231   : > { %v2721_v0 = vmax.f32 %v2705_v10, 0.0  ;;  %v2683_v21 = vmax.f32 %v2651_v61, %v2653_v56 }
 0x232   : > { %v2567_v3 = vpop.permute.xlu0 %2566 }
 0x233   : > { %v3134_v5 = vpack.c.bf16 %v2721_v0, %v2721_v0  ;;  %v2706_v44 = vadd.f32 %v4558_v52, %v2683_v21  ;;  %v2569_v59 = vpop.permute.xlu1 %2568  ;;  %v2656_v9 = vmax.f32 %v4444_v18, %v2567_v3 }
 0x234   : > { %v2657_v16 = vmax.f32 %v4448_v30, %v2569_v59 }
 0x235   : > { %2802 = vst.msk [vmem:[%s4567_s14] sm:$0xf] %vm2801_vm4, %v3134_v5  ;;  %v2722_v57 = vmax.f32 %v2706_v44, 0.0 }
 0x236   : > { %v2563_v1 = vpop.permute.xlu0 %2562 }
 0x237   : > { %v3135_v7 = vpack.c.bf16 %v2722_v57, %v2722_v57  ;;  %v2654_v13 = vmax.f32 %v4446_v25, %v2563_v1  ;;  %v2565_v14 = vpop.permute.xlu1 %2564 }
 0x238   : > { %v2655_v19 = vmax.f32 %v4450_v27, %v2565_v14 }
 0x239   : > { %2804 = vst.msk [vmem:[%s4567_s14 + $0x4] sm:$0x3] %vm2803_vm5, %v3135_v7  ;;  %v2684_v63 = vmax.f32 %v2654_v13, %v2656_v9 }
 0x23a   : > { %v2685_v36 = vmax.f32 %v2655_v19, %v2657_v16  ;;  %v2575_v29 = vpop.permute.xlu0 %2574 }
 0x23b   : > { %v2707_v62 = vadd.f32 %v4558_v52, %v2684_v63  ;;  %v2577_v22 = vpop.permute.xlu1 %2576  ;;  %v2660_v30 = vmax.f32 %v4458_v24, %v2575_v29 }
 0x23c   : > { %v2708_v54 = vadd.f32 %v4558_v52, %v2685_v36  ;;  %v2661_v40 = vmax.f32 %v4464_v6, %v2577_v22 }
 0x23d   : > { %v2723_v18 = vmax.f32 %v2707_v62, 0.0 }
 0x23e   : > { %v2724_v31 = vmax.f32 %v2708_v54, 0.0  ;;  %v2571_v25 = vpop.permute.xlu0 %2570 }
 0x23f   : > { %v3136_v43 = vpack.c.bf16 %v2723_v18, %v2723_v18  ;;  %v2658_v27 = vmax.f32 %v4462_v26, %v2571_v25  ;;  %v2573_v15 = vpop.permute.xlu1 %2572 }
 0x240   : > { %v3137_v37 = vpack.c.bf16 %v2724_v31, %v2724_v31  ;;  %v2659_v47 = vmax.f32 %v4466_v11, %v2573_v15 }
 0x241   : > { %2805 = vst.msk [vmem:[%s4567_s14 + $0x8] sm:$0xf] %vm2801_vm4, %v3136_v43  ;;  %v2686_v49 = vmax.f32 %v2658_v27, %v2660_v30 }
 0x242   : > { %2806 = vst.msk [vmem:[%s4567_s14 + $0xc] sm:$0x3] %vm2803_vm5, %v3137_v37  ;;  %v2687_v48 = vmax.f32 %v2659_v47, %v2661_v40  ;;  %v2583_v50 = vpop.permute.xlu0 %2582 }
 0x243   : > { %v2709_v55 = vadd.f32 %v4558_v52, %v2686_v49  ;;  %v2585_v24 = vpop.permute.xlu1 %2584  ;;  %v2664_v11 = vmax.f32 %v4474_v28, %v2583_v50 }
 0x244   : > { %v2710_v26 = vadd.f32 %v4558_v52, %v2687_v48  ;;  %v2665_v21 = vmax.f32 %v4480_v39, %v2585_v24 }
 0x245   : > { %v2725_v33 = vmax.f32 %v2709_v55, 0.0 }
 0x246   : > { %v2726_v56 = vmax.f32 %v2710_v26, 0.0  ;;  %v2579_v23 = vpop.permute.xlu0 %2578 }
 0x247   : > { %v3138_v6 = vpack.c.bf16 %v2725_v33, %v2725_v33  ;;  %v2662_v10 = vmax.f32 %v4478_v38, %v2579_v23  ;;  %v2581_v61 = vpop.permute.xlu1 %2580 }
 0x248   : > { %v3139_v0 = vpack.c.bf16 %v2726_v56, %v2726_v56  ;;  %v2663_v3 = vmax.f32 %v4482_v41, %v2581_v61 }
 0x249   : > { %2807 = vst.msk [vmem:[%s4567_s14 + $0x10] sm:$0xf] %vm2801_vm4, %v3138_v6  ;;  %v2688_v5 = vmax.f32 %v2662_v10, %v2664_v11 }
 0x24a   : > { %2808 = vst.msk [vmem:[%s4567_s14 + $0x14] sm:$0x3] %vm2803_vm5, %v3139_v0  ;;  %v2689_v44 = vmax.f32 %v2663_v3, %v2665_v21  ;;  %v2591_v59 = vpop.permute.xlu0 %2590 }
 0x24b   : > { %v2711_v57 = vadd.f32 %v4558_v52, %v2688_v5  ;;  %v2593_v28 = vpop.permute.xlu1 %2592  ;;  %v2668_v41 = vmax.f32 %v4490_v60, %v2591_v59 }
 0x24c   : > { %v2712_v38 = vadd.f32 %v4558_v52, %v2689_v44  ;;  %v2669_v19 = vmax.f32 %v4496_v4, %v2593_v28 }
 0x24d   : > { %v2727_v1 = vmax.f32 %v2711_v57, 0.0 }
 0x24e   : > { %v2728_v7 = vmax.f32 %v2712_v38, 0.0  ;;  %v2587_v9 = vpop.permute.xlu0 %2586 }
 0x24f   : > { %v3140_v39 = vpack.c.bf16 %v2727_v1, %v2727_v1  ;;  %v2666_v13 = vmax.f32 %v4494_v46, %v2587_v9  ;;  %v2589_v14 = vpop.permute.xlu1 %2588 }
 0x250   : > { %v3141_v16 = vpack.c.bf16 %v2728_v7, %v2728_v7  ;;  %v2667_v63 = vmax.f32 %v4498_v58, %v2589_v14 }
 0x251   : > { %2809 = vst.msk [vmem:[%s4567_s14 + $0x18] sm:$0xf] %vm2801_vm4, %v3140_v39  ;;  %v2690_v36 = vmax.f32 %v2666_v13, %v2668_v41 }
 0x252   : > { %2810 = vst.msk [vmem:[%s4567_s14 + $0x1c] sm:$0x3] %vm2803_vm5, %v3141_v16  ;;  %v2691_v29 = vmax.f32 %v2667_v63, %v2669_v19  ;;  %v2599_v62 = vpop.permute.xlu0 %2598 }
 0x253   : > { %v2713_v22 = vadd.f32 %v4558_v52, %v2690_v36  ;;  %v2601_v60 = vpop.permute.xlu1 %2600  ;;  %v2672_v58 = vmax.f32 %v4506_v35, %v2599_v62 }
 0x254   : > { %v2714_v46 = vadd.f32 %v4558_v52, %v2691_v29  ;;  %v2673_v27 = vmax.f32 %v4512_v34, %v2601_v60 }
 0x255   : > { %v2729_v54 = vmax.f32 %v2713_v22, 0.0 }
 0x256   : > { %v2730_v18 = vmax.f32 %v2714_v46, 0.0  ;;  %v2595_v31 = vpop.permute.xlu0 %2594 }
 0x257   : > { %v3142_v4 = vpack.c.bf16 %v2729_v54, %v2729_v54  ;;  %v2670_v25 = vmax.f32 %v4510_v2, %v2595_v31  ;;  %v2597_v43 = vpop.permute.xlu1 %2596 }
 0x258   : > { %v3143_v30 = vpack.c.bf16 %v2730_v18, %v2730_v18  ;;  %v2671_v15 = vmax.f32 %v4514_v8, %v2597_v43 }
 0x259   : > { %2811 = vst.msk [vmem:[%s4567_s14 + $0x20] sm:$0xf] %vm2801_vm4, %v3142_v4  ;;  %v2692_v37 = vmax.f32 %v2670_v25, %v2672_v58 }
 0x25a   : > { %2812 = vst.msk [vmem:[%s4567_s14 + $0x24] sm:$0x3] %vm2803_vm5, %v3143_v30  ;;  %v2693_v40 = vmax.f32 %v2671_v15, %v2673_v27  ;;  %v2607_v47 = vpop.permute.xlu0 %2606 }
 0x25b   : > { %v2715_v49 = vadd.f32 %v4558_v52, %v2692_v37  ;;  %v2609_v35 = vpop.permute.xlu1 %2608  ;;  %v2676_v8 = vmax.f32 %v4522_v53, %v2607_v47 }
 0x25c   : > { %v2716_v2 = vadd.f32 %v4558_v52, %v2693_v40  ;;  %v2677_v56 = vmax.f32 %v4528_v45, %v2609_v35 }
 0x25d   : > { %v2731_v48 = vmax.f32 %v2715_v49, 0.0 }
 0x25e   : > { %v2732_v50 = vmax.f32 %v2716_v2, 0.0  ;;  %v2603_v55 = vpop.permute.xlu0 %2602 }
 0x25f   : > { %v3144_v34 = vpack.c.bf16 %v2731_v48, %v2731_v48  ;;  %v2674_v24 = vmax.f32 %v4526_v20, %v2603_v55  ;;  %v2605_v26 = vpop.permute.xlu1 %2604 }
 0x260   : > { %v3145_v33 = vpack.c.bf16 %v2732_v50, %v2732_v50  ;;  %v2675_v23 = vmax.f32 %v4530_v12, %v2605_v26 }
 0x261   : > { %2813 = vst.msk [vmem:[%s4567_s14 + $0x28] sm:$0xf] %vm2801_vm4, %v3144_v34  ;;  %v2694_v6 = vmax.f32 %v2674_v24, %v2676_v8 }
 0x262   : > { %2814 = vst.msk [vmem:[%s4567_s14 + $0x2c] sm:$0x3] %vm2803_vm5, %v3145_v33  ;;  %v2695_v11 = vmax.f32 %v2675_v23, %v2677_v56  ;;  %v2611_v10 = vpop.permute.xlu0 %2610 }
 0x263   : > { %v2717_v61 = vadd.f32 %v4558_v52, %v2694_v6  ;;  %v2678_v12 = vmax.f32 %v4542_v17, %v2611_v10 }
 0x264   : > { %v2718_v53 = vadd.f32 %v4558_v52, %v2695_v11  ;;  %v2613_v20 = vpop.permute.xlu1 %2612 }
 0x265   : > { %v2733_v0 = vmax.f32 %v2717_v61, 0.0  ;;  %v2679_v57 = vmax.f32 %v4546_v42, %v2613_v20 }
 0x266   : > { %v2734_v21 = vmax.f32 %v2718_v53, 0.0  ;;  %v2615_v3 = vpop.permute.xlu0 %2614 }
 0x267   : > { %v3146_v45 = vpack.c.bf16 %v2733_v0, %v2733_v0  ;;  %v2680_v5 = vmax.f32 %v4538_v32, %v2615_v3 }
 0x268   : > { %v3147_v44 = vpack.c.bf16 %v2734_v21, %v2734_v21  ;;  %v2617_v59 = vpop.permute.xlu1 %2616 }
 0x269   : > { %2815 = vst.msk [vmem:[%s4567_s14 + $0x30] sm:$0xf] %vm2801_vm4, %v3146_v45  ;;  %v2696_v28 = vmax.f32 %v2678_v12, %v2680_v5  ;;  %v2681_v38 = vmax.f32 %v4544_v51, %v2617_v59 }
 0x26a   : > { %2816 = vst.msk [vmem:[%s4567_s14 + $0x34] sm:$0x3] %vm2803_vm5, %v3147_v44 }
 0x26b   : > { %v2719_v1 = vadd.f32 %v4558_v52, %v2696_v28  ;;  %v2697_v7 = vmax.f32 %v2679_v57, %v2681_v38 }
 0x26d   : > { %v2735_v9 = vmax.f32 %v2719_v1, 0.0  ;;  %v2720_v17 = vadd.f32 %v4558_v52, %v2697_v7 }
 0x26f   : > { %v3148_v39 = vpack.c.bf16 %v2735_v9, %v2735_v9  ;;  %v2736_v32 = vmax.f32 %v2720_v17, 0.0 }
 0x271   : > { %2817 = vst.msk [vmem:[%s4567_s14 + $0x38] sm:$0xf] %vm2801_vm4, %v3148_v39  ;;  %v3149_v41 = vpack.c.bf16 %v2736_v32, %v2736_v32 }
 0x273   : > { %2818 = vst.msk [vmem:[%s4567_s14 + $0x3c] sm:$0x3] %vm2803_vm5, %v3149_v41 }
 0x274 PF: > { %s16_s17 = sadd.s32 1, %s3811_s17   ;;  %s4666_s15 = smov %s3807_s16 }
 0x275   : > { %p13_p6 = scmp.ge.s32.totalorder %s16_s17, 4   ;;  %s4667_s16 = smov %s4669_s19 }
 0x277   :  { %15 = sbr.rel (!%p13_p6) target bundleno = 3 (0x3), region = 83 }
 0x27e   :  { %2851 = vsyncpa [#allocation4], 1 }
 0x27f   :  { %2853 = vsyncpa [#allocation4 + $0x1], 1 }
 0x280   :  { %2854 = vsyncpa [#allocation6], 1 }

// kernel: image_encoder_forward.7
= control target key start
LH: loop header
LB: loop body
LE: loop exit
PB: predicated region body
PF: predicated region fallthrough
CT: control target
= control target key end

     0   :  { %8 = vsyncpa [#allocation5], 0  ;;  %s6627_s0 = inlined_call_operand.vmem [shape: bf16[2,1536], index: 0, kind: input, shape index: {}]   ;;  %s6628_s1 = inlined_call_operand.vmem [shape: bf16[1536,1024], index: 1, kind: input, shape index: {}]   ;;  %s6629_s2 = inlined_call_operand.vmem [shape: f32[1,1024], index: 2, kind: input, shape index: {}]   ;;  %s6630_s3 = inlined_call_operand.hbm [shape: f32[2,1024], index: 3, kind: output, shape index: {}]  }
   0x1   :  { %10 = vsyncpa [#allocation5 + $0x1], 0  ;;  %s5263_s12 = smov 0   ;;  %s5265_s13 = smov 0  }
   0x2   :  { %s5267_s14 = smov 0   ;;  %s5269_s15 = smov 0  }
   0x3   :  { %s5271_s16 = smov 0   ;;  %s5273_s17 = smov 0  }
   0x4 LB: > { %s4082_s18 = sadd.s32 4294967295, %s5238_s17   ;;  %s4083_s19 = sadd.s32 4294967294, %s5238_s17   ;;  %s5238_s17 = sphi %s5273_s17, %s16_s17   ;;  %s5234_s16 = sphi %s5271_s16, %s6637_s16   ;;  %s5230_s15 = sphi %s5269_s15, %s6636_s15   ;;  %s5226_s14 = sphi %s5267_s14, %s6635_s14   ;;  %s5222_s13 = sphi %s5265_s13, %s6634_s13   ;;  %s5218_s12 = sphi %s5263_s12, %s6633_s12  }
   0x5   : > { %s28_s20 = sadd.s32 1, %s5234_s16  ;;  %s63_s21 = sadd.s32 1, %s5226_s14 }
   0x6   : > { %p30_p0 = scmp.ge.s32.totalorder %s28_s20, 2  ;;  %p70_p1 = scmp.ne.s32.totalorder %s5226_s14, %s5222_s13 }
   0x7   : > { %p71_p2 = scmp.eq.s32.totalorder %s5238_s17, 0  ;;  %p126_p3 = scmp.eq.s32.totalorder %s4082_s18, 1 }
   0x8   : > { %s6639_s20 = smov (%p30_p0, %s28_s20), 0  ;;  %p131_p6 = scmp.ne.s32.totalorder %s5222_s13, %s5218_s12 }
   0x9   : > { %p72_p4 = por %p71_p2, %p70_p1  ;;  %p5302_p5 = por %p126_p3, %p70_p1 }
   0xa   : > { %s59_s23 = ssub.s32 %s5234_s16, %s6639_s20  ;;  %p132_p8 = scmp.eq.s32.totalorder %s4083_s19, 1 }
   0xb   : > { %p61_p7 = scmp.eq.s32.totalorder %s59_s23, 0  ;;  %p4086_p10 = scmp.ge.s32.totalorder %s5238_s17, 2 }
   0xc   : > { %p5313_p9 = por %p132_p8, %p131_p6 }
   0xd   : > { %s5311_s24 = scalar_select %p61_p7, %s5226_s14, %s63_s21  }
   0xe   : > { %156 = sbr.rel (%p4086_p10) target bundleno = 217 (0xd9), region = 20 }
  0x15   : > { %159 = sbr.rel (!%p72_p4) target bundleno = 217 (0xd9), region = 24  ;;  %s161_s26 = sand.u32 (%p72_p4), 1, %s5226_s14  }
  0x16   : > { %s4482_s27 = sshll.u32 (%p72_p4), %s5234_s16, 4  ;;  %s4524_s28 = smul.u32 (%p72_p4), 3072, %s161_s26 }
  0x17   : > { %s5325_s4 = scalar_lea.vmem (%p72_p4), %s6628_s1, %s4482_s27 }
  0x18   : > { %v182_v0 = vld [vmem:[%s5325_s4] sm:$0xff] (%p72_p4)  ;;  %v184_v1 = vld [vmem:[%s5325_s4 + $0x8] sm:$0xff] (%p72_p4)  ;;  %s5333_s5 = scalar_lea.vmem (%p72_p4), [#allocation3], %s4524_s28 }
  0x19   : > { %v186_v2 = vld [vmem:[%s5325_s4 + $0x20] sm:$0xff] (%p72_p4)  ;;  %v188_v3 = vld [vmem:[%s5325_s4 + $0x28] sm:$0xff] (%p72_p4)  ;;  %183 = vst [vmem:[%s5333_s5] sm:$0xff] (%p72_p4), %v182_v0  ;;  %185 = vst [vmem:[%s5333_s5 + $0x8] sm:$0xff] (%p72_p4), %v184_v1 }
  0x1a   : > { %v190_v4 = vld [vmem:[%s5325_s4 + $0x40] sm:$0xff] (%p72_p4)  ;;  %v192_v5 = vld [vmem:[%s5325_s4 + $0x48] sm:$0xff] (%p72_p4)  ;;  %187 = vst [vmem:[%s5333_s5 + $0x10] sm:$0xff] (%p72_p4), %v186_v2  ;;  %189 = vst [vmem:[%s5333_s5 + $0x18] sm:$0xff] (%p72_p4), %v188_v3 }
  0x1b   : > { %191 = vst [vmem:[%s5333_s5 + $0x20] sm:$0xff] (%p72_p4), %v190_v4  ;;  %193 = vst [vmem:[%s5333_s5 + $0x28] sm:$0xff] (%p72_p4), %v192_v5  ;;  %v194_v6 = vld [vmem:[%s5325_s4 + $0x60] sm:$0xff] (%p72_p4)  ;;  %v196_v7 = vld [vmem:[%s5325_s4 + $0x68] sm:$0xff] (%p72_p4) }
  0x1c   : > { %v198_v8 = vld [vmem:[%s5325_s4 + $0x80] sm:$0xff]  ;;  %195 = vst [vmem:[%s5333_s5 + $0x30] sm:$0xff] %v194_v6  ;;  %197 = vst [vmem:[%s5333_s5 + $0x38] sm:$0xff] %v196_v7  ;;  %v200_v9 = vld [vmem:[%s5325_s4 + $0x88] sm:$0xff] }
  0x1d   : > { %199 = vst [vmem:[%s5333_s5 + $0x40] sm:$0xff] %v198_v8  ;;  %v202_v10 = vld [vmem:[%s5325_s4 + $0xa0] sm:$0xff]  ;;  %v204_v11 = vld [vmem:[%s5325_s4 + $0xa8] sm:$0xff]  ;;  %201 = vst [vmem:[%s5333_s5 + $0x48] sm:$0xff] %v200_v9 }
  0x1e   : > { %203 = vst [vmem:[%s5333_s5 + $0x50] sm:$0xff] %v202_v10  ;;  %205 = vst [vmem:[%s5333_s5 + $0x58] sm:$0xff] %v204_v11  ;;  %v206_v12 = vld [vmem:[%s5325_s4 + $0xc0] sm:$0xff]  ;;  %v208_v13 = vld [vmem:[%s5325_s4 + $0xc8] sm:$0xff] }
  0x1f   : > { %v210_v14 = vld [vmem:[%s5325_s4 + $0xe0] sm:$0xff]  ;;  %207 = vst [vmem:[%s5333_s5 + $0x60] sm:$0xff] %v206_v12  ;;  %209 = vst [vmem:[%s5333_s5 + $0x68] sm:$0xff] %v208_v13  ;;  %v212_v15 = vld [vmem:[%s5325_s4 + $0xe8] sm:$0xff] }
  0x20   : > { %211 = vst [vmem:[%s5333_s5 + $0x70] sm:$0xff] %v210_v14  ;;  %v214_v16 = vld [vmem:[%s5325_s4 + $0x100] sm:$0xff]  ;;  %v216_v17 = vld [vmem:[%s5325_s4 + $0x108] sm:$0xff]  ;;  %213 = vst [vmem:[%s5333_s5 + $0x78] sm:$0xff] %v212_v15 }
  0x21   : > { %215 = vst [vmem:[%s5333_s5 + $0x80] sm:$0xff] %v214_v16  ;;  %217 = vst [vmem:[%s5333_s5 + $0x88] sm:$0xff] %v216_v17  ;;  %v218_v18 = vld [vmem:[%s5325_s4 + $0x120] sm:$0xff]  ;;  %v220_v19 = vld [vmem:[%s5325_s4 + $0x128] sm:$0xff] }
  0x22   : > { %v222_v20 = vld [vmem:[%s5325_s4 + $0x140] sm:$0xff]  ;;  %219 = vst [vmem:[%s5333_s5 + $0x90] sm:$0xff] %v218_v18  ;;  %221 = vst [vmem:[%s5333_s5 + $0x98] sm:$0xff] %v220_v19  ;;  %v224_v21 = vld [vmem:[%s5325_s4 + $0x148] sm:$0xff] }
  0x23   : > { %223 = vst [vmem:[%s5333_s5 + $0xa0] sm:$0xff] %v222_v20  ;;  %v226_v22 = vld [vmem:[%s5325_s4 + $0x160] sm:$0xff]  ;;  %v228_v23 = vld [vmem:[%s5325_s4 + $0x168] sm:$0xff]  ;;  %225 = vst [vmem:[%s5333_s5 + $0xa8] sm:$0xff] %v224_v21 }
  0x24   : > { %227 = vst [vmem:[%s5333_s5 + $0xb0] sm:$0xff] %v226_v22  ;;  %229 = vst [vmem:[%s5333_s5 + $0xb8] sm:$0xff] %v228_v23  ;;  %v230_v24 = vld [vmem:[%s5325_s4 + $0x180] sm:$0xff]  ;;  %v232_v25 = vld [vmem:[%s5325_s4 + $0x188] sm:$0xff] }
  0x25   : > { %v234_v26 = vld [vmem:[%s5325_s4 + $0x1a0] sm:$0xff]  ;;  %231 = vst [vmem:[%s5333_s5 + $0xc0] sm:$0xff] %v230_v24  ;;  %233 = vst [vmem:[%s5333_s5 + $0xc8] sm:$0xff] %v232_v25  ;;  %v236_v27 = vld [vmem:[%s5325_s4 + $0x1a8] sm:$0xff] }
  0x26   : > { %235 = vst [vmem:[%s5333_s5 + $0xd0] sm:$0xff] %v234_v26  ;;  %v238_v28 = vld [vmem:[%s5325_s4 + $0x1c0] sm:$0xff]  ;;  %v240_v29 = vld [vmem:[%s5325_s4 + $0x1c8] sm:$0xff]  ;;  %237 = vst [vmem:[%s5333_s5 + $0xd8] sm:$0xff] %v236_v27 }
  0x27   : > { %239 = vst [vmem:[%s5333_s5 + $0xe0] sm:$0xff] %v238_v28  ;;  %241 = vst [vmem:[%s5333_s5 + $0xe8] sm:$0xff] %v240_v29  ;;  %v242_v30 = vld [vmem:[%s5325_s4 + $0x1e0] sm:$0xff]  ;;  %v244_v31 = vld [vmem:[%s5325_s4 + $0x1e8] sm:$0xff] }
  0x28   : > { %v246_v32 = vld [vmem:[%s5325_s4 + $0x200] sm:$0xff]  ;;  %243 = vst [vmem:[%s5333_s5 + $0xf0] sm:$0xff] %v242_v30  ;;  %245 = vst [vmem:[%s5333_s5 + $0xf8] sm:$0xff] %v244_v31  ;;  %v248_v33 = vld [vmem:[%s5325_s4 + $0x208] sm:$0xff] }
  0x29   : > { %247 = vst [vmem:[%s5333_s5 + $0x100] sm:$0xff] %v246_v32  ;;  %v250_v34 = vld [vmem:[%s5325_s4 + $0x220] sm:$0xff]  ;;  %v252_v35 = vld [vmem:[%s5325_s4 + $0x228] sm:$0xff]  ;;  %249 = vst [vmem:[%s5333_s5 + $0x108] sm:$0xff] %v248_v33 }
  0x2a   : > { %251 = vst [vmem:[%s5333_s5 + $0x110] sm:$0xff] %v250_v34  ;;  %253 = vst [vmem:[%s5333_s5 + $0x118] sm:$0xff] %v252_v35  ;;  %v254_v36 = vld [vmem:[%s5325_s4 + $0x240] sm:$0xff]  ;;  %v256_v37 = vld [vmem:[%s5325_s4 + $0x248] sm:$0xff] }
  0x2b   : > { %v258_v38 = vld [vmem:[%s5325_s4 + $0x260] sm:$0xff]  ;;  %255 = vst [vmem:[%s5333_s5 + $0x120] sm:$0xff] %v254_v36  ;;  %257 = vst [vmem:[%s5333_s5 + $0x128] sm:$0xff] %v256_v37  ;;  %v260_v39 = vld [vmem:[%s5325_s4 + $0x268] sm:$0xff] }
  0x2c   : > { %259 = vst [vmem:[%s5333_s5 + $0x130] sm:$0xff] %v258_v38  ;;  %v262_v40 = vld [vmem:[%s5325_s4 + $0x280] sm:$0xff]  ;;  %v264_v41 = vld [vmem:[%s5325_s4 + $0x288] sm:$0xff]  ;;  %261 = vst [vmem:[%s5333_s5 + $0x138] sm:$0xff] %v260_v39 }
  0x2d   : > { %263 = vst [vmem:[%s5333_s5 + $0x140] sm:$0xff] %v262_v40  ;;  %265 = vst [vmem:[%s5333_s5 + $0x148] sm:$0xff] %v264_v41  ;;  %v266_v42 = vld [vmem:[%s5325_s4 + $0x2a0] sm:$0xff]  ;;  %v268_v43 = vld [vmem:[%s5325_s4 + $0x2a8] sm:$0xff] }
  0x2e   : > { %v270_v44 = vld [vmem:[%s5325_s4 + $0x2c0] sm:$0xff]  ;;  %267 = vst [vmem:[%s5333_s5 + $0x150] sm:$0xff] %v266_v42  ;;  %269 = vst [vmem:[%s5333_s5 + $0x158] sm:$0xff] %v268_v43  ;;  %v272_v45 = vld [vmem:[%s5325_s4 + $0x2c8] sm:$0xff] }
  0x2f   : > { %271 = vst [vmem:[%s5333_s5 + $0x160] sm:$0xff] %v270_v44  ;;  %v274_v46 = vld [vmem:[%s5325_s4 + $0x2e0] sm:$0xff]  ;;  %v276_v47 = vld [vmem:[%s5325_s4 + $0x2e8] sm:$0xff]  ;;  %273 = vst [vmem:[%s5333_s5 + $0x168] sm:$0xff] %v272_v45 }
  0x30   : > { %275 = vst [vmem:[%s5333_s5 + $0x170] sm:$0xff] %v274_v46  ;;  %277 = vst [vmem:[%s5333_s5 + $0x178] sm:$0xff] %v276_v47  ;;  %v278_v48 = vld [vmem:[%s5325_s4 + $0x300] sm:$0xff]  ;;  %v280_v49 = vld [vmem:[%s5325_s4 + $0x308] sm:$0xff] }
  0x31   : > { %v282_v50 = vld [vmem:[%s5325_s4 + $0x320] sm:$0xff]  ;;  %279 = vst [vmem:[%s5333_s5 + $0x180] sm:$0xff] %v278_v48  ;;  %281 = vst [vmem:[%s5333_s5 + $0x188] sm:$0xff] %v280_v49  ;;  %v284_v51 = vld [vmem:[%s5325_s4 + $0x328] sm:$0xff] }
  0x32   : > { %283 = vst [vmem:[%s5333_s5 + $0x190] sm:$0xff] %v282_v50  ;;  %v286_v52 = vld [vmem:[%s5325_s4 + $0x340] sm:$0xff]  ;;  %v288_v53 = vld [vmem:[%s5325_s4 + $0x348] sm:$0xff]  ;;  %285 = vst [vmem:[%s5333_s5 + $0x198] sm:$0xff] %v284_v51 }
  0x33   : > { %287 = vst [vmem:[%s5333_s5 + $0x1a0] sm:$0xff] %v286_v52  ;;  %289 = vst [vmem:[%s5333_s5 + $0x1a8] sm:$0xff] %v288_v53  ;;  %v290_v54 = vld [vmem:[%s5325_s4 + $0x360] sm:$0xff]  ;;  %v292_v55 = vld [vmem:[%s5325_s4 + $0x368] sm:$0xff] }
  0x34   : > { %v294_v56 = vld [vmem:[%s5325_s4 + $0x380] sm:$0xff]  ;;  %291 = vst [vmem:[%s5333_s5 + $0x1b0] sm:$0xff] %v290_v54  ;;  %293 = vst [vmem:[%s5333_s5 + $0x1b8] sm:$0xff] %v292_v55  ;;  %v296_v57 = vld [vmem:[%s5325_s4 + $0x388] sm:$0xff] }
  0x35   : > { %295 = vst [vmem:[%s5333_s5 + $0x1c0] sm:$0xff] %v294_v56  ;;  %v298_v58 = vld [vmem:[%s5325_s4 + $0x3a0] sm:$0xff]  ;;  %v300_v59 = vld [vmem:[%s5325_s4 + $0x3a8] sm:$0xff]  ;;  %297 = vst [vmem:[%s5333_s5 + $0x1c8] sm:$0xff] %v296_v57 }
  0x36   : > { %299 = vst [vmem:[%s5333_s5 + $0x1d0] sm:$0xff] %v298_v58  ;;  %301 = vst [vmem:[%s5333_s5 + $0x1d8] sm:$0xff] %v300_v59  ;;  %v302_v60 = vld [vmem:[%s5325_s4 + $0x3c0] sm:$0xff]  ;;  %v304_v61 = vld [vmem:[%s5325_s4 + $0x3c8] sm:$0xff] }
  0x37   : > { %v306_v62 = vld [vmem:[%s5325_s4 + $0x3e0] sm:$0xff]  ;;  %303 = vst [vmem:[%s5333_s5 + $0x1e0] sm:$0xff] %v302_v60  ;;  %305 = vst [vmem:[%s5333_s5 + $0x1e8] sm:$0xff] %v304_v61  ;;  %v308_v63 = vld [vmem:[%s5325_s4 + $0x3e8] sm:$0xff] }
  0x38   : > { %307 = vst [vmem:[%s5333_s5 + $0x1f0] sm:$0xff] %v306_v62  ;;  %v310_v0 = vld [vmem:[%s5325_s4 + $0x400] sm:$0xff]  ;;  %v312_v1 = vld [vmem:[%s5325_s4 + $0x408] sm:$0xff]  ;;  %309 = vst [vmem:[%s5333_s5 + $0x1f8] sm:$0xff] %v308_v63 }
  0x39   : > { %311 = vst [vmem:[%s5333_s5 + $0x200] sm:$0xff] %v310_v0  ;;  %313 = vst [vmem:[%s5333_s5 + $0x208] sm:$0xff] %v312_v1  ;;  %v314_v2 = vld [vmem:[%s5325_s4 + $0x420] sm:$0xff]  ;;  %v316_v3 = vld [vmem:[%s5325_s4 + $0x428] sm:$0xff] }
  0x3a   : > { %v318_v4 = vld [vmem:[%s5325_s4 + $0x440] sm:$0xff]  ;;  %315 = vst [vmem:[%s5333_s5 + $0x210] sm:$0xff] %v314_v2  ;;  %317 = vst [vmem:[%s5333_s5 + $0x218] sm:$0xff] %v316_v3  ;;  %v320_v5 = vld [vmem:[%s5325_s4 + $0x448] sm:$0xff] }
  0x3b   : > { %319 = vst [vmem:[%s5333_s5 + $0x220] sm:$0xff] %v318_v4  ;;  %v322_v6 = vld [vmem:[%s5325_s4 + $0x460] sm:$0xff]  ;;  %v324_v7 = vld [vmem:[%s5325_s4 + $0x468] sm:$0xff]  ;;  %321 = vst [vmem:[%s5333_s5 + $0x228] sm:$0xff] %v320_v5 }
  0x3c   : > { %323 = vst [vmem:[%s5333_s5 + $0x230] sm:$0xff] %v322_v6  ;;  %325 = vst [vmem:[%s5333_s5 + $0x238] sm:$0xff] %v324_v7  ;;  %v326_v8 = vld [vmem:[%s5325_s4 + $0x480] sm:$0xff]  ;;  %v328_v9 = vld [vmem:[%s5325_s4 + $0x488] sm:$0xff] }
  0x3d   : > { %v330_v10 = vld [vmem:[%s5325_s4 + $0x4a0] sm:$0xff]  ;;  %327 = vst [vmem:[%s5333_s5 + $0x240] sm:$0xff] %v326_v8  ;;  %329 = vst [vmem:[%s5333_s5 + $0x248] sm:$0xff] %v328_v9  ;;  %v332_v11 = vld [vmem:[%s5325_s4 + $0x4a8] sm:$0xff] }
  0x3e   : > { %331 = vst [vmem:[%s5333_s5 + $0x250] sm:$0xff] %v330_v10  ;;  %v334_v12 = vld [vmem:[%s5325_s4 + $0x4c0] sm:$0xff]  ;;  %v336_v13 = vld [vmem:[%s5325_s4 + $0x4c8] sm:$0xff]  ;;  %333 = vst [vmem:[%s5333_s5 + $0x258] sm:$0xff] %v332_v11 }
  0x3f   : > { %335 = vst [vmem:[%s5333_s5 + $0x260] sm:$0xff] %v334_v12  ;;  %337 = vst [vmem:[%s5333_s5 + $0x268] sm:$0xff] %v336_v13  ;;  %v338_v14 = vld [vmem:[%s5325_s4 + $0x4e0] sm:$0xff]  ;;  %v340_v15 = vld [vmem:[%s5325_s4 + $0x4e8] sm:$0xff] }
  0x40   : > { %v342_v16 = vld [vmem:[%s5325_s4 + $0x500] sm:$0xff]  ;;  %339 = vst [vmem:[%s5333_s5 + $0x270] sm:$0xff] %v338_v14  ;;  %341 = vst [vmem:[%s5333_s5 + $0x278] sm:$0xff] %v340_v15  ;;  %v344_v17 = vld [vmem:[%s5325_s4 + $0x508] sm:$0xff] }
  0x41   : > { %343 = vst [vmem:[%s5333_s5 + $0x280] sm:$0xff] %v342_v16  ;;  %v346_v18 = vld [vmem:[%s5325_s4 + $0x520] sm:$0xff]  ;;  %v348_v19 = vld [vmem:[%s5325_s4 + $0x528] sm:$0xff]  ;;  %345 = vst [vmem:[%s5333_s5 + $0x288] sm:$0xff] %v344_v17 }
  0x42   : > { %347 = vst [vmem:[%s5333_s5 + $0x290] sm:$0xff] %v346_v18  ;;  %349 = vst [vmem:[%s5333_s5 + $0x298] sm:$0xff] %v348_v19  ;;  %v350_v20 = vld [vmem:[%s5325_s4 + $0x540] sm:$0xff]  ;;  %v352_v21 = vld [vmem:[%s5325_s4 + $0x548] sm:$0xff] }
  0x43   : > { %v354_v22 = vld [vmem:[%s5325_s4 + $0x560] sm:$0xff]  ;;  %351 = vst [vmem:[%s5333_s5 + $0x2a0] sm:$0xff] %v350_v20  ;;  %353 = vst [vmem:[%s5333_s5 + $0x2a8] sm:$0xff] %v352_v21  ;;  %v356_v23 = vld [vmem:[%s5325_s4 + $0x568] sm:$0xff] }
  0x44   : > { %355 = vst [vmem:[%s5333_s5 + $0x2b0] sm:$0xff] %v354_v22  ;;  %v358_v24 = vld [vmem:[%s5325_s4 + $0x580] sm:$0xff]  ;;  %v360_v25 = vld [vmem:[%s5325_s4 + $0x588] sm:$0xff]  ;;  %357 = vst [vmem:[%s5333_s5 + $0x2b8] sm:$0xff] %v356_v23 }
  0x45   : > { %359 = vst [vmem:[%s5333_s5 + $0x2c0] sm:$0xff] %v358_v24  ;;  %361 = vst [vmem:[%s5333_s5 + $0x2c8] sm:$0xff] %v360_v25  ;;  %v362_v26 = vld [vmem:[%s5325_s4 + $0x5a0] sm:$0xff]  ;;  %v364_v27 = vld [vmem:[%s5325_s4 + $0x5a8] sm:$0xff] }
  0x46   : > { %v366_v28 = vld [vmem:[%s5325_s4 + $0x5c0] sm:$0xff]  ;;  %363 = vst [vmem:[%s5333_s5 + $0x2d0] sm:$0xff] %v362_v26  ;;  %365 = vst [vmem:[%s5333_s5 + $0x2d8] sm:$0xff] %v364_v27  ;;  %v368_v29 = vld [vmem:[%s5325_s4 + $0x5c8] sm:$0xff] }
  0x47   : > { %367 = vst [vmem:[%s5333_s5 + $0x2e0] sm:$0xff] %v366_v28  ;;  %v370_v30 = vld [vmem:[%s5325_s4 + $0x5e0] sm:$0xff]  ;;  %v372_v31 = vld [vmem:[%s5325_s4 + $0x5e8] sm:$0xff]  ;;  %369 = vst [vmem:[%s5333_s5 + $0x2e8] sm:$0xff] %v368_v29 }
  0x48   : > { %371 = vst [vmem:[%s5333_s5 + $0x2f0] sm:$0xff] %v370_v30  ;;  %373 = vst [vmem:[%s5333_s5 + $0x2f8] sm:$0xff] %v372_v31  ;;  %v374_v32 = vld [vmem:[%s5325_s4 + $0x600] sm:$0xff]  ;;  %v376_v33 = vld [vmem:[%s5325_s4 + $0x608] sm:$0xff] }
  0x49   : > { %v378_v34 = vld [vmem:[%s5325_s4 + $0x620] sm:$0xff]  ;;  %375 = vst [vmem:[%s5333_s5 + $0x300] sm:$0xff] %v374_v32  ;;  %377 = vst [vmem:[%s5333_s5 + $0x308] sm:$0xff] %v376_v33  ;;  %v380_v35 = vld [vmem:[%s5325_s4 + $0x628] sm:$0xff] }
  0x4a   : > { %379 = vst [vmem:[%s5333_s5 + $0x310] sm:$0xff] %v378_v34  ;;  %v382_v36 = vld [vmem:[%s5325_s4 + $0x640] sm:$0xff]  ;;  %v384_v37 = vld [vmem:[%s5325_s4 + $0x648] sm:$0xff]  ;;  %381 = vst [vmem:[%s5333_s5 + $0x318] sm:$0xff] %v380_v35 }
  0x4b   : > { %383 = vst [vmem:[%s5333_s5 + $0x320] sm:$0xff] %v382_v36  ;;  %385 = vst [vmem:[%s5333_s5 + $0x328] sm:$0xff] %v384_v37  ;;  %v386_v38 = vld [vmem:[%s5325_s4 + $0x660] sm:$0xff]  ;;  %v388_v39 = vld [vmem:[%s5325_s4 + $0x668] sm:$0xff] }
  0x4c   : > { %v390_v40 = vld [vmem:[%s5325_s4 + $0x680] sm:$0xff]  ;;  %387 = vst [vmem:[%s5333_s5 + $0x330] sm:$0xff] %v386_v38  ;;  %389 = vst [vmem:[%s5333_s5 + $0x338] sm:$0xff] %v388_v39  ;;  %v392_v41 = vld [vmem:[%s5325_s4 + $0x688] sm:$0xff] }
  0x4d   : > { %391 = vst [vmem:[%s5333_s5 + $0x340] sm:$0xff] %v390_v40  ;;  %v394_v42 = vld [vmem:[%s5325_s4 + $0x6a0] sm:$0xff]  ;;  %v396_v43 = vld [vmem:[%s5325_s4 + $0x6a8] sm:$0xff]  ;;  %393 = vst [vmem:[%s5333_s5 + $0x348] sm:$0xff] %v392_v41 }
  0x4e   : > { %395 = vst [vmem:[%s5333_s5 + $0x350] sm:$0xff] %v394_v42  ;;  %397 = vst [vmem:[%s5333_s5 + $0x358] sm:$0xff] %v396_v43  ;;  %v398_v44 = vld [vmem:[%s5325_s4 + $0x6c0] sm:$0xff]  ;;  %v400_v45 = vld [vmem:[%s5325_s4 + $0x6c8] sm:$0xff] }
  0x4f   : > { %v402_v46 = vld [vmem:[%s5325_s4 + $0x6e0] sm:$0xff]  ;;  %399 = vst [vmem:[%s5333_s5 + $0x360] sm:$0xff] %v398_v44  ;;  %401 = vst [vmem:[%s5333_s5 + $0x368] sm:$0xff] %v400_v45  ;;  %v404_v47 = vld [vmem:[%s5325_s4 + $0x6e8] sm:$0xff] }
  0x50   : > { %403 = vst [vmem:[%s5333_s5 + $0x370] sm:$0xff] %v402_v46  ;;  %v406_v48 = vld [vmem:[%s5325_s4 + $0x700] sm:$0xff]  ;;  %v408_v49 = vld [vmem:[%s5325_s4 + $0x708] sm:$0xff]  ;;  %405 = vst [vmem:[%s5333_s5 + $0x378] sm:$0xff] %v404_v47 }
  0x51   : > { %407 = vst [vmem:[%s5333_s5 + $0x380] sm:$0xff] %v406_v48  ;;  %409 = vst [vmem:[%s5333_s5 + $0x388] sm:$0xff] %v408_v49  ;;  %v410_v50 = vld [vmem:[%s5325_s4 + $0x720] sm:$0xff]  ;;  %v412_v51 = vld [vmem:[%s5325_s4 + $0x728] sm:$0xff] }
  0x52   : > { %v414_v52 = vld [vmem:[%s5325_s4 + $0x740] sm:$0xff]  ;;  %411 = vst [vmem:[%s5333_s5 + $0x390] sm:$0xff] %v410_v50  ;;  %413 = vst [vmem:[%s5333_s5 + $0x398] sm:$0xff] %v412_v51  ;;  %v416_v53 = vld [vmem:[%s5325_s4 + $0x748] sm:$0xff] }
  0x53   : > { %415 = vst [vmem:[%s5333_s5 + $0x3a0] sm:$0xff] %v414_v52  ;;  %v418_v54 = vld [vmem:[%s5325_s4 + $0x760] sm:$0xff]  ;;  %v420_v55 = vld [vmem:[%s5325_s4 + $0x768] sm:$0xff]  ;;  %417 = vst [vmem:[%s5333_s5 + $0x3a8] sm:$0xff] %v416_v53 }
  0x54   : > { %419 = vst [vmem:[%s5333_s5 + $0x3b0] sm:$0xff] %v418_v54  ;;  %421 = vst [vmem:[%s5333_s5 + $0x3b8] sm:$0xff] %v420_v55  ;;  %v422_v56 = vld [vmem:[%s5325_s4 + $0x780] sm:$0xff]  ;;  %v424_v57 = vld [vmem:[%s5325_s4 + $0x788] sm:$0xff] }
  0x55   : > { %v426_v58 = vld [vmem:[%s5325_s4 + $0x7a0] sm:$0xff]  ;;  %423 = vst [vmem:[%s5333_s5 + $0x3c0] sm:$0xff] %v422_v56  ;;  %425 = vst [vmem:[%s5333_s5 + $0x3c8] sm:$0xff] %v424_v57  ;;  %v428_v59 = vld [vmem:[%s5325_s4 + $0x7a8] sm:$0xff] }
  0x56   : > { %427 = vst [vmem:[%s5333_s5 + $0x3d0] sm:$0xff] %v426_v58  ;;  %v430_v60 = vld [vmem:[%s5325_s4 + $0x7c0] sm:$0xff]  ;;  %v432_v61 = vld [vmem:[%s5325_s4 + $0x7c8] sm:$0xff]  ;;  %429 = vst [vmem:[%s5333_s5 + $0x3d8] sm:$0xff] %v428_v59 }
  0x57   : > { %431 = vst [vmem:[%s5333_s5 + $0x3e0] sm:$0xff] %v430_v60  ;;  %433 = vst [vmem:[%s5333_s5 + $0x3e8] sm:$0xff] %v432_v61  ;;  %v434_v62 = vld [vmem:[%s5325_s4 + $0x7e0] sm:$0xff]  ;;  %v436_v63 = vld [vmem:[%s5325_s4 + $0x7e8] sm:$0xff] }
  0x58   : > { %v438_v0 = vld [vmem:[%s5325_s4 + $0x800] sm:$0xff]  ;;  %435 = vst [vmem:[%s5333_s5 + $0x3f0] sm:$0xff] %v434_v62  ;;  %437 = vst [vmem:[%s5333_s5 + $0x3f8] sm:$0xff] %v436_v63  ;;  %v440_v1 = vld [vmem:[%s5325_s4 + $0x808] sm:$0xff] }
  0x59   : > { %439 = vst [vmem:[%s5333_s5 + $0x400] sm:$0xff] %v438_v0  ;;  %v442_v2 = vld [vmem:[%s5325_s4 + $0x820] sm:$0xff]  ;;  %v444_v3 = vld [vmem:[%s5325_s4 + $0x828] sm:$0xff]  ;;  %441 = vst [vmem:[%s5333_s5 + $0x408] sm:$0xff] %v440_v1 }
  0x5a   : > { %443 = vst [vmem:[%s5333_s5 + $0x410] sm:$0xff] %v442_v2  ;;  %445 = vst [vmem:[%s5333_s5 + $0x418] sm:$0xff] %v444_v3  ;;  %v446_v4 = vld [vmem:[%s5325_s4 + $0x840] sm:$0xff]  ;;  %v448_v5 = vld [vmem:[%s5325_s4 + $0x848] sm:$0xff] }
  0x5b   : > { %v450_v6 = vld [vmem:[%s5325_s4 + $0x860] sm:$0xff]  ;;  %447 = vst [vmem:[%s5333_s5 + $0x420] sm:$0xff] %v446_v4  ;;  %449 = vst [vmem:[%s5333_s5 + $0x428] sm:$0xff] %v448_v5  ;;  %v452_v7 = vld [vmem:[%s5325_s4 + $0x868] sm:$0xff] }
  0x5c   : > { %451 = vst [vmem:[%s5333_s5 + $0x430] sm:$0xff] %v450_v6  ;;  %v454_v8 = vld [vmem:[%s5325_s4 + $0x880] sm:$0xff]  ;;  %v456_v9 = vld [vmem:[%s5325_s4 + $0x888] sm:$0xff]  ;;  %453 = vst [vmem:[%s5333_s5 + $0x438] sm:$0xff] %v452_v7 }
  0x5d   : > { %455 = vst [vmem:[%s5333_s5 + $0x440] sm:$0xff] %v454_v8  ;;  %457 = vst [vmem:[%s5333_s5 + $0x448] sm:$0xff] %v456_v9  ;;  %v458_v10 = vld [vmem:[%s5325_s4 + $0x8a0] sm:$0xff]  ;;  %v460_v11 = vld [vmem:[%s5325_s4 + $0x8a8] sm:$0xff] }
  0x5e   : > { %v462_v12 = vld [vmem:[%s5325_s4 + $0x8c0] sm:$0xff]  ;;  %459 = vst [vmem:[%s5333_s5 + $0x450] sm:$0xff] %v458_v10  ;;  %461 = vst [vmem:[%s5333_s5 + $0x458] sm:$0xff] %v460_v11  ;;  %v464_v13 = vld [vmem:[%s5325_s4 + $0x8c8] sm:$0xff] }
  0x5f   : > { %463 = vst [vmem:[%s5333_s5 + $0x460] sm:$0xff] %v462_v12  ;;  %v466_v14 = vld [vmem:[%s5325_s4 + $0x8e0] sm:$0xff]  ;;  %v468_v15 = vld [vmem:[%s5325_s4 + $0x8e8] sm:$0xff]  ;;  %465 = vst [vmem:[%s5333_s5 + $0x468] sm:$0xff] %v464_v13 }
  0x60   : > { %467 = vst [vmem:[%s5333_s5 + $0x470] sm:$0xff] %v466_v14  ;;  %469 = vst [vmem:[%s5333_s5 + $0x478] sm:$0xff] %v468_v15  ;;  %v470_v16 = vld [vmem:[%s5325_s4 + $0x900] sm:$0xff]  ;;  %v472_v17 = vld [vmem:[%s5325_s4 + $0x908] sm:$0xff] }
  0x61   : > { %v474_v18 = vld [vmem:[%s5325_s4 + $0x920] sm:$0xff]  ;;  %471 = vst [vmem:[%s5333_s5 + $0x480] sm:$0xff] %v470_v16  ;;  %473 = vst [vmem:[%s5333_s5 + $0x488] sm:$0xff] %v472_v17  ;;  %v476_v19 = vld [vmem:[%s5325_s4 + $0x928] sm:$0xff] }
  0x62   : > { %475 = vst [vmem:[%s5333_s5 + $0x490] sm:$0xff] %v474_v18  ;;  %v478_v20 = vld [vmem:[%s5325_s4 + $0x940] sm:$0xff]  ;;  %v480_v21 = vld [vmem:[%s5325_s4 + $0x948] sm:$0xff]  ;;  %477 = vst [vmem:[%s5333_s5 + $0x498] sm:$0xff] %v476_v19 }
  0x63   : > { %479 = vst [vmem:[%s5333_s5 + $0x4a0] sm:$0xff] %v478_v20  ;;  %481 = vst [vmem:[%s5333_s5 + $0x4a8] sm:$0xff] %v480_v21  ;;  %v482_v22 = vld [vmem:[%s5325_s4 + $0x960] sm:$0xff]  ;;  %v484_v23 = vld [vmem:[%s5325_s4 + $0x968] sm:$0xff] }
  0x64   : > { %v486_v24 = vld [vmem:[%s5325_s4 + $0x980] sm:$0xff]  ;;  %483 = vst [vmem:[%s5333_s5 + $0x4b0] sm:$0xff] %v482_v22  ;;  %485 = vst [vmem:[%s5333_s5 + $0x4b8] sm:$0xff] %v484_v23  ;;  %v488_v25 = vld [vmem:[%s5325_s4 + $0x988] sm:$0xff] }
  0x65   : > { %487 = vst [vmem:[%s5333_s5 + $0x4c0] sm:$0xff] %v486_v24  ;;  %v490_v26 = vld [vmem:[%s5325_s4 + $0x9a0] sm:$0xff]  ;;  %v492_v27 = vld [vmem:[%s5325_s4 + $0x9a8] sm:$0xff]  ;;  %489 = vst [vmem:[%s5333_s5 + $0x4c8] sm:$0xff] %v488_v25 }
  0x66   : > { %491 = vst [vmem:[%s5333_s5 + $0x4d0] sm:$0xff] %v490_v26  ;;  %493 = vst [vmem:[%s5333_s5 + $0x4d8] sm:$0xff] %v492_v27  ;;  %v494_v28 = vld [vmem:[%s5325_s4 + $0x9c0] sm:$0xff]  ;;  %v496_v29 = vld [vmem:[%s5325_s4 + $0x9c8] sm:$0xff] }
  0x67   : > { %v498_v30 = vld [vmem:[%s5325_s4 + $0x9e0] sm:$0xff]  ;;  %495 = vst [vmem:[%s5333_s5 + $0x4e0] sm:$0xff] %v494_v28  ;;  %497 = vst [vmem:[%s5333_s5 + $0x4e8] sm:$0xff] %v496_v29  ;;  %v500_v31 = vld [vmem:[%s5325_s4 + $0x9e8] sm:$0xff] }
  0x68   : > { %499 = vst [vmem:[%s5333_s5 + $0x4f0] sm:$0xff] %v498_v30  ;;  %v502_v32 = vld [vmem:[%s5325_s4 + $0xa00] sm:$0xff]  ;;  %v504_v33 = vld [vmem:[%s5325_s4 + $0xa08] sm:$0xff]  ;;  %501 = vst [vmem:[%s5333_s5 + $0x4f8] sm:$0xff] %v500_v31 }
  0x69   : > { %503 = vst [vmem:[%s5333_s5 + $0x500] sm:$0xff] %v502_v32  ;;  %505 = vst [vmem:[%s5333_s5 + $0x508] sm:$0xff] %v504_v33  ;;  %v506_v34 = vld [vmem:[%s5325_s4 + $0xa20] sm:$0xff]  ;;  %v508_v35 = vld [vmem:[%s5325_s4 + $0xa28] sm:$0xff] }
  0x6a   : > { %v510_v36 = vld [vmem:[%s5325_s4 + $0xa40] sm:$0xff]  ;;  %507 = vst [vmem:[%s5333_s5 + $0x510] sm:$0xff] %v506_v34  ;;  %509 = vst [vmem:[%s5333_s5 + $0x518] sm:$0xff] %v508_v35  ;;  %v512_v37 = vld [vmem:[%s5325_s4 + $0xa48] sm:$0xff] }
  0x6b   : > { %511 = vst [vmem:[%s5333_s5 + $0x520] sm:$0xff] %v510_v36  ;;  %v514_v38 = vld [vmem:[%s5325_s4 + $0xa60] sm:$0xff]  ;;  %v516_v39 = vld [vmem:[%s5325_s4 + $0xa68] sm:$0xff]  ;;  %513 = vst [vmem:[%s5333_s5 + $0x528] sm:$0xff] %v512_v37 }
  0x6c   : > { %515 = vst [vmem:[%s5333_s5 + $0x530] sm:$0xff] %v514_v38  ;;  %517 = vst [vmem:[%s5333_s5 + $0x538] sm:$0xff] %v516_v39  ;;  %v518_v40 = vld [vmem:[%s5325_s4 + $0xa80] sm:$0xff]  ;;  %v520_v41 = vld [vmem:[%s5325_s4 + $0xa88] sm:$0xff] }
  0x6d   : > { %v522_v42 = vld [vmem:[%s5325_s4 + $0xaa0] sm:$0xff]  ;;  %519 = vst [vmem:[%s5333_s5 + $0x540] sm:$0xff] %v518_v40  ;;  %521 = vst [vmem:[%s5333_s5 + $0x548] sm:$0xff] %v520_v41  ;;  %v524_v43 = vld [vmem:[%s5325_s4 + $0xaa8] sm:$0xff] }
  0x6e   : > { %523 = vst [vmem:[%s5333_s5 + $0x550] sm:$0xff] %v522_v42  ;;  %v526_v44 = vld [vmem:[%s5325_s4 + $0xac0] sm:$0xff]  ;;  %v528_v45 = vld [vmem:[%s5325_s4 + $0xac8] sm:$0xff]  ;;  %525 = vst [vmem:[%s5333_s5 + $0x558] sm:$0xff] %v524_v43 }
  0x6f   : > { %527 = vst [vmem:[%s5333_s5 + $0x560] sm:$0xff] %v526_v44  ;;  %529 = vst [vmem:[%s5333_s5 + $0x568] sm:$0xff] %v528_v45  ;;  %v530_v46 = vld [vmem:[%s5325_s4 + $0xae0] sm:$0xff]  ;;  %v532_v47 = vld [vmem:[%s5325_s4 + $0xae8] sm:$0xff] }
  0x70   : > { %v534_v48 = vld [vmem:[%s5325_s4 + $0xb00] sm:$0xff]  ;;  %531 = vst [vmem:[%s5333_s5 + $0x570] sm:$0xff] %v530_v46  ;;  %533 = vst [vmem:[%s5333_s5 + $0x578] sm:$0xff] %v532_v47  ;;  %v536_v49 = vld [vmem:[%s5325_s4 + $0xb08] sm:$0xff] }
  0x71   : > { %535 = vst [vmem:[%s5333_s5 + $0x580] sm:$0xff] %v534_v48  ;;  %v538_v50 = vld [vmem:[%s5325_s4 + $0xb20] sm:$0xff]  ;;  %v540_v51 = vld [vmem:[%s5325_s4 + $0xb28] sm:$0xff]  ;;  %537 = vst [vmem:[%s5333_s5 + $0x588] sm:$0xff] %v536_v49 }
  0x72   : > { %539 = vst [vmem:[%s5333_s5 + $0x590] sm:$0xff] %v538_v50  ;;  %541 = vst [vmem:[%s5333_s5 + $0x598] sm:$0xff] %v540_v51  ;;  %v542_v52 = vld [vmem:[%s5325_s4 + $0xb40] sm:$0xff]  ;;  %v544_v53 = vld [vmem:[%s5325_s4 + $0xb48] sm:$0xff] }
  0x73   : > { %v546_v54 = vld [vmem:[%s5325_s4 + $0xb60] sm:$0xff]  ;;  %543 = vst [vmem:[%s5333_s5 + $0x5a0] sm:$0xff] %v542_v52  ;;  %545 = vst [vmem:[%s5333_s5 + $0x5a8] sm:$0xff] %v544_v53  ;;  %v548_v55 = vld [vmem:[%s5325_s4 + $0xb68] sm:$0xff] }
  0x74   : > { %547 = vst [vmem:[%s5333_s5 + $0x5b0] sm:$0xff] %v546_v54  ;;  %v550_v56 = vld [vmem:[%s5325_s4 + $0xb80] sm:$0xff]  ;;  %v552_v57 = vld [vmem:[%s5325_s4 + $0xb88] sm:$0xff]  ;;  %549 = vst [vmem:[%s5333_s5 + $0x5b8] sm:$0xff] %v548_v55 }
  0x75   : > { %551 = vst [vmem:[%s5333_s5 + $0x5c0] sm:$0xff] %v550_v56  ;;  %553 = vst [vmem:[%s5333_s5 + $0x5c8] sm:$0xff] %v552_v57  ;;  %v554_v58 = vld [vmem:[%s5325_s4 + $0xba0] sm:$0xff]  ;;  %v556_v59 = vld [vmem:[%s5325_s4 + $0xba8] sm:$0xff] }
  0x76   : > { %v558_v60 = vld [vmem:[%s5325_s4 + $0xbc0] sm:$0xff]  ;;  %555 = vst [vmem:[%s5333_s5 + $0x5d0] sm:$0xff] %v554_v58  ;;  %557 = vst [vmem:[%s5333_s5 + $0x5d8] sm:$0xff] %v556_v59  ;;  %v560_v61 = vld [vmem:[%s5325_s4 + $0xbc8] sm:$0xff] }
  0x77   : > { %559 = vst [vmem:[%s5333_s5 + $0x5e0] sm:$0xff] %v558_v60  ;;  %v562_v62 = vld [vmem:[%s5325_s4 + $0xbe0] sm:$0xff]  ;;  %v564_v63 = vld [vmem:[%s5325_s4 + $0xbe8] sm:$0xff]  ;;  %561 = vst [vmem:[%s5333_s5 + $0x5e8] sm:$0xff] %v560_v61 }
  0x78   : > { %563 = vst [vmem:[%s5333_s5 + $0x5f0] sm:$0xff] %v562_v62  ;;  %565 = vst [vmem:[%s5333_s5 + $0x5f8] sm:$0xff] %v564_v63  ;;  %v566_v0 = vld [vmem:[%s5325_s4 + $0xc00] sm:$0xff]  ;;  %v568_v1 = vld [vmem:[%s5325_s4 + $0xc08] sm:$0xff] }
  0x79   : > { %v570_v2 = vld [vmem:[%s5325_s4 + $0xc20] sm:$0xff]  ;;  %567 = vst [vmem:[%s5333_s5 + $0x600] sm:$0xff] %v566_v0  ;;  %569 = vst [vmem:[%s5333_s5 + $0x608] sm:$0xff] %v568_v1  ;;  %v572_v3 = vld [vmem:[%s5325_s4 + $0xc28] sm:$0xff] }
  0x7a   : > { %571 = vst [vmem:[%s5333_s5 + $0x610] sm:$0xff] %v570_v2  ;;  %v574_v4 = vld [vmem:[%s5325_s4 + $0xc40] sm:$0xff]  ;;  %v576_v5 = vld [vmem:[%s5325_s4 + $0xc48] sm:$0xff]  ;;  %573 = vst [vmem:[%s5333_s5 + $0x618] sm:$0xff] %v572_v3 }
  0x7b   : > { %575 = vst [vmem:[%s5333_s5 + $0x620] sm:$0xff] %v574_v4  ;;  %577 = vst [vmem:[%s5333_s5 + $0x628] sm:$0xff] %v576_v5  ;;  %v578_v6 = vld [vmem:[%s5325_s4 + $0xc60] sm:$0xff]  ;;  %v580_v7 = vld [vmem:[%s5325_s4 + $0xc68] sm:$0xff] }
  0x7c   : > { %v582_v8 = vld [vmem:[%s5325_s4 + $0xc80] sm:$0xff]  ;;  %579 = vst [vmem:[%s5333_s5 + $0x630] sm:$0xff] %v578_v6  ;;  %581 = vst [vmem:[%s5333_s5 + $0x638] sm:$0xff] %v580_v7  ;;  %v584_v9 = vld [vmem:[%s5325_s4 + $0xc88] sm:$0xff] }
  0x7d   : > { %583 = vst [vmem:[%s5333_s5 + $0x640] sm:$0xff] %v582_v8  ;;  %v586_v10 = vld [vmem:[%s5325_s4 + $0xca0] sm:$0xff]  ;;  %v588_v11 = vld [vmem:[%s5325_s4 + $0xca8] sm:$0xff]  ;;  %585 = vst [vmem:[%s5333_s5 + $0x648] sm:$0xff] %v584_v9 }
  0x7e   : > { %587 = vst [vmem:[%s5333_s5 + $0x650] sm:$0xff] %v586_v10  ;;  %589 = vst [vmem:[%s5333_s5 + $0x658] sm:$0xff] %v588_v11  ;;  %v590_v12 = vld [vmem:[%s5325_s4 + $0xcc0] sm:$0xff]  ;;  %v592_v13 = vld [vmem:[%s5325_s4 + $0xcc8] sm:$0xff] }
  0x7f   : > { %v594_v14 = vld [vmem:[%s5325_s4 + $0xce0] sm:$0xff]  ;;  %591 = vst [vmem:[%s5333_s5 + $0x660] sm:$0xff] %v590_v12  ;;  %593 = vst [vmem:[%s5333_s5 + $0x668] sm:$0xff] %v592_v13  ;;  %v596_v15 = vld [vmem:[%s5325_s4 + $0xce8] sm:$0xff] }
  0x80   : > { %595 = vst [vmem:[%s5333_s5 + $0x670] sm:$0xff] %v594_v14  ;;  %v598_v16 = vld [vmem:[%s5325_s4 + $0xd00] sm:$0xff]  ;;  %v600_v17 = vld [vmem:[%s5325_s4 + $0xd08] sm:$0xff]  ;;  %597 = vst [vmem:[%s5333_s5 + $0x678] sm:$0xff] %v596_v15 }
  0x81   : > { %599 = vst [vmem:[%s5333_s5 + $0x680] sm:$0xff] %v598_v16  ;;  %601 = vst [vmem:[%s5333_s5 + $0x688] sm:$0xff] %v600_v17  ;;  %v602_v18 = vld [vmem:[%s5325_s4 + $0xd20] sm:$0xff]  ;;  %v604_v19 = vld [vmem:[%s5325_s4 + $0xd28] sm:$0xff] }
  0x82   : > { %v606_v20 = vld [vmem:[%s5325_s4 + $0xd40] sm:$0xff]  ;;  %603 = vst [vmem:[%s5333_s5 + $0x690] sm:$0xff] %v602_v18  ;;  %605 = vst [vmem:[%s5333_s5 + $0x698] sm:$0xff] %v604_v19  ;;  %v608_v21 = vld [vmem:[%s5325_s4 + $0xd48] sm:$0xff] }
  0x83   : > { %607 = vst [vmem:[%s5333_s5 + $0x6a0] sm:$0xff] %v606_v20  ;;  %v610_v22 = vld [vmem:[%s5325_s4 + $0xd60] sm:$0xff]  ;;  %v612_v23 = vld [vmem:[%s5325_s4 + $0xd68] sm:$0xff]  ;;  %609 = vst [vmem:[%s5333_s5 + $0x6a8] sm:$0xff] %v608_v21 }
  0x84   : > { %611 = vst [vmem:[%s5333_s5 + $0x6b0] sm:$0xff] %v610_v22  ;;  %613 = vst [vmem:[%s5333_s5 + $0x6b8] sm:$0xff] %v612_v23  ;;  %v614_v24 = vld [vmem:[%s5325_s4 + $0xd80] sm:$0xff]  ;;  %v616_v25 = vld [vmem:[%s5325_s4 + $0xd88] sm:$0xff] }
  0x85   : > { %v618_v26 = vld [vmem:[%s5325_s4 + $0xda0] sm:$0xff]  ;;  %615 = vst [vmem:[%s5333_s5 + $0x6c0] sm:$0xff] %v614_v24  ;;  %617 = vst [vmem:[%s5333_s5 + $0x6c8] sm:$0xff] %v616_v25  ;;  %v620_v27 = vld [vmem:[%s5325_s4 + $0xda8] sm:$0xff] }
  0x86   : > { %619 = vst [vmem:[%s5333_s5 + $0x6d0] sm:$0xff] %v618_v26  ;;  %v622_v28 = vld [vmem:[%s5325_s4 + $0xdc0] sm:$0xff]  ;;  %v624_v29 = vld [vmem:[%s5325_s4 + $0xdc8] sm:$0xff]  ;;  %621 = vst [vmem:[%s5333_s5 + $0x6d8] sm:$0xff] %v620_v27 }
  0x87   : > { %623 = vst [vmem:[%s5333_s5 + $0x6e0] sm:$0xff] %v622_v28  ;;  %625 = vst [vmem:[%s5333_s5 + $0x6e8] sm:$0xff] %v624_v29  ;;  %v626_v30 = vld [vmem:[%s5325_s4 + $0xde0] sm:$0xff]  ;;  %v628_v31 = vld [vmem:[%s5325_s4 + $0xde8] sm:$0xff] }
  0x88   : > { %v630_v32 = vld [vmem:[%s5325_s4 + $0xe00] sm:$0xff]  ;;  %627 = vst [vmem:[%s5333_s5 + $0x6f0] sm:$0xff] %v626_v30  ;;  %629 = vst [vmem:[%s5333_s5 + $0x6f8] sm:$0xff] %v628_v31  ;;  %v632_v33 = vld [vmem:[%s5325_s4 + $0xe08] sm:$0xff] }
  0x89   : > { %631 = vst [vmem:[%s5333_s5 + $0x700] sm:$0xff] %v630_v32  ;;  %v634_v34 = vld [vmem:[%s5325_s4 + $0xe20] sm:$0xff]  ;;  %v636_v35 = vld [vmem:[%s5325_s4 + $0xe28] sm:$0xff]  ;;  %633 = vst [vmem:[%s5333_s5 + $0x708] sm:$0xff] %v632_v33 }
  0x8a   : > { %635 = vst [vmem:[%s5333_s5 + $0x710] sm:$0xff] %v634_v34  ;;  %637 = vst [vmem:[%s5333_s5 + $0x718] sm:$0xff] %v636_v35  ;;  %v638_v36 = vld [vmem:[%s5325_s4 + $0xe40] sm:$0xff]  ;;  %v640_v37 = vld [vmem:[%s5325_s4 + $0xe48] sm:$0xff] }
  0x8b   : > { %v642_v38 = vld [vmem:[%s5325_s4 + $0xe60] sm:$0xff]  ;;  %639 = vst [vmem:[%s5333_s5 + $0x720] sm:$0xff] %v638_v36  ;;  %641 = vst [vmem:[%s5333_s5 + $0x728] sm:$0xff] %v640_v37  ;;  %v644_v39 = vld [vmem:[%s5325_s4 + $0xe68] sm:$0xff] }
  0x8c   : > { %643 = vst [vmem:[%s5333_s5 + $0x730] sm:$0xff] %v642_v38  ;;  %v646_v40 = vld [vmem:[%s5325_s4 + $0xe80] sm:$0xff]  ;;  %v648_v41 = vld [vmem:[%s5325_s4 + $0xe88] sm:$0xff]  ;;  %645 = vst [vmem:[%s5333_s5 + $0x738] sm:$0xff] %v644_v39 }
  0x8d   : > { %647 = vst [vmem:[%s5333_s5 + $0x740] sm:$0xff] %v646_v40  ;;  %649 = vst [vmem:[%s5333_s5 + $0x748] sm:$0xff] %v648_v41  ;;  %v650_v42 = vld [vmem:[%s5325_s4 + $0xea0] sm:$0xff]  ;;  %v652_v43 = vld [vmem:[%s5325_s4 + $0xea8] sm:$0xff] }
  0x8e   : > { %v654_v44 = vld [vmem:[%s5325_s4 + $0xec0] sm:$0xff]  ;;  %651 = vst [vmem:[%s5333_s5 + $0x750] sm:$0xff] %v650_v42  ;;  %653 = vst [vmem:[%s5333_s5 + $0x758] sm:$0xff] %v652_v43  ;;  %v656_v45 = vld [vmem:[%s5325_s4 + $0xec8] sm:$0xff] }
  0x8f   : > { %655 = vst [vmem:[%s5333_s5 + $0x760] sm:$0xff] %v654_v44  ;;  %v658_v46 = vld [vmem:[%s5325_s4 + $0xee0] sm:$0xff]  ;;  %v660_v47 = vld [vmem:[%s5325_s4 + $0xee8] sm:$0xff]  ;;  %657 = vst [vmem:[%s5333_s5 + $0x768] sm:$0xff] %v656_v45 }
  0x90   : > { %659 = vst [vmem:[%s5333_s5 + $0x770] sm:$0xff] %v658_v46  ;;  %661 = vst [vmem:[%s5333_s5 + $0x778] sm:$0xff] %v660_v47  ;;  %v662_v48 = vld [vmem:[%s5325_s4 + $0xf00] sm:$0xff]  ;;  %v664_v49 = vld [vmem:[%s5325_s4 + $0xf08] sm:$0xff] }
  0x91   : > { %v666_v50 = vld [vmem:[%s5325_s4 + $0xf20] sm:$0xff]  ;;  %663 = vst [vmem:[%s5333_s5 + $0x780] sm:$0xff] %v662_v48  ;;  %665 = vst [vmem:[%s5333_s5 + $0x788] sm:$0xff] %v664_v49  ;;  %v668_v51 = vld [vmem:[%s5325_s4 + $0xf28] sm:$0xff] }
  0x92   : > { %667 = vst [vmem:[%s5333_s5 + $0x790] sm:$0xff] %v666_v50  ;;  %v670_v52 = vld [vmem:[%s5325_s4 + $0xf40] sm:$0xff]  ;;  %v672_v53 = vld [vmem:[%s5325_s4 + $0xf48] sm:$0xff]  ;;  %669 = vst [vmem:[%s5333_s5 + $0x798] sm:$0xff] %v668_v51 }
  0x93   : > { %671 = vst [vmem:[%s5333_s5 + $0x7a0] sm:$0xff] %v670_v52  ;;  %673 = vst [vmem:[%s5333_s5 + $0x7a8] sm:$0xff] %v672_v53  ;;  %v674_v54 = vld [vmem:[%s5325_s4 + $0xf60] sm:$0xff]  ;;  %v676_v55 = vld [vmem:[%s5325_s4 + $0xf68] sm:$0xff] }
  0x94   : > { %v678_v56 = vld [vmem:[%s5325_s4 + $0xf80] sm:$0xff]  ;;  %675 = vst [vmem:[%s5333_s5 + $0x7b0] sm:$0xff] %v674_v54  ;;  %677 = vst [vmem:[%s5333_s5 + $0x7b8] sm:$0xff] %v676_v55  ;;  %v680_v57 = vld [vmem:[%s5325_s4 + $0xf88] sm:$0xff] }
  0x95   : > { %679 = vst [vmem:[%s5333_s5 + $0x7c0] sm:$0xff] %v678_v56  ;;  %v682_v58 = vld [vmem:[%s5325_s4 + $0xfa0] sm:$0xff]  ;;  %v684_v59 = vld [vmem:[%s5325_s4 + $0xfa8] sm:$0xff]  ;;  %681 = vst [vmem:[%s5333_s5 + $0x7c8] sm:$0xff] %v680_v57 }
  0x96   : > { %683 = vst [vmem:[%s5333_s5 + $0x7d0] sm:$0xff] %v682_v58  ;;  %685 = vst [vmem:[%s5333_s5 + $0x7d8] sm:$0xff] %v684_v59  ;;  %v686_v60 = vld [vmem:[%s5325_s4 + $0xfc0] sm:$0xff]  ;;  %v688_v61 = vld [vmem:[%s5325_s4 + $0xfc8] sm:$0xff] }
  0x97   : > { %v690_v62 = vld [vmem:[%s5325_s4 + $0xfe0] sm:$0xff]  ;;  %687 = vst [vmem:[%s5333_s5 + $0x7e0] sm:$0xff] %v686_v60  ;;  %689 = vst [vmem:[%s5333_s5 + $0x7e8] sm:$0xff] %v688_v61  ;;  %v692_v63 = vld [vmem:[%s5325_s4 + $0xfe8] sm:$0xff] }
  0x98   : > { %691 = vst [vmem:[%s5333_s5 + $0x7f0] sm:$0xff] %v690_v62  ;;  %v694_v0 = vld [vmem:[%s5325_s4 + $0x1000] sm:$0xff]  ;;  %v696_v1 = vld [vmem:[%s5325_s4 + $0x1008] sm:$0xff]  ;;  %693 = vst [vmem:[%s5333_s5 + $0x7f8] sm:$0xff] %v692_v63 }
  0x99   : > { %695 = vst [vmem:[%s5333_s5 + $0x800] sm:$0xff] %v694_v0  ;;  %697 = vst [vmem:[%s5333_s5 + $0x808] sm:$0xff] %v696_v1  ;;  %v698_v2 = vld [vmem:[%s5325_s4 + $0x1020] sm:$0xff]  ;;  %v700_v3 = vld [vmem:[%s5325_s4 + $0x1028] sm:$0xff] }
  0x9a   : > { %v702_v4 = vld [vmem:[%s5325_s4 + $0x1040] sm:$0xff]  ;;  %699 = vst [vmem:[%s5333_s5 + $0x810] sm:$0xff] %v698_v2  ;;  %701 = vst [vmem:[%s5333_s5 + $0x818] sm:$0xff] %v700_v3  ;;  %v704_v5 = vld [vmem:[%s5325_s4 + $0x1048] sm:$0xff] }
  0x9b   : > { %703 = vst [vmem:[%s5333_s5 + $0x820] sm:$0xff] %v702_v4  ;;  %v706_v6 = vld [vmem:[%s5325_s4 + $0x1060] sm:$0xff]  ;;  %v708_v7 = vld [vmem:[%s5325_s4 + $0x1068] sm:$0xff]  ;;  %705 = vst [vmem:[%s5333_s5 + $0x828] sm:$0xff] %v704_v5 }
  0x9c   : > { %707 = vst [vmem:[%s5333_s5 + $0x830] sm:$0xff] %v706_v6  ;;  %709 = vst [vmem:[%s5333_s5 + $0x838] sm:$0xff] %v708_v7  ;;  %v710_v8 = vld [vmem:[%s5325_s4 + $0x1080] sm:$0xff]  ;;  %v712_v9 = vld [vmem:[%s5325_s4 + $0x1088] sm:$0xff] }
  0x9d   : > { %v714_v10 = vld [vmem:[%s5325_s4 + $0x10a0] sm:$0xff]  ;;  %711 = vst [vmem:[%s5333_s5 + $0x840] sm:$0xff] %v710_v8  ;;  %713 = vst [vmem:[%s5333_s5 + $0x848] sm:$0xff] %v712_v9  ;;  %v716_v11 = vld [vmem:[%s5325_s4 + $0x10a8] sm:$0xff] }
  0x9e   : > { %715 = vst [vmem:[%s5333_s5 + $0x850] sm:$0xff] %v714_v10  ;;  %v718_v12 = vld [vmem:[%s5325_s4 + $0x10c0] sm:$0xff]  ;;  %v720_v13 = vld [vmem:[%s5325_s4 + $0x10c8] sm:$0xff]  ;;  %717 = vst [vmem:[%s5333_s5 + $0x858] sm:$0xff] %v716_v11 }
  0x9f   : > { %719 = vst [vmem:[%s5333_s5 + $0x860] sm:$0xff] %v718_v12  ;;  %721 = vst [vmem:[%s5333_s5 + $0x868] sm:$0xff] %v720_v13  ;;  %v722_v14 = vld [vmem:[%s5325_s4 + $0x10e0] sm:$0xff]  ;;  %v724_v15 = vld [vmem:[%s5325_s4 + $0x10e8] sm:$0xff] }
  0xa0   : > { %v726_v16 = vld [vmem:[%s5325_s4 + $0x1100] sm:$0xff]  ;;  %723 = vst [vmem:[%s5333_s5 + $0x870] sm:$0xff] %v722_v14  ;;  %725 = vst [vmem:[%s5333_s5 + $0x878] sm:$0xff] %v724_v15  ;;  %v728_v17 = vld [vmem:[%s5325_s4 + $0x1108] sm:$0xff] }
  0xa1   : > { %727 = vst [vmem:[%s5333_s5 + $0x880] sm:$0xff] %v726_v16  ;;  %v730_v18 = vld [vmem:[%s5325_s4 + $0x1120] sm:$0xff]  ;;  %v732_v19 = vld [vmem:[%s5325_s4 + $0x1128] sm:$0xff]  ;;  %729 = vst [vmem:[%s5333_s5 + $0x888] sm:$0xff] %v728_v17 }
  0xa2   : > { %731 = vst [vmem:[%s5333_s5 + $0x890] sm:$0xff] %v730_v18  ;;  %733 = vst [vmem:[%s5333_s5 + $0x898] sm:$0xff] %v732_v19  ;;  %v734_v20 = vld [vmem:[%s5325_s4 + $0x1140] sm:$0xff]  ;;  %v736_v21 = vld [vmem:[%s5325_s4 + $0x1148] sm:$0xff] }
  0xa3   : > { %v738_v22 = vld [vmem:[%s5325_s4 + $0x1160] sm:$0xff]  ;;  %735 = vst [vmem:[%s5333_s5 + $0x8a0] sm:$0xff] %v734_v20  ;;  %737 = vst [vmem:[%s5333_s5 + $0x8a8] sm:$0xff] %v736_v21  ;;  %v740_v23 = vld [vmem:[%s5325_s4 + $0x1168] sm:$0xff] }
  0xa4   : > { %739 = vst [vmem:[%s5333_s5 + $0x8b0] sm:$0xff] %v738_v22  ;;  %v742_v24 = vld [vmem:[%s5325_s4 + $0x1180] sm:$0xff]  ;;  %v744_v25 = vld [vmem:[%s5325_s4 + $0x1188] sm:$0xff]  ;;  %741 = vst [vmem:[%s5333_s5 + $0x8b8] sm:$0xff] %v740_v23 }
  0xa5   : > { %743 = vst [vmem:[%s5333_s5 + $0x8c0] sm:$0xff] %v742_v24  ;;  %745 = vst [vmem:[%s5333_s5 + $0x8c8] sm:$0xff] %v744_v25  ;;  %v746_v26 = vld [vmem:[%s5325_s4 + $0x11a0] sm:$0xff]  ;;  %v748_v27 = vld [vmem:[%s5325_s4 + $0x11a8] sm:$0xff] }
  0xa6   : > { %v750_v28 = vld [vmem:[%s5325_s4 + $0x11c0] sm:$0xff]  ;;  %747 = vst [vmem:[%s5333_s5 + $0x8d0] sm:$0xff] %v746_v26  ;;  %749 = vst [vmem:[%s5333_s5 + $0x8d8] sm:$0xff] %v748_v27  ;;  %v752_v29 = vld [vmem:[%s5325_s4 + $0x11c8] sm:$0xff] }
  0xa7   : > { %751 = vst [vmem:[%s5333_s5 + $0x8e0] sm:$0xff] %v750_v28  ;;  %v754_v30 = vld [vmem:[%s5325_s4 + $0x11e0] sm:$0xff]  ;;  %v756_v31 = vld [vmem:[%s5325_s4 + $0x11e8] sm:$0xff]  ;;  %753 = vst [vmem:[%s5333_s5 + $0x8e8] sm:$0xff] %v752_v29 }
  0xa8   : > { %755 = vst [vmem:[%s5333_s5 + $0x8f0] sm:$0xff] %v754_v30  ;;  %757 = vst [vmem:[%s5333_s5 + $0x8f8] sm:$0xff] %v756_v31  ;;  %v758_v32 = vld [vmem:[%s5325_s4 + $0x1200] sm:$0xff]  ;;  %v760_v33 = vld [vmem:[%s5325_s4 + $0x1208] sm:$0xff] }
  0xa9   : > { %v762_v34 = vld [vmem:[%s5325_s4 + $0x1220] sm:$0xff]  ;;  %759 = vst [vmem:[%s5333_s5 + $0x900] sm:$0xff] %v758_v32  ;;  %761 = vst [vmem:[%s5333_s5 + $0x908] sm:$0xff] %v760_v33  ;;  %v764_v35 = vld [vmem:[%s5325_s4 + $0x1228] sm:$0xff] }
  0xaa   : > { %763 = vst [vmem:[%s5333_s5 + $0x910] sm:$0xff] %v762_v34  ;;  %v766_v36 = vld [vmem:[%s5325_s4 + $0x1240] sm:$0xff]  ;;  %v768_v37 = vld [vmem:[%s5325_s4 + $0x1248] sm:$0xff]  ;;  %765 = vst [vmem:[%s5333_s5 + $0x918] sm:$0xff] %v764_v35 }
  0xab   : > { %767 = vst [vmem:[%s5333_s5 + $0x920] sm:$0xff] %v766_v36  ;;  %769 = vst [vmem:[%s5333_s5 + $0x928] sm:$0xff] %v768_v37  ;;  %v770_v38 = vld [vmem:[%s5325_s4 + $0x1260] sm:$0xff]  ;;  %v772_v39 = vld [vmem:[%s5325_s4 + $0x1268] sm:$0xff] }
  0xac   : > { %v774_v40 = vld [vmem:[%s5325_s4 + $0x1280] sm:$0xff]  ;;  %771 = vst [vmem:[%s5333_s5 + $0x930] sm:$0xff] %v770_v38  ;;  %773 = vst [vmem:[%s5333_s5 + $0x938] sm:$0xff] %v772_v39  ;;  %v776_v41 = vld [vmem:[%s5325_s4 + $0x1288] sm:$0xff] }
  0xad   : > { %775 = vst [vmem:[%s5333_s5 + $0x940] sm:$0xff] %v774_v40  ;;  %v778_v42 = vld [vmem:[%s5325_s4 + $0x12a0] sm:$0xff]  ;;  %v780_v43 = vld [vmem:[%s5325_s4 + $0x12a8] sm:$0xff]  ;;  %777 = vst [vmem:[%s5333_s5 + $0x948] sm:$0xff] %v776_v41 }
  0xae   : > { %779 = vst [vmem:[%s5333_s5 + $0x950] sm:$0xff] %v778_v42  ;;  %781 = vst [vmem:[%s5333_s5 + $0x958] sm:$0xff] %v780_v43  ;;  %v782_v44 = vld [vmem:[%s5325_s4 + $0x12c0] sm:$0xff]  ;;  %v784_v45 = vld [vmem:[%s5325_s4 + $0x12c8] sm:$0xff] }
  0xaf   : > { %v786_v46 = vld [vmem:[%s5325_s4 + $0x12e0] sm:$0xff]  ;;  %783 = vst [vmem:[%s5333_s5 + $0x960] sm:$0xff] %v782_v44  ;;  %785 = vst [vmem:[%s5333_s5 + $0x968] sm:$0xff] %v784_v45  ;;  %v788_v47 = vld [vmem:[%s5325_s4 + $0x12e8] sm:$0xff] }
  0xb0   : > { %787 = vst [vmem:[%s5333_s5 + $0x970] sm:$0xff] %v786_v46  ;;  %v790_v48 = vld [vmem:[%s5325_s4 + $0x1300] sm:$0xff]  ;;  %v792_v49 = vld [vmem:[%s5325_s4 + $0x1308] sm:$0xff]  ;;  %789 = vst [vmem:[%s5333_s5 + $0x978] sm:$0xff] %v788_v47 }
  0xb1   : > { %791 = vst [vmem:[%s5333_s5 + $0x980] sm:$0xff] %v790_v48  ;;  %793 = vst [vmem:[%s5333_s5 + $0x988] sm:$0xff] %v792_v49  ;;  %v794_v50 = vld [vmem:[%s5325_s4 + $0x1320] sm:$0xff]  ;;  %v796_v51 = vld [vmem:[%s5325_s4 + $0x1328] sm:$0xff] }
  0xb2   : > { %v798_v52 = vld [vmem:[%s5325_s4 + $0x1340] sm:$0xff]  ;;  %795 = vst [vmem:[%s5333_s5 + $0x990] sm:$0xff] %v794_v50  ;;  %797 = vst [vmem:[%s5333_s5 + $0x998] sm:$0xff] %v796_v51  ;;  %v800_v53 = vld [vmem:[%s5325_s4 + $0x1348] sm:$0xff] }
  0xb3   : > { %799 = vst [vmem:[%s5333_s5 + $0x9a0] sm:$0xff] %v798_v52  ;;  %v802_v54 = vld [vmem:[%s5325_s4 + $0x1360] sm:$0xff]  ;;  %v804_v55 = vld [vmem:[%s5325_s4 + $0x1368] sm:$0xff]  ;;  %801 = vst [vmem:[%s5333_s5 + $0x9a8] sm:$0xff] %v800_v53 }
  0xb4   : > { %803 = vst [vmem:[%s5333_s5 + $0x9b0] sm:$0xff] %v802_v54  ;;  %805 = vst [vmem:[%s5333_s5 + $0x9b8] sm:$0xff] %v804_v55  ;;  %v806_v56 = vld [vmem:[%s5325_s4 + $0x1380] sm:$0xff]  ;;  %v808_v57 = vld [vmem:[%s5325_s4 + $0x1388] sm:$0xff] }
  0xb5   : > { %v810_v58 = vld [vmem:[%s5325_s4 + $0x13a0] sm:$0xff]  ;;  %807 = vst [vmem:[%s5333_s5 + $0x9c0] sm:$0xff] %v806_v56  ;;  %809 = vst [vmem:[%s5333_s5 + $0x9c8] sm:$0xff] %v808_v57  ;;  %v812_v59 = vld [vmem:[%s5325_s4 + $0x13a8] sm:$0xff] }
  0xb6   : > { %811 = vst [vmem:[%s5333_s5 + $0x9d0] sm:$0xff] %v810_v58  ;;  %v814_v60 = vld [vmem:[%s5325_s4 + $0x13c0] sm:$0xff]  ;;  %v816_v61 = vld [vmem:[%s5325_s4 + $0x13c8] sm:$0xff]  ;;  %813 = vst [vmem:[%s5333_s5 + $0x9d8] sm:$0xff] %v812_v59 }
  0xb7   : > { %815 = vst [vmem:[%s5333_s5 + $0x9e0] sm:$0xff] %v814_v60  ;;  %817 = vst [vmem:[%s5333_s5 + $0x9e8] sm:$0xff] %v816_v61  ;;  %v818_v62 = vld [vmem:[%s5325_s4 + $0x13e0] sm:$0xff]  ;;  %v820_v63 = vld [vmem:[%s5325_s4 + $0x13e8] sm:$0xff] }
  0xb8   : > { %v822_v0 = vld [vmem:[%s5325_s4 + $0x1400] sm:$0xff]  ;;  %819 = vst [vmem:[%s5333_s5 + $0x9f0] sm:$0xff] %v818_v62  ;;  %821 = vst [vmem:[%s5333_s5 + $0x9f8] sm:$0xff] %v820_v63  ;;  %v824_v1 = vld [vmem:[%s5325_s4 + $0x1408] sm:$0xff] }
  0xb9   : > { %823 = vst [vmem:[%s5333_s5 + $0xa00] sm:$0xff] %v822_v0  ;;  %v826_v2 = vld [vmem:[%s5325_s4 + $0x1420] sm:$0xff]  ;;  %v828_v3 = vld [vmem:[%s5325_s4 + $0x1428] sm:$0xff]  ;;  %825 = vst [vmem:[%s5333_s5 + $0xa08] sm:$0xff] %v824_v1 }
  0xba   : > { %827 = vst [vmem:[%s5333_s5 + $0xa10] sm:$0xff] %v826_v2  ;;  %829 = vst [vmem:[%s5333_s5 + $0xa18] sm:$0xff] %v828_v3  ;;  %v830_v4 = vld [vmem:[%s5325_s4 + $0x1440] sm:$0xff]  ;;  %v832_v5 = vld [vmem:[%s5325_s4 + $0x1448] sm:$0xff] }
  0xbb   : > { %v834_v6 = vld [vmem:[%s5325_s4 + $0x1460] sm:$0xff]  ;;  %831 = vst [vmem:[%s5333_s5 + $0xa20] sm:$0xff] %v830_v4  ;;  %833 = vst [vmem:[%s5333_s5 + $0xa28] sm:$0xff] %v832_v5  ;;  %v836_v7 = vld [vmem:[%s5325_s4 + $0x1468] sm:$0xff] }
  0xbc   : > { %835 = vst [vmem:[%s5333_s5 + $0xa30] sm:$0xff] %v834_v6  ;;  %v838_v8 = vld [vmem:[%s5325_s4 + $0x1480] sm:$0xff]  ;;  %v840_v9 = vld [vmem:[%s5325_s4 + $0x1488] sm:$0xff]  ;;  %837 = vst [vmem:[%s5333_s5 + $0xa38] sm:$0xff] %v836_v7 }
  0xbd   : > { %839 = vst [vmem:[%s5333_s5 + $0xa40] sm:$0xff] %v838_v8  ;;  %841 = vst [vmem:[%s5333_s5 + $0xa48] sm:$0xff] %v840_v9  ;;  %v842_v10 = vld [vmem:[%s5325_s4 + $0x14a0] sm:$0xff]  ;;  %v844_v11 = vld [vmem:[%s5325_s4 + $0x14a8] sm:$0xff] }
  0xbe   : > { %v846_v12 = vld [vmem:[%s5325_s4 + $0x14c0] sm:$0xff]  ;;  %843 = vst [vmem:[%s5333_s5 + $0xa50] sm:$0xff] %v842_v10  ;;  %845 = vst [vmem:[%s5333_s5 + $0xa58] sm:$0xff] %v844_v11  ;;  %v848_v13 = vld [vmem:[%s5325_s4 + $0x14c8] sm:$0xff] }
  0xbf   : > { %847 = vst [vmem:[%s5333_s5 + $0xa60] sm:$0xff] %v846_v12  ;;  %v850_v14 = vld [vmem:[%s5325_s4 + $0x14e0] sm:$0xff]  ;;  %v852_v15 = vld [vmem:[%s5325_s4 + $0x14e8] sm:$0xff]  ;;  %849 = vst [vmem:[%s5333_s5 + $0xa68] sm:$0xff] %v848_v13 }
  0xc0   : > { %851 = vst [vmem:[%s5333_s5 + $0xa70] sm:$0xff] %v850_v14  ;;  %853 = vst [vmem:[%s5333_s5 + $0xa78] sm:$0xff] %v852_v15  ;;  %v854_v16 = vld [vmem:[%s5325_s4 + $0x1500] sm:$0xff]  ;;  %v856_v17 = vld [vmem:[%s5325_s4 + $0x1508] sm:$0xff] }
  0xc1   : > { %v858_v18 = vld [vmem:[%s5325_s4 + $0x1520] sm:$0xff]  ;;  %855 = vst [vmem:[%s5333_s5 + $0xa80] sm:$0xff] %v854_v16  ;;  %857 = vst [vmem:[%s5333_s5 + $0xa88] sm:$0xff] %v856_v17  ;;  %v860_v19 = vld [vmem:[%s5325_s4 + $0x1528] sm:$0xff] }
  0xc2   : > { %859 = vst [vmem:[%s5333_s5 + $0xa90] sm:$0xff] %v858_v18  ;;  %v862_v20 = vld [vmem:[%s5325_s4 + $0x1540] sm:$0xff]  ;;  %v864_v21 = vld [vmem:[%s5325_s4 + $0x1548] sm:$0xff]  ;;  %861 = vst [vmem:[%s5333_s5 + $0xa98] sm:$0xff] %v860_v19 }
  0xc3   : > { %863 = vst [vmem:[%s5333_s5 + $0xaa0] sm:$0xff] %v862_v20  ;;  %865 = vst [vmem:[%s5333_s5 + $0xaa8] sm:$0xff] %v864_v21  ;;  %v866_v22 = vld [vmem:[%s5325_s4 + $0x1560] sm:$0xff]  ;;  %v868_v23 = vld [vmem:[%s5325_s4 + $0x1568] sm:$0xff] }
  0xc4   : > { %v870_v24 = vld [vmem:[%s5325_s4 + $0x1580] sm:$0xff]  ;;  %867 = vst [vmem:[%s5333_s5 + $0xab0] sm:$0xff] %v866_v22  ;;  %869 = vst [vmem:[%s5333_s5 + $0xab8] sm:$0xff] %v868_v23  ;;  %v872_v25 = vld [vmem:[%s5325_s4 + $0x1588] sm:$0xff] }
  0xc5   : > { %871 = vst [vmem:[%s5333_s5 + $0xac0] sm:$0xff] %v870_v24  ;;  %v874_v26 = vld [vmem:[%s5325_s4 + $0x15a0] sm:$0xff]  ;;  %v876_v27 = vld [vmem:[%s5325_s4 + $0x15a8] sm:$0xff]  ;;  %873 = vst [vmem:[%s5333_s5 + $0xac8] sm:$0xff] %v872_v25 }
  0xc6   : > { %875 = vst [vmem:[%s5333_s5 + $0xad0] sm:$0xff] %v874_v26  ;;  %877 = vst [vmem:[%s5333_s5 + $0xad8] sm:$0xff] %v876_v27  ;;  %v878_v28 = vld [vmem:[%s5325_s4 + $0x15c0] sm:$0xff]  ;;  %v880_v29 = vld [vmem:[%s5325_s4 + $0x15c8] sm:$0xff] }
  0xc7   : > { %v882_v30 = vld [vmem:[%s5325_s4 + $0x15e0] sm:$0xff]  ;;  %879 = vst [vmem:[%s5333_s5 + $0xae0] sm:$0xff] %v878_v28  ;;  %881 = vst [vmem:[%s5333_s5 + $0xae8] sm:$0xff] %v880_v29  ;;  %v884_v31 = vld [vmem:[%s5325_s4 + $0x15e8] sm:$0xff] }
  0xc8   : > { %883 = vst [vmem:[%s5333_s5 + $0xaf0] sm:$0xff] %v882_v30  ;;  %v886_v32 = vld [vmem:[%s5325_s4 + $0x1600] sm:$0xff]  ;;  %v888_v33 = vld [vmem:[%s5325_s4 + $0x1608] sm:$0xff]  ;;  %885 = vst [vmem:[%s5333_s5 + $0xaf8] sm:$0xff] %v884_v31 }
  0xc9   : > { %887 = vst [vmem:[%s5333_s5 + $0xb00] sm:$0xff] %v886_v32  ;;  %889 = vst [vmem:[%s5333_s5 + $0xb08] sm:$0xff] %v888_v33  ;;  %v890_v34 = vld [vmem:[%s5325_s4 + $0x1620] sm:$0xff]  ;;  %v892_v35 = vld [vmem:[%s5325_s4 + $0x1628] sm:$0xff] }
  0xca   : > { %v894_v36 = vld [vmem:[%s5325_s4 + $0x1640] sm:$0xff]  ;;  %891 = vst [vmem:[%s5333_s5 + $0xb10] sm:$0xff] %v890_v34  ;;  %893 = vst [vmem:[%s5333_s5 + $0xb18] sm:$0xff] %v892_v35  ;;  %v896_v37 = vld [vmem:[%s5325_s4 + $0x1648] sm:$0xff] }
  0xcb   : > { %895 = vst [vmem:[%s5333_s5 + $0xb20] sm:$0xff] %v894_v36  ;;  %v898_v38 = vld [vmem:[%s5325_s4 + $0x1660] sm:$0xff]  ;;  %v900_v39 = vld [vmem:[%s5325_s4 + $0x1668] sm:$0xff]  ;;  %897 = vst [vmem:[%s5333_s5 + $0xb28] sm:$0xff] %v896_v37 }
  0xcc   : > { %899 = vst [vmem:[%s5333_s5 + $0xb30] sm:$0xff] %v898_v38  ;;  %901 = vst [vmem:[%s5333_s5 + $0xb38] sm:$0xff] %v900_v39  ;;  %v902_v40 = vld [vmem:[%s5325_s4 + $0x1680] sm:$0xff]  ;;  %v904_v41 = vld [vmem:[%s5325_s4 + $0x1688] sm:$0xff] }
  0xcd   : > { %v906_v42 = vld [vmem:[%s5325_s4 + $0x16a0] sm:$0xff]  ;;  %903 = vst [vmem:[%s5333_s5 + $0xb40] sm:$0xff] %v902_v40  ;;  %905 = vst [vmem:[%s5333_s5 + $0xb48] sm:$0xff] %v904_v41  ;;  %v908_v43 = vld [vmem:[%s5325_s4 + $0x16a8] sm:$0xff] }
  0xce   : > { %907 = vst [vmem:[%s5333_s5 + $0xb50] sm:$0xff] %v906_v42  ;;  %v910_v44 = vld [vmem:[%s5325_s4 + $0x16c0] sm:$0xff]  ;;  %v912_v45 = vld [vmem:[%s5325_s4 + $0x16c8] sm:$0xff]  ;;  %909 = vst [vmem:[%s5333_s5 + $0xb58] sm:$0xff] %v908_v43 }
  0xcf   : > { %911 = vst [vmem:[%s5333_s5 + $0xb60] sm:$0xff] %v910_v44  ;;  %913 = vst [vmem:[%s5333_s5 + $0xb68] sm:$0xff] %v912_v45  ;;  %v914_v46 = vld [vmem:[%s5325_s4 + $0x16e0] sm:$0xff]  ;;  %v916_v47 = vld [vmem:[%s5325_s4 + $0x16e8] sm:$0xff] }
  0xd0   : > { %v918_v48 = vld [vmem:[%s5325_s4 + $0x1700] sm:$0xff]  ;;  %915 = vst [vmem:[%s5333_s5 + $0xb70] sm:$0xff] %v914_v46  ;;  %917 = vst [vmem:[%s5333_s5 + $0xb78] sm:$0xff] %v916_v47  ;;  %v920_v49 = vld [vmem:[%s5325_s4 + $0x1708] sm:$0xff] }
  0xd1   : > { %919 = vst [vmem:[%s5333_s5 + $0xb80] sm:$0xff] %v918_v48  ;;  %v922_v50 = vld [vmem:[%s5325_s4 + $0x1720] sm:$0xff]  ;;  %v924_v51 = vld [vmem:[%s5325_s4 + $0x1728] sm:$0xff]  ;;  %921 = vst [vmem:[%s5333_s5 + $0xb88] sm:$0xff] %v920_v49 }
  0xd2   : > { %923 = vst [vmem:[%s5333_s5 + $0xb90] sm:$0xff] %v922_v50  ;;  %925 = vst [vmem:[%s5333_s5 + $0xb98] sm:$0xff] %v924_v51  ;;  %v926_v52 = vld [vmem:[%s5325_s4 + $0x1740] sm:$0xff]  ;;  %v928_v53 = vld [vmem:[%s5325_s4 + $0x1748] sm:$0xff] }
  0xd3   : > { %v930_v54 = vld [vmem:[%s5325_s4 + $0x1760] sm:$0xff]  ;;  %927 = vst [vmem:[%s5333_s5 + $0xba0] sm:$0xff] %v926_v52  ;;  %929 = vst [vmem:[%s5333_s5 + $0xba8] sm:$0xff] %v928_v53  ;;  %v932_v55 = vld [vmem:[%s5325_s4 + $0x1768] sm:$0xff] }
  0xd4   : > { %931 = vst [vmem:[%s5333_s5 + $0xbb0] sm:$0xff] %v930_v54  ;;  %v934_v56 = vld [vmem:[%s5325_s4 + $0x1780] sm:$0xff]  ;;  %v936_v57 = vld [vmem:[%s5325_s4 + $0x1788] sm:$0xff]  ;;  %933 = vst [vmem:[%s5333_s5 + $0xbb8] sm:$0xff] %v932_v55 }
  0xd5   : > { %935 = vst [vmem:[%s5333_s5 + $0xbc0] sm:$0xff] %v934_v56  ;;  %937 = vst [vmem:[%s5333_s5 + $0xbc8] sm:$0xff] %v936_v57  ;;  %v938_v58 = vld [vmem:[%s5325_s4 + $0x17a0] sm:$0xff]  ;;  %v940_v59 = vld [vmem:[%s5325_s4 + $0x17a8] sm:$0xff] }
  0xd6   : > { %v942_v60 = vld [vmem:[%s5325_s4 + $0x17c0] sm:$0xff]  ;;  %939 = vst [vmem:[%s5333_s5 + $0xbd0] sm:$0xff] %v938_v58  ;;  %941 = vst [vmem:[%s5333_s5 + $0xbd8] sm:$0xff] %v940_v59  ;;  %v944_v61 = vld [vmem:[%s5325_s4 + $0x17c8] sm:$0xff] }
  0xd7   : > { %943 = vst [vmem:[%s5333_s5 + $0xbe0] sm:$0xff] %v942_v60  ;;  %v946_v62 = vld [vmem:[%s5325_s4 + $0x17e0] sm:$0xff]  ;;  %v948_v63 = vld [vmem:[%s5325_s4 + $0x17e8] sm:$0xff]  ;;  %945 = vst [vmem:[%s5333_s5 + $0xbe8] sm:$0xff] %v944_v61 }
  0xd8   : > { %947 = vst [vmem:[%s5333_s5 + $0xbf0] sm:$0xff] %v946_v62  ;;  %949 = vst [vmem:[%s5333_s5 + $0xbf8] sm:$0xff] %v948_v63 }
  0xd9 PF: > { %p4089_p11 = scmp.ge.s32.totalorder %s5238_s17, 1  ;;  %p962_p12 = scmp.lt.s32.totalorder %s5238_s17, 3 }
  0xdb   : > { %p963_p13 = pnand %p4089_p11, %p962_p12 }
  0xdc   : > { %s6100_s6 = sand.u32 (!%p963_p13), 1, %s5222_s13   ;;  %v1411_v0 = vlaneseq (!%p963_p13)  ;;  %v5240_v1 = vmov (!%p963_p13), 1966171168   ;;  %v6108_v4 = vld [vmem:[%s6627_s0] sm:$0xff] (!%p963_p13)  ;;  %s4091_s19 = sshll.u32 (!%p963_p13), %s5230_s15, 2 }
  0xdd   : > { %966 = sbr.rel (%p963_p13) target bundleno = 845 (0x34d), region = 51  ;;  %v1409_v2 = vunpack.c.l.s4 (!%p963_p13), %v5240_v1  ;;  %p1008_p0 = scmp.lt.s32.totalorder (!%p963_p13), %s4091_s19, 7 }
  0xde   : > { %s4525_s7 = smul.u32 (!%p963_p13), 3072, %s6100_s6  ;;  %v6103_v3 = vshrl.u32 (!%p963_p13), %v1411_v0, 7  ;;  %s4090_s27 = sshll.u32 (!%p963_p13), %s6100_s6, 3 }
  0xdf   : > { %v1410_v5 = vunpack.c.0.s8 (!%p963_p13), %v1409_v2  ;;  %s4483_s28 = sshll.u32 (!%p963_p13), %s5230_s15, 7  ;;  %s999_s29 = scalar_lea.vmem (!%p963_p13), [#allocation4], %s4090_s27 }
  0xe0   : > { %s6110_s10 = scalar_lea.vmem (!%p963_p13), [#allocation3], %s4525_s7  ;;  %s3985_s30 = sshll.u32 (!%p963_p13), %s999_s29, 4  ;;  %s6580_s30 = int_to_ptr.vmem [resolvable:$true] %s3985_s30 }
  0xe1   : > { %v4583_v6 = vld [vmem:[%s6110_s10 + $0x4] ss:$16 sps:$4 sm:$0xff] (!%p963_p13)   ;;  %v4585_v7 = vld [vmem:[%s6110_s10 + $0xc] ss:$16 sps:$4 sm:$0xff] (!%p963_p13)   ;;  %v6115_v8 = vsub.s32 (!%p963_p13), %v1410_v5, %v6103_v3  ;;  %v4587_v9 = vld [vmem:[%s6110_s10] ss:$16 sps:$4 sm:$0xff] (!%p963_p13)   ;;  %s6578_s7 = scalar_lea.hbm (!%p963_p13), %s6630_s3, %s4483_s28 }
  0xe2   : > { %3412 = vmatprep.subr.bf16.mxu0 (!%p963_p13), %v4583_v6  ;;  %v4588_v10 = vld [vmem:[%s6110_s10 + $0x8] ss:$16 sps:$4 sm:$0xff] (!%p963_p13)   ;;  %3658 = vmatprep.subr.bf16.mxu1 (!%p963_p13), %v4585_v7  ;;  %v4589_v11 = vld [vmem:[%s6110_s10 + $0x24] ss:$16 sps:$4 sm:$0xff] (!%p963_p13)   ;;  %v4591_v13 = vld [vmem:[%s6110_s10 + $0x2c] ss:$16 sps:$4 sm:$0xff] (!%p963_p13)  }
  0xe3   : > { %v6122_v12 = vrot.slane (!%p963_p13), %v6108_v4, %v6115_v8  ;;  %3413 = vmatpush1.bf16.msra.mxu0 (!%p963_p13), %v4587_v9  ;;  %3659 = vmatpush1.bf16.msra.mxu1 (!%p963_p13), %v4588_v10  ;;  %v4593_v14 = vld [vmem:[%s6110_s10 + $0x20] ss:$16 sps:$4 sm:$0xff] (!%p963_p13)   ;;  %v4594_v15 = vld [vmem:[%s6110_s10 + $0x28] ss:$16 sps:$4 sm:$0xff] (!%p963_p13)   ;;  %v4595_v17 = vld [vmem:[%s6110_s10 + $0x44] ss:$16 sps:$4 sm:$0xff] (!%p963_p13)  }
  0xe4   : > { %3414 = vmatprep.subr.bf16.mxu0 %v4589_v11  ;;  %3660 = vmatprep.subr.bf16.mxu1 %v4591_v13  ;;  %v4597_v18 = vld [vmem:[%s6110_s10 + $0x4c] ss:$16 sps:$4 sm:$0xff]   ;;  %v4599_v19 = vld [vmem:[%s6110_s10 + $0x40] ss:$16 sps:$4 sm:$0xff]   ;;  %v4600_v20 = vld [vmem:[%s6110_s10 + $0x48] ss:$16 sps:$4 sm:$0xff]  }
  0xe5   : > { %v1422_v16 = vcombine.high %v6122_v12, %v6122_v12  ;;  %v4601_v22 = vld [vmem:[%s6110_s10 + $0x64] ss:$16 sps:$4 sm:$0xff]   ;;  %v4603_v23 = vld [vmem:[%s6110_s10 + $0x6c] ss:$16 sps:$4 sm:$0xff]   ;;  %v4605_v24 = vld [vmem:[%s6110_s10 + $0x60] ss:$16 sps:$4 sm:$0xff]  }
  0xe6   : > { %v4606_v25 = vld [vmem:[%s6110_s10 + $0x68] ss:$16 sps:$4 sm:$0xff]   ;;  %v4607_v26 = vld [vmem:[%s6110_s10 + $0x84] ss:$16 sps:$4 sm:$0xff]   ;;  %v4609_v27 = vld [vmem:[%s6110_s10 + $0x8c] ss:$16 sps:$4 sm:$0xff]  }
  0xe7   : > { %v6134_v21 = vrot.slane %v1422_v16, %v6115_v8  ;;  %3415 = vmatpush1.bf16.msra.mxu0 %v4593_v14  ;;  %3661 = vmatpush1.bf16.msra.mxu1 %v4594_v15  ;;  %v4611_v28 = vld [vmem:[%s6110_s10 + $0x80] ss:$16 sps:$4 sm:$0xff]   ;;  %v4612_v29 = vld [vmem:[%s6110_s10 + $0x88] ss:$16 sps:$4 sm:$0xff]   ;;  %v4613_v30 = vld [vmem:[%s6110_s10 + $0xa4] ss:$16 sps:$4 sm:$0xff]  }
  0xe8   : > { %3416 = vmatprep.subr.bf16.mxu0 %v4595_v17  ;;  %3662 = vmatprep.subr.bf16.mxu1 %v4597_v18  ;;  %v4615_v31 = vld [vmem:[%s6110_s10 + $0xac] ss:$16 sps:$4 sm:$0xff]   ;;  %v4617_v32 = vld [vmem:[%s6110_s10 + $0xa0] ss:$16 sps:$4 sm:$0xff]   ;;  %v4618_v33 = vld [vmem:[%s6110_s10 + $0xa8] ss:$16 sps:$4 sm:$0xff]   ;;  %v6196_v18 = vrot.slane %v6122_v12, %v6115_v8 }
  0xe9   : > { %3444 = vmatprep.mubr.bf16.mxu0 %v6134_v21  ;;  %3690 = vmatprep.mubr.bf16.mxu1 %v6134_v21  ;;  %v4619_v34 = vld [vmem:[%s6110_s10 + $0xc4] ss:$16 sps:$4 sm:$0xff]   ;;  %v4621_v35 = vld [vmem:[%s6110_s10 + $0xcc] ss:$16 sps:$4 sm:$0xff]   ;;  %v4623_v36 = vld [vmem:[%s6110_s10 + $0xc0] ss:$16 sps:$4 sm:$0xff]  }
  0xea   : > { %v4624_v37 = vld [vmem:[%s6110_s10 + $0xc8] ss:$16 sps:$4 sm:$0xff]   ;;  %v4625_v38 = vld [vmem:[%s6110_s10 + $0xe4] ss:$16 sps:$4 sm:$0xff]   ;;  %v4627_v39 = vld [vmem:[%s6110_s10 + $0xec] ss:$16 sps:$4 sm:$0xff]  }
  0xeb   : > { %3417 = vmatpush1.bf16.msra.mxu0 %v4599_v19  ;;  %3663 = vmatpush1.bf16.msra.mxu1 %v4600_v20  ;;  %v4629_v40 = vld [vmem:[%s6110_s10 + $0xe0] ss:$16 sps:$4 sm:$0xff]   ;;  %v4630_v41 = vld [vmem:[%s6110_s10 + $0xe8] ss:$16 sps:$4 sm:$0xff]   ;;  %v4631_v42 = vld [vmem:[%s6110_s10 + $0x104] ss:$16 sps:$4 sm:$0xff]  }
  0xec   : > { %3418 = vmatprep.subr.bf16.mxu0 %v4601_v22  ;;  %3664 = vmatprep.subr.bf16.mxu1 %v4603_v23  ;;  %v4633_v43 = vld [vmem:[%s6110_s10 + $0x10c] ss:$16 sps:$4 sm:$0xff]   ;;  %v4635_v44 = vld [vmem:[%s6110_s10 + $0x100] ss:$16 sps:$4 sm:$0xff]   ;;  %v4636_v45 = vld [vmem:[%s6110_s10 + $0x108] ss:$16 sps:$4 sm:$0xff]   ;;  %v1454_v22 = vcombine.high %v6134_v21, %v6134_v21 }
  0xed   : > { %v4637_v46 = vld [vmem:[%s6110_s10 + $0x124] ss:$16 sps:$4 sm:$0xff]   ;;  %v4639_v47 = vld [vmem:[%s6110_s10 + $0x12c] ss:$16 sps:$4 sm:$0xff]   ;;  %v4641_v48 = vld [vmem:[%s6110_s10 + $0x120] ss:$16 sps:$4 sm:$0xff]  }
  0xee   : > { %v4642_v49 = vld [vmem:[%s6110_s10 + $0x128] ss:$16 sps:$4 sm:$0xff]   ;;  %v4643_v50 = vld [vmem:[%s6110_s10 + $0x144] ss:$16 sps:$4 sm:$0xff]   ;;  %v4645_v51 = vld [vmem:[%s6110_s10 + $0x14c] ss:$16 sps:$4 sm:$0xff]  }
  0xef   : > { %3419 = vmatpush1.bf16.msra.mxu0 %v4605_v24  ;;  %3665 = vmatpush1.bf16.msra.mxu1 %v4606_v25  ;;  %v4647_v52 = vld [vmem:[%s6110_s10 + $0x140] ss:$16 sps:$4 sm:$0xff]   ;;  %v4648_v53 = vld [vmem:[%s6110_s10 + $0x148] ss:$16 sps:$4 sm:$0xff]   ;;  %v4649_v54 = vld [vmem:[%s6110_s10 + $0x164] ss:$16 sps:$4 sm:$0xff]  }
  0xf0   : > { %3420 = vmatprep.subr.bf16.mxu0 %v4607_v26  ;;  %3666 = vmatprep.subr.bf16.mxu1 %v4609_v27  ;;  %v4651_v55 = vld [vmem:[%s6110_s10 + $0x16c] ss:$16 sps:$4 sm:$0xff]   ;;  %v4653_v56 = vld [vmem:[%s6110_s10 + $0x160] ss:$16 sps:$4 sm:$0xff]   ;;  %v4654_v57 = vld [vmem:[%s6110_s10 + $0x168] ss:$16 sps:$4 sm:$0xff]  }
  0xf1   : > { %v4655_v58 = vld [vmem:[%s6110_s10 + $0x184] ss:$16 sps:$4 sm:$0xff]   ;;  %v4657_v59 = vld [vmem:[%s6110_s10 + $0x18c] ss:$16 sps:$4 sm:$0xff]   ;;  %v4659_v60 = vld [vmem:[%s6110_s10 + $0x180] ss:$16 sps:$4 sm:$0xff]  }
  0xf2   : > { %v4660_v61 = vld [vmem:[%s6110_s10 + $0x188] ss:$16 sps:$4 sm:$0xff]   ;;  %v4661_v62 = vld [vmem:[%s6110_s10 + $0x1a4] ss:$16 sps:$4 sm:$0xff]   ;;  %v4663_v63 = vld [vmem:[%s6110_s10 + $0x1ac] ss:$16 sps:$4 sm:$0xff]  }
  0xf3   : > { %3421 = vmatpush1.bf16.msra.mxu0 %v4611_v28  ;;  %3667 = vmatpush1.bf16.msra.mxu1 %v4612_v29  ;;  %v4665_v0 = vld [vmem:[%s6110_s10 + $0x1a0] ss:$16 sps:$4 sm:$0xff]   ;;  %v4666_v1 = vld [vmem:[%s6110_s10 + $0x1a8] ss:$16 sps:$4 sm:$0xff]   ;;  %v4667_v2 = vld [vmem:[%s6110_s10 + $0x1c4] ss:$16 sps:$4 sm:$0xff]  }
  0xf4   : > { %3422 = vmatprep.subr.bf16.mxu0 %v4613_v30  ;;  %3668 = vmatprep.subr.bf16.mxu1 %v4615_v31  ;;  %v4669_v5 = vld [vmem:[%s6110_s10 + $0x1cc] ss:$16 sps:$4 sm:$0xff]   ;;  %v4671_v6 = vld [vmem:[%s6110_s10 + $0x1c0] ss:$16 sps:$4 sm:$0xff]   ;;  %v4672_v7 = vld [vmem:[%s6110_s10 + $0x1c8] ss:$16 sps:$4 sm:$0xff]  }
  0xf5   : > { %v4673_v9 = vld [vmem:[%s6110_s10 + $0x1e4] ss:$16 sps:$4 sm:$0xff]   ;;  %v4675_v10 = vld [vmem:[%s6110_s10 + $0x1ec] ss:$16 sps:$4 sm:$0xff]   ;;  %v4677_v11 = vld [vmem:[%s6110_s10 + $0x1e0] ss:$16 sps:$4 sm:$0xff]  }
  0xf6   : > { %v4678_v13 = vld [vmem:[%s6110_s10 + $0x1e8] ss:$16 sps:$4 sm:$0xff]   ;;  %v4681_v14 = vld [vmem:[%s6110_s10 + $0x204] ss:$16 sps:$4 sm:$0xff]   ;;  %v4684_v15 = vld [vmem:[%s6110_s10 + $0x20c] ss:$16 sps:$4 sm:$0xff]  }
  0xf7   : > { %3423 = vmatpush1.bf16.msra.mxu0 %v4617_v32  ;;  %3669 = vmatpush1.bf16.msra.mxu1 %v4618_v33  ;;  %v4679_v16 = vld [vmem:[%s6110_s10 + $0x200] ss:$16 sps:$4 sm:$0xff]   ;;  %v4682_v17 = vld [vmem:[%s6110_s10 + $0x208] ss:$16 sps:$4 sm:$0xff]   ;;  %v4687_v19 = vld [vmem:[%s6110_s10 + $0x224] ss:$16 sps:$4 sm:$0xff]  }
  0xf8   : > { %3424 = vmatprep.subr.bf16.mxu0 %v4619_v34  ;;  %3670 = vmatprep.subr.bf16.mxu1 %v4621_v35  ;;  %v4690_v20 = vld [vmem:[%s6110_s10 + $0x22c] ss:$16 sps:$4 sm:$0xff]   ;;  %v4685_v23 = vld [vmem:[%s6110_s10 + $0x220] ss:$16 sps:$4 sm:$0xff]   ;;  %v4688_v12 = vld [vmem:[%s6110_s10 + $0x228] ss:$16 sps:$4 sm:$0xff]  }
  0xf9   : > { %v4693_v24 = vld [vmem:[%s6110_s10 + $0x244] ss:$16 sps:$4 sm:$0xff]   ;;  %v4696_v25 = vld [vmem:[%s6110_s10 + $0x24c] ss:$16 sps:$4 sm:$0xff]   ;;  %v4691_v21 = vld [vmem:[%s6110_s10 + $0x240] ss:$16 sps:$4 sm:$0xff]  }
  0xfa   : > { %v4694_v26 = vld [vmem:[%s6110_s10 + $0x248] ss:$16 sps:$4 sm:$0xff]   ;;  %v4699_v27 = vld [vmem:[%s6110_s10 + $0x264] ss:$16 sps:$4 sm:$0xff]   ;;  %v4702_v28 = vld [vmem:[%s6110_s10 + $0x26c] ss:$16 sps:$4 sm:$0xff]  }
  0xfb   : > { %3425 = vmatpush1.bf16.msra.mxu0 %v4623_v36  ;;  %3671 = vmatpush1.bf16.msra.mxu1 %v4624_v37  ;;  %v4697_v29 = vld [vmem:[%s6110_s10 + $0x260] ss:$16 sps:$4 sm:$0xff]   ;;  %v4700_v30 = vld [vmem:[%s6110_s10 + $0x268] ss:$16 sps:$4 sm:$0xff]   ;;  %v4705_v31 = vld [vmem:[%s6110_s10 + $0x284] ss:$16 sps:$4 sm:$0xff]  }
  0xfc   : > { %3426 = vmatprep.subr.bf16.mxu0 %v4625_v38  ;;  %3672 = vmatprep.subr.bf16.mxu1 %v4627_v39  ;;  %v4708_v32 = vld [vmem:[%s6110_s10 + $0x28c] ss:$16 sps:$4 sm:$0xff]   ;;  %v4703_v33 = vld [vmem:[%s6110_s10 + $0x280] ss:$16 sps:$4 sm:$0xff]   ;;  %v4706_v34 = vld [vmem:[%s6110_s10 + $0x288] ss:$16 sps:$4 sm:$0xff]  }
  0xfd   : > { %v4711_v35 = vld [vmem:[%s6110_s10 + $0x2a4] ss:$16 sps:$4 sm:$0xff]   ;;  %v4714_v36 = vld [vmem:[%s6110_s10 + $0x2ac] ss:$16 sps:$4 sm:$0xff]   ;;  %v4709_v37 = vld [vmem:[%s6110_s10 + $0x2a0] ss:$16 sps:$4 sm:$0xff]  }
  0xfe   : > { %v4712_v38 = vld [vmem:[%s6110_s10 + $0x2a8] ss:$16 sps:$4 sm:$0xff]   ;;  %v4717_v39 = vld [vmem:[%s6110_s10 + $0x2c4] ss:$16 sps:$4 sm:$0xff]   ;;  %s6641_s19 = smov (!%p1008_p0, %s4091_s19), 7  ;;  %s3971_s8 = scalar_lea.sflag [#allocation5], %s6100_s6 }
  0xff   : > { %3427 = vmatpush1.bf16.msra.mxu0 %v4629_v40  ;;  %3673 = vmatpush1.bf16.msra.mxu1 %v4630_v41  ;;  %v4720_v40 = vld [vmem:[%s6110_s10 + $0x2cc] ss:$16 sps:$4 sm:$0xff]   ;;  %v4715_v41 = vld [vmem:[%s6110_s10 + $0x2c0] ss:$16 sps:$4 sm:$0xff]   ;;  %s1010_s26 = scalar_lea.vmem %s6629_s2, %s6641_s19  ;;  %s5160_s9 = scalar_lea.vmem %s6580_s30, 128 }
 0x100   : > { %3428 = vmatprep.subr.bf16.mxu0 %v4631_v42  ;;  %3674 = vmatprep.subr.bf16.mxu1 %v4633_v43  ;;  %v4718_v42 = vld [vmem:[%s6110_s10 + $0x2c8] ss:$16 sps:$4 sm:$0xff]   ;;  %v4723_v43 = vld [vmem:[%s6110_s10 + $0x2e4] ss:$16 sps:$4 sm:$0xff]   ;;  %p5161_p1 = scmp.ne.s32.totalorder %s6580_s30, %s5160_s9  ;;  %s5242_s15 = smov [#allocation4]  }
 0x102   : > { %p5162_p2 = pnand %p5161_p1, %p5302_p5 }
 0x103   : > { %3429 = vmatpush1.bf16.msra.mxu0 %v4635_v44  ;;  %3675 = vmatpush1.bf16.msra.mxu1 %v4636_v45  ;;  %v4726_v44 = vld [vmem:[%s6110_s10 + $0x2ec] ss:$16 sps:$4 sm:$0xff]   ;;  %v4721_v45 = vld [vmem:[%s6110_s10 + $0x2e0] ss:$16 sps:$4 sm:$0xff]  }
 0x104   : > { %3430 = vmatprep.subr.bf16.mxu0 %v4637_v46  ;;  %3676 = vmatprep.subr.bf16.mxu1 %v4639_v47  ;;  %v4724_v46 = vld [vmem:[%s6110_s10 + $0x2e8] ss:$16 sps:$4 sm:$0xff]   ;;  %v4729_v47 = vld [vmem:[%s6110_s10 + $0x304] ss:$16 sps:$4 sm:$0xff]   ;;  %p5163_p3 = pneg %p5162_p2 }
 0x107   : > { %3431 = vmatpush1.bf16.msra.mxu0 %v4641_v48  ;;  %3677 = vmatpush1.bf16.msra.mxu1 %v4642_v49  ;;  %v4732_v48 = vld [vmem:[%s6110_s10 + $0x30c] ss:$16 sps:$4 sm:$0xff]   ;;  %v4727_v49 = vld [vmem:[%s6110_s10 + $0x300] ss:$16 sps:$4 sm:$0xff]  }
 0x108   : > { %3432 = vmatprep.subr.bf16.mxu0 %v4643_v50  ;;  %3678 = vmatprep.subr.bf16.mxu1 %v4645_v51  ;;  %v4730_v50 = vld [vmem:[%s6110_s10 + $0x308] ss:$16 sps:$4 sm:$0xff]   ;;  %v4735_v51 = vld [vmem:[%s6110_s10 + $0x324] ss:$16 sps:$4 sm:$0xff]  }
 0x10b   : > { %3433 = vmatpush1.bf16.msra.mxu0 %v4647_v52  ;;  %3679 = vmatpush1.bf16.msra.mxu1 %v4648_v53  ;;  %v4738_v52 = vld [vmem:[%s6110_s10 + $0x32c] ss:$16 sps:$4 sm:$0xff]   ;;  %v4733_v53 = vld [vmem:[%s6110_s10 + $0x320] ss:$16 sps:$4 sm:$0xff]  }
 0x10c   : > { %3434 = vmatprep.subr.bf16.mxu0 %v4649_v54  ;;  %3680 = vmatprep.subr.bf16.mxu1 %v4651_v55  ;;  %v4736_v54 = vld [vmem:[%s6110_s10 + $0x328] ss:$16 sps:$4 sm:$0xff]   ;;  %v4741_v55 = vld [vmem:[%s6110_s10 + $0x344] ss:$16 sps:$4 sm:$0xff]  }
 0x10f   : > { %3435 = vmatpush1.bf16.msra.mxu0 %v4653_v56  ;;  %3681 = vmatpush1.bf16.msra.mxu1 %v4654_v57  ;;  %v4744_v56 = vld [vmem:[%s6110_s10 + $0x34c] ss:$16 sps:$4 sm:$0xff]   ;;  %v4739_v57 = vld [vmem:[%s6110_s10 + $0x340] ss:$16 sps:$4 sm:$0xff]  }
 0x110   : > { %3436 = vmatprep.subr.bf16.mxu0 %v4655_v58  ;;  %3682 = vmatprep.subr.bf16.mxu1 %v4657_v59  ;;  %v4742_v58 = vld [vmem:[%s6110_s10 + $0x348] ss:$16 sps:$4 sm:$0xff]   ;;  %v4747_v59 = vld [vmem:[%s6110_s10 + $0x364] ss:$16 sps:$4 sm:$0xff]  }
 0x113   : > { %3437 = vmatpush1.bf16.msra.mxu0 %v4659_v60  ;;  %3683 = vmatpush1.bf16.msra.mxu1 %v4660_v61  ;;  %v4750_v60 = vld [vmem:[%s6110_s10 + $0x36c] ss:$16 sps:$4 sm:$0xff]   ;;  %v4745_v61 = vld [vmem:[%s6110_s10 + $0x360] ss:$16 sps:$4 sm:$0xff]  }
 0x114   : > { %3438 = vmatprep.subr.bf16.mxu0 %v4661_v62  ;;  %3684 = vmatprep.subr.bf16.mxu1 %v4663_v63  ;;  %v4748_v62 = vld [vmem:[%s6110_s10 + $0x368] ss:$16 sps:$4 sm:$0xff]   ;;  %v4753_v63 = vld [vmem:[%s6110_s10 + $0x384] ss:$16 sps:$4 sm:$0xff]  }
 0x117   : > { %3439 = vmatpush1.bf16.msra.mxu0 %v4665_v0  ;;  %3685 = vmatpush1.bf16.msra.mxu1 %v4666_v1  ;;  %v4756_v0 = vld [vmem:[%s6110_s10 + $0x38c] ss:$16 sps:$4 sm:$0xff]   ;;  %v4751_v1 = vld [vmem:[%s6110_s10 + $0x380] ss:$16 sps:$4 sm:$0xff]  }
 0x118   : > { %3440 = vmatprep.subr.bf16.mxu0 %v4667_v2  ;;  %3686 = vmatprep.subr.bf16.mxu1 %v4669_v5  ;;  %v4754_v2 = vld [vmem:[%s6110_s10 + $0x388] ss:$16 sps:$4 sm:$0xff]   ;;  %v4759_v5 = vld [vmem:[%s6110_s10 + $0x3a4] ss:$16 sps:$4 sm:$0xff]  }
 0x11b   : > { %3441 = vmatpush1.bf16.msra.mxu0 %v4671_v6  ;;  %3687 = vmatpush1.bf16.msra.mxu1 %v4672_v7  ;;  %v4762_v6 = vld [vmem:[%s6110_s10 + $0x3ac] ss:$16 sps:$4 sm:$0xff]   ;;  %v4757_v7 = vld [vmem:[%s6110_s10 + $0x3a0] ss:$16 sps:$4 sm:$0xff]  }
 0x11c   : > { %3442 = vmatprep.subr.bf16.mxu0 %v4673_v9  ;;  %3688 = vmatprep.subr.bf16.mxu1 %v4675_v10  ;;  %v4760_v9 = vld [vmem:[%s6110_s10 + $0x3a8] ss:$16 sps:$4 sm:$0xff]   ;;  %v4765_v10 = vld [vmem:[%s6110_s10 + $0x3c4] ss:$16 sps:$4 sm:$0xff]  }
 0x11f   : > { %3443 = vmatpush1.bf16.msra.mxu0 %v4677_v11  ;;  %3689 = vmatpush1.bf16.msra.mxu1 %v4678_v13  ;;  %v4768_v11 = vld [vmem:[%s6110_s10 + $0x3cc] ss:$16 sps:$4 sm:$0xff]   ;;  %v1407_v13 = vcombine.high %v6108_v4, %v6108_v4  ;;  %v4777_v4 = vld [vmem:[%s6110_s10 + $0x404] ss:$16 sps:$4 sm:$0xff]  }
 0x120   : > { %3453 = vmatprep.subr.bf16.mxu0 %v4681_v14  ;;  %3699 = vmatprep.subr.bf16.mxu1 %v4684_v15  ;;  %v4763_v14 = vld [vmem:[%s6110_s10 + $0x3c0] ss:$16 sps:$4 sm:$0xff]   ;;  %v4766_v15 = vld [vmem:[%s6110_s10 + $0x3c8] ss:$16 sps:$4 sm:$0xff]  }
 0x122   : > { %3445 = vmatmul.mubr.bf16.vlgmr.msra.gmra.mrb[0].mxu0 %v6196_v18  ;;  %3691 = vmatmul.mubr.bf16.vlgmr.msra.gmra.mrb[0].mxu1 %v6196_v18 }
 0x123   : > { %3454 = vmatpush1.bf16.msra.mxu0 %v4679_v16  ;;  %3700 = vmatpush1.bf16.msra.mxu1 %v4682_v17  ;;  %v4771_v16 = vld [vmem:[%s6110_s10 + $0x3e4] ss:$16 sps:$4 sm:$0xff]   ;;  %v4774_v17 = vld [vmem:[%s6110_s10 + $0x3ec] ss:$16 sps:$4 sm:$0xff]  }
 0x124   : > { %3455 = vmatprep.subr.bf16.mxu0 %v4687_v19  ;;  %3701 = vmatprep.subr.bf16.mxu1 %v4690_v20  ;;  %v6263_v19 = vrot.slane %v1407_v13, %v6115_v8  ;;  %v4769_v20 = vld [vmem:[%s6110_s10 + $0x3e0] ss:$16 sps:$4 sm:$0xff]   ;;  %v4850_v13 = vld [vmem:[%s6110_s10 + $0x588] ss:$16 sps:$4 sm:$0xff]  }
 0x125   : > { %3485 = vmatprep.mubr.bf16.mxu0 %v1454_v22  ;;  %3731 = vmatprep.mubr.bf16.mxu1 %v1454_v22  ;;  %v4772_v22 = vld [vmem:[%s6110_s10 + $0x3e8] ss:$16 sps:$4 sm:$0xff]  }
 0x127   : > { %3456 = vmatpush1.bf16.msra.mxu0 %v4685_v23  ;;  %3702 = vmatpush1.bf16.msra.mxu1 %v4688_v12  ;;  %v4780_v23 = vld [vmem:[%s6110_s10 + $0x40c] ss:$16 sps:$4 sm:$0xff]   ;;  %v1423_v12 = vcombine.high %v6263_v19, %v6263_v19 }
 0x128   : > { %3457 = vmatprep.subr.bf16.mxu0 %v4693_v24  ;;  %3703 = vmatprep.subr.bf16.mxu1 %v4696_v25  ;;  %v4775_v24 = vld [vmem:[%s6110_s10 + $0x400] ss:$16 sps:$4 sm:$0xff]   ;;  %v4778_v25 = vld [vmem:[%s6110_s10 + $0x408] ss:$16 sps:$4 sm:$0xff]  }
 0x12b   : > { %3458 = vmatpush1.bf16.msra.mxu0 %v4691_v21  ;;  %3704 = vmatpush1.bf16.msra.mxu1 %v4694_v26  ;;  %v1452_v21 = vcombine.high %v6196_v18, %v6196_v18  ;;  %v4783_v26 = vld [vmem:[%s6110_s10 + $0x424] ss:$16 sps:$4 sm:$0xff]  }
 0x12c   : > { %3459 = vmatprep.subr.bf16.mxu0 %v4699_v27  ;;  %3705 = vmatprep.subr.bf16.mxu1 %v4702_v28  ;;  %v4786_v27 = vld [vmem:[%s6110_s10 + $0x42c] ss:$16 sps:$4 sm:$0xff]   ;;  %v6278_v28 = vrot.slane %v1423_v12, %v6115_v8  ;;  %v4789_v18 = vld [vmem:[%s6110_s10 + $0x444] ss:$16 sps:$4 sm:$0xff]  }
 0x12d   : > { %v4867_v12 = vld [vmem:[%s6110_s10 + $0x5e4] ss:$16 sps:$4 sm:$0xff]  }
 0x12f   : > { %3460 = vmatpush1.bf16.msra.mxu0 %v4697_v29  ;;  %3706 = vmatpush1.bf16.msra.mxu1 %v4700_v30  ;;  %v4781_v29 = vld [vmem:[%s6110_s10 + $0x420] ss:$16 sps:$4 sm:$0xff]   ;;  %v4784_v30 = vld [vmem:[%s6110_s10 + $0x428] ss:$16 sps:$4 sm:$0xff]  }
 0x130   : > { %3461 = vmatprep.subr.bf16.mxu0 %v4705_v31  ;;  %3707 = vmatprep.subr.bf16.mxu1 %v4708_v32  ;;  %v4792_v31 = vld [vmem:[%s6110_s10 + $0x44c] ss:$16 sps:$4 sm:$0xff]   ;;  %v4787_v32 = vld [vmem:[%s6110_s10 + $0x440] ss:$16 sps:$4 sm:$0xff]  }
 0x133   : > { %3462 = vmatpush1.bf16.msra.mxu0 %v4703_v33  ;;  %3708 = vmatpush1.bf16.msra.mxu1 %v4706_v34  ;;  %v4790_v33 = vld [vmem:[%s6110_s10 + $0x448] ss:$16 sps:$4 sm:$0xff]   ;;  %v4795_v34 = vld [vmem:[%s6110_s10 + $0x464] ss:$16 sps:$4 sm:$0xff]  }
 0x134   : > { %3463 = vmatprep.subr.bf16.mxu0 %v4711_v35  ;;  %3709 = vmatprep.subr.bf16.mxu1 %v4714_v36  ;;  %v4798_v35 = vld [vmem:[%s6110_s10 + $0x46c] ss:$16 sps:$4 sm:$0xff]   ;;  %v4793_v36 = vld [vmem:[%s6110_s10 + $0x460] ss:$16 sps:$4 sm:$0xff]  }
 0x137   : > { %3464 = vmatpush1.bf16.msra.mxu0 %v4709_v37  ;;  %3710 = vmatpush1.bf16.msra.mxu1 %v4712_v38  ;;  %v4796_v37 = vld [vmem:[%s6110_s10 + $0x468] ss:$16 sps:$4 sm:$0xff]   ;;  %v4801_v38 = vld [vmem:[%s6110_s10 + $0x484] ss:$16 sps:$4 sm:$0xff]  }
 0x138   : > { %3465 = vmatprep.subr.bf16.mxu0 %v4717_v39  ;;  %3711 = vmatprep.subr.bf16.mxu1 %v4720_v40  ;;  %v4804_v39 = vld [vmem:[%s6110_s10 + $0x48c] ss:$16 sps:$4 sm:$0xff]   ;;  %v4799_v40 = vld [vmem:[%s6110_s10 + $0x480] ss:$16 sps:$4 sm:$0xff]  }
 0x13b   : > { %3466 = vmatpush1.bf16.msra.mxu0 %v4715_v41  ;;  %3712 = vmatpush1.bf16.msra.mxu1 %v4718_v42  ;;  %v4802_v41 = vld [vmem:[%s6110_s10 + $0x488] ss:$16 sps:$4 sm:$0xff]   ;;  %v4807_v42 = vld [vmem:[%s6110_s10 + $0x4a4] ss:$16 sps:$4 sm:$0xff]  }
 0x13c   : > { %3467 = vmatprep.subr.bf16.mxu0 %v4723_v43  ;;  %3713 = vmatprep.subr.bf16.mxu1 %v4726_v44  ;;  %v4810_v43 = vld [vmem:[%s6110_s10 + $0x4ac] ss:$16 sps:$4 sm:$0xff]   ;;  %v4805_v44 = vld [vmem:[%s6110_s10 + $0x4a0] ss:$16 sps:$4 sm:$0xff]  }
 0x13f   : > { %3468 = vmatpush1.bf16.msra.mxu0 %v4721_v45  ;;  %3714 = vmatpush1.bf16.msra.mxu1 %v4724_v46  ;;  %v4808_v45 = vld [vmem:[%s6110_s10 + $0x4a8] ss:$16 sps:$4 sm:$0xff]   ;;  %v4813_v46 = vld [vmem:[%s6110_s10 + $0x4c4] ss:$16 sps:$4 sm:$0xff]  }
 0x140   : > { %3469 = vmatprep.subr.bf16.mxu0 %v4729_v47  ;;  %3715 = vmatprep.subr.bf16.mxu1 %v4732_v48  ;;  %v4816_v47 = vld [vmem:[%s6110_s10 + $0x4cc] ss:$16 sps:$4 sm:$0xff]   ;;  %v4811_v48 = vld [vmem:[%s6110_s10 + $0x4c0] ss:$16 sps:$4 sm:$0xff]  }
 0x143   : > { %3470 = vmatpush1.bf16.msra.mxu0 %v4727_v49  ;;  %3716 = vmatpush1.bf16.msra.mxu1 %v4730_v50  ;;  %v4814_v49 = vld [vmem:[%s6110_s10 + $0x4c8] ss:$16 sps:$4 sm:$0xff]   ;;  %v4819_v50 = vld [vmem:[%s6110_s10 + $0x4e4] ss:$16 sps:$4 sm:$0xff]  }
 0x144   : > { %3471 = vmatprep.subr.bf16.mxu0 %v4735_v51  ;;  %3717 = vmatprep.subr.bf16.mxu1 %v4738_v52  ;;  %v4822_v51 = vld [vmem:[%s6110_s10 + $0x4ec] ss:$16 sps:$4 sm:$0xff]   ;;  %v4817_v52 = vld [vmem:[%s6110_s10 + $0x4e0] ss:$16 sps:$4 sm:$0xff]  }
 0x147   : > { %3472 = vmatpush1.bf16.msra.mxu0 %v4733_v53  ;;  %3718 = vmatpush1.bf16.msra.mxu1 %v4736_v54  ;;  %v4820_v53 = vld [vmem:[%s6110_s10 + $0x4e8] ss:$16 sps:$4 sm:$0xff]   ;;  %v4825_v54 = vld [vmem:[%s6110_s10 + $0x504] ss:$16 sps:$4 sm:$0xff]  }
 0x148   : > { %3473 = vmatprep.subr.bf16.mxu0 %v4741_v55  ;;  %3719 = vmatprep.subr.bf16.mxu1 %v4744_v56  ;;  %v4828_v55 = vld [vmem:[%s6110_s10 + $0x50c] ss:$16 sps:$4 sm:$0xff]   ;;  %v4823_v56 = vld [vmem:[%s6110_s10 + $0x500] ss:$16 sps:$4 sm:$0xff]  }
 0x14b   : > { %3474 = vmatpush1.bf16.msra.mxu0 %v4739_v57  ;;  %3720 = vmatpush1.bf16.msra.mxu1 %v4742_v58  ;;  %v4826_v57 = vld [vmem:[%s6110_s10 + $0x508] ss:$16 sps:$4 sm:$0xff]   ;;  %v4831_v58 = vld [vmem:[%s6110_s10 + $0x524] ss:$16 sps:$4 sm:$0xff]  }
 0x14c   : > { %3475 = vmatprep.subr.bf16.mxu0 %v4747_v59  ;;  %3721 = vmatprep.subr.bf16.mxu1 %v4750_v60  ;;  %v4834_v59 = vld [vmem:[%s6110_s10 + $0x52c] ss:$16 sps:$4 sm:$0xff]   ;;  %v4829_v60 = vld [vmem:[%s6110_s10 + $0x520] ss:$16 sps:$4 sm:$0xff]  }
 0x14f   : > { %3476 = vmatpush1.bf16.msra.mxu0 %v4745_v61  ;;  %3722 = vmatpush1.bf16.msra.mxu1 %v4748_v62  ;;  %v4832_v61 = vld [vmem:[%s6110_s10 + $0x528] ss:$16 sps:$4 sm:$0xff]   ;;  %v4837_v62 = vld [vmem:[%s6110_s10 + $0x544] ss:$16 sps:$4 sm:$0xff]  }
 0x150   : > { %3477 = vmatprep.subr.bf16.mxu0 %v4753_v63  ;;  %3723 = vmatprep.subr.bf16.mxu1 %v4756_v0  ;;  %v4840_v63 = vld [vmem:[%s6110_s10 + $0x54c] ss:$16 sps:$4 sm:$0xff]   ;;  %v4835_v0 = vld [vmem:[%s6110_s10 + $0x540] ss:$16 sps:$4 sm:$0xff]  }
 0x153   : > { %3478 = vmatpush1.bf16.msra.mxu0 %v4751_v1  ;;  %3724 = vmatpush1.bf16.msra.mxu1 %v4754_v2  ;;  %v4838_v1 = vld [vmem:[%s6110_s10 + $0x548] ss:$16 sps:$4 sm:$0xff]   ;;  %v4843_v2 = vld [vmem:[%s6110_s10 + $0x564] ss:$16 sps:$4 sm:$0xff]  }
 0x154   : > { %3479 = vmatprep.subr.bf16.mxu0 %v4759_v5  ;;  %3725 = vmatprep.subr.bf16.mxu1 %v4762_v6  ;;  %v4846_v5 = vld [vmem:[%s6110_s10 + $0x56c] ss:$16 sps:$4 sm:$0xff]   ;;  %v4841_v6 = vld [vmem:[%s6110_s10 + $0x560] ss:$16 sps:$4 sm:$0xff]  }
 0x157   : > { %3480 = vmatpush1.bf16.msra.mxu0 %v4757_v7  ;;  %3726 = vmatpush1.bf16.msra.mxu1 %v4760_v9  ;;  %v4844_v7 = vld [vmem:[%s6110_s10 + $0x568] ss:$16 sps:$4 sm:$0xff]   ;;  %v4849_v9 = vld [vmem:[%s6110_s10 + $0x584] ss:$16 sps:$4 sm:$0xff]  }
 0x158   : > { %3481 = vmatprep.subr.bf16.mxu0 %v4765_v10  ;;  %3727 = vmatprep.subr.bf16.mxu1 %v4768_v11  ;;  %v4852_v10 = vld [vmem:[%s6110_s10 + $0x58c] ss:$16 sps:$4 sm:$0xff]   ;;  %v4847_v11 = vld [vmem:[%s6110_s10 + $0x580] ss:$16 sps:$4 sm:$0xff]  }
 0x15b   : > { %3482 = vmatpush1.bf16.msra.mxu0 %v4763_v14  ;;  %3728 = vmatpush1.bf16.msra.mxu1 %v4766_v15  ;;  %v4855_v14 = vld [vmem:[%s6110_s10 + $0x5a4] ss:$16 sps:$4 sm:$0xff]   ;;  %v4858_v15 = vld [vmem:[%s6110_s10 + $0x5ac] ss:$16 sps:$4 sm:$0xff]  }
 0x15c   : > { %3483 = vmatprep.subr.bf16.mxu0 %v4771_v16  ;;  %3729 = vmatprep.subr.bf16.mxu1 %v4774_v17  ;;  %v4853_v16 = vld [vmem:[%s6110_s10 + $0x5a0] ss:$16 sps:$4 sm:$0xff]   ;;  %v4856_v17 = vld [vmem:[%s6110_s10 + $0x5a8] ss:$16 sps:$4 sm:$0xff]  }
 0x15f   : > { %3484 = vmatpush1.bf16.msra.mxu0 %v4769_v20  ;;  %3730 = vmatpush1.bf16.msra.mxu1 %v4772_v22  ;;  %v4861_v20 = vld [vmem:[%s6110_s10 + $0x5c4] ss:$16 sps:$4 sm:$0xff]   ;;  %v4864_v22 = vld [vmem:[%s6110_s10 + $0x5cc] ss:$16 sps:$4 sm:$0xff]  }
 0x160   : > { %3494 = vmatprep.subr.bf16.mxu0 %v4777_v4  ;;  %3740 = vmatprep.subr.bf16.mxu1 %v4780_v23  ;;  %v4859_v4 = vld [vmem:[%s6110_s10 + $0x5c0] ss:$16 sps:$4 sm:$0xff]   ;;  %v4862_v23 = vld [vmem:[%s6110_s10 + $0x5c8] ss:$16 sps:$4 sm:$0xff]  }
 0x162   : > { %3486 = vmatmul.mubr.bf16.vlgmr.msra.gmra.mrb[0].mxu0 %v1452_v21  ;;  %3732 = vmatmul.mubr.bf16.vlgmr.msra.gmra.mrb[0].mxu1 %v1452_v21  ;;  %v4868_v21 = vld [vmem:[%s6110_s10 + $0x5e8] ss:$16 sps:$4 sm:$0xff]  }
 0x163   : > { %3495 = vmatpush1.bf16.msra.mxu0 %v4775_v24  ;;  %3741 = vmatpush1.bf16.msra.mxu1 %v4778_v25  ;;  %v4870_v24 = vld [vmem:[%s6110_s10 + $0x5ec] ss:$16 sps:$4 sm:$0xff]   ;;  %v4865_v25 = vld [vmem:[%s6110_s10 + $0x5e0] ss:$16 sps:$4 sm:$0xff]  }
 0x164   : > { %3496 = vmatprep.subr.bf16.mxu0 %v4783_v26  ;;  %3742 = vmatprep.subr.bf16.mxu1 %v4786_v27  ;;  %v4874_v26 = vld [vmem:[%s6110_s10 + $0x604] ss:$16 sps:$4 sm:$0xff]   ;;  %v4877_v27 = vld [vmem:[%s6110_s10 + $0x60c] ss:$16 sps:$4 sm:$0xff]  }
 0x165   : > { %3526 = vmatprep.mubr.bf16.mxu0 %v6278_v28  ;;  %3772 = vmatprep.mubr.bf16.mxu1 %v6278_v28 }
 0x167   : > { %3497 = vmatpush1.bf16.msra.mxu0 %v4781_v29  ;;  %3743 = vmatpush1.bf16.msra.mxu1 %v4784_v30  ;;  %v4872_v29 = vld [vmem:[%s6110_s10 + $0x600] ss:$16 sps:$4 sm:$0xff]   ;;  %v4875_v30 = vld [vmem:[%s6110_s10 + $0x608] ss:$16 sps:$4 sm:$0xff]  }
 0x168   : > { %3498 = vmatprep.subr.bf16.mxu0 %v4789_v18  ;;  %3744 = vmatprep.subr.bf16.mxu1 %v4792_v31  ;;  %v6346_v18 = vrot.slane %v6263_v19, %v6115_v8  ;;  %v4880_v31 = vld [vmem:[%s6110_s10 + $0x624] ss:$16 sps:$4 sm:$0xff]   ;;  %v4881_v19 = vld [vmem:[%s6110_s10 + $0x628] ss:$16 sps:$4 sm:$0xff]  }
 0x16b   : > { %3499 = vmatpush1.bf16.msra.mxu0 %v4787_v32  ;;  %3745 = vmatpush1.bf16.msra.mxu1 %v4790_v33  ;;  %v4883_v32 = vld [vmem:[%s6110_s10 + $0x62c] ss:$16 sps:$4 sm:$0xff]   ;;  %v1455_v33 = vcombine.high %v6278_v28, %v6278_v28  ;;  %v4884_v28 = vld [vmem:[%s6110_s10 + $0x640] ss:$16 sps:$4 sm:$0xff]  }
 0x16c   : > { %3500 = vmatprep.subr.bf16.mxu0 %v4795_v34  ;;  %3746 = vmatprep.subr.bf16.mxu1 %v4798_v35  ;;  %v4878_v34 = vld [vmem:[%s6110_s10 + $0x620] ss:$16 sps:$4 sm:$0xff]   ;;  %v4886_v35 = vld [vmem:[%s6110_s10 + $0x644] ss:$16 sps:$4 sm:$0xff]  }
 0x16f   : > { %3501 = vmatpush1.bf16.msra.mxu0 %v4793_v36  ;;  %3747 = vmatpush1.bf16.msra.mxu1 %v4796_v37  ;;  %v4889_v36 = vld [vmem:[%s6110_s10 + $0x64c] ss:$16 sps:$4 sm:$0xff]   ;;  %v4887_v37 = vld [vmem:[%s6110_s10 + $0x648] ss:$16 sps:$4 sm:$0xff]  }
 0x170   : > { %3502 = vmatprep.subr.bf16.mxu0 %v4801_v38  ;;  %3748 = vmatprep.subr.bf16.mxu1 %v4804_v39  ;;  %v4892_v38 = vld [vmem:[%s6110_s10 + $0x664] ss:$16 sps:$4 sm:$0xff]   ;;  %v4895_v39 = vld [vmem:[%s6110_s10 + $0x66c] ss:$16 sps:$4 sm:$0xff]  }
 0x173   : > { %3503 = vmatpush1.bf16.msra.mxu0 %v4799_v40  ;;  %3749 = vmatpush1.bf16.msra.mxu1 %v4802_v41  ;;  %v4890_v40 = vld [vmem:[%s6110_s10 + $0x660] ss:$16 sps:$4 sm:$0xff]   ;;  %v4893_v41 = vld [vmem:[%s6110_s10 + $0x668] ss:$16 sps:$4 sm:$0xff]  }
 0x174   : > { %3504 = vmatprep.subr.bf16.mxu0 %v4807_v42  ;;  %3750 = vmatprep.subr.bf16.mxu1 %v4810_v43  ;;  %v4898_v42 = vld [vmem:[%s6110_s10 + $0x684] ss:$16 sps:$4 sm:$0xff]   ;;  %v4901_v43 = vld [vmem:[%s6110_s10 + $0x68c] ss:$16 sps:$4 sm:$0xff]  }
 0x177   : > { %3505 = vmatpush1.bf16.msra.mxu0 %v4805_v44  ;;  %3751 = vmatpush1.bf16.msra.mxu1 %v4808_v45  ;;  %v4896_v44 = vld [vmem:[%s6110_s10 + $0x680] ss:$16 sps:$4 sm:$0xff]   ;;  %v4899_v45 = vld [vmem:[%s6110_s10 + $0x688] ss:$16 sps:$4 sm:$0xff]  }
 0x178   : > { %3506 = vmatprep.subr.bf16.mxu0 %v4813_v46  ;;  %3752 = vmatprep.subr.bf16.mxu1 %v4816_v47  ;;  %v4904_v46 = vld [vmem:[%s6110_s10 + $0x6a4] ss:$16 sps:$4 sm:$0xff]   ;;  %v4907_v47 = vld [vmem:[%s6110_s10 + $0x6ac] ss:$16 sps:$4 sm:$0xff]  }
 0x17b   : > { %3507 = vmatpush1.bf16.msra.mxu0 %v4811_v48  ;;  %3753 = vmatpush1.bf16.msra.mxu1 %v4814_v49  ;;  %v4902_v48 = vld [vmem:[%s6110_s10 + $0x6a0] ss:$16 sps:$4 sm:$0xff]   ;;  %v4905_v49 = vld [vmem:[%s6110_s10 + $0x6a8] ss:$16 sps:$4 sm:$0xff]  }
 0x17c   : > { %3508 = vmatprep.subr.bf16.mxu0 %v4819_v50  ;;  %3754 = vmatprep.subr.bf16.mxu1 %v4822_v51  ;;  %v4910_v50 = vld [vmem:[%s6110_s10 + $0x6c4] ss:$16 sps:$4 sm:$0xff]   ;;  %v4913_v51 = vld [vmem:[%s6110_s10 + $0x6cc] ss:$16 sps:$4 sm:$0xff]  }
 0x17f   : > { %3509 = vmatpush1.bf16.msra.mxu0 %v4817_v52  ;;  %3755 = vmatpush1.bf16.msra.mxu1 %v4820_v53  ;;  %v4908_v52 = vld [vmem:[%s6110_s10 + $0x6c0] ss:$16 sps:$4 sm:$0xff]   ;;  %v4911_v53 = vld [vmem:[%s6110_s10 + $0x6c8] ss:$16 sps:$4 sm:$0xff]  }
 0x180   : > { %3510 = vmatprep.subr.bf16.mxu0 %v4825_v54  ;;  %3756 = vmatprep.subr.bf16.mxu1 %v4828_v55  ;;  %v4916_v54 = vld [vmem:[%s6110_s10 + $0x6e4] ss:$16 sps:$4 sm:$0xff]   ;;  %v4919_v55 = vld [vmem:[%s6110_s10 + $0x6ec] ss:$16 sps:$4 sm:$0xff]  }
 0x183   : > { %3511 = vmatpush1.bf16.msra.mxu0 %v4823_v56  ;;  %3757 = vmatpush1.bf16.msra.mxu1 %v4826_v57  ;;  %v4914_v56 = vld [vmem:[%s6110_s10 + $0x6e0] ss:$16 sps:$4 sm:$0xff]   ;;  %v4917_v57 = vld [vmem:[%s6110_s10 + $0x6e8] ss:$16 sps:$4 sm:$0xff]  }
 0x184   : > { %3512 = vmatprep.subr.bf16.mxu0 %v4831_v58  ;;  %3758 = vmatprep.subr.bf16.mxu1 %v4834_v59  ;;  %v4922_v58 = vld [vmem:[%s6110_s10 + $0x704] ss:$16 sps:$4 sm:$0xff]   ;;  %v4925_v59 = vld [vmem:[%s6110_s10 + $0x70c] ss:$16 sps:$4 sm:$0xff]  }
 0x187   : > { %3513 = vmatpush1.bf16.msra.mxu0 %v4829_v60  ;;  %3759 = vmatpush1.bf16.msra.mxu1 %v4832_v61  ;;  %v4920_v60 = vld [vmem:[%s6110_s10 + $0x700] ss:$16 sps:$4 sm:$0xff]   ;;  %v4923_v61 = vld [vmem:[%s6110_s10 + $0x708] ss:$16 sps:$4 sm:$0xff]  }
 0x188   : > { %3514 = vmatprep.subr.bf16.mxu0 %v4837_v62  ;;  %3760 = vmatprep.subr.bf16.mxu1 %v4840_v63  ;;  %v4928_v62 = vld [vmem:[%s6110_s10 + $0x724] ss:$16 sps:$4 sm:$0xff]   ;;  %v4931_v63 = vld [vmem:[%s6110_s10 + $0x72c] ss:$16 sps:$4 sm:$0xff]  }
 0x18b   : > { %3515 = vmatpush1.bf16.msra.mxu0 %v4835_v0  ;;  %3761 = vmatpush1.bf16.msra.mxu1 %v4838_v1  ;;  %v4926_v0 = vld [vmem:[%s6110_s10 + $0x720] ss:$16 sps:$4 sm:$0xff]   ;;  %v4929_v1 = vld [vmem:[%s6110_s10 + $0x728] ss:$16 sps:$4 sm:$0xff]  }
 0x18c   : > { %3516 = vmatprep.subr.bf16.mxu0 %v4843_v2  ;;  %3762 = vmatprep.subr.bf16.mxu1 %v4846_v5  ;;  %v4934_v2 = vld [vmem:[%s6110_s10 + $0x744] ss:$16 sps:$4 sm:$0xff]   ;;  %v4937_v5 = vld [vmem:[%s6110_s10 + $0x74c] ss:$16 sps:$4 sm:$0xff]  }
 0x18f   : > { %3517 = vmatpush1.bf16.msra.mxu0 %v4841_v6  ;;  %3763 = vmatpush1.bf16.msra.mxu1 %v4844_v7  ;;  %v4932_v6 = vld [vmem:[%s6110_s10 + $0x740] ss:$16 sps:$4 sm:$0xff]   ;;  %v4935_v7 = vld [vmem:[%s6110_s10 + $0x748] ss:$16 sps:$4 sm:$0xff]  }
 0x190   : > { %3518 = vmatprep.subr.bf16.mxu0 %v4849_v9  ;;  %3764 = vmatprep.subr.bf16.mxu1 %v4852_v10  ;;  %v4940_v9 = vld [vmem:[%s6110_s10 + $0x764] ss:$16 sps:$4 sm:$0xff]   ;;  %v4943_v10 = vld [vmem:[%s6110_s10 + $0x76c] ss:$16 sps:$4 sm:$0xff]  }
 0x193   : > { %3519 = vmatpush1.bf16.msra.mxu0 %v4847_v11  ;;  %3765 = vmatpush1.bf16.msra.mxu1 %v4850_v13  ;;  %v4938_v11 = vld [vmem:[%s6110_s10 + $0x760] ss:$16 sps:$4 sm:$0xff]   ;;  %v4941_v13 = vld [vmem:[%s6110_s10 + $0x768] ss:$16 sps:$4 sm:$0xff]  }
 0x194   : > { %3520 = vmatprep.subr.bf16.mxu0 %v4855_v14  ;;  %3766 = vmatprep.subr.bf16.mxu1 %v4858_v15  ;;  %v4946_v14 = vld [vmem:[%s6110_s10 + $0x784] ss:$16 sps:$4 sm:$0xff]   ;;  %v4949_v15 = vld [vmem:[%s6110_s10 + $0x78c] ss:$16 sps:$4 sm:$0xff]  }
 0x197   : > { %3521 = vmatpush1.bf16.msra.mxu0 %v4853_v16  ;;  %3767 = vmatpush1.bf16.msra.mxu1 %v4856_v17  ;;  %v4944_v16 = vld [vmem:[%s6110_s10 + $0x780] ss:$16 sps:$4 sm:$0xff]   ;;  %v4947_v17 = vld [vmem:[%s6110_s10 + $0x788] ss:$16 sps:$4 sm:$0xff]  }
 0x198   : > { %3522 = vmatprep.subr.bf16.mxu0 %v4861_v20  ;;  %3768 = vmatprep.subr.bf16.mxu1 %v4864_v22  ;;  %v4952_v20 = vld [vmem:[%s6110_s10 + $0x7a4] ss:$16 sps:$4 sm:$0xff]   ;;  %v4955_v22 = vld [vmem:[%s6110_s10 + $0x7ac] ss:$16 sps:$4 sm:$0xff]  }
 0x19b   : > { %3523 = vmatpush1.bf16.msra.mxu0 %v4859_v4  ;;  %3769 = vmatpush1.bf16.msra.mxu1 %v4862_v23  ;;  %v4950_v4 = vld [vmem:[%s6110_s10 + $0x7a0] ss:$16 sps:$4 sm:$0xff]   ;;  %v4953_v23 = vld [vmem:[%s6110_s10 + $0x7a8] ss:$16 sps:$4 sm:$0xff]  }
 0x19c   : > { %3524 = vmatprep.subr.bf16.mxu0 %v4867_v12  ;;  %3770 = vmatprep.subr.bf16.mxu1 %v4870_v24  ;;  %v4958_v12 = vld [vmem:[%s6110_s10 + $0x7c4] ss:$16 sps:$4 sm:$0xff]   ;;  %v4961_v24 = vld [vmem:[%s6110_s10 + $0x7cc] ss:$16 sps:$4 sm:$0xff]  }
 0x19f   : > { %3525 = vmatpush1.bf16.msra.mxu0 %v4865_v25  ;;  %3771 = vmatpush1.bf16.msra.mxu1 %v4868_v21  ;;  %v4956_v25 = vld [vmem:[%s6110_s10 + $0x7c0] ss:$16 sps:$4 sm:$0xff]   ;;  %v4959_v21 = vld [vmem:[%s6110_s10 + $0x7c8] ss:$16 sps:$4 sm:$0xff]  }
 0x1a0   : > { %3535 = vmatprep.subr.bf16.mxu0 %v4874_v26  ;;  %3781 = vmatprep.subr.bf16.mxu1 %v4877_v27  ;;  %v4964_v26 = vld [vmem:[%s6110_s10 + $0x7e4] ss:$16 sps:$4 sm:$0xff]   ;;  %v4967_v27 = vld [vmem:[%s6110_s10 + $0x7ec] ss:$16 sps:$4 sm:$0xff]  }
 0x1a2   : > { %3527 = vmatmul.mubr.bf16.vlgmr.msra.gmra.mrb[0].mxu0 %v6346_v18  ;;  %3773 = vmatmul.mubr.bf16.vlgmr.msra.gmra.mrb[0].mxu1 %v6346_v18 }
 0x1a3   : > { %3536 = vmatpush1.bf16.msra.mxu0 %v4872_v29  ;;  %3782 = vmatpush1.bf16.msra.mxu1 %v4875_v30  ;;  %v6413_v29 = vld.sshfl [vmem:[%s6627_s0 + $0x8] sm:$0x33 pattern:$0x75316420]  ;;  %v4962_v30 = vld [vmem:[%s6110_s10 + $0x7e0] ss:$16 sps:$4 sm:$0xff]  }
 0x1a4   : > { %3537 = vmatprep.subr.bf16.mxu0 %v4880_v31  ;;  %3783 = vmatprep.subr.bf16.mxu1 %v4883_v32  ;;  %v4965_v31 = vld [vmem:[%s6110_s10 + $0x7e8] ss:$16 sps:$4 sm:$0xff]   ;;  %v4970_v32 = vld [vmem:[%s6110_s10 + $0x804] ss:$16 sps:$4 sm:$0xff]  }
 0x1a5   : > { %3567 = vmatprep.mubr.bf16.mxu0 %v1455_v33  ;;  %3813 = vmatprep.mubr.bf16.mxu1 %v1455_v33  ;;  %v4973_v33 = vld [vmem:[%s6110_s10 + $0x80c] ss:$16 sps:$4 sm:$0xff]  }
 0x1a7   : > { %3538 = vmatpush1.bf16.msra.mxu0 %v4878_v34  ;;  %3784 = vmatpush1.bf16.msra.mxu1 %v4881_v19  ;;  %v1463_v34 = vcombine.high %v6413_v29, %v6413_v29  ;;  %v1453_v19 = vcombine.high %v6346_v18, %v6346_v18  ;;  %v4974_v18 = vld [vmem:[%s6110_s10 + $0x820] ss:$16 sps:$4 sm:$0xff]  }
 0x1a8   : > { %3539 = vmatprep.subr.bf16.mxu0 %v4886_v35  ;;  %3785 = vmatprep.subr.bf16.mxu1 %v4889_v36  ;;  %v4968_v35 = vld [vmem:[%s6110_s10 + $0x800] ss:$16 sps:$4 sm:$0xff]   ;;  %v4971_v36 = vld [vmem:[%s6110_s10 + $0x808] ss:$16 sps:$4 sm:$0xff]  }
 0x1ab   : > { %3540 = vmatpush1.bf16.msra.mxu0 %v4884_v28  ;;  %3786 = vmatpush1.bf16.msra.mxu1 %v4887_v37  ;;  %v4976_v28 = vld [vmem:[%s6110_s10 + $0x824] ss:$16 sps:$4 sm:$0xff]   ;;  %v4979_v37 = vld [vmem:[%s6110_s10 + $0x82c] ss:$16 sps:$4 sm:$0xff]  }
 0x1ac   : > { %3541 = vmatprep.subr.bf16.mxu0 %v4892_v38  ;;  %3787 = vmatprep.subr.bf16.mxu1 %v4895_v39  ;;  %v6428_v38 = vrot.slane %v1463_v34, %v6115_v8  ;;  %v4977_v39 = vld [vmem:[%s6110_s10 + $0x828] ss:$16 sps:$4 sm:$0xff]   ;;  %v5060_v34 = vld [vmem:[%s6110_s10 + $0x9e4] ss:$16 sps:$4 sm:$0xff]  }
 0x1af   : > { %3542 = vmatpush1.bf16.msra.mxu0 %v4890_v40  ;;  %3788 = vmatpush1.bf16.msra.mxu1 %v4893_v41  ;;  %v4982_v40 = vld [vmem:[%s6110_s10 + $0x844] ss:$16 sps:$4 sm:$0xff]   ;;  %v4985_v41 = vld [vmem:[%s6110_s10 + $0x84c] ss:$16 sps:$4 sm:$0xff]  }
 0x1b0   : > { %3543 = vmatprep.subr.bf16.mxu0 %v4898_v42  ;;  %3789 = vmatprep.subr.bf16.mxu1 %v4901_v43  ;;  %v4980_v42 = vld [vmem:[%s6110_s10 + $0x840] ss:$16 sps:$4 sm:$0xff]   ;;  %v4983_v43 = vld [vmem:[%s6110_s10 + $0x848] ss:$16 sps:$4 sm:$0xff]  }
 0x1b3   : > { %3544 = vmatpush1.bf16.msra.mxu0 %v4896_v44  ;;  %3790 = vmatpush1.bf16.msra.mxu1 %v4899_v45  ;;  %v4988_v44 = vld [vmem:[%s6110_s10 + $0x864] ss:$16 sps:$4 sm:$0xff]   ;;  %v4991_v45 = vld [vmem:[%s6110_s10 + $0x86c] ss:$16 sps:$4 sm:$0xff]  }
 0x1b4   : > { %3545 = vmatprep.subr.bf16.mxu0 %v4904_v46  ;;  %3791 = vmatprep.subr.bf16.mxu1 %v4907_v47  ;;  %v4986_v46 = vld [vmem:[%s6110_s10 + $0x860] ss:$16 sps:$4 sm:$0xff]   ;;  %v4989_v47 = vld [vmem:[%s6110_s10 + $0x868] ss:$16 sps:$4 sm:$0xff]  }
 0x1b7   : > { %3546 = vmatpush1.bf16.msra.mxu0 %v4902_v48  ;;  %3792 = vmatpush1.bf16.msra.mxu1 %v4905_v49  ;;  %v4994_v48 = vld [vmem:[%s6110_s10 + $0x884] ss:$16 sps:$4 sm:$0xff]   ;;  %v4997_v49 = vld [vmem:[%s6110_s10 + $0x88c] ss:$16 sps:$4 sm:$0xff]  }
 0x1b8   : > { %3547 = vmatprep.subr.bf16.mxu0 %v4910_v50  ;;  %3793 = vmatprep.subr.bf16.mxu1 %v4913_v51  ;;  %v4992_v50 = vld [vmem:[%s6110_s10 + $0x880] ss:$16 sps:$4 sm:$0xff]   ;;  %v4995_v51 = vld [vmem:[%s6110_s10 + $0x888] ss:$16 sps:$4 sm:$0xff]  }
 0x1bb   : > { %3548 = vmatpush1.bf16.msra.mxu0 %v4908_v52  ;;  %3794 = vmatpush1.bf16.msra.mxu1 %v4911_v53  ;;  %v5000_v52 = vld [vmem:[%s6110_s10 + $0x8a4] ss:$16 sps:$4 sm:$0xff]   ;;  %v5003_v53 = vld [vmem:[%s6110_s10 + $0x8ac] ss:$16 sps:$4 sm:$0xff]  }
 0x1bc   : > { %3549 = vmatprep.subr.bf16.mxu0 %v4916_v54  ;;  %3795 = vmatprep.subr.bf16.mxu1 %v4919_v55  ;;  %v4998_v54 = vld [vmem:[%s6110_s10 + $0x8a0] ss:$16 sps:$4 sm:$0xff]   ;;  %v5001_v55 = vld [vmem:[%s6110_s10 + $0x8a8] ss:$16 sps:$4 sm:$0xff]  }
 0x1bf   : > { %3550 = vmatpush1.bf16.msra.mxu0 %v4914_v56  ;;  %3796 = vmatpush1.bf16.msra.mxu1 %v4917_v57  ;;  %v5006_v56 = vld [vmem:[%s6110_s10 + $0x8c4] ss:$16 sps:$4 sm:$0xff]   ;;  %v5009_v57 = vld [vmem:[%s6110_s10 + $0x8cc] ss:$16 sps:$4 sm:$0xff]  }
 0x1c0   : > { %3551 = vmatprep.subr.bf16.mxu0 %v4922_v58  ;;  %3797 = vmatprep.subr.bf16.mxu1 %v4925_v59  ;;  %v5004_v58 = vld [vmem:[%s6110_s10 + $0x8c0] ss:$16 sps:$4 sm:$0xff]   ;;  %v5007_v59 = vld [vmem:[%s6110_s10 + $0x8c8] ss:$16 sps:$4 sm:$0xff]  }
 0x1c3   : > { %3552 = vmatpush1.bf16.msra.mxu0 %v4920_v60  ;;  %3798 = vmatpush1.bf16.msra.mxu1 %v4923_v61  ;;  %v5012_v60 = vld [vmem:[%s6110_s10 + $0x8e4] ss:$16 sps:$4 sm:$0xff]   ;;  %v5015_v61 = vld [vmem:[%s6110_s10 + $0x8ec] ss:$16 sps:$4 sm:$0xff]  }
 0x1c4   : > { %3553 = vmatprep.subr.bf16.mxu0 %v4928_v62  ;;  %3799 = vmatprep.subr.bf16.mxu1 %v4931_v63  ;;  %v5010_v62 = vld [vmem:[%s6110_s10 + $0x8e0] ss:$16 sps:$4 sm:$0xff]   ;;  %v5013_v63 = vld [vmem:[%s6110_s10 + $0x8e8] ss:$16 sps:$4 sm:$0xff]  }
 0x1c7   : > { %3554 = vmatpush1.bf16.msra.mxu0 %v4926_v0  ;;  %3800 = vmatpush1.bf16.msra.mxu1 %v4929_v1  ;;  %v5018_v0 = vld [vmem:[%s6110_s10 + $0x904] ss:$16 sps:$4 sm:$0xff]   ;;  %v5021_v1 = vld [vmem:[%s6110_s10 + $0x90c] ss:$16 sps:$4 sm:$0xff]  }
 0x1c8   : > { %3555 = vmatprep.subr.bf16.mxu0 %v4934_v2  ;;  %3801 = vmatprep.subr.bf16.mxu1 %v4937_v5  ;;  %v5016_v2 = vld [vmem:[%s6110_s10 + $0x900] ss:$16 sps:$4 sm:$0xff]   ;;  %v5019_v5 = vld [vmem:[%s6110_s10 + $0x908] ss:$16 sps:$4 sm:$0xff]  }
 0x1cb   : > { %3556 = vmatpush1.bf16.msra.mxu0 %v4932_v6  ;;  %3802 = vmatpush1.bf16.msra.mxu1 %v4935_v7  ;;  %v5024_v6 = vld [vmem:[%s6110_s10 + $0x924] ss:$16 sps:$4 sm:$0xff]   ;;  %v5027_v7 = vld [vmem:[%s6110_s10 + $0x92c] ss:$16 sps:$4 sm:$0xff]  }
 0x1cc   : > { %3557 = vmatprep.subr.bf16.mxu0 %v4940_v9  ;;  %3803 = vmatprep.subr.bf16.mxu1 %v4943_v10  ;;  %v5022_v9 = vld [vmem:[%s6110_s10 + $0x920] ss:$16 sps:$4 sm:$0xff]   ;;  %v5025_v10 = vld [vmem:[%s6110_s10 + $0x928] ss:$16 sps:$4 sm:$0xff]  }
 0x1cf   : > { %3558 = vmatpush1.bf16.msra.mxu0 %v4938_v11  ;;  %3804 = vmatpush1.bf16.msra.mxu1 %v4941_v13  ;;  %v5030_v11 = vld [vmem:[%s6110_s10 + $0x944] ss:$16 sps:$4 sm:$0xff]   ;;  %v5033_v13 = vld [vmem:[%s6110_s10 + $0x94c] ss:$16 sps:$4 sm:$0xff]  }
 0x1d0   : > { %3559 = vmatprep.subr.bf16.mxu0 %v4946_v14  ;;  %3805 = vmatprep.subr.bf16.mxu1 %v4949_v15  ;;  %v5028_v14 = vld [vmem:[%s6110_s10 + $0x940] ss:$16 sps:$4 sm:$0xff]   ;;  %v5031_v15 = vld [vmem:[%s6110_s10 + $0x948] ss:$16 sps:$4 sm:$0xff]  }
 0x1d3   : > { %3560 = vmatpush1.bf16.msra.mxu0 %v4944_v16  ;;  %3806 = vmatpush1.bf16.msra.mxu1 %v4947_v17  ;;  %v5036_v16 = vld [vmem:[%s6110_s10 + $0x964] ss:$16 sps:$4 sm:$0xff]   ;;  %v5039_v17 = vld [vmem:[%s6110_s10 + $0x96c] ss:$16 sps:$4 sm:$0xff]  }
 0x1d4   : > { %3561 = vmatprep.subr.bf16.mxu0 %v4952_v20  ;;  %3807 = vmatprep.subr.bf16.mxu1 %v4955_v22  ;;  %v5034_v20 = vld [vmem:[%s6110_s10 + $0x960] ss:$16 sps:$4 sm:$0xff]   ;;  %v5037_v22 = vld [vmem:[%s6110_s10 + $0x968] ss:$16 sps:$4 sm:$0xff]  }
 0x1d7   : > { %3562 = vmatpush1.bf16.msra.mxu0 %v4950_v4  ;;  %3808 = vmatpush1.bf16.msra.mxu1 %v4953_v23  ;;  %v5042_v4 = vld [vmem:[%s6110_s10 + $0x984] ss:$16 sps:$4 sm:$0xff]   ;;  %v5045_v23 = vld [vmem:[%s6110_s10 + $0x98c] ss:$16 sps:$4 sm:$0xff]  }
 0x1d8   : > { %3563 = vmatprep.subr.bf16.mxu0 %v4958_v12  ;;  %3809 = vmatprep.subr.bf16.mxu1 %v4961_v24  ;;  %v5040_v12 = vld [vmem:[%s6110_s10 + $0x980] ss:$16 sps:$4 sm:$0xff]   ;;  %v5043_v24 = vld [vmem:[%s6110_s10 + $0x988] ss:$16 sps:$4 sm:$0xff]  }
 0x1db   : > { %3564 = vmatpush1.bf16.msra.mxu0 %v4956_v25  ;;  %3810 = vmatpush1.bf16.msra.mxu1 %v4959_v21  ;;  %v5048_v25 = vld [vmem:[%s6110_s10 + $0x9a4] ss:$16 sps:$4 sm:$0xff]   ;;  %v5051_v21 = vld [vmem:[%s6110_s10 + $0x9ac] ss:$16 sps:$4 sm:$0xff]  }
 0x1dc   : > { %3565 = vmatprep.subr.bf16.mxu0 %v4964_v26  ;;  %3811 = vmatprep.subr.bf16.mxu1 %v4967_v27  ;;  %v5046_v26 = vld [vmem:[%s6110_s10 + $0x9a0] ss:$16 sps:$4 sm:$0xff]   ;;  %v5049_v27 = vld [vmem:[%s6110_s10 + $0x9a8] ss:$16 sps:$4 sm:$0xff]  }
 0x1df   : > { %3566 = vmatpush1.bf16.msra.mxu0 %v4962_v30  ;;  %3812 = vmatpush1.bf16.msra.mxu1 %v4965_v31  ;;  %v5054_v30 = vld [vmem:[%s6110_s10 + $0x9c4] ss:$16 sps:$4 sm:$0xff]   ;;  %v5057_v31 = vld [vmem:[%s6110_s10 + $0x9cc] ss:$16 sps:$4 sm:$0xff]  }
 0x1e0   : > { %3576 = vmatprep.subr.bf16.mxu0 %v4970_v32  ;;  %3822 = vmatprep.subr.bf16.mxu1 %v4973_v33  ;;  %v5052_v32 = vld [vmem:[%s6110_s10 + $0x9c0] ss:$16 sps:$4 sm:$0xff]   ;;  %v5055_v33 = vld [vmem:[%s6110_s10 + $0x9c8] ss:$16 sps:$4 sm:$0xff]  }
 0x1e2   : > { %3568 = vmatmul.mubr.bf16.vlgmr.msra.gmra.mrb[0].mxu0 %v1453_v19  ;;  %3814 = vmatmul.mubr.bf16.vlgmr.msra.gmra.mrb[0].mxu1 %v1453_v19  ;;  %v5063_v19 = vld [vmem:[%s6110_s10 + $0x9ec] ss:$16 sps:$4 sm:$0xff]  }
 0x1e3   : > { %3577 = vmatpush1.bf16.msra.mxu0 %v4968_v35  ;;  %3823 = vmatpush1.bf16.msra.mxu1 %v4971_v36  ;;  %v5058_v35 = vld [vmem:[%s6110_s10 + $0x9e0] ss:$16 sps:$4 sm:$0xff]   ;;  %v5061_v36 = vld [vmem:[%s6110_s10 + $0x9e8] ss:$16 sps:$4 sm:$0xff]  }
 0x1e4   : > { %3578 = vmatprep.subr.bf16.mxu0 %v4976_v28  ;;  %3824 = vmatprep.subr.bf16.mxu1 %v4979_v37  ;;  %v5066_v28 = vld [vmem:[%s6110_s10 + $0xa04] ss:$16 sps:$4 sm:$0xff]   ;;  %v5069_v37 = vld [vmem:[%s6110_s10 + $0xa0c] ss:$16 sps:$4 sm:$0xff]  }
 0x1e5   : > { %3608 = vmatprep.mubr.bf16.mxu0 %v6428_v38  ;;  %3854 = vmatprep.mubr.bf16.mxu1 %v6428_v38 }
 0x1e7   : > { %3579 = vmatpush1.bf16.msra.mxu0 %v4974_v18  ;;  %3825 = vmatpush1.bf16.msra.mxu1 %v4977_v39  ;;  %v6494_v18 = vrot.slane %v6413_v29, %v6115_v8  ;;  %v5064_v39 = vld [vmem:[%s6110_s10 + $0xa00] ss:$16 sps:$4 sm:$0xff]   ;;  %v5073_v29 = vld [vmem:[%s6110_s10 + $0xa28] ss:$16 sps:$4 sm:$0xff]  }
 0x1e8   : > { %3580 = vmatprep.subr.bf16.mxu0 %v4982_v40  ;;  %3826 = vmatprep.subr.bf16.mxu1 %v4985_v41  ;;  %v5067_v40 = vld [vmem:[%s6110_s10 + $0xa08] ss:$16 sps:$4 sm:$0xff]   ;;  %v5072_v41 = vld [vmem:[%s6110_s10 + $0xa24] ss:$16 sps:$4 sm:$0xff]   ;;  %v5070_v8 = vld [vmem:[%s6110_s10 + $0xa20] ss:$16 sps:$4 sm:$0xff]  }
 0x1eb   : > { %3581 = vmatpush1.bf16.msra.mxu0 %v4980_v42  ;;  %3827 = vmatpush1.bf16.msra.mxu1 %v4983_v43  ;;  %v5075_v42 = vld [vmem:[%s6110_s10 + $0xa2c] ss:$16 sps:$4 sm:$0xff]   ;;  %v1479_v43 = vcombine.high %v6428_v38, %v6428_v38  ;;  %v5076_v38 = vld [vmem:[%s6110_s10 + $0xa40] ss:$16 sps:$4 sm:$0xff]  }
 0x1ec   : > { %3582 = vmatprep.subr.bf16.mxu0 %v4988_v44  ;;  %3828 = vmatprep.subr.bf16.mxu1 %v4991_v45  ;;  %v5078_v44 = vld [vmem:[%s6110_s10 + $0xa44] ss:$16 sps:$4 sm:$0xff]   ;;  %v5081_v45 = vld [vmem:[%s6110_s10 + $0xa4c] ss:$16 sps:$4 sm:$0xff]  }
 0x1ef   : > { %3583 = vmatpush1.bf16.msra.mxu0 %v4986_v46  ;;  %3829 = vmatpush1.bf16.msra.mxu1 %v4989_v47  ;;  %v5079_v46 = vld [vmem:[%s6110_s10 + $0xa48] ss:$16 sps:$4 sm:$0xff]   ;;  %v5084_v47 = vld [vmem:[%s6110_s10 + $0xa64] ss:$16 sps:$4 sm:$0xff]  }
 0x1f0   : > { %3584 = vmatprep.subr.bf16.mxu0 %v4994_v48  ;;  %3830 = vmatprep.subr.bf16.mxu1 %v4997_v49  ;;  %v5087_v48 = vld [vmem:[%s6110_s10 + $0xa6c] ss:$16 sps:$4 sm:$0xff]   ;;  %v5082_v49 = vld [vmem:[%s6110_s10 + $0xa60] ss:$16 sps:$4 sm:$0xff]  }
 0x1f3   : > { %3585 = vmatpush1.bf16.msra.mxu0 %v4992_v50  ;;  %3831 = vmatpush1.bf16.msra.mxu1 %v4995_v51  ;;  %v5085_v50 = vld [vmem:[%s6110_s10 + $0xa68] ss:$16 sps:$4 sm:$0xff]   ;;  %v5090_v51 = vld [vmem:[%s6110_s10 + $0xa84] ss:$16 sps:$4 sm:$0xff]  }
 0x1f4   : > { %3586 = vmatprep.subr.bf16.mxu0 %v5000_v52  ;;  %3832 = vmatprep.subr.bf16.mxu1 %v5003_v53  ;;  %v5093_v52 = vld [vmem:[%s6110_s10 + $0xa8c] ss:$16 sps:$4 sm:$0xff]   ;;  %v5088_v53 = vld [vmem:[%s6110_s10 + $0xa80] ss:$16 sps:$4 sm:$0xff]  }
 0x1f7   : > { %3587 = vmatpush1.bf16.msra.mxu0 %v4998_v54  ;;  %3833 = vmatpush1.bf16.msra.mxu1 %v5001_v55  ;;  %v5091_v54 = vld [vmem:[%s6110_s10 + $0xa88] ss:$16 sps:$4 sm:$0xff]   ;;  %v5096_v55 = vld [vmem:[%s6110_s10 + $0xaa4] ss:$16 sps:$4 sm:$0xff]  }
 0x1f8   : > { %3588 = vmatprep.subr.bf16.mxu0 %v5006_v56  ;;  %3834 = vmatprep.subr.bf16.mxu1 %v5009_v57  ;;  %v5099_v56 = vld [vmem:[%s6110_s10 + $0xaac] ss:$16 sps:$4 sm:$0xff]   ;;  %v5094_v57 = vld [vmem:[%s6110_s10 + $0xaa0] ss:$16 sps:$4 sm:$0xff]  }
 0x1fb   : > { %3589 = vmatpush1.bf16.msra.mxu0 %v5004_v58  ;;  %3835 = vmatpush1.bf16.msra.mxu1 %v5007_v59  ;;  %v5097_v58 = vld [vmem:[%s6110_s10 + $0xaa8] ss:$16 sps:$4 sm:$0xff]   ;;  %v5102_v59 = vld [vmem:[%s6110_s10 + $0xac4] ss:$16 sps:$4 sm:$0xff]  }
 0x1fc   : > { %3590 = vmatprep.subr.bf16.mxu0 %v5012_v60  ;;  %3836 = vmatprep.subr.bf16.mxu1 %v5015_v61  ;;  %v5105_v60 = vld [vmem:[%s6110_s10 + $0xacc] ss:$16 sps:$4 sm:$0xff]   ;;  %v5100_v61 = vld [vmem:[%s6110_s10 + $0xac0] ss:$16 sps:$4 sm:$0xff]  }
 0x1ff   : > { %3591 = vmatpush1.bf16.msra.mxu0 %v5010_v62  ;;  %3837 = vmatpush1.bf16.msra.mxu1 %v5013_v63  ;;  %v5103_v62 = vld [vmem:[%s6110_s10 + $0xac8] ss:$16 sps:$4 sm:$0xff]   ;;  %v5108_v63 = vld [vmem:[%s6110_s10 + $0xae4] ss:$16 sps:$4 sm:$0xff]  }
 0x200   : > { %3592 = vmatprep.subr.bf16.mxu0 %v5018_v0  ;;  %3838 = vmatprep.subr.bf16.mxu1 %v5021_v1  ;;  %v5111_v0 = vld [vmem:[%s6110_s10 + $0xaec] ss:$16 sps:$4 sm:$0xff]   ;;  %v5106_v1 = vld [vmem:[%s6110_s10 + $0xae0] ss:$16 sps:$4 sm:$0xff]  }
 0x203   : > { %3593 = vmatpush1.bf16.msra.mxu0 %v5016_v2  ;;  %3839 = vmatpush1.bf16.msra.mxu1 %v5019_v5  ;;  %v5109_v2 = vld [vmem:[%s6110_s10 + $0xae8] ss:$16 sps:$4 sm:$0xff]   ;;  %v5114_v5 = vld [vmem:[%s6110_s10 + $0xb04] ss:$16 sps:$4 sm:$0xff]  }
 0x204   : > { %3594 = vmatprep.subr.bf16.mxu0 %v5024_v6  ;;  %3840 = vmatprep.subr.bf16.mxu1 %v5027_v7  ;;  %v5117_v6 = vld [vmem:[%s6110_s10 + $0xb0c] ss:$16 sps:$4 sm:$0xff]   ;;  %v5112_v7 = vld [vmem:[%s6110_s10 + $0xb00] ss:$16 sps:$4 sm:$0xff]  }
 0x207   : > { %3595 = vmatpush1.bf16.msra.mxu0 %v5022_v9  ;;  %3841 = vmatpush1.bf16.msra.mxu1 %v5025_v10  ;;  %v5115_v9 = vld [vmem:[%s6110_s10 + $0xb08] ss:$16 sps:$4 sm:$0xff]   ;;  %v5120_v10 = vld [vmem:[%s6110_s10 + $0xb24] ss:$16 sps:$4 sm:$0xff]  }
 0x208   : > { %3596 = vmatprep.subr.bf16.mxu0 %v5030_v11  ;;  %3842 = vmatprep.subr.bf16.mxu1 %v5033_v13  ;;  %v5123_v11 = vld [vmem:[%s6110_s10 + $0xb2c] ss:$16 sps:$4 sm:$0xff]   ;;  %v5118_v13 = vld [vmem:[%s6110_s10 + $0xb20] ss:$16 sps:$4 sm:$0xff]  }
 0x20b   : > { %3597 = vmatpush1.bf16.msra.mxu0 %v5028_v14  ;;  %3843 = vmatpush1.bf16.msra.mxu1 %v5031_v15  ;;  %v5121_v14 = vld [vmem:[%s6110_s10 + $0xb28] ss:$16 sps:$4 sm:$0xff]   ;;  %v5126_v15 = vld [vmem:[%s6110_s10 + $0xb44] ss:$16 sps:$4 sm:$0xff]  }
 0x20c   : > { %3598 = vmatprep.subr.bf16.mxu0 %v5036_v16  ;;  %3844 = vmatprep.subr.bf16.mxu1 %v5039_v17  ;;  %v5129_v16 = vld [vmem:[%s6110_s10 + $0xb4c] ss:$16 sps:$4 sm:$0xff]   ;;  %v5124_v17 = vld [vmem:[%s6110_s10 + $0xb40] ss:$16 sps:$4 sm:$0xff]  }
 0x20f   : > { %3599 = vmatpush1.bf16.msra.mxu0 %v5034_v20  ;;  %3845 = vmatpush1.bf16.msra.mxu1 %v5037_v22  ;;  %v5127_v20 = vld [vmem:[%s6110_s10 + $0xb48] ss:$16 sps:$4 sm:$0xff]   ;;  %v5132_v22 = vld [vmem:[%s6110_s10 + $0xb64] ss:$16 sps:$4 sm:$0xff]  }
 0x210   : > { %3600 = vmatprep.subr.bf16.mxu0 %v5042_v4  ;;  %3846 = vmatprep.subr.bf16.mxu1 %v5045_v23  ;;  %v5135_v4 = vld [vmem:[%s6110_s10 + $0xb6c] ss:$16 sps:$4 sm:$0xff]   ;;  %v5130_v23 = vld [vmem:[%s6110_s10 + $0xb60] ss:$16 sps:$4 sm:$0xff]  }
 0x213   : > { %3601 = vmatpush1.bf16.msra.mxu0 %v5040_v12  ;;  %3847 = vmatpush1.bf16.msra.mxu1 %v5043_v24  ;;  %v5133_v12 = vld [vmem:[%s6110_s10 + $0xb68] ss:$16 sps:$4 sm:$0xff]   ;;  %v5138_v24 = vld [vmem:[%s6110_s10 + $0xb84] ss:$16 sps:$4 sm:$0xff]  }
 0x214   : > { %3602 = vmatprep.subr.bf16.mxu0 %v5048_v25  ;;  %3848 = vmatprep.subr.bf16.mxu1 %v5051_v21  ;;  %v5141_v25 = vld [vmem:[%s6110_s10 + $0xb8c] ss:$16 sps:$4 sm:$0xff]   ;;  %v5136_v21 = vld [vmem:[%s6110_s10 + $0xb80] ss:$16 sps:$4 sm:$0xff]  }
 0x217   : > { %3603 = vmatpush1.bf16.msra.mxu0 %v5046_v26  ;;  %3849 = vmatpush1.bf16.msra.mxu1 %v5049_v27  ;;  %v5139_v26 = vld [vmem:[%s6110_s10 + $0xb88] ss:$16 sps:$4 sm:$0xff]   ;;  %v5144_v27 = vld [vmem:[%s6110_s10 + $0xba4] ss:$16 sps:$4 sm:$0xff]  }
 0x218   : > { %3604 = vmatprep.subr.bf16.mxu0 %v5054_v30  ;;  %3850 = vmatprep.subr.bf16.mxu1 %v5057_v31  ;;  %v5147_v30 = vld [vmem:[%s6110_s10 + $0xbac] ss:$16 sps:$4 sm:$0xff]   ;;  %v5142_v31 = vld [vmem:[%s6110_s10 + $0xba0] ss:$16 sps:$4 sm:$0xff]  }
 0x21b   : > { %3605 = vmatpush1.bf16.msra.mxu0 %v5052_v32  ;;  %3851 = vmatpush1.bf16.msra.mxu1 %v5055_v33  ;;  %v5145_v32 = vld [vmem:[%s6110_s10 + $0xba8] ss:$16 sps:$4 sm:$0xff]   ;;  %v5150_v33 = vld [vmem:[%s6110_s10 + $0xbc4] ss:$16 sps:$4 sm:$0xff]  }
 0x21c   : > { %3606 = vmatprep.subr.bf16.mxu0 %v5060_v34  ;;  %3852 = vmatprep.subr.bf16.mxu1 %v5063_v19  ;;  %v5153_v34 = vld [vmem:[%s6110_s10 + $0xbcc] ss:$16 sps:$4 sm:$0xff]   ;;  %v5148_v19 = vld [vmem:[%s6110_s10 + $0xbc0] ss:$16 sps:$4 sm:$0xff]  }
 0x21f   : > { %3607 = vmatpush1.bf16.msra.mxu0 %v5058_v35  ;;  %3853 = vmatpush1.bf16.msra.mxu1 %v5061_v36  ;;  %v5151_v35 = vld [vmem:[%s6110_s10 + $0xbc8] ss:$16 sps:$4 sm:$0xff]   ;;  %v5156_v36 = vld [vmem:[%s6110_s10 + $0xbe4] ss:$16 sps:$4 sm:$0xff]  }
 0x220   : > { %3617 = vmatprep.subr.bf16.mxu0 %v5066_v28  ;;  %3863 = vmatprep.subr.bf16.mxu1 %v5069_v37  ;;  %v5159_v28 = vld [vmem:[%s6110_s10 + $0xbec] ss:$16 sps:$4 sm:$0xff]   ;;  %v5154_v37 = vld [vmem:[%s6110_s10 + $0xbe0] ss:$16 sps:$4 sm:$0xff]  }
 0x222   : > { %3609 = vmatmul.mubr.bf16.vlgmr.msra.gmra.mrb[0].mxu0 %v6494_v18  ;;  %3855 = vmatmul.mubr.bf16.vlgmr.msra.gmra.mrb[0].mxu1 %v6494_v18 }
 0x223   : > { %3618 = vmatpush1.bf16.msra.mxu0 %v5064_v39  ;;  %3864 = vmatpush1.bf16.msra.mxu1 %v5067_v40  ;;  %v5157_v39 = vld [vmem:[%s6110_s10 + $0xbe8] ss:$16 sps:$4 sm:$0xff]   ;;  %v1478_v40 = vcombine.high %v6494_v18, %v6494_v18  ;;  %v3944_v18 = vsub.s32 2, %v6103_v3  ;;  %s5164_s10 = sshll.u32 %s5242_s15, 4  ;;  %s5165_s10 = int_to_ptr.vmem [resolvable:$false] %s5164_s10 }
 0x224   : > { %3619 = vmatprep.subr.bf16.mxu0 %v5072_v41  ;;  %3865 = vmatprep.subr.bf16.mxu1 %v5075_v42  ;;  %v5241_v41 = vmov 1983009808   ;;  %s5166_s11 = scalar_lea.vmem %s5165_s10, 256  ;;  %p5167_p4 = scmp.lt.s32.totalorder %s6580_s30, %s5165_s10 }
 0x225   : > { %3649 = vmatprep.mubr.bf16.mxu0 %v1479_v43  ;;  %3895 = vmatprep.mubr.bf16.mxu1 %v1479_v43  ;;  %v3911_v42 = vunpack.c.l.s4 %v5241_v41  ;;  %v3936_v43 = vsub.s32 0, %v6103_v3  ;;  %p5168_p6 = scmp.lt.s32.totalorder %s5166_s11, %s5160_s9 }
 0x227   : > { %3620 = vmatpush1.bf16.msra.mxu0 %v5070_v8  ;;  %3866 = vmatpush1.bf16.msra.mxu1 %v5073_v29  ;;  %v3940_v8 = vsub.s32 1, %v6103_v3  ;;  %v3948_v29 = vsub.s32 3, %v6103_v3  ;;  %p5169_p7 = por %p5168_p6, %p5167_p4 }
 0x228   : > { %3621 = vmatprep.subr.bf16.mxu0 %v5078_v44  ;;  %3867 = vmatprep.subr.bf16.mxu1 %v5081_v45  ;;  %v3932_v44 = vld [vmem:[%s1010_s26] sm:$0xf]  ;;  %v3912_v45 = vunpack.c.0.s8 %v3911_v42 }
 0x229   : > { %p5170_p8 = pnand %p5169_p7, %p5163_p3 }
 0x22b   : > { %3622 = vmatpush1.bf16.msra.mxu0 %v5076_v38  ;;  %3868 = vmatpush1.bf16.msra.mxu1 %v5079_v46  ;;  %v3937_v38 = vrot.slane %v3932_v44, %v3936_v43  ;;  %v3941_v46 = vrot.slane %v3932_v44, %v3940_v8 }
 0x22c   : > { %3623 = vmatprep.subr.bf16.mxu0 %v5084_v47  ;;  %3869 = vmatprep.subr.bf16.mxu1 %v5087_v48  ;;  %v3945_v47 = vrot.slane %v3932_v44, %v3944_v18  ;;  %v3949_v48 = vrot.slane %v3932_v44, %v3948_v29 }
 0x22f   : > { %3624 = vmatpush1.bf16.msra.mxu0 %v5082_v49  ;;  %3870 = vmatpush1.bf16.msra.mxu1 %v5085_v50  ;;  %v3915_v49 = vsub.s32 %v3912_v45, %v6103_v3  ;;  %v3950_v50 = vcombine.low %v3937_v38, %v3941_v46 }
 0x230   : > { %3625 = vmatprep.subr.bf16.mxu0 %v5090_v51  ;;  %3871 = vmatprep.subr.bf16.mxu1 %v5093_v52  ;;  %v3951_v51 = vcombine.low %v3945_v47, %v3949_v48 }
 0x233   : > { %3626 = vmatpush1.bf16.msra.mxu0 %v5088_v53  ;;  %3872 = vmatpush1.bf16.msra.mxu1 %v5091_v54  ;;  %v3958_v54 = vrot.slane %v3950_v50, %v3915_v49 }
 0x234   : > { %3627 = vmatprep.subr.bf16.mxu0 %v5096_v55  ;;  %3873 = vmatprep.subr.bf16.mxu1 %v5099_v56  ;;  %v3965_v55 = vrot.slane %v3951_v51, %v3915_v49 }
 0x237   : > { %3628 = vmatpush1.bf16.msra.mxu0 %v5094_v57  ;;  %3874 = vmatpush1.bf16.msra.mxu1 %v5097_v58 }
 0x238   : > { %3629 = vmatprep.subr.bf16.mxu0 %v5102_v59  ;;  %3875 = vmatprep.subr.bf16.mxu1 %v5105_v60 }
 0x23b   : > { %3630 = vmatpush1.bf16.msra.mxu0 %v5100_v61  ;;  %3876 = vmatpush1.bf16.msra.mxu1 %v5103_v62 }
 0x23c   : > { %3631 = vmatprep.subr.bf16.mxu0 %v5108_v63  ;;  %3877 = vmatprep.subr.bf16.mxu1 %v5111_v0 }
 0x23f   : > { %3632 = vmatpush1.bf16.msra.mxu0 %v5106_v1  ;;  %3878 = vmatpush1.bf16.msra.mxu1 %v5109_v2  ;;  %v3966_v1 = vcombine.low %v3958_v54, %v3965_v55 }
 0x240   : > { %3633 = vmatprep.subr.bf16.mxu0 %v5114_v5  ;;  %3879 = vmatprep.subr.bf16.mxu1 %v5117_v6 }
 0x243   : > { %3634 = vmatpush1.bf16.msra.mxu0 %v5112_v7  ;;  %3880 = vmatpush1.bf16.msra.mxu1 %v5115_v9 }
 0x244   : > { %3635 = vmatprep.subr.bf16.mxu0 %v5120_v10  ;;  %3881 = vmatprep.subr.bf16.mxu1 %v5123_v11 }
 0x247   : > { %3636 = vmatpush1.bf16.msra.mxu0 %v5118_v13  ;;  %3882 = vmatpush1.bf16.msra.mxu1 %v5121_v14 }
 0x248   : > { %3637 = vmatprep.subr.bf16.mxu0 %v5126_v15  ;;  %3883 = vmatprep.subr.bf16.mxu1 %v5129_v16 }
 0x24b   : > { %3638 = vmatpush1.bf16.msra.mxu0 %v5124_v17  ;;  %3884 = vmatpush1.bf16.msra.mxu1 %v5127_v20 }
 0x24c   : > { %3639 = vmatprep.subr.bf16.mxu0 %v5132_v22  ;;  %3885 = vmatprep.subr.bf16.mxu1 %v5135_v4 }
 0x24f   : > { %3640 = vmatpush1.bf16.msra.mxu0 %v5130_v23  ;;  %3886 = vmatpush1.bf16.msra.mxu1 %v5133_v12 }
 0x250   : > { %3641 = vmatprep.subr.bf16.mxu0 %v5138_v24  ;;  %3887 = vmatprep.subr.bf16.mxu1 %v5141_v25 }
 0x253   : > { %3642 = vmatpush1.bf16.msra.mxu0 %v5136_v21  ;;  %3888 = vmatpush1.bf16.msra.mxu1 %v5139_v26 }
 0x254   : > { %3643 = vmatprep.subr.bf16.mxu0 %v5144_v27  ;;  %3889 = vmatprep.subr.bf16.mxu1 %v5147_v30 }
 0x257   : > { %3644 = vmatpush1.bf16.msra.mxu0 %v5142_v31  ;;  %3890 = vmatpush1.bf16.msra.mxu1 %v5145_v32 }
 0x258   : > { %3645 = vmatprep.subr.bf16.mxu0 %v5150_v33  ;;  %3891 = vmatprep.subr.bf16.mxu1 %v5153_v34 }
 0x25b   : > { %3646 = vmatpush1.bf16.msra.mxu0 %v5148_v19  ;;  %3892 = vmatpush1.bf16.msra.mxu1 %v5151_v35 }
 0x25c   : > { %3647 = vmatprep.subr.bf16.mxu0 %v5156_v36  ;;  %3893 = vmatprep.subr.bf16.mxu1 %v5159_v28 }
 0x25f   : > { %3648 = vmatpush1.bf16.msra.mxu0 %v5154_v37  ;;  %3894 = vmatpush1.bf16.msra.mxu1 %v5157_v39 }
 0x262   : > { %3650 = vmatmul.mubr.bf16.vlgmr.msra.gmra.mrb[0].mxu0 %v1478_v40  ;;  %3896 = vmatmul.mubr.bf16.vlgmr.msra.gmra.mrb[0].mxu1 %v1478_v40 }
 0x335   : > { %v3651_v52 = vpop.f32.mrb[0].mxu0  ;;  %v3897_v53 = vpop.f32.mrb[0].mxu1 }
 0x336   : > { %v3653_v56 = vpop.f32.mrb[1].mxu0  ;;  %v3899_v57 = vpop.f32.mrb[1].mxu1 }
 0x337   : > { %v3908_v58 = vcombine.low %v3651_v52, %v3653_v56  ;;  %v3909_v59 = vcombine.low %v3897_v53, %v3899_v57  ;;  %v3655_v60 = vpop.f32.mrb[2].mxu0  ;;  %v3901_v61 = vpop.f32.mrb[2].mxu1 }
 0x338   : > { %v3656_v62 = vpop.f32.mrb[3].mxu0  ;;  %v3902_v63 = vpop.f32.mrb[3].mxu1 }
 0x339   : > { %v3916_v0 = vrot.slane %v3908_v58, %v3915_v49  ;;  %v3923_v3 = vrot.slane %v3909_v59, %v3915_v49 }
 0x33b   : > { %v3924_v2 = vcombine.low %v3916_v0, %v3923_v3 }
 0x33d   : > { %v3968_v5 = vadd.f32 %v3966_v1, %v3924_v2 }
 0x33f   : > { %3969 = vst [vmem:[%s999_s29] sm:$0xff] %v3968_v5 }
 0x340   : > { %5173 = shalt.err (!%p5170_p8)
}
 0x341   : > { %s5174_s6 = scalar_lea.hbm %s6578_s7, 128  ;;  %s5178_s21 = scalar_lea.hbm %s6630_s3, 256 }
 0x342   : > { %p5175_p11 = scmp.ne.s32.totalorder %s6578_s7, %s5174_s6  ;;  %p5179_p0 = scmp.lt.u32.totalorder %s6578_s7, %s6630_s3 }
 0x343   : > { %p5180_p1 = scmp.lt.u32.totalorder %s5178_s21, %s5174_s6  ;;  %p5182_p3 = scmp.lt.u32.totalorder %s5174_s6, %s6578_s7 }
 0x344   : > { %p5176_p12 = pnand %p5175_p11, %p5302_p5 }
 0x345   : > { %p5181_p2 = por %p5180_p1, %p5179_p0 }
 0x346   : > { %p5177_p13 = pneg %p5176_p12 }
 0x347   : > { %p5183_p4 = por %p5182_p3, %p5181_p2 }
 0x349   : > { %p5184_p6 = pnand %p5183_p4, %p5177_p13 }
 0x34b   : > { %5187 = shalt.err (!%p5184_p6)
}
 0x34c   : > { %4526 = dma.vmem_to_hbm [thread:$0]  (%p5302_p5), %s6580_s30, 128, %s6578_s7, %s3971_s8  }
 0x34d PF: > { %s3997_s27 = sand.u32 1, %s5218_s12   ;;  %p4529_p7 = pnand %p4086_p10, %p5313_p9 }
 0x34e   : > { %s3998_s28 = scalar_lea.sflag [#allocation5], %s3997_s27 }
 0x34f   : > { %5213 = dma.done.wait (!%p4529_p7), %s3998_s28, 128  }
 0x350   : > { %5215 = vsyncadd (!%p4529_p7), %s3998_s28, 4294967168  ;;  %s16_s17 = sadd.s32 1, %s5238_s17   ;;  %s6633_s12 = smov %s5222_s13 }
 0x351   : > { %p13_p8 = scmp.ge.s32.totalorder %s16_s17, 4   ;;  %s6634_s13 = smov %s5226_s14 }
 0x352   : > { %s6635_s14 = smov %s5311_s24  ;;  %s6636_s15 = smov %s5234_s16 }
 0x353   : > { %s6637_s16 = smov %s6639_s20  ;;  %15 = sbr.rel (!%p13_p8) target bundleno = 4 (0x4), region = 109 }
 0x35a   :  { %4003 = vsyncpa [#allocation5], 1 }
 0x35b   :  { %4005 = vsyncpa [#allocation5 + $0x1], 1 }

</bundles_post_ra>
